<compile_context>
chip_gen: v5e
topology: v5e:2x2
jax: 0.10.0
libtpu: 0.0.40
codegen_flags: <defaults>
</compile_context>

<pallas_src>
import functools

import jax
import jax.numpy as jnp
import numpy as np
from jax.experimental import pallas as pl
from jax.experimental.pallas import tpu as pltpu

N_LEVELS = 4


def _erf_approx(z):
    # Abramowitz & Stegun 7.1.26 (exp + reciprocal only), max abs err ~1.5e-7.
    a1, a2, a3, a4, a5 = 0.254829592, -0.284496736, 1.421413741, -1.453152027, 1.061405429
    pc = 0.3275911
    az = jnp.abs(z)
    d = 1.0 + pc * az
    # EUP approximate reciprocal + one Newton step (keeps the divide off the VALU).
    t = pl.reciprocal(d, approx=True)
    t = t * (2.0 - d * t)
    poly = ((((a5 * t + a4) * t + a3) * t + a2) * t + a1) * t
    y = 1.0 - poly * jnp.exp(-(az * az))
    return jnp.where(z >= 0, y, -y)


def _gelu(a):
    return 0.5 * a * (1.0 + _erf_approx(a * 0.7071067811865476))


def _safm_kernel(x_ref, dww_ref, dwb_ref, awt_ref, ab_ref, o_ref, *, H, W, dim, cd):
    f32 = jnp.float32

    ups = []
    for lvl in range(N_LEVELS):
        p = 2 ** lvl
        Hc, Wc = H // p, W // p
        c0 = lvl * cd

        # channel chunk of this level, viewed spatially: (H, W, cd)
        xc = x_ref[:, c0:c0 + cd].astype(f32).reshape(H, W, cd)

        # ---- adaptive max pool by p (exact: H, W divisible by p) -------------
        if lvl == 0:
            s = xc                                                   # (H, W, cd)
        else:
            # pool H: split the (outer) H axis into (Hc, p), reduce in registers
            xr = xc.reshape(Hc, p, W, cd)
            ph = xr[:, 0]
            for i in range(1, p):
                ph = jnp.maximum(ph, xr[:, i])                       # (Hc, W, cd)
            # pool W: one reshape + (p-1)-term maximum tree (no per-column concat)
            phr = ph.reshape(Hc, Wc, p, cd)
            s = phr[:, :, 0]
            for i in range(1, p):
                s = jnp.maximum(s, phr[:, :, i])                     # (Hc, Wc, cd)

        # ---- 3x3 depthwise conv, padding=1 (zero-pad built in registers) -----
        zrow = jnp.zeros((1, Wc, cd), f32)
        zcol = jnp.zeros((Hc + 2, 1, cd), f32)
        sp = jnp.concatenate([zrow, s, zrow], axis=0)                # (Hc+2, Wc,   cd)
        sp = jnp.concatenate([zcol, sp, zcol], axis=1)               # (Hc+2, Wc+2, cd)
        acc = jnp.zeros((Hc, Wc, cd), f32)
        for kx in range(3):
            # hoist the sublane-unaligned kx slice: 3 relayouts per level, not 9
            spx = sp[:, kx:kx + Wc, :]                               # (Hc+2, Wc, cd)
            for ky in range(3):
                wv = dww_ref[lvl * 9 + ky * 3 + kx].astype(f32)      # (cd,)
                acc = acc + spx[ky:ky + Hc] * wv[None, None, :]
        conv = acc + dwb_ref[lvl].astype(f32)[None, None, :]         # (Hc, Wc, cd)

        # ---- nearest-neighbour upsample back to (H, W), cd channels only -----
        if lvl == 0:
            up = conv
        else:
            # W: broadcast each pooled column to p columns, single reshape
            uw = jnp.broadcast_to(conv[:, :, None, :],
                                  (Hc, Wc, p, cd)).reshape(Hc, W, cd)
            # H: broadcast a new outer axis and merge the two leading dims
            up = jnp.broadcast_to(uw[:, None, :, :],
                                  (Hc, p, W, cd)).reshape(H, W, cd)

        ups.append(up.reshape(H * W, cd))

    # ---- 1x1 "aggr" conv as one MXU matmul + bias, then GELU(aggr) * x -------
    # cat is built in registers (no VMEM scratch / masked partial stores).
    cat = jnp.concatenate(ups, axis=-1)                              # (H*W, dim)
    agg = jnp.dot(cat, awt_ref[...].astype(f32),
                  preferred_element_type=jnp.float32) + ab_ref[...].astype(f32)
    o_ref[...] = (_gelu(agg) * x_ref[...].astype(f32)).astype(o_ref.dtype)


def _vmem_limit_bytes():
    # ~3/4 of physical VMEM: leaves compiler-scratch headroom on v7x (64 MiB)
    # and raises the small default scoped limit on v5e/v6e (128 MiB physical).
    try:
        cap = getattr(pltpu.get_tpu_info(), "vmem_capacity_bytes", None)
        if cap:
            return int(cap) * 3 // 4
    except Exception:
        pass
    return 48 * 1024 * 1024


def safm_pallas(x, dw_w, dw_b, aggr_w, aggr_b):
    """x: (N, H, W, dim) NHWC float32.  Returns (N, H, W, dim)."""
    N, H, W, dim = x.shape
    cd = dim // N_LEVELS
    assert dim % N_LEVELS == 0
    # NOTE: unlike F.adaptive_max_pool2d, this kernel requires exact divisibility.
    assert H % (2 ** (N_LEVELS - 1)) == 0 and W % (2 ** (N_LEVELS - 1)) == 0

    x2 = x.reshape(N, H * W, dim)                       # row-major: free reshape
    dww_flat = dw_w.reshape(N_LEVELS * 9, cd)           # row = lvl*9 + ky*3 + kx
    awt = aggr_w.T                                      # (in, out)
    ab2 = aggr_b.reshape(1, dim)

    kernel = functools.partial(_safm_kernel, H=H, W=W, dim=dim, cd=cd)
    out2 = pl.pallas_call(
        kernel,
        out_shape=jax.ShapeDtypeStruct((N, H * W, dim), x.dtype),
        grid=(N,),
        in_specs=[
            pl.BlockSpec((None, H * W, dim), lambda n: (n, 0, 0)),   # x (flat spatial)
            pl.BlockSpec((N_LEVELS * 9, cd), lambda n: (0, 0)),      # depthwise 3x3 weights
            pl.BlockSpec((N_LEVELS, cd), lambda n: (0, 0)),          # depthwise bias
            pl.BlockSpec((dim, dim), lambda n: (0, 0)),              # aggr W^T (in, out)
            pl.BlockSpec((1, dim), lambda n: (0, 0)),                # aggr bias
        ],
        out_specs=pl.BlockSpec((None, H * W, dim), lambda n: (n, 0, 0)),
        compiler_params=pltpu.CompilerParams(
            dimension_semantics=("parallel",),          # batch axis -> both TCs on v7x
            vmem_limit_bytes=_vmem_limit_bytes()),
    )(x2, dww_flat, dw_b, awt, ab2)
    return out2.reshape(N, H, W, dim)


def safm_reference(x, dw_w, dw_b, aggr_w, aggr_b):
    """Pure-JAX NHWC reference mirroring the PyTorch SAFM forward."""
    N, H, W, dim = x.shape
    cd = dim // N_LEVELS
    outs = []
    for i in range(N_LEVELS):
        p = 2 ** i
        xc = x[..., i * cd:(i + 1) * cd]
        if i > 0:
            s = xc.reshape(N, H // p, p, W // p, p, cd).max(axis=(2, 4))
        else:
            s = xc
        Hc, Wc = s.shape[1], s.shape[2]
        sp = jnp.pad(s, ((0, 0), (1, 1), (1, 1), (0, 0)))
        conv = jnp.zeros_like(s)
        for ky in range(3):
            for kx in range(3):
                conv = conv + sp[:, ky:ky + Hc, kx:kx + Wc, :] * dw_w[i, ky, kx, :]
        conv = conv + dw_b[i]
        if i > 0:
            conv = jnp.repeat(jnp.repeat(conv, p, axis=1), p, axis=2)
        outs.append(conv)
    cat = jnp.concatenate(outs, axis=-1)
    agg = jnp.einsum("nhwc,oc->nhwo", cat, aggr_w) + aggr_b
    g = 0.5 * agg * (1.0 + jax.scipy.special.erf(agg / jnp.sqrt(2.0)))
    return g * x


if __name__ == "__main__":
    N, dim, H, W = 2, 8, 16, 16          # dim divisible by n_levels=4
    cd = dim // N_LEVELS

    key = jax.random.PRNGKey(0)
    kx, k1, k2, k3, k4 = jax.random.split(key, 5)
    # Build the input in NCHW (as the torch module expects), then go NHWC.
    x_nchw = jax.random.normal(kx, (N, dim, H, W), jnp.float32)
    x = jnp.transpose(x_nchw, (0, 2, 3, 1))                        # NHWC

    # Deterministic synthetic parameters (shapes from SAFM.__init__).
    dw_w = 0.2 * jax.random.normal(k1, (N_LEVELS, 3, 3, cd), jnp.float32)  # depthwise 3x3
    dw_b = 0.1 * jax.random.normal(k2, (N_LEVELS, cd), jnp.float32)
    aggr_w = 0.2 * jax.random.normal(k3, (dim, dim), jnp.float32)          # 1x1 conv (out, in)
    aggr_b = 0.1 * jax.random.normal(k4, (dim,), jnp.float32)

    out = jax.block_until_ready(jax.jit(safm_pallas)(x, dw_w, dw_b, aggr_w, aggr_b))
    ref = jax.block_until_ready(safm_reference(x, dw_w, dw_b, aggr_w, aggr_b))

    np.testing.assert_allclose(np.asarray(out), np.asarray(ref), rtol=2e-4, atol=2e-4)
    print("KERNEL_OK")
</pallas_src>

<mosaic_0001>
module attributes {stable_mosaic.version = 11 : i64} {
  func.func @_safm_kernel(%arg0: i32, %arg1: memref<1x256x8xf32, #tpu.memory_space<vmem>>, %arg2: memref<36x2xf32, #tpu.memory_space<vmem>>, %arg3: memref<4x2xf32, #tpu.memory_space<vmem>>, %arg4: memref<8x8xf32, #tpu.memory_space<vmem>>, %arg5: memref<1x8xf32, #tpu.memory_space<vmem>>, %arg6: memref<1x256x8xf32, #tpu.memory_space<vmem>>) attributes {dimension_semantics = [#tpu.dimension_semantics<parallel>], iteration_bounds = array<i64: 2>, scalar_prefetch = 0 : i64, scratch_operands = 0 : i64, tpu.core_type = #tpu.core_type<tc>, window_params = [{transform_indices = @transform_0, window_bounds = array<i64: 1, 256, 8>}, {pipeline_mode = #tpu.pipeline_mode<synchronous>, transform_indices = @transform_1, window_bounds = array<i64: 36, 2>}, {pipeline_mode = #tpu.pipeline_mode<synchronous>, transform_indices = @transform_2, window_bounds = array<i64: 4, 2>}, {pipeline_mode = #tpu.pipeline_mode<synchronous>, transform_indices = @transform_3, window_bounds = array<i64: 8, 8>}, {pipeline_mode = #tpu.pipeline_mode<synchronous>, transform_indices = @transform_4, window_bounds = array<i64: 1, 8>}, {transform_indices = @transform_5, window_bounds = array<i64: 1, 256, 8>}]} {
    %c0 = arith.constant 0 : index
    %c0_0 = arith.constant 0 : index
    %c0_1 = arith.constant 0 : index
    %0 = vector.load %arg1[%c0, %c0_0, %c0_1] : memref<1x256x8xf32, #tpu.memory_space<vmem>>, vector<1x256x2xf32>
    %1 = vector.shape_cast %0 : vector<1x256x2xf32> to vector<256x2xf32>
    %2 = vector.shape_cast %1 : vector<256x2xf32> to vector<16x16x2xf32>
    %cst = arith.constant 0.000000e+00 : f32
    %3 = vector.broadcast %cst : f32 to vector<1x16x2xf32>
    %cst_2 = arith.constant 0.000000e+00 : f32
    %4 = vector.broadcast %cst_2 : f32 to vector<18x1x2xf32>
    %5 = tpu.concatenate %3, %2, %3 in 0 : vector<1x16x2xf32>, vector<16x16x2xf32>, vector<1x16x2xf32> -> vector<18x16x2xf32>
    %6 = tpu.concatenate %4, %5, %4 in 1 : vector<18x1x2xf32>, vector<18x16x2xf32>, vector<18x1x2xf32> -> vector<18x18x2xf32>
    %cst_3 = arith.constant 0.000000e+00 : f32
    %7 = vector.broadcast %cst_3 : f32 to vector<16x16x2xf32>
    %8 = vector.extract_strided_slice %6 {offsets = [0, 0, 0], sizes = [18, 16, 2], strides = [1, 1, 1]} : vector<18x18x2xf32> to vector<18x16x2xf32>
    %c0_4 = arith.constant 0 : index
    %c0_5 = arith.constant 0 : index
    %9 = vector.load %arg2[%c0_4, %c0_5] : memref<36x2xf32, #tpu.memory_space<vmem>>, vector<1x2xf32>
    %10 = vector.shape_cast %9 : vector<1x2xf32> to vector<2xf32>
    %11 = vector.extract_strided_slice %8 {offsets = [0, 0, 0], sizes = [16, 16, 2], strides = [1, 1, 1]} : vector<18x16x2xf32> to vector<16x16x2xf32>
    %12 = vector.shape_cast %10 : vector<2xf32> to vector<1x1x2xf32>
    %13 = vector.broadcast %12 : vector<1x1x2xf32> to vector<16x16x2xf32>
    %14 = arith.mulf %11, %13 : vector<16x16x2xf32>
    %15 = arith.addf %7, %14 : vector<16x16x2xf32>
    %c3 = arith.constant 3 : index
    %c0_6 = arith.constant 0 : index
    %16 = vector.load %arg2[%c3, %c0_6] : memref<36x2xf32, #tpu.memory_space<vmem>>, vector<1x2xf32>
    %17 = vector.shape_cast %16 : vector<1x2xf32> to vector<2xf32>
    %18 = vector.extract_strided_slice %8 {offsets = [1, 0, 0], sizes = [16, 16, 2], strides = [1, 1, 1]} : vector<18x16x2xf32> to vector<16x16x2xf32>
    %19 = vector.shape_cast %17 : vector<2xf32> to vector<1x1x2xf32>
    %20 = vector.broadcast %19 : vector<1x1x2xf32> to vector<16x16x2xf32>
    %21 = arith.mulf %18, %20 : vector<16x16x2xf32>
    %22 = arith.addf %15, %21 : vector<16x16x2xf32>
    %c6 = arith.constant 6 : index
    %c0_7 = arith.constant 0 : index
    %23 = vector.load %arg2[%c6, %c0_7] : memref<36x2xf32, #tpu.memory_space<vmem>>, vector<1x2xf32>
    %24 = vector.shape_cast %23 : vector<1x2xf32> to vector<2xf32>
    %25 = vector.extract_strided_slice %8 {offsets = [2, 0, 0], sizes = [16, 16, 2], strides = [1, 1, 1]} : vector<18x16x2xf32> to vector<16x16x2xf32>
    %26 = vector.shape_cast %24 : vector<2xf32> to vector<1x1x2xf32>
    %27 = vector.broadcast %26 : vector<1x1x2xf32> to vector<16x16x2xf32>
    %28 = arith.mulf %25, %27 : vector<16x16x2xf32>
    %29 = arith.addf %22, %28 : vector<16x16x2xf32>
    %30 = vector.extract_strided_slice %6 {offsets = [0, 1, 0], sizes = [18, 16, 2], strides = [1, 1, 1]} : vector<18x18x2xf32> to vector<18x16x2xf32>
    %c1 = arith.constant 1 : index
    %c0_8 = arith.constant 0 : index
    %31 = vector.load %arg2[%c1, %c0_8] : memref<36x2xf32, #tpu.memory_space<vmem>>, vector<1x2xf32>
    %32 = vector.shape_cast %31 : vector<1x2xf32> to vector<2xf32>
    %33 = vector.extract_strided_slice %30 {offsets = [0, 0, 0], sizes = [16, 16, 2], strides = [1, 1, 1]} : vector<18x16x2xf32> to vector<16x16x2xf32>
    %34 = vector.shape_cast %32 : vector<2xf32> to vector<1x1x2xf32>
    %35 = vector.broadcast %34 : vector<1x1x2xf32> to vector<16x16x2xf32>
    %36 = arith.mulf %33, %35 : vector<16x16x2xf32>
    %37 = arith.addf %29, %36 : vector<16x16x2xf32>
    %c4 = arith.constant 4 : index
    %c0_9 = arith.constant 0 : index
    %38 = vector.load %arg2[%c4, %c0_9] : memref<36x2xf32, #tpu.memory_space<vmem>>, vector<1x2xf32>
    %39 = vector.shape_cast %38 : vector<1x2xf32> to vector<2xf32>
    %40 = vector.extract_strided_slice %30 {offsets = [1, 0, 0], sizes = [16, 16, 2], strides = [1, 1, 1]} : vector<18x16x2xf32> to vector<16x16x2xf32>
    %41 = vector.shape_cast %39 : vector<2xf32> to vector<1x1x2xf32>
    %42 = vector.broadcast %41 : vector<1x1x2xf32> to vector<16x16x2xf32>
    %43 = arith.mulf %40, %42 : vector<16x16x2xf32>
    %44 = arith.addf %37, %43 : vector<16x16x2xf32>
    %c7 = arith.constant 7 : index
    %c0_10 = arith.constant 0 : index
    %45 = vector.load %arg2[%c7, %c0_10] : memref<36x2xf32, #tpu.memory_space<vmem>>, vector<1x2xf32>
    %46 = vector.shape_cast %45 : vector<1x2xf32> to vector<2xf32>
    %47 = vector.extract_strided_slice %30 {offsets = [2, 0, 0], sizes = [16, 16, 2], strides = [1, 1, 1]} : vector<18x16x2xf32> to vector<16x16x2xf32>
    %48 = vector.shape_cast %46 : vector<2xf32> to vector<1x1x2xf32>
    %49 = vector.broadcast %48 : vector<1x1x2xf32> to vector<16x16x2xf32>
    %50 = arith.mulf %47, %49 : vector<16x16x2xf32>
    %51 = arith.addf %44, %50 : vector<16x16x2xf32>
    %52 = vector.extract_strided_slice %6 {offsets = [0, 2, 0], sizes = [18, 16, 2], strides = [1, 1, 1]} : vector<18x18x2xf32> to vector<18x16x2xf32>
    %c2 = arith.constant 2 : index
    %c0_11 = arith.constant 0 : index
    %53 = vector.load %arg2[%c2, %c0_11] : memref<36x2xf32, #tpu.memory_space<vmem>>, vector<1x2xf32>
    %54 = vector.shape_cast %53 : vector<1x2xf32> to vector<2xf32>
    %55 = vector.extract_strided_slice %52 {offsets = [0, 0, 0], sizes = [16, 16, 2], strides = [1, 1, 1]} : vector<18x16x2xf32> to vector<16x16x2xf32>
    %56 = vector.shape_cast %54 : vector<2xf32> to vector<1x1x2xf32>
    %57 = vector.broadcast %56 : vector<1x1x2xf32> to vector<16x16x2xf32>
    %58 = arith.mulf %55, %57 : vector<16x16x2xf32>
    %59 = arith.addf %51, %58 : vector<16x16x2xf32>
    %c5 = arith.constant 5 : index
    %c0_12 = arith.constant 0 : index
    %60 = vector.load %arg2[%c5, %c0_12] : memref<36x2xf32, #tpu.memory_space<vmem>>, vector<1x2xf32>
    %61 = vector.shape_cast %60 : vector<1x2xf32> to vector<2xf32>
    %62 = vector.extract_strided_slice %52 {offsets = [1, 0, 0], sizes = [16, 16, 2], strides = [1, 1, 1]} : vector<18x16x2xf32> to vector<16x16x2xf32>
    %63 = vector.shape_cast %61 : vector<2xf32> to vector<1x1x2xf32>
    %64 = vector.broadcast %63 : vector<1x1x2xf32> to vector<16x16x2xf32>
    %65 = arith.mulf %62, %64 : vector<16x16x2xf32>
    %66 = arith.addf %59, %65 : vector<16x16x2xf32>
    %c8 = arith.constant 8 : index
    %c0_13 = arith.constant 0 : index
    %67 = vector.load %arg2[%c8, %c0_13] : memref<36x2xf32, #tpu.memory_space<vmem>>, vector<1x2xf32>
    %68 = vector.shape_cast %67 : vector<1x2xf32> to vector<2xf32>
    %69 = vector.extract_strided_slice %52 {offsets = [2, 0, 0], sizes = [16, 16, 2], strides = [1, 1, 1]} : vector<18x16x2xf32> to vector<16x16x2xf32>
    %70 = vector.shape_cast %68 : vector<2xf32> to vector<1x1x2xf32>
    %71 = vector.broadcast %70 : vector<1x1x2xf32> to vector<16x16x2xf32>
    %72 = arith.mulf %69, %71 : vector<16x16x2xf32>
    %73 = arith.addf %66, %72 : vector<16x16x2xf32>
    %c0_14 = arith.constant 0 : index
    %c0_15 = arith.constant 0 : index
    %74 = vector.load %arg3[%c0_14, %c0_15] : memref<4x2xf32, #tpu.memory_space<vmem>>, vector<1x2xf32>
    %75 = vector.shape_cast %74 : vector<1x2xf32> to vector<2xf32>
    %76 = vector.shape_cast %75 : vector<2xf32> to vector<1x1x2xf32>
    %77 = vector.broadcast %76 : vector<1x1x2xf32> to vector<16x16x2xf32>
    %78 = arith.addf %73, %77 : vector<16x16x2xf32>
    %79 = vector.shape_cast %78 : vector<16x16x2xf32> to vector<256x2xf32>
    %c0_16 = arith.constant 0 : index
    %c0_17 = arith.constant 0 : index
    %c2_18 = arith.constant 2 : index
    %80 = vector.load %arg1[%c0_16, %c0_17, %c2_18] : memref<1x256x8xf32, #tpu.memory_space<vmem>>, vector<1x256x2xf32>
    %81 = vector.shape_cast %80 : vector<1x256x2xf32> to vector<256x2xf32>
    %82 = vector.shape_cast %81 : vector<256x2xf32> to vector<16x16x2xf32>
    %83 = vector.shape_cast %82 : vector<16x16x2xf32> to vector<8x2x16x2xf32>
    %84 = vector.extract_strided_slice %83 {offsets = [0, 0, 0, 0], sizes = [8, 1, 16, 2], strides = [1, 1, 1, 1]} : vector<8x2x16x2xf32> to vector<8x1x16x2xf32>
    %85 = vector.shape_cast %84 : vector<8x1x16x2xf32> to vector<8x16x2xf32>
    %86 = vector.extract_strided_slice %83 {offsets = [0, 1, 0, 0], sizes = [8, 1, 16, 2], strides = [1, 1, 1, 1]} : vector<8x2x16x2xf32> to vector<8x1x16x2xf32>
    %87 = vector.shape_cast %86 : vector<8x1x16x2xf32> to vector<8x16x2xf32>
    %88 = arith.maximumf %85, %87 : vector<8x16x2xf32>
    %89 = vector.shape_cast %88 : vector<8x16x2xf32> to vector<8x8x2x2xf32>
    %90 = vector.extract_strided_slice %89 {offsets = [0, 0, 0, 0], sizes = [8, 8, 1, 2], strides = [1, 1, 1, 1]} : vector<8x8x2x2xf32> to vector<8x8x1x2xf32>
    %91 = vector.shape_cast %90 : vector<8x8x1x2xf32> to vector<8x8x2xf32>
    %92 = vector.extract_strided_slice %89 {offsets = [0, 0, 1, 0], sizes = [8, 8, 1, 2], strides = [1, 1, 1, 1]} : vector<8x8x2x2xf32> to vector<8x8x1x2xf32>
    %93 = vector.shape_cast %92 : vector<8x8x1x2xf32> to vector<8x8x2xf32>
    %94 = arith.maximumf %91, %93 : vector<8x8x2xf32>
    %cst_19 = arith.constant 0.000000e+00 : f32
    %95 = vector.broadcast %cst_19 : f32 to vector<1x8x2xf32>
    %cst_20 = arith.constant 0.000000e+00 : f32
    %96 = vector.broadcast %cst_20 : f32 to vector<10x1x2xf32>
    %97 = tpu.concatenate %95, %94, %95 in 0 : vector<1x8x2xf32>, vector<8x8x2xf32>, vector<1x8x2xf32> -> vector<10x8x2xf32>
    %98 = tpu.concatenate %96, %97, %96 in 1 : vector<10x1x2xf32>, vector<10x8x2xf32>, vector<10x1x2xf32> -> vector<10x10x2xf32>
    %cst_21 = arith.constant 0.000000e+00 : f32
    %99 = vector.broadcast %cst_21 : f32 to vector<8x8x2xf32>
    %100 = vector.extract_strided_slice %98 {offsets = [0, 0, 0], sizes = [10, 8, 2], strides = [1, 1, 1]} : vector<10x10x2xf32> to vector<10x8x2xf32>
    %c9 = arith.constant 9 : index
    %c0_22 = arith.constant 0 : index
    %101 = vector.load %arg2[%c9, %c0_22] : memref<36x2xf32, #tpu.memory_space<vmem>>, vector<1x2xf32>
    %102 = vector.shape_cast %101 : vector<1x2xf32> to vector<2xf32>
    %103 = vector.extract_strided_slice %100 {offsets = [0, 0, 0], sizes = [8, 8, 2], strides = [1, 1, 1]} : vector<10x8x2xf32> to vector<8x8x2xf32>
    %104 = vector.shape_cast %102 : vector<2xf32> to vector<1x1x2xf32>
    %105 = vector.broadcast %104 : vector<1x1x2xf32> to vector<8x8x2xf32>
    %106 = arith.mulf %103, %105 : vector<8x8x2xf32>
    %107 = arith.addf %99, %106 : vector<8x8x2xf32>
    %c12 = arith.constant 12 : index
    %c0_23 = arith.constant 0 : index
    %108 = vector.load %arg2[%c12, %c0_23] : memref<36x2xf32, #tpu.memory_space<vmem>>, vector<1x2xf32>
    %109 = vector.shape_cast %108 : vector<1x2xf32> to vector<2xf32>
    %110 = vector.extract_strided_slice %100 {offsets = [1, 0, 0], sizes = [8, 8, 2], strides = [1, 1, 1]} : vector<10x8x2xf32> to vector<8x8x2xf32>
    %111 = vector.shape_cast %109 : vector<2xf32> to vector<1x1x2xf32>
    %112 = vector.broadcast %111 : vector<1x1x2xf32> to vector<8x8x2xf32>
    %113 = arith.mulf %110, %112 : vector<8x8x2xf32>
    %114 = arith.addf %107, %113 : vector<8x8x2xf32>
    %c15 = arith.constant 15 : index
    %c0_24 = arith.constant 0 : index
    %115 = vector.load %arg2[%c15, %c0_24] : memref<36x2xf32, #tpu.memory_space<vmem>>, vector<1x2xf32>
    %116 = vector.shape_cast %115 : vector<1x2xf32> to vector<2xf32>
    %117 = vector.extract_strided_slice %100 {offsets = [2, 0, 0], sizes = [8, 8, 2], strides = [1, 1, 1]} : vector<10x8x2xf32> to vector<8x8x2xf32>
    %118 = vector.shape_cast %116 : vector<2xf32> to vector<1x1x2xf32>
    %119 = vector.broadcast %118 : vector<1x1x2xf32> to vector<8x8x2xf32>
    %120 = arith.mulf %117, %119 : vector<8x8x2xf32>
    %121 = arith.addf %114, %120 : vector<8x8x2xf32>
    %122 = vector.extract_strided_slice %98 {offsets = [0, 1, 0], sizes = [10, 8, 2], strides = [1, 1, 1]} : vector<10x10x2xf32> to vector<10x8x2xf32>
    %c10 = arith.constant 10 : index
    %c0_25 = arith.constant 0 : index
    %123 = vector.load %arg2[%c10, %c0_25] : memref<36x2xf32, #tpu.memory_space<vmem>>, vector<1x2xf32>
    %124 = vector.shape_cast %123 : vector<1x2xf32> to vector<2xf32>
    %125 = vector.extract_strided_slice %122 {offsets = [0, 0, 0], sizes = [8, 8, 2], strides = [1, 1, 1]} : vector<10x8x2xf32> to vector<8x8x2xf32>
    %126 = vector.shape_cast %124 : vector<2xf32> to vector<1x1x2xf32>
    %127 = vector.broadcast %126 : vector<1x1x2xf32> to vector<8x8x2xf32>
    %128 = arith.mulf %125, %127 : vector<8x8x2xf32>
    %129 = arith.addf %121, %128 : vector<8x8x2xf32>
    %c13 = arith.constant 13 : index
    %c0_26 = arith.constant 0 : index
    %130 = vector.load %arg2[%c13, %c0_26] : memref<36x2xf32, #tpu.memory_space<vmem>>, vector<1x2xf32>
    %131 = vector.shape_cast %130 : vector<1x2xf32> to vector<2xf32>
    %132 = vector.extract_strided_slice %122 {offsets = [1, 0, 0], sizes = [8, 8, 2], strides = [1, 1, 1]} : vector<10x8x2xf32> to vector<8x8x2xf32>
    %133 = vector.shape_cast %131 : vector<2xf32> to vector<1x1x2xf32>
    %134 = vector.broadcast %133 : vector<1x1x2xf32> to vector<8x8x2xf32>
    %135 = arith.mulf %132, %134 : vector<8x8x2xf32>
    %136 = arith.addf %129, %135 : vector<8x8x2xf32>
    %c16 = arith.constant 16 : index
    %c0_27 = arith.constant 0 : index
    %137 = vector.load %arg2[%c16, %c0_27] : memref<36x2xf32, #tpu.memory_space<vmem>>, vector<1x2xf32>
    %138 = vector.shape_cast %137 : vector<1x2xf32> to vector<2xf32>
    %139 = vector.extract_strided_slice %122 {offsets = [2, 0, 0], sizes = [8, 8, 2], strides = [1, 1, 1]} : vector<10x8x2xf32> to vector<8x8x2xf32>
    %140 = vector.shape_cast %138 : vector<2xf32> to vector<1x1x2xf32>
    %141 = vector.broadcast %140 : vector<1x1x2xf32> to vector<8x8x2xf32>
    %142 = arith.mulf %139, %141 : vector<8x8x2xf32>
    %143 = arith.addf %136, %142 : vector<8x8x2xf32>
    %144 = vector.extract_strided_slice %98 {offsets = [0, 2, 0], sizes = [10, 8, 2], strides = [1, 1, 1]} : vector<10x10x2xf32> to vector<10x8x2xf32>
    %c11 = arith.constant 11 : index
    %c0_28 = arith.constant 0 : index
    %145 = vector.load %arg2[%c11, %c0_28] : memref<36x2xf32, #tpu.memory_space<vmem>>, vector<1x2xf32>
    %146 = vector.shape_cast %145 : vector<1x2xf32> to vector<2xf32>
    %147 = vector.extract_strided_slice %144 {offsets = [0, 0, 0], sizes = [8, 8, 2], strides = [1, 1, 1]} : vector<10x8x2xf32> to vector<8x8x2xf32>
    %148 = vector.shape_cast %146 : vector<2xf32> to vector<1x1x2xf32>
    %149 = vector.broadcast %148 : vector<1x1x2xf32> to vector<8x8x2xf32>
    %150 = arith.mulf %147, %149 : vector<8x8x2xf32>
    %151 = arith.addf %143, %150 : vector<8x8x2xf32>
    %c14 = arith.constant 14 : index
    %c0_29 = arith.constant 0 : index
    %152 = vector.load %arg2[%c14, %c0_29] : memref<36x2xf32, #tpu.memory_space<vmem>>, vector<1x2xf32>
    %153 = vector.shape_cast %152 : vector<1x2xf32> to vector<2xf32>
    %154 = vector.extract_strided_slice %144 {offsets = [1, 0, 0], sizes = [8, 8, 2], strides = [1, 1, 1]} : vector<10x8x2xf32> to vector<8x8x2xf32>
    %155 = vector.shape_cast %153 : vector<2xf32> to vector<1x1x2xf32>
    %156 = vector.broadcast %155 : vector<1x1x2xf32> to vector<8x8x2xf32>
    %157 = arith.mulf %154, %156 : vector<8x8x2xf32>
    %158 = arith.addf %151, %157 : vector<8x8x2xf32>
    %c17 = arith.constant 17 : index
    %c0_30 = arith.constant 0 : index
    %159 = vector.load %arg2[%c17, %c0_30] : memref<36x2xf32, #tpu.memory_space<vmem>>, vector<1x2xf32>
    %160 = vector.shape_cast %159 : vector<1x2xf32> to vector<2xf32>
    %161 = vector.extract_strided_slice %144 {offsets = [2, 0, 0], sizes = [8, 8, 2], strides = [1, 1, 1]} : vector<10x8x2xf32> to vector<8x8x2xf32>
    %162 = vector.shape_cast %160 : vector<2xf32> to vector<1x1x2xf32>
    %163 = vector.broadcast %162 : vector<1x1x2xf32> to vector<8x8x2xf32>
    %164 = arith.mulf %161, %163 : vector<8x8x2xf32>
    %165 = arith.addf %158, %164 : vector<8x8x2xf32>
    %c1_31 = arith.constant 1 : index
    %c0_32 = arith.constant 0 : index
    %166 = vector.load %arg3[%c1_31, %c0_32] : memref<4x2xf32, #tpu.memory_space<vmem>>, vector<1x2xf32>
    %167 = vector.shape_cast %166 : vector<1x2xf32> to vector<2xf32>
    %168 = vector.shape_cast %167 : vector<2xf32> to vector<1x1x2xf32>
    %169 = vector.broadcast %168 : vector<1x1x2xf32> to vector<8x8x2xf32>
    %170 = arith.addf %165, %169 : vector<8x8x2xf32>
    %171 = vector.shape_cast %170 : vector<8x8x2xf32> to vector<8x8x1x2xf32>
    %172 = vector.shape_cast %171 : vector<8x8x1x2xf32> to vector<8x8x1x2xf32>
    %173 = vector.broadcast %172 : vector<8x8x1x2xf32> to vector<8x8x2x2xf32>
    %174 = vector.shape_cast %173 : vector<8x8x2x2xf32> to vector<8x16x2xf32>
    %175 = vector.shape_cast %174 : vector<8x16x2xf32> to vector<8x1x16x2xf32>
    %176 = vector.shape_cast %175 : vector<8x1x16x2xf32> to vector<8x1x16x2xf32>
    %177 = vector.broadcast %176 : vector<8x1x16x2xf32> to vector<8x2x16x2xf32>
    %178 = vector.shape_cast %177 : vector<8x2x16x2xf32> to vector<16x16x2xf32>
    %179 = vector.shape_cast %178 : vector<16x16x2xf32> to vector<256x2xf32>
    %c0_33 = arith.constant 0 : index
    %c0_34 = arith.constant 0 : index
    %c4_35 = arith.constant 4 : index
    %180 = vector.load %arg1[%c0_33, %c0_34, %c4_35] : memref<1x256x8xf32, #tpu.memory_space<vmem>>, vector<1x256x2xf32>
    %181 = vector.shape_cast %180 : vector<1x256x2xf32> to vector<256x2xf32>
    %182 = vector.shape_cast %181 : vector<256x2xf32> to vector<16x16x2xf32>
    %183 = vector.shape_cast %182 : vector<16x16x2xf32> to vector<4x4x16x2xf32>
    %184 = vector.extract_strided_slice %183 {offsets = [0, 0, 0, 0], sizes = [4, 1, 16, 2], strides = [1, 1, 1, 1]} : vector<4x4x16x2xf32> to vector<4x1x16x2xf32>
    %185 = vector.shape_cast %184 : vector<4x1x16x2xf32> to vector<4x16x2xf32>
    %186 = vector.extract_strided_slice %183 {offsets = [0, 1, 0, 0], sizes = [4, 1, 16, 2], strides = [1, 1, 1, 1]} : vector<4x4x16x2xf32> to vector<4x1x16x2xf32>
    %187 = vector.shape_cast %186 : vector<4x1x16x2xf32> to vector<4x16x2xf32>
    %188 = arith.maximumf %185, %187 : vector<4x16x2xf32>
    %189 = vector.extract_strided_slice %183 {offsets = [0, 2, 0, 0], sizes = [4, 1, 16, 2], strides = [1, 1, 1, 1]} : vector<4x4x16x2xf32> to vector<4x1x16x2xf32>
    %190 = vector.shape_cast %189 : vector<4x1x16x2xf32> to vector<4x16x2xf32>
    %191 = arith.maximumf %188, %190 : vector<4x16x2xf32>
    %192 = vector.extract_strided_slice %183 {offsets = [0, 3, 0, 0], sizes = [4, 1, 16, 2], strides = [1, 1, 1, 1]} : vector<4x4x16x2xf32> to vector<4x1x16x2xf32>
    %193 = vector.shape_cast %192 : vector<4x1x16x2xf32> to vector<4x16x2xf32>
    %194 = arith.maximumf %191, %193 : vector<4x16x2xf32>
    %195 = vector.shape_cast %194 : vector<4x16x2xf32> to vector<4x4x4x2xf32>
    %196 = vector.extract_strided_slice %195 {offsets = [0, 0, 0, 0], sizes = [4, 4, 1, 2], strides = [1, 1, 1, 1]} : vector<4x4x4x2xf32> to vector<4x4x1x2xf32>
    %197 = vector.shape_cast %196 : vector<4x4x1x2xf32> to vector<4x4x2xf32>
    %198 = vector.extract_strided_slice %195 {offsets = [0, 0, 1, 0], sizes = [4, 4, 1, 2], strides = [1, 1, 1, 1]} : vector<4x4x4x2xf32> to vector<4x4x1x2xf32>
    %199 = vector.shape_cast %198 : vector<4x4x1x2xf32> to vector<4x4x2xf32>
    %200 = arith.maximumf %197, %199 : vector<4x4x2xf32>
    %201 = vector.extract_strided_slice %195 {offsets = [0, 0, 2, 0], sizes = [4, 4, 1, 2], strides = [1, 1, 1, 1]} : vector<4x4x4x2xf32> to vector<4x4x1x2xf32>
    %202 = vector.shape_cast %201 : vector<4x4x1x2xf32> to vector<4x4x2xf32>
    %203 = arith.maximumf %200, %202 : vector<4x4x2xf32>
    %204 = vector.extract_strided_slice %195 {offsets = [0, 0, 3, 0], sizes = [4, 4, 1, 2], strides = [1, 1, 1, 1]} : vector<4x4x4x2xf32> to vector<4x4x1x2xf32>
    %205 = vector.shape_cast %204 : vector<4x4x1x2xf32> to vector<4x4x2xf32>
    %206 = arith.maximumf %203, %205 : vector<4x4x2xf32>
    %cst_36 = arith.constant 0.000000e+00 : f32
    %207 = vector.broadcast %cst_36 : f32 to vector<1x4x2xf32>
    %cst_37 = arith.constant 0.000000e+00 : f32
    %208 = vector.broadcast %cst_37 : f32 to vector<6x1x2xf32>
    %209 = tpu.concatenate %207, %206, %207 in 0 : vector<1x4x2xf32>, vector<4x4x2xf32>, vector<1x4x2xf32> -> vector<6x4x2xf32>
    %210 = tpu.concatenate %208, %209, %208 in 1 : vector<6x1x2xf32>, vector<6x4x2xf32>, vector<6x1x2xf32> -> vector<6x6x2xf32>
    %cst_38 = arith.constant 0.000000e+00 : f32
    %211 = vector.broadcast %cst_38 : f32 to vector<4x4x2xf32>
    %212 = vector.extract_strided_slice %210 {offsets = [0, 0, 0], sizes = [6, 4, 2], strides = [1, 1, 1]} : vector<6x6x2xf32> to vector<6x4x2xf32>
    %c18 = arith.constant 18 : index
    %c0_39 = arith.constant 0 : index
    %213 = vector.load %arg2[%c18, %c0_39] : memref<36x2xf32, #tpu.memory_space<vmem>>, vector<1x2xf32>
    %214 = vector.shape_cast %213 : vector<1x2xf32> to vector<2xf32>
    %215 = vector.extract_strided_slice %212 {offsets = [0, 0, 0], sizes = [4, 4, 2], strides = [1, 1, 1]} : vector<6x4x2xf32> to vector<4x4x2xf32>
    %216 = vector.shape_cast %214 : vector<2xf32> to vector<1x1x2xf32>
    %217 = vector.broadcast %216 : vector<1x1x2xf32> to vector<4x4x2xf32>
    %218 = arith.mulf %215, %217 : vector<4x4x2xf32>
    %219 = arith.addf %211, %218 : vector<4x4x2xf32>
    %c21 = arith.constant 21 : index
    %c0_40 = arith.constant 0 : index
    %220 = vector.load %arg2[%c21, %c0_40] : memref<36x2xf32, #tpu.memory_space<vmem>>, vector<1x2xf32>
    %221 = vector.shape_cast %220 : vector<1x2xf32> to vector<2xf32>
    %222 = vector.extract_strided_slice %212 {offsets = [1, 0, 0], sizes = [4, 4, 2], strides = [1, 1, 1]} : vector<6x4x2xf32> to vector<4x4x2xf32>
    %223 = vector.shape_cast %221 : vector<2xf32> to vector<1x1x2xf32>
    %224 = vector.broadcast %223 : vector<1x1x2xf32> to vector<4x4x2xf32>
    %225 = arith.mulf %222, %224 : vector<4x4x2xf32>
    %226 = arith.addf %219, %225 : vector<4x4x2xf32>
    %c24 = arith.constant 24 : index
    %c0_41 = arith.constant 0 : index
    %227 = vector.load %arg2[%c24, %c0_41] : memref<36x2xf32, #tpu.memory_space<vmem>>, vector<1x2xf32>
    %228 = vector.shape_cast %227 : vector<1x2xf32> to vector<2xf32>
    %229 = vector.extract_strided_slice %212 {offsets = [2, 0, 0], sizes = [4, 4, 2], strides = [1, 1, 1]} : vector<6x4x2xf32> to vector<4x4x2xf32>
    %230 = vector.shape_cast %228 : vector<2xf32> to vector<1x1x2xf32>
    %231 = vector.broadcast %230 : vector<1x1x2xf32> to vector<4x4x2xf32>
    %232 = arith.mulf %229, %231 : vector<4x4x2xf32>
    %233 = arith.addf %226, %232 : vector<4x4x2xf32>
    %234 = vector.extract_strided_slice %210 {offsets = [0, 1, 0], sizes = [6, 4, 2], strides = [1, 1, 1]} : vector<6x6x2xf32> to vector<6x4x2xf32>
    %c19 = arith.constant 19 : index
    %c0_42 = arith.constant 0 : index
    %235 = vector.load %arg2[%c19, %c0_42] : memref<36x2xf32, #tpu.memory_space<vmem>>, vector<1x2xf32>
    %236 = vector.shape_cast %235 : vector<1x2xf32> to vector<2xf32>
    %237 = vector.extract_strided_slice %234 {offsets = [0, 0, 0], sizes = [4, 4, 2], strides = [1, 1, 1]} : vector<6x4x2xf32> to vector<4x4x2xf32>
    %238 = vector.shape_cast %236 : vector<2xf32> to vector<1x1x2xf32>
    %239 = vector.broadcast %238 : vector<1x1x2xf32> to vector<4x4x2xf32>
    %240 = arith.mulf %237, %239 : vector<4x4x2xf32>
    %241 = arith.addf %233, %240 : vector<4x4x2xf32>
    %c22 = arith.constant 22 : index
    %c0_43 = arith.constant 0 : index
    %242 = vector.load %arg2[%c22, %c0_43] : memref<36x2xf32, #tpu.memory_space<vmem>>, vector<1x2xf32>
    %243 = vector.shape_cast %242 : vector<1x2xf32> to vector<2xf32>
    %244 = vector.extract_strided_slice %234 {offsets = [1, 0, 0], sizes = [4, 4, 2], strides = [1, 1, 1]} : vector<6x4x2xf32> to vector<4x4x2xf32>
    %245 = vector.shape_cast %243 : vector<2xf32> to vector<1x1x2xf32>
    %246 = vector.broadcast %245 : vector<1x1x2xf32> to vector<4x4x2xf32>
    %247 = arith.mulf %244, %246 : vector<4x4x2xf32>
    %248 = arith.addf %241, %247 : vector<4x4x2xf32>
    %c25 = arith.constant 25 : index
    %c0_44 = arith.constant 0 : index
    %249 = vector.load %arg2[%c25, %c0_44] : memref<36x2xf32, #tpu.memory_space<vmem>>, vector<1x2xf32>
    %250 = vector.shape_cast %249 : vector<1x2xf32> to vector<2xf32>
    %251 = vector.extract_strided_slice %234 {offsets = [2, 0, 0], sizes = [4, 4, 2], strides = [1, 1, 1]} : vector<6x4x2xf32> to vector<4x4x2xf32>
    %252 = vector.shape_cast %250 : vector<2xf32> to vector<1x1x2xf32>
    %253 = vector.broadcast %252 : vector<1x1x2xf32> to vector<4x4x2xf32>
    %254 = arith.mulf %251, %253 : vector<4x4x2xf32>
    %255 = arith.addf %248, %254 : vector<4x4x2xf32>
    %256 = vector.extract_strided_slice %210 {offsets = [0, 2, 0], sizes = [6, 4, 2], strides = [1, 1, 1]} : vector<6x6x2xf32> to vector<6x4x2xf32>
    %c20 = arith.constant 20 : index
    %c0_45 = arith.constant 0 : index
    %257 = vector.load %arg2[%c20, %c0_45] : memref<36x2xf32, #tpu.memory_space<vmem>>, vector<1x2xf32>
    %258 = vector.shape_cast %257 : vector<1x2xf32> to vector<2xf32>
    %259 = vector.extract_strided_slice %256 {offsets = [0, 0, 0], sizes = [4, 4, 2], strides = [1, 1, 1]} : vector<6x4x2xf32> to vector<4x4x2xf32>
    %260 = vector.shape_cast %258 : vector<2xf32> to vector<1x1x2xf32>
    %261 = vector.broadcast %260 : vector<1x1x2xf32> to vector<4x4x2xf32>
    %262 = arith.mulf %259, %261 : vector<4x4x2xf32>
    %263 = arith.addf %255, %262 : vector<4x4x2xf32>
    %c23 = arith.constant 23 : index
    %c0_46 = arith.constant 0 : index
    %264 = vector.load %arg2[%c23, %c0_46] : memref<36x2xf32, #tpu.memory_space<vmem>>, vector<1x2xf32>
    %265 = vector.shape_cast %264 : vector<1x2xf32> to vector<2xf32>
    %266 = vector.extract_strided_slice %256 {offsets = [1, 0, 0], sizes = [4, 4, 2], strides = [1, 1, 1]} : vector<6x4x2xf32> to vector<4x4x2xf32>
    %267 = vector.shape_cast %265 : vector<2xf32> to vector<1x1x2xf32>
    %268 = vector.broadcast %267 : vector<1x1x2xf32> to vector<4x4x2xf32>
    %269 = arith.mulf %266, %268 : vector<4x4x2xf32>
    %270 = arith.addf %263, %269 : vector<4x4x2xf32>
    %c26 = arith.constant 26 : index
    %c0_47 = arith.constant 0 : index
    %271 = vector.load %arg2[%c26, %c0_47] : memref<36x2xf32, #tpu.memory_space<vmem>>, vector<1x2xf32>
    %272 = vector.shape_cast %271 : vector<1x2xf32> to vector<2xf32>
    %273 = vector.extract_strided_slice %256 {offsets = [2, 0, 0], sizes = [4, 4, 2], strides = [1, 1, 1]} : vector<6x4x2xf32> to vector<4x4x2xf32>
    %274 = vector.shape_cast %272 : vector<2xf32> to vector<1x1x2xf32>
    %275 = vector.broadcast %274 : vector<1x1x2xf32> to vector<4x4x2xf32>
    %276 = arith.mulf %273, %275 : vector<4x4x2xf32>
    %277 = arith.addf %270, %276 : vector<4x4x2xf32>
    %c2_48 = arith.constant 2 : index
    %c0_49 = arith.constant 0 : index
    %278 = vector.load %arg3[%c2_48, %c0_49] : memref<4x2xf32, #tpu.memory_space<vmem>>, vector<1x2xf32>
    %279 = vector.shape_cast %278 : vector<1x2xf32> to vector<2xf32>
    %280 = vector.shape_cast %279 : vector<2xf32> to vector<1x1x2xf32>
    %281 = vector.broadcast %280 : vector<1x1x2xf32> to vector<4x4x2xf32>
    %282 = arith.addf %277, %281 : vector<4x4x2xf32>
    %283 = vector.shape_cast %282 : vector<4x4x2xf32> to vector<4x4x1x2xf32>
    %284 = vector.shape_cast %283 : vector<4x4x1x2xf32> to vector<4x4x1x2xf32>
    %285 = vector.broadcast %284 : vector<4x4x1x2xf32> to vector<4x4x4x2xf32>
    %286 = vector.shape_cast %285 : vector<4x4x4x2xf32> to vector<4x16x2xf32>
    %287 = vector.shape_cast %286 : vector<4x16x2xf32> to vector<4x1x16x2xf32>
    %288 = vector.shape_cast %287 : vector<4x1x16x2xf32> to vector<4x1x16x2xf32>
    %289 = vector.broadcast %288 : vector<4x1x16x2xf32> to vector<4x4x16x2xf32>
    %290 = vector.shape_cast %289 : vector<4x4x16x2xf32> to vector<16x16x2xf32>
    %291 = vector.shape_cast %290 : vector<16x16x2xf32> to vector<256x2xf32>
    %c0_50 = arith.constant 0 : index
    %c0_51 = arith.constant 0 : index
    %c6_52 = arith.constant 6 : index
    %292 = vector.load %arg1[%c0_50, %c0_51, %c6_52] : memref<1x256x8xf32, #tpu.memory_space<vmem>>, vector<1x256x2xf32>
    %293 = vector.shape_cast %292 : vector<1x256x2xf32> to vector<256x2xf32>
    %294 = vector.shape_cast %293 : vector<256x2xf32> to vector<16x16x2xf32>
    %295 = vector.shape_cast %294 : vector<16x16x2xf32> to vector<2x8x16x2xf32>
    %296 = vector.extract_strided_slice %295 {offsets = [0, 0, 0, 0], sizes = [2, 1, 16, 2], strides = [1, 1, 1, 1]} : vector<2x8x16x2xf32> to vector<2x1x16x2xf32>
    %297 = vector.shape_cast %296 : vector<2x1x16x2xf32> to vector<2x16x2xf32>
    %298 = vector.extract_strided_slice %295 {offsets = [0, 1, 0, 0], sizes = [2, 1, 16, 2], strides = [1, 1, 1, 1]} : vector<2x8x16x2xf32> to vector<2x1x16x2xf32>
    %299 = vector.shape_cast %298 : vector<2x1x16x2xf32> to vector<2x16x2xf32>
    %300 = arith.maximumf %297, %299 : vector<2x16x2xf32>
    %301 = vector.extract_strided_slice %295 {offsets = [0, 2, 0, 0], sizes = [2, 1, 16, 2], strides = [1, 1, 1, 1]} : vector<2x8x16x2xf32> to vector<2x1x16x2xf32>
    %302 = vector.shape_cast %301 : vector<2x1x16x2xf32> to vector<2x16x2xf32>
    %303 = arith.maximumf %300, %302 : vector<2x16x2xf32>
    %304 = vector.extract_strided_slice %295 {offsets = [0, 3, 0, 0], sizes = [2, 1, 16, 2], strides = [1, 1, 1, 1]} : vector<2x8x16x2xf32> to vector<2x1x16x2xf32>
    %305 = vector.shape_cast %304 : vector<2x1x16x2xf32> to vector<2x16x2xf32>
    %306 = arith.maximumf %303, %305 : vector<2x16x2xf32>
    %307 = vector.extract_strided_slice %295 {offsets = [0, 4, 0, 0], sizes = [2, 1, 16, 2], strides = [1, 1, 1, 1]} : vector<2x8x16x2xf32> to vector<2x1x16x2xf32>
    %308 = vector.shape_cast %307 : vector<2x1x16x2xf32> to vector<2x16x2xf32>
    %309 = arith.maximumf %306, %308 : vector<2x16x2xf32>
    %310 = vector.extract_strided_slice %295 {offsets = [0, 5, 0, 0], sizes = [2, 1, 16, 2], strides = [1, 1, 1, 1]} : vector<2x8x16x2xf32> to vector<2x1x16x2xf32>
    %311 = vector.shape_cast %310 : vector<2x1x16x2xf32> to vector<2x16x2xf32>
    %312 = arith.maximumf %309, %311 : vector<2x16x2xf32>
    %313 = vector.extract_strided_slice %295 {offsets = [0, 6, 0, 0], sizes = [2, 1, 16, 2], strides = [1, 1, 1, 1]} : vector<2x8x16x2xf32> to vector<2x1x16x2xf32>
    %314 = vector.shape_cast %313 : vector<2x1x16x2xf32> to vector<2x16x2xf32>
    %315 = arith.maximumf %312, %314 : vector<2x16x2xf32>
    %316 = vector.extract_strided_slice %295 {offsets = [0, 7, 0, 0], sizes = [2, 1, 16, 2], strides = [1, 1, 1, 1]} : vector<2x8x16x2xf32> to vector<2x1x16x2xf32>
    %317 = vector.shape_cast %316 : vector<2x1x16x2xf32> to vector<2x16x2xf32>
    %318 = arith.maximumf %315, %317 : vector<2x16x2xf32>
    %319 = vector.shape_cast %318 : vector<2x16x2xf32> to vector<2x2x8x2xf32>
    %320 = vector.extract_strided_slice %319 {offsets = [0, 0, 0, 0], sizes = [2, 2, 1, 2], strides = [1, 1, 1, 1]} : vector<2x2x8x2xf32> to vector<2x2x1x2xf32>
    %321 = vector.shape_cast %320 : vector<2x2x1x2xf32> to vector<2x2x2xf32>
    %322 = vector.extract_strided_slice %319 {offsets = [0, 0, 1, 0], sizes = [2, 2, 1, 2], strides = [1, 1, 1, 1]} : vector<2x2x8x2xf32> to vector<2x2x1x2xf32>
    %323 = vector.shape_cast %322 : vector<2x2x1x2xf32> to vector<2x2x2xf32>
    %324 = arith.maximumf %321, %323 : vector<2x2x2xf32>
    %325 = vector.extract_strided_slice %319 {offsets = [0, 0, 2, 0], sizes = [2, 2, 1, 2], strides = [1, 1, 1, 1]} : vector<2x2x8x2xf32> to vector<2x2x1x2xf32>
    %326 = vector.shape_cast %325 : vector<2x2x1x2xf32> to vector<2x2x2xf32>
    %327 = arith.maximumf %324, %326 : vector<2x2x2xf32>
    %328 = vector.extract_strided_slice %319 {offsets = [0, 0, 3, 0], sizes = [2, 2, 1, 2], strides = [1, 1, 1, 1]} : vector<2x2x8x2xf32> to vector<2x2x1x2xf32>
    %329 = vector.shape_cast %328 : vector<2x2x1x2xf32> to vector<2x2x2xf32>
    %330 = arith.maximumf %327, %329 : vector<2x2x2xf32>
    %331 = vector.extract_strided_slice %319 {offsets = [0, 0, 4, 0], sizes = [2, 2, 1, 2], strides = [1, 1, 1, 1]} : vector<2x2x8x2xf32> to vector<2x2x1x2xf32>
    %332 = vector.shape_cast %331 : vector<2x2x1x2xf32> to vector<2x2x2xf32>
    %333 = arith.maximumf %330, %332 : vector<2x2x2xf32>
    %334 = vector.extract_strided_slice %319 {offsets = [0, 0, 5, 0], sizes = [2, 2, 1, 2], strides = [1, 1, 1, 1]} : vector<2x2x8x2xf32> to vector<2x2x1x2xf32>
    %335 = vector.shape_cast %334 : vector<2x2x1x2xf32> to vector<2x2x2xf32>
    %336 = arith.maximumf %333, %335 : vector<2x2x2xf32>
    %337 = vector.extract_strided_slice %319 {offsets = [0, 0, 6, 0], sizes = [2, 2, 1, 2], strides = [1, 1, 1, 1]} : vector<2x2x8x2xf32> to vector<2x2x1x2xf32>
    %338 = vector.shape_cast %337 : vector<2x2x1x2xf32> to vector<2x2x2xf32>
    %339 = arith.maximumf %336, %338 : vector<2x2x2xf32>
    %340 = vector.extract_strided_slice %319 {offsets = [0, 0, 7, 0], sizes = [2, 2, 1, 2], strides = [1, 1, 1, 1]} : vector<2x2x8x2xf32> to vector<2x2x1x2xf32>
    %341 = vector.shape_cast %340 : vector<2x2x1x2xf32> to vector<2x2x2xf32>
    %342 = arith.maximumf %339, %341 : vector<2x2x2xf32>
    %cst_53 = arith.constant 0.000000e+00 : f32
    %343 = vector.broadcast %cst_53 : f32 to vector<1x2x2xf32>
    %cst_54 = arith.constant 0.000000e+00 : f32
    %344 = vector.broadcast %cst_54 : f32 to vector<4x1x2xf32>
    %345 = tpu.concatenate %343, %342, %343 in 0 : vector<1x2x2xf32>, vector<2x2x2xf32>, vector<1x2x2xf32> -> vector<4x2x2xf32>
    %346 = tpu.concatenate %344, %345, %344 in 1 : vector<4x1x2xf32>, vector<4x2x2xf32>, vector<4x1x2xf32> -> vector<4x4x2xf32>
    %cst_55 = arith.constant 0.000000e+00 : f32
    %347 = vector.broadcast %cst_55 : f32 to vector<2x2x2xf32>
    %348 = vector.extract_strided_slice %346 {offsets = [0, 0, 0], sizes = [4, 2, 2], strides = [1, 1, 1]} : vector<4x4x2xf32> to vector<4x2x2xf32>
    %c27 = arith.constant 27 : index
    %c0_56 = arith.constant 0 : index
    %349 = vector.load %arg2[%c27, %c0_56] : memref<36x2xf32, #tpu.memory_space<vmem>>, vector<1x2xf32>
    %350 = vector.shape_cast %349 : vector<1x2xf32> to vector<2xf32>
    %351 = vector.extract_strided_slice %348 {offsets = [0, 0, 0], sizes = [2, 2, 2], strides = [1, 1, 1]} : vector<4x2x2xf32> to vector<2x2x2xf32>
    %352 = vector.shape_cast %350 : vector<2xf32> to vector<1x1x2xf32>
    %353 = vector.broadcast %352 : vector<1x1x2xf32> to vector<2x2x2xf32>
    %354 = arith.mulf %351, %353 : vector<2x2x2xf32>
    %355 = arith.addf %347, %354 : vector<2x2x2xf32>
    %c30 = arith.constant 30 : index
    %c0_57 = arith.constant 0 : index
    %356 = vector.load %arg2[%c30, %c0_57] : memref<36x2xf32, #tpu.memory_space<vmem>>, vector<1x2xf32>
    %357 = vector.shape_cast %356 : vector<1x2xf32> to vector<2xf32>
    %358 = vector.extract_strided_slice %348 {offsets = [1, 0, 0], sizes = [2, 2, 2], strides = [1, 1, 1]} : vector<4x2x2xf32> to vector<2x2x2xf32>
    %359 = vector.shape_cast %357 : vector<2xf32> to vector<1x1x2xf32>
    %360 = vector.broadcast %359 : vector<1x1x2xf32> to vector<2x2x2xf32>
    %361 = arith.mulf %358, %360 : vector<2x2x2xf32>
    %362 = arith.addf %355, %361 : vector<2x2x2xf32>
    %c33 = arith.constant 33 : index
    %c0_58 = arith.constant 0 : index
    %363 = vector.load %arg2[%c33, %c0_58] : memref<36x2xf32, #tpu.memory_space<vmem>>, vector<1x2xf32>
    %364 = vector.shape_cast %363 : vector<1x2xf32> to vector<2xf32>
    %365 = vector.extract_strided_slice %348 {offsets = [2, 0, 0], sizes = [2, 2, 2], strides = [1, 1, 1]} : vector<4x2x2xf32> to vector<2x2x2xf32>
    %366 = vector.shape_cast %364 : vector<2xf32> to vector<1x1x2xf32>
    %367 = vector.broadcast %366 : vector<1x1x2xf32> to vector<2x2x2xf32>
    %368 = arith.mulf %365, %367 : vector<2x2x2xf32>
    %369 = arith.addf %362, %368 : vector<2x2x2xf32>
    %370 = vector.extract_strided_slice %346 {offsets = [0, 1, 0], sizes = [4, 2, 2], strides = [1, 1, 1]} : vector<4x4x2xf32> to vector<4x2x2xf32>
    %c28 = arith.constant 28 : index
    %c0_59 = arith.constant 0 : index
    %371 = vector.load %arg2[%c28, %c0_59] : memref<36x2xf32, #tpu.memory_space<vmem>>, vector<1x2xf32>
    %372 = vector.shape_cast %371 : vector<1x2xf32> to vector<2xf32>
    %373 = vector.extract_strided_slice %370 {offsets = [0, 0, 0], sizes = [2, 2, 2], strides = [1, 1, 1]} : vector<4x2x2xf32> to vector<2x2x2xf32>
    %374 = vector.shape_cast %372 : vector<2xf32> to vector<1x1x2xf32>
    %375 = vector.broadcast %374 : vector<1x1x2xf32> to vector<2x2x2xf32>
    %376 = arith.mulf %373, %375 : vector<2x2x2xf32>
    %377 = arith.addf %369, %376 : vector<2x2x2xf32>
    %c31 = arith.constant 31 : index
    %c0_60 = arith.constant 0 : index
    %378 = vector.load %arg2[%c31, %c0_60] : memref<36x2xf32, #tpu.memory_space<vmem>>, vector<1x2xf32>
    %379 = vector.shape_cast %378 : vector<1x2xf32> to vector<2xf32>
    %380 = vector.extract_strided_slice %370 {offsets = [1, 0, 0], sizes = [2, 2, 2], strides = [1, 1, 1]} : vector<4x2x2xf32> to vector<2x2x2xf32>
    %381 = vector.shape_cast %379 : vector<2xf32> to vector<1x1x2xf32>
    %382 = vector.broadcast %381 : vector<1x1x2xf32> to vector<2x2x2xf32>
    %383 = arith.mulf %380, %382 : vector<2x2x2xf32>
    %384 = arith.addf %377, %383 : vector<2x2x2xf32>
    %c34 = arith.constant 34 : index
    %c0_61 = arith.constant 0 : index
    %385 = vector.load %arg2[%c34, %c0_61] : memref<36x2xf32, #tpu.memory_space<vmem>>, vector<1x2xf32>
    %386 = vector.shape_cast %385 : vector<1x2xf32> to vector<2xf32>
    %387 = vector.extract_strided_slice %370 {offsets = [2, 0, 0], sizes = [2, 2, 2], strides = [1, 1, 1]} : vector<4x2x2xf32> to vector<2x2x2xf32>
    %388 = vector.shape_cast %386 : vector<2xf32> to vector<1x1x2xf32>
    %389 = vector.broadcast %388 : vector<1x1x2xf32> to vector<2x2x2xf32>
    %390 = arith.mulf %387, %389 : vector<2x2x2xf32>
    %391 = arith.addf %384, %390 : vector<2x2x2xf32>
    %392 = vector.extract_strided_slice %346 {offsets = [0, 2, 0], sizes = [4, 2, 2], strides = [1, 1, 1]} : vector<4x4x2xf32> to vector<4x2x2xf32>
    %c29 = arith.constant 29 : index
    %c0_62 = arith.constant 0 : index
    %393 = vector.load %arg2[%c29, %c0_62] : memref<36x2xf32, #tpu.memory_space<vmem>>, vector<1x2xf32>
    %394 = vector.shape_cast %393 : vector<1x2xf32> to vector<2xf32>
    %395 = vector.extract_strided_slice %392 {offsets = [0, 0, 0], sizes = [2, 2, 2], strides = [1, 1, 1]} : vector<4x2x2xf32> to vector<2x2x2xf32>
    %396 = vector.shape_cast %394 : vector<2xf32> to vector<1x1x2xf32>
    %397 = vector.broadcast %396 : vector<1x1x2xf32> to vector<2x2x2xf32>
    %398 = arith.mulf %395, %397 : vector<2x2x2xf32>
    %399 = arith.addf %391, %398 : vector<2x2x2xf32>
    %c32 = arith.constant 32 : index
    %c0_63 = arith.constant 0 : index
    %400 = vector.load %arg2[%c32, %c0_63] : memref<36x2xf32, #tpu.memory_space<vmem>>, vector<1x2xf32>
    %401 = vector.shape_cast %400 : vector<1x2xf32> to vector<2xf32>
    %402 = vector.extract_strided_slice %392 {offsets = [1, 0, 0], sizes = [2, 2, 2], strides = [1, 1, 1]} : vector<4x2x2xf32> to vector<2x2x2xf32>
    %403 = vector.shape_cast %401 : vector<2xf32> to vector<1x1x2xf32>
    %404 = vector.broadcast %403 : vector<1x1x2xf32> to vector<2x2x2xf32>
    %405 = arith.mulf %402, %404 : vector<2x2x2xf32>
    %406 = arith.addf %399, %405 : vector<2x2x2xf32>
    %c35 = arith.constant 35 : index
    %c0_64 = arith.constant 0 : index
    %407 = vector.load %arg2[%c35, %c0_64] : memref<36x2xf32, #tpu.memory_space<vmem>>, vector<1x2xf32>
    %408 = vector.shape_cast %407 : vector<1x2xf32> to vector<2xf32>
    %409 = vector.extract_strided_slice %392 {offsets = [2, 0, 0], sizes = [2, 2, 2], strides = [1, 1, 1]} : vector<4x2x2xf32> to vector<2x2x2xf32>
    %410 = vector.shape_cast %408 : vector<2xf32> to vector<1x1x2xf32>
    %411 = vector.broadcast %410 : vector<1x1x2xf32> to vector<2x2x2xf32>
    %412 = arith.mulf %409, %411 : vector<2x2x2xf32>
    %413 = arith.addf %406, %412 : vector<2x2x2xf32>
    %c3_65 = arith.constant 3 : index
    %c0_66 = arith.constant 0 : index
    %414 = vector.load %arg3[%c3_65, %c0_66] : memref<4x2xf32, #tpu.memory_space<vmem>>, vector<1x2xf32>
    %415 = vector.shape_cast %414 : vector<1x2xf32> to vector<2xf32>
    %416 = vector.shape_cast %415 : vector<2xf32> to vector<1x1x2xf32>
    %417 = vector.broadcast %416 : vector<1x1x2xf32> to vector<2x2x2xf32>
    %418 = arith.addf %413, %417 : vector<2x2x2xf32>
    %419 = vector.shape_cast %418 : vector<2x2x2xf32> to vector<2x2x1x2xf32>
    %420 = vector.shape_cast %419 : vector<2x2x1x2xf32> to vector<2x2x1x2xf32>
    %421 = vector.broadcast %420 : vector<2x2x1x2xf32> to vector<2x2x8x2xf32>
    %422 = vector.shape_cast %421 : vector<2x2x8x2xf32> to vector<2x16x2xf32>
    %423 = vector.shape_cast %422 : vector<2x16x2xf32> to vector<2x1x16x2xf32>
    %424 = vector.shape_cast %423 : vector<2x1x16x2xf32> to vector<2x1x16x2xf32>
    %425 = vector.broadcast %424 : vector<2x1x16x2xf32> to vector<2x8x16x2xf32>
    %426 = vector.shape_cast %425 : vector<2x8x16x2xf32> to vector<16x16x2xf32>
    %427 = vector.shape_cast %426 : vector<16x16x2xf32> to vector<256x2xf32>
    %428 = tpu.concatenate %79, %179, %291, %427 in 1 : vector<256x2xf32>, vector<256x2xf32>, vector<256x2xf32>, vector<256x2xf32> -> vector<256x8xf32>
    %c0_67 = arith.constant 0 : index
    %c0_68 = arith.constant 0 : index
    %429 = vector.load %arg4[%c0_67, %c0_68] : memref<8x8xf32, #tpu.memory_space<vmem>>, vector<8x8xf32>
    %cst_69 = arith.constant dense<0.000000e+00> : vector<256x8xf32>
    %430 = tpu.matmul %428, %429, %cst_69 {dimension_numbers = #tpu.dot_dimension_numbers<[1], [0], [0], [1], [0, 0, 1, 1], [], []>} : vector<256x8xf32>, vector<8x8xf32>, vector<256x8xf32> -> vector<256x8xf32>
    %c0_70 = arith.constant 0 : index
    %c0_71 = arith.constant 0 : index
    %431 = vector.load %arg5[%c0_70, %c0_71] : memref<1x8xf32, #tpu.memory_space<vmem>>, vector<1x8xf32>
    %432 = vector.broadcast %431 : vector<1x8xf32> to vector<256x8xf32>
    %433 = arith.addf %430, %432 : vector<256x8xf32>
    %cst_72 = arith.constant 5.000000e-01 : f32
    %434 = vector.broadcast %cst_72 : f32 to vector<256x8xf32>
    %435 = arith.mulf %434, %433 : vector<256x8xf32>
    %cst_73 = arith.constant 0.707106769 : f32
    %436 = vector.broadcast %cst_73 : f32 to vector<256x8xf32>
    %437 = arith.mulf %433, %436 : vector<256x8xf32>
    %438 = math.absf %437 : vector<256x8xf32>
    %cst_74 = arith.constant 0.327591091 : f32
    %439 = vector.broadcast %cst_74 : f32 to vector<256x8xf32>
    %440 = arith.mulf %439, %438 : vector<256x8xf32>
    %cst_75 = arith.constant 1.000000e+00 : f32
    %441 = vector.broadcast %cst_75 : f32 to vector<256x8xf32>
    %442 = arith.addf %441, %440 : vector<256x8xf32>
    %443 = tpu.reciprocal %442 {approx = true} : vector<256x8xf32> -> vector<256x8xf32>
    %444 = arith.mulf %442, %443 : vector<256x8xf32>
    %cst_76 = arith.constant 2.000000e+00 : f32
    %445 = vector.broadcast %cst_76 : f32 to vector<256x8xf32>
    %446 = arith.subf %445, %444 : vector<256x8xf32>
    %447 = arith.mulf %443, %446 : vector<256x8xf32>
    %cst_77 = arith.constant 1.06140542 : f32
    %448 = vector.broadcast %cst_77 : f32 to vector<256x8xf32>
    %449 = arith.mulf %448, %447 : vector<256x8xf32>
    %cst_78 = arith.constant -1.45315206 : f32
    %450 = vector.broadcast %cst_78 : f32 to vector<256x8xf32>
    %451 = arith.addf %449, %450 : vector<256x8xf32>
    %452 = arith.mulf %451, %447 : vector<256x8xf32>
    %cst_79 = arith.constant 1.42141378 : f32
    %453 = vector.broadcast %cst_79 : f32 to vector<256x8xf32>
    %454 = arith.addf %452, %453 : vector<256x8xf32>
    %455 = arith.mulf %454, %447 : vector<256x8xf32>
    %cst_80 = arith.constant -0.284496725 : f32
    %456 = vector.broadcast %cst_80 : f32 to vector<256x8xf32>
    %457 = arith.addf %455, %456 : vector<256x8xf32>
    %458 = arith.mulf %457, %447 : vector<256x8xf32>
    %cst_81 = arith.constant 0.254829586 : f32
    %459 = vector.broadcast %cst_81 : f32 to vector<256x8xf32>
    %460 = arith.addf %458, %459 : vector<256x8xf32>
    %461 = arith.mulf %460, %447 : vector<256x8xf32>
    %462 = arith.mulf %438, %438 : vector<256x8xf32>
    %cst_82 = arith.constant 0.000000e+00 : f32
    %463 = vector.broadcast %cst_82 : f32 to vector<256x8xf32>
    %464 = arith.subf %463, %462 : vector<256x8xf32>
    %465 = math.exp %464 : vector<256x8xf32>
    %466 = arith.mulf %461, %465 : vector<256x8xf32>
    %cst_83 = arith.constant 1.000000e+00 : f32
    %467 = vector.broadcast %cst_83 : f32 to vector<256x8xf32>
    %468 = arith.subf %467, %466 : vector<256x8xf32>
    %cst_84 = arith.constant 0.000000e+00 : f32
    %469 = vector.broadcast %cst_84 : f32 to vector<256x8xf32>
    %470 = arith.cmpf oge, %437, %469 : vector<256x8xf32>
    %cst_85 = arith.constant 0.000000e+00 : f32
    %471 = vector.broadcast %cst_85 : f32 to vector<256x8xf32>
    %472 = arith.subf %471, %468 : vector<256x8xf32>
    %473 = arith.select %470, %468, %472 : vector<256x8xi1>, vector<256x8xf32>
    %cst_86 = arith.constant 1.000000e+00 : f32
    %474 = vector.broadcast %cst_86 : f32 to vector<256x8xf32>
    %475 = arith.addf %474, %473 : vector<256x8xf32>
    %476 = arith.mulf %435, %475 : vector<256x8xf32>
    %c0_87 = arith.constant 0 : index
    %c0_88 = arith.constant 0 : index
    %c0_89 = arith.constant 0 : index
    %477 = vector.load %arg1[%c0_87, %c0_88, %c0_89] : memref<1x256x8xf32, #tpu.memory_space<vmem>>, vector<1x256x8xf32>
    %478 = vector.shape_cast %477 : vector<1x256x8xf32> to vector<256x8xf32>
    %479 = arith.mulf %476, %478 : vector<256x8xf32>
    %c0_90 = arith.constant 0 : index
    %c0_91 = arith.constant 0 : index
    %c0_92 = arith.constant 0 : index
    %480 = vector.load %arg6[%c0_90, %c0_91, %c0_92] : memref<1x256x8xf32, #tpu.memory_space<vmem>>, vector<1x256x8xf32>
    %481 = vector.shape_cast %480 : vector<1x256x8xf32> to vector<256x8xf32>
    %482 = vector.shape_cast %479 : vector<256x8xf32> to vector<1x256x8xf32>
    tpu.vector_store %arg6[%c0_90, %c0_91, %c0_92], %482 {strides = array<i32>} : memref<1x256x8xf32, #tpu.memory_space<vmem>>, vector<1x256x8xf32>,
    return
  }
  func.func @transform_0(%arg0: i32) -> (i32, i32, i32) {
    %c0_i32 = arith.constant 0 : i32
    %c0_i32_0 = arith.constant 0 : i32
    %c0_i32_1 = arith.constant 0 : i32
    return %arg0, %c0_i32, %c0_i32_0 : i32, i32, i32
  }
  func.func @transform_1(%arg0: i32) -> (i32, i32) {
    %c0_i32 = arith.constant 0 : i32
    %c0_i32_0 = arith.constant 0 : i32
    %c0_i32_1 = arith.constant 0 : i32
    return %c0_i32, %c0_i32_0 : i32, i32
  }
  func.func @transform_2(%arg0: i32) -> (i32, i32) {
    %c0_i32 = arith.constant 0 : i32
    %c0_i32_0 = arith.constant 0 : i32
    %c0_i32_1 = arith.constant 0 : i32
    return %c0_i32, %c0_i32_0 : i32, i32
  }
  func.func @transform_3(%arg0: i32) -> (i32, i32) {
    %c0_i32 = arith.constant 0 : i32
    %c0_i32_0 = arith.constant 0 : i32
    %c0_i32_1 = arith.constant 0 : i32
    return %c0_i32, %c0_i32_0 : i32, i32
  }
  func.func @transform_4(%arg0: i32) -> (i32, i32) {
    %c0_i32 = arith.constant 0 : i32
    %c0_i32_0 = arith.constant 0 : i32
    %c0_i32_1 = arith.constant 0 : i32
    return %c0_i32, %c0_i32_0 : i32, i32
  }
  func.func @transform_5(%arg0: i32) -> (i32, i32, i32) {
    %c0_i32 = arith.constant 0 : i32
    %c0_i32_0 = arith.constant 0 : i32
    %c0_i32_1 = arith.constant 0 : i32
    return %arg0, %c0_i32, %c0_i32_0 : i32, i32, i32
  }
}

</mosaic_0001>

<bundles_post_ra>
// kernel: safm_pallas.1
= control target key start
LH: loop header
LB: loop body
LE: loop exit
PB: predicated region body
PF: predicated region fallthrough
CT: control target
= control target key end

     0   :  { %s6404_s18 = smov 0   ;;  %s11358_s0 = inlined_call_operand.vmem [shape: f32[2,256,8], index: 0, kind: input, shape index: {}]   ;;  %s11359_s1 = inlined_call_operand.vmem [shape: f32[36,2], index: 1, kind: input, shape index: {}]   ;;  %s11360_s2 = inlined_call_operand.vmem [shape: f32[4,2], index: 2, kind: input, shape index: {}]   ;;  %s11361_s3 = inlined_call_operand.vmem [shape: f32[8,8], index: 3, kind: input, shape index: {}]   ;;  %s11362_s4 = inlined_call_operand.vmem [shape: f32[1,8], index: 4, kind: input, shape index: {}]   ;;  %s11363_s5 = inlined_call_operand.vmem [shape: f32[2,256,8], index: 5, kind: output, shape index: {}]  }
   0x1 LB: > { %s5967_s19 = sadd.s32 4294967295, %s6365_s18   ;;  %p5971_p0 = scmp.ge.s32.totalorder %s6365_s18, 1  ;;  %s6365_s18 = sphi %s6404_s18, %s15_s18  }
   0x2   : > { %p187_p1 = scmp.lt.s32.totalorder %s6365_s18, 3 }
   0x4   : > { %p188_p2 = pnand %p5971_p0, %p187_p1 }
   0x6   : > { %191 = sbr.rel (%p188_p2) target bundleno = 1032 (0x408), region = 40 }
   0xb   : > { %p215_p3 = scmp.lt.s32.totalorder %s5967_s19, 1  ;;  %vm290_vm0 = vcmask 1040384   ;;  %vm2623_vm1 = vcmask 1041409   ;;  %vm2625_vm2 = vcmask 1042434   ;;  %vm2627_vm3 = vcmask 1043459   ;;  %s6367_s24 = smov 126  }
   0xc   : > { %vm2629_vm4 = vcmask 1044484   ;;  %vm2631_vm5 = vcmask 1045509   ;;  %vm2633_vm6 = vcmask 1046534   ;;  %vm2635_vm7 = vcmask 1047559   ;;  %s6368_s25 = smov 124   ;;  %s6369_s26 = smov 122  }
   0xd   : > { %s11968_s19 = smov (!%p215_p3, %s5967_s19), 1  ;;  %vm721_vm8 = vcmask 1046528   ;;  %vm1448_vm9 = vcmask 1045504   ;;  %vm3994_vm10 = vcmask 1042432   ;;  %vm3666_vm11 = vcmask 1044480   ;;  %s6372_s6 = smov 6  }
   0xe   : > { %s6122_s20 = sshll.u32 %s11968_s19, 8  ;;  %vm4574_vm12 = vcmask 15360   ;;  %s6373_s9 = smov 4   ;;  %vm4607_vm13 = vcmask 31744   ;;  %vm4640_vm14 = vcmask 48128   ;;  %vm4678_vm15 = vcmask 64512  }
   0xf   : > { %s6420_s23 = scalar_lea.vmem %s11358_s0, %s6122_s20  ;;  %s10693_s14 = scalar_lea.vmem %s11363_s5, %s6122_s20 }
  0x10   : > { %v6423_v0 = vld [vmem:[%s6420_s23 + $0x40] sm:$0xff]  ;;  %v6426_v1 = vld [vmem:[%s6420_s23 + $0x48] sm:$0xff]  ;;  %v6429_v2 = vld [vmem:[%s6420_s23 + $0x50] sm:$0xff] }
  0x11   : > { %11583 = vst [vmem:[#allocation2_spill] sm:$0xff] %v6423_v0  ;;  %v6432_v3 = vld [vmem:[%s6420_s23 + $0x58] sm:$0xff]  ;;  %v6436_v4 = vmax.f32 %v6423_v0, %v6429_v2  ;;  %v11366_v5 = vrot.slane %v6426_v1, 7  ;;  %v11367_v7 = vrot.slane %v6423_v0, 7  ;;  %v225_v24 = vld [vmem:[%s6420_s23] sm:$0xff]  ;;  %v227_v29 = vld [vmem:[%s6420_s23 + $0x10] sm:$0xff] }
  0x12   : > { %11584 = vst [vmem:[#allocation3_spill] sm:$0xff] %v6426_v1  ;;  %v6441_v6 = vmax.f32 %v6426_v1, %v6432_v3  ;;  %v226_v33 = vld [vmem:[%s6420_s23 + $0x8] sm:$0xff]  ;;  %v228_v34 = vld [vmem:[%s6420_s23 + $0x18] sm:$0xff]  ;;  %v6465_v41 = vmax.f32 %v225_v24, %v227_v29 }
  0x13   : > { %v2155_v8 = vrot.slane %v6436_v4, 2  ;;  %v2156_v9 = vrot.slane %v6436_v4, 4  ;;  %v2157_v10 = vrot.slane %v6436_v4, 6  ;;  %v5992_v11 = vrot.slane %v6436_v4, 9 }
  0x14   : > { %v2158_v12 = vrot.slane %v6441_v6, 2  ;;  %v2159_v13 = vrot.slane %v6441_v6, 4  ;;  %v2160_v14 = vrot.slane %v6441_v6, 6  ;;  %v5996_v15 = vrot.slane %v6441_v6, 9 }
  0x15   : > { %v5993_v16 = vrot.slane %v2155_v8, 9  ;;  %v5994_v17 = vrot.slane %v2156_v9, 9  ;;  %v5995_v18 = vrot.slane %v2157_v10, 9  ;;  %v2447_v19 = vmax.f32 %v6436_v4, %v5992_v11  ;;  %v6488_v11 = vld [vmem:[%s6420_s23 + $0x68] sm:$0xff] }
  0x16   : > { %v5997_v20 = vrot.slane %v2158_v12, 9  ;;  %v5998_v21 = vrot.slane %v2159_v13, 9  ;;  %v5999_v22 = vrot.slane %v2160_v14, 9  ;;  %v2451_v23 = vmax.f32 %v6441_v6, %v5996_v15 }
  0x17   : > { %v2448_v25 = vmax.f32 %v2155_v8, %v5993_v16  ;;  %v2449_v26 = vmax.f32 %v2156_v9, %v5994_v17  ;;  %v2450_v27 = vmax.f32 %v2157_v10, %v5995_v18  ;;  %v2575_v28 = vperm.slane %v2447_v19, 0  ;;  %v6485_v10 = vld [vmem:[%s6420_s23 + $0x60] sm:$0xff] }
  0x18   : > { %v2452_v30 = vmax.f32 %v2158_v12, %v5997_v20  ;;  %v2453_v31 = vmax.f32 %v2159_v13, %v5998_v21  ;;  %v2454_v32 = vmax.f32 %v2160_v14, %v5999_v22  ;;  %v6463_v38 = vsel %vm290_vm0, %v11367_v7, %v11366_v5  ;;  %v6491_v12 = vld [vmem:[%s6420_s23 + $0x70] sm:$0xff]  ;;  %v6494_v13 = vld [vmem:[%s6420_s23 + $0x78] sm:$0xff] }
  0x19   : > { %v2576_v35 = vperm.slane %v2448_v25, 0  ;;  %v2577_v36 = vperm.slane %v2449_v26, 0  ;;  %v2578_v37 = vperm.slane %v2450_v27, 0  ;;  %11585 = vst [vmem:[#allocation4_spill] sm:$0xff] %v6463_v38  ;;  %v2579_v39 = vperm.slane %v2451_v23, 0 }
  0x1a   : > { %v2580_v40 = vperm.slane %v2452_v30, 0  ;;  %v2581_v42 = vperm.slane %v2453_v31, 0  ;;  %v2582_v43 = vperm.slane %v2454_v32, 0  ;;  %v6468_v45 = vmax.f32 %v226_v33, %v228_v34  ;;  %v6505_v32 = vld [vmem:[%s6420_s23 + $0x20] sm:$0xff]  ;;  %v6508_v33 = vld [vmem:[%s6420_s23 + $0x28] sm:$0xff] }
  0x1b   : > { %v2644_v44 = vsel %vm2623_vm1, %v2576_v35, %v2575_v28  ;;  %v2143_v47 = vrot.slane %v6465_v41, 2  ;;  %v2144_v48 = vrot.slane %v6465_v41, 4  ;;  %v2145_v49 = vrot.slane %v6465_v41, 6  ;;  %11586 = vst [vmem:[#allocation5_spill] sm:$0xff] %v6505_v32 }
  0x1c   : > { %v2645_v46 = vsel %vm2625_vm2, %v2577_v36, %v2644_v44  ;;  %v2146_v51 = vrot.slane %v6468_v45, 2  ;;  %v2147_v52 = vrot.slane %v6468_v45, 4  ;;  %v2148_v53 = vrot.slane %v6468_v45, 6  ;;  %11587 = vst [vmem:[#allocation6_spill] sm:$0xff] %v6508_v33 }
  0x1d   : > { %v2646_v50 = vsel %vm2627_vm3, %v2578_v37, %v2645_v46  ;;  %v5976_v55 = vrot.slane %v6465_v41, 9  ;;  %v5977_v56 = vrot.slane %v2143_v47, 9  ;;  %v5978_v57 = vrot.slane %v2144_v48, 9 }
  0x1e   : > { %v2647_v54 = vsel %vm2629_vm4, %v2579_v39, %v2646_v50  ;;  %v5979_v59 = vrot.slane %v2145_v49, 9  ;;  %v5980_v60 = vrot.slane %v6468_v45, 9  ;;  %v5981_v61 = vrot.slane %v2146_v51, 9 }
  0x1f   : > { %v2648_v58 = vsel %vm2631_vm5, %v2580_v40, %v2647_v54  ;;  %v5982_v63 = vrot.slane %v2147_v52, 9  ;;  %v5983_v8 = vrot.slane %v2148_v53, 9  ;;  %v2431_v9 = vmax.f32 %v6465_v41, %v5976_v55 }
  0x20   : > { %v2649_v62 = vsel %vm2633_vm6, %v2581_v42, %v2648_v58  ;;  %v2432_v15 = vmax.f32 %v2143_v47, %v5977_v56  ;;  %v2433_v16 = vmax.f32 %v2144_v48, %v5978_v57  ;;  %v2434_v17 = vmax.f32 %v2145_v49, %v5979_v59 }
  0x21   : > { %v2650_v14 = vsel %vm2635_vm7, %v2582_v43, %v2649_v62  ;;  %v2435_v18 = vmax.f32 %v6468_v45, %v5980_v60  ;;  %v2436_v19 = vmax.f32 %v2146_v51, %v5981_v61  ;;  %v2437_v20 = vmax.f32 %v2147_v52, %v5982_v63  ;;  %v6519_v61 = vld [vmem:[%s6420_s23 + $0x30] sm:$0xff] }
  0x22   : > { %2690 = vrot.lane.b32.xlu1 %v2650_v14, %s6367_s24  ;;  %v2438_v21 = vmax.f32 %v2148_v53, %v5983_v8  ;;  %v2559_v22 = vperm.slane %v2431_v9, 0  ;;  %v2560_v23 = vperm.slane %v2432_v15, 0  ;;  %v2561_v24 = vperm.slane %v2433_v16, 0 }
  0x23   : > { %v2562_v25 = vperm.slane %v2434_v17, 0  ;;  %v2563_v26 = vperm.slane %v2435_v18, 0  ;;  %v2564_v27 = vperm.slane %v2436_v19, 0  ;;  %v2565_v28 = vperm.slane %v2437_v20, 0  ;;  %v6523_v18 = vld [vmem:[%s6420_s23 + $0x38] sm:$0xff] }
  0x24   : > { %v2624_v29 = vsel %vm2623_vm1, %v2560_v23, %v2559_v22  ;;  %v2117_v30 = vmax.f32 %v6485_v10, %v6491_v12  ;;  %v2118_v31 = vmax.f32 %v6488_v11, %v6494_v13  ;;  %v2566_v34 = vperm.slane %v2438_v21, 0  ;;  %11588 = vst [vmem:[#allocation7_spill] sm:$0xff] %v6523_v18 }
  0x25   : > { %v2626_v35 = vsel %vm2625_vm2, %v2561_v24, %v2624_v29  ;;  %v11368_v36 = vrot.slane %v6505_v32, 7  ;;  %v11365_v37 = vrot.slane %v6508_v33, 7  ;;  %v11369_v22 = vrot.slane %v6519_v61, 7 }
  0x26   : > { %v2628_v39 = vsel %vm2627_vm3, %v2562_v25, %v2626_v35  ;;  %v2161_v40 = vrot.slane %v2117_v30, 2  ;;  %v2162_v42 = vrot.slane %v2117_v30, 4  ;;  %v2163_v43 = vrot.slane %v2117_v30, 6 }
  0x27   : > { %v2630_v44 = vsel %vm2629_vm4, %v2563_v26, %v2628_v39  ;;  %v2164_v46 = vrot.slane %v2118_v31, 2  ;;  %v2165_v47 = vrot.slane %v2118_v31, 4  ;;  %v2166_v48 = vrot.slane %v2118_v31, 6 }
  0x28   : > { %v2632_v49 = vsel %vm2631_vm5, %v2564_v27, %v2630_v44  ;;  %v6000_v50 = vrot.slane %v2117_v30, 9  ;;  %v6001_v51 = vrot.slane %v2161_v40, 9  ;;  %v6002_v52 = vrot.slane %v2162_v42, 9 }
  0x29   : > { %v2634_v53 = vsel %vm2633_vm6, %v2565_v28, %v2632_v49  ;;  %v6003_v54 = vrot.slane %v2163_v43, 9  ;;  %v6004_v55 = vrot.slane %v2118_v31, 9  ;;  %v6005_v56 = vrot.slane %v2164_v46, 9 }
  0x2a   : > { %v2636_v57 = vsel %vm2635_vm7, %v2566_v34, %v2634_v53  ;;  %v6006_v58 = vrot.slane %v2165_v47, 9  ;;  %v6007_v59 = vrot.slane %v2166_v48, 9  ;;  %v2455_v60 = vmax.f32 %v2117_v30, %v6000_v50 }
  0x2b   : > { %2686 = vrot.lane.b32.xlu0 %v2636_v57, %s6367_s24  ;;  %v2456_v62 = vmax.f32 %v2161_v40, %v6001_v51  ;;  %v2457_v63 = vmax.f32 %v2162_v42, %v6002_v52  ;;  %v2458_v8 = vmax.f32 %v2163_v43, %v6003_v54  ;;  %v2459_v9 = vmax.f32 %v2118_v31, %v6004_v55 }
  0x2c   : > { %v2460_v14 = vmax.f32 %v2164_v46, %v6005_v56  ;;  %v2461_v15 = vmax.f32 %v2165_v47, %v6006_v58  ;;  %v2462_v16 = vmax.f32 %v2166_v48, %v6007_v59  ;;  %v2583_v17 = vperm.slane %v2455_v60, 0 }
  0x2d   : > { %v2584_v19 = vperm.slane %v2456_v62, 0  ;;  %v2585_v20 = vperm.slane %v2457_v63, 0  ;;  %v2586_v21 = vperm.slane %v2458_v8, 0  ;;  %v2587_v23 = vperm.slane %v2459_v9, 0 }
  0x2e   : > { %v2588_v24 = vperm.slane %v2460_v14, 0  ;;  %v2589_v25 = vperm.slane %v2461_v15, 0  ;;  %v6531_v26 = vsel %vm290_vm0, %v11368_v36, %v11365_v37  ;;  %v2590_v27 = vperm.slane %v2462_v16, 0 }
  0x2f   : > { %11589 = vst [vmem:[#allocation8_spill] sm:$0xff] %v6531_v26  ;;  %v2651_v28 = vsel %vm2623_vm1, %v2584_v19, %v2583_v17  ;;  %v11364_v29 = vrot.slane %v6523_v18, 7  ;;  %v2113_v30 = vmax.f32 %v6505_v32, %v6519_v61  ;;  %v2114_v34 = vmax.f32 %v6508_v33, %v6523_v18  ;;  %v6558_v17 = vld [vmem:[%s6420_s23 + $0xe0] sm:$0xff]  ;;  %v6561_v19 = vld [vmem:[%s6420_s23 + $0xf0] sm:$0xff] }
  0x30   : > { %v2652_v31 = vsel %vm2625_vm2, %v2585_v20, %v2651_v28  ;;  %v3370_v35 = vmax.f32 %v6465_v41, %v6505_v32  ;;  %v3371_v39 = vmax.f32 %v6468_v45, %v6508_v33  ;;  %v6564_v20 = vld [vmem:[%s6420_s23 + $0xc0] sm:$0xff]  ;;  %v6570_v28 = vld [vmem:[%s6420_s23 + $0xf8] sm:$0xff] }
  0x31   : > { %v2653_v40 = vsel %vm2627_vm3, %v2586_v21, %v2652_v31  ;;  %v6550_v42 = vsel %vm290_vm0, %v11369_v22, %v11364_v29  ;;  %v2149_v43 = vrot.slane %v2113_v30, 2  ;;  %v2150_v44 = vrot.slane %v2113_v30, 4  ;;  %v6573_v31 = vld [vmem:[%s6420_s23 + $0xc8] sm:$0xff] }
  0x32   : > { %11590 = vst [vmem:[#allocation9_spill] sm:$0xff] %v6550_v42  ;;  %v2654_v46 = vsel %vm2629_vm4, %v2587_v23, %v2653_v40  ;;  %v2151_v47 = vrot.slane %v2113_v30, 6  ;;  %v2152_v48 = vrot.slane %v2114_v34, 2  ;;  %v2153_v49 = vrot.slane %v2114_v34, 4  ;;  %v6579_v40 = vld [vmem:[%s6420_s23 + $0xd8] sm:$0xff] }
  0x33   : > { %v2655_v41 = vsel %vm2631_vm5, %v2588_v24, %v2654_v46  ;;  %v2154_v50 = vrot.slane %v2114_v34, 6  ;;  %v5984_v45 = vrot.slane %v2113_v30, 9  ;;  %v5985_v51 = vrot.slane %v2149_v43, 9 }
  0x34   : > { %v2656_v52 = vsel %vm2633_vm6, %v2589_v25, %v2655_v41  ;;  %v5986_v53 = vrot.slane %v2150_v44, 9  ;;  %v5987_v54 = vrot.slane %v2151_v47, 9  ;;  %v5988_v55 = vrot.slane %v2114_v34, 9 }
  0x35   : > { %v2657_v56 = vsel %vm2635_vm7, %v2590_v27, %v2656_v52  ;;  %v5989_v57 = vrot.slane %v2152_v48, 9  ;;  %v5990_v58 = vrot.slane %v2153_v49, 9  ;;  %v5991_v59 = vrot.slane %v2154_v50, 9  ;;  %v6567_v27 = vld [vmem:[%s6420_s23 + $0xe8] sm:$0xff] }
  0x36   : > { %2692 = vrot.lane.b32.xlu1 %v2657_v56, %s6367_s24  ;;  %v2439_v60 = vmax.f32 %v2113_v30, %v5984_v45  ;;  %v2440_v62 = vmax.f32 %v2149_v43, %v5985_v51  ;;  %v2441_v63 = vmax.f32 %v2150_v44, %v5986_v53  ;;  %v2442_v8 = vmax.f32 %v2151_v47, %v5987_v54 }
  0x37   : > { %v2443_v9 = vmax.f32 %v2114_v34, %v5988_v55  ;;  %v2444_v14 = vmax.f32 %v2152_v48, %v5989_v57  ;;  %v2445_v15 = vmax.f32 %v2153_v49, %v5990_v58  ;;  %v2446_v16 = vmax.f32 %v2154_v50, %v5991_v59  ;;  %v6576_v34 = vld [vmem:[%s6420_s23 + $0xd0] sm:$0xff] }
  0x38   : > { %v2567_v21 = vperm.slane %v2439_v60, 0  ;;  %v2568_v23 = vperm.slane %v2440_v62, 0  ;;  %v2569_v24 = vperm.slane %v2441_v63, 0  ;;  %v2570_v25 = vperm.slane %v2442_v8, 0 }
  0x39   : > { %v2571_v30 = vperm.slane %v2443_v9, 0  ;;  %v2572_v43 = vperm.slane %v2444_v14, 0  ;;  %v2573_v44 = vperm.slane %v2445_v15, 0  ;;  %v2574_v46 = vperm.slane %v2446_v16, 0 }
  0x3a   : > { %v2637_v47 = vsel %vm2623_vm1, %v2568_v23, %v2567_v21  ;;  %v6584_v49 = vmax.f32 %v3370_v35, %v6519_v61  ;;  %v2125_v41 = vmax.f32 %v6558_v17, %v6561_v19  ;;  %v2126_v50 = vmax.f32 %v6567_v27, %v6570_v28 }
  0x3b   : > { %v2638_v48 = vsel %vm2625_vm2, %v2569_v24, %v2637_v47  ;;  %v6592_v51 = vmax.f32 %v3371_v39, %v6523_v18  ;;  %v6596_v52 = vmax.f32 %v6564_v20, %v6576_v34  ;;  %v6600_v53 = vmax.f32 %v6573_v31, %v6579_v40 }
  0x3c   : > { %v2639_v45 = vsel %vm2627_vm3, %v2570_v25, %v2638_v48  ;;  %v2185_v54 = vrot.slane %v2125_v41, 2  ;;  %v2186_v55 = vrot.slane %v2125_v41, 4  ;;  %v2187_v56 = vrot.slane %v2125_v41, 6 }
  0x3d   : > { %v2640_v35 = vsel %vm2629_vm4, %v2571_v30, %v2639_v45  ;;  %v2188_v58 = vrot.slane %v2126_v50, 2  ;;  %v2189_v59 = vrot.slane %v2126_v50, 4  ;;  %v2190_v60 = vrot.slane %v2126_v50, 6 }
  0x3e   : > { %v2641_v57 = vsel %vm2631_vm5, %v2572_v43, %v2640_v35  ;;  %v6032_v62 = vrot.slane %v2125_v41, 9  ;;  %v6033_v63 = vrot.slane %v2185_v54, 9  ;;  %v6034_v8 = vrot.slane %v2186_v55, 9 }
  0x3f   : > { %v2642_v39 = vsel %vm2633_vm6, %v2573_v44, %v2641_v57  ;;  %v6035_v14 = vrot.slane %v2187_v56, 9  ;;  %v6036_v15 = vrot.slane %v2126_v50, 9  ;;  %v6037_v16 = vrot.slane %v2188_v58, 9 }
  0x40   : > { %v2643_v9 = vsel %vm2635_vm7, %v2574_v46, %v2642_v39  ;;  %v6038_v21 = vrot.slane %v2189_v59, 9  ;;  %v6039_v23 = vrot.slane %v2190_v60, 9  ;;  %v2487_v24 = vmax.f32 %v2125_v41, %v6032_v62 }
  0x41   : > { %2688 = vrot.lane.b32.xlu0 %v2643_v9, %s6367_s24  ;;  %v2488_v25 = vmax.f32 %v2185_v54, %v6033_v63  ;;  %v2489_v30 = vmax.f32 %v2186_v55, %v6034_v8  ;;  %v2490_v43 = vmax.f32 %v2187_v56, %v6035_v14  ;;  %v2491_v47 = vmax.f32 %v2126_v50, %v6036_v15 }
  0x42   : > { %v2492_v48 = vmax.f32 %v2188_v58, %v6037_v16  ;;  %v2493_v45 = vmax.f32 %v2189_v59, %v6038_v21  ;;  %v2494_v44 = vmax.f32 %v2190_v60, %v6039_v23  ;;  %v2615_v35 = vperm.slane %v2487_v24, 0 }
  0x43   : > { %v2616_v57 = vperm.slane %v2488_v25, 0  ;;  %v2617_v29 = vperm.slane %v2489_v30, 0  ;;  %v2618_v37 = vperm.slane %v2490_v43, 0  ;;  %v2619_v46 = vperm.slane %v2491_v47, 0 }
  0x44   : > { %v2620_v39 = vperm.slane %v2492_v48, 0  ;;  %v2621_v5 = vperm.slane %v2493_v45, 0  ;;  %v2622_v7 = vperm.slane %v2494_v44, 0  ;;  %v2179_v36 = vrot.slane %v6596_v52, 2  ;;  %v242_v45 = vld [vmem:[%s6420_s23 + $0x88] sm:$0xff] }
  0x45   : > { %v2679_v9 = vsel %vm2623_vm1, %v2616_v57, %v2615_v35  ;;  %v2180_v54 = vrot.slane %v6596_v52, 4  ;;  %v2181_v50 = vrot.slane %v6596_v52, 6  ;;  %v2182_v55 = vrot.slane %v6600_v53, 2 }
  0x46   : > { %v2680_v41 = vsel %vm2625_vm2, %v2617_v29, %v2679_v9  ;;  %v2183_v58 = vrot.slane %v6600_v53, 4  ;;  %v2184_v59 = vrot.slane %v6600_v53, 6  ;;  %v6024_v60 = vrot.slane %v6596_v52, 9  ;;  %v244_v9 = vld [vmem:[%s6420_s23 + $0x98] sm:$0xff] }
  0x47   : > { %v2681_v56 = vsel %vm2627_vm3, %v2618_v37, %v2680_v41  ;;  %v6025_v63 = vrot.slane %v2179_v36, 9  ;;  %v6026_v8 = vrot.slane %v2180_v54, 9  ;;  %v6027_v29 = vrot.slane %v2181_v50, 9 }
  0x48   : > { %v2682_v62 = vsel %vm2629_vm4, %v2619_v46, %v2681_v56  ;;  %v6028_v15 = vrot.slane %v6600_v53, 9  ;;  %v6029_v16 = vrot.slane %v2182_v55, 9  ;;  %v6030_v21 = vrot.slane %v2183_v58, 9  ;;  %v241_v46 = vld [vmem:[%s6420_s23 + $0x80] sm:$0xff] }
  0x49   : > { %v2683_v14 = vsel %vm2631_vm5, %v2620_v39, %v2682_v62  ;;  %v6031_v23 = vrot.slane %v2184_v59, 9  ;;  %v2479_v24 = vmax.f32 %v6596_v52, %v6024_v60  ;;  %v2480_v25 = vmax.f32 %v2179_v36, %v6025_v63  ;;  %v243_v39 = vld [vmem:[%s6420_s23 + $0x90] sm:$0xff]  ;;  %v6632_v62 = vld [vmem:[%s6420_s23 + $0xa0] sm:$0xff] }
  0x4a   : > { %v2684_v37 = vsel %vm2633_vm6, %v2621_v5, %v2683_v14  ;;  %v2481_v43 = vmax.f32 %v2180_v54, %v6026_v8  ;;  %v2482_v47 = vmax.f32 %v2181_v50, %v6027_v29  ;;  %v2483_v48 = vmax.f32 %v6600_v53, %v6028_v15  ;;  %11591 = vst [vmem:[#allocation10_spill] sm:$0xff] %v6632_v62  ;;  %v6644_v14 = vld [vmem:[%s6420_s23 + $0xb0] sm:$0xff]  ;;  %v6647_v15 = vld [vmem:[%s6420_s23 + $0xb8] sm:$0xff] }
  0x4b   : > { %v2685_v30 = vsel %vm2635_vm7, %v2622_v7, %v2684_v37  ;;  %v2484_v44 = vmax.f32 %v2182_v55, %v6029_v16  ;;  %v2485_v35 = vmax.f32 %v2183_v58, %v6030_v21  ;;  %v2486_v57 = vmax.f32 %v2184_v59, %v6031_v23  ;;  %v6635_v55 = vld [vmem:[%s6420_s23 + $0xa8] sm:$0xff]  ;;  %11592 = vst [vmem:[#allocation11_spill] sm:$0xff] %v6644_v14 }
  0x4c   : > { %2700 = vrot.lane.b32.xlu1 %v2685_v30, %s6367_s24  ;;  %v2607_v5 = vperm.slane %v2479_v24, 0  ;;  %v3873_v7 = vmax.f32 %v6592_v51, %v6426_v1  ;;  %v2608_v36 = vperm.slane %v2480_v25, 0  ;;  %v2609_v41 = vperm.slane %v2481_v43, 0 }
  0x4d   : > { %v2610_v54 = vperm.slane %v2482_v47, 0  ;;  %v2611_v50 = vperm.slane %v2483_v48, 0  ;;  %v2612_v56 = vperm.slane %v2484_v44, 0  ;;  %v2613_v60 = vperm.slane %v2485_v35, 0 }
  0x4e   : > { %v2614_v58 = vperm.slane %v2486_v57, 0  ;;  %v2672_v59 = vsel %vm2623_vm1, %v2608_v36, %v2607_v5  ;;  %v6638_v63 = vmax.f32 %v241_v46, %v243_v39  ;;  %v6640_v8 = vmax.f32 %v242_v45, %v244_v9 }
  0x4f   : > { %v2673_v29 = vsel %vm2625_vm2, %v2609_v41, %v2672_v59  ;;  %v3372_v16 = vmax.f32 %v6436_v4, %v6485_v10  ;;  %v3373_v21 = vmax.f32 %v6441_v6, %v6488_v11  ;;  %v3872_v37 = vmax.f32 %v6584_v49, %v6423_v0 }
  0x50   : > { %v2674_v23 = vsel %vm2627_vm3, %v2610_v54, %v2673_v29  ;;  %v3374_v24 = vmax.f32 %v6638_v63, %v6632_v62  ;;  %v3375_v25 = vmax.f32 %v6640_v8, %v6635_v55  ;;  %v6661_v30 = vmax.f32 %v3873_v7, %v6432_v3 }
  0x51   : > { %v2675_v43 = vsel %vm2629_vm4, %v2611_v50, %v2674_v23  ;;  %v6665_v4 = vmax.f32 %v3372_v16, %v6491_v12  ;;  %v6668_v6 = vmax.f32 %v3373_v21, %v6494_v13  ;;  %v6671_v47 = vmax.f32 %v3872_v37, %v6429_v2 }
  0x52   : > { %v2676_v48 = vsel %vm2631_vm5, %v2612_v56, %v2675_v43  ;;  %v6675_v45 = vmax.f32 %v3374_v24, %v6644_v14  ;;  %v6678_v44 = vmax.f32 %v3375_v25, %v6647_v15 }
  0x53   : > { %v2677_v35 = vsel %vm2633_vm6, %v2613_v60, %v2676_v48  ;;  %v3396_v57 = vrot.slane %v6665_v4, 4  ;;  %v3397_v5 = vrot.slane %v6668_v6, 4  ;;  %v6044_v2 = vrot.slane %v6665_v4, 9 }
  0x54   : > { %v2678_v46 = vsel %vm2635_vm7, %v2614_v58, %v2677_v35  ;;  %v3398_v39 = vrot.slane %v6675_v45, 4  ;;  %v3399_v9 = vrot.slane %v6678_v44, 4  ;;  %v6048_v7 = vrot.slane %v6675_v45, 9 }
  0x55   : > { %2698 = vrot.lane.b32.xlu0 %v2678_v46, %s6367_s24  ;;  %v6050_v36 = vrot.slane %v6678_v44, 9  ;;  %v6064_v41 = vrot.slane %v6675_v45, 10  ;;  %v6066_v54 = vrot.slane %v6678_v44, 10  ;;  %v6080_v50 = vrot.slane %v6675_v45, 11 }
  0x56   : > { %v6049_v56 = vrot.slane %v3398_v39, 9  ;;  %v6051_v60 = vrot.slane %v3399_v9, 9  ;;  %v3466_v58 = vmax.f32 %v6675_v45, %v6048_v7  ;;  %v6065_v59 = vrot.slane %v3398_v39, 10 }
  0x57   : > { %v3468_v29 = vmax.f32 %v6678_v44, %v6050_v36  ;;  %v6067_v16 = vrot.slane %v3399_v9, 10  ;;  %v6081_v21 = vrot.slane %v3398_v39, 11  ;;  %v6082_v37 = vrot.slane %v6678_v44, 11 }
  0x58   : > { %v3467_v23 = vmax.f32 %v3398_v39, %v6049_v56  ;;  %v3469_v24 = vmax.f32 %v3399_v9, %v6051_v60  ;;  %v3530_v25 = vmax.f32 %v3466_v58, %v6064_v41  ;;  %v6083_v43 = vrot.slane %v3399_v9, 11 }
  0x59   : > { %v3532_v48 = vmax.f32 %v3468_v29, %v6066_v54  ;;  %v6045_v35 = vrot.slane %v3396_v57, 9  ;;  %v6046_v46 = vrot.slane %v6668_v6, 9  ;;  %v6047_v22 = vrot.slane %v3397_v5, 9 }
  0x5a   : > { %v3531_v3 = vmax.f32 %v3467_v23, %v6065_v59  ;;  %v3533_v18 = vmax.f32 %v3469_v24, %v6067_v16  ;;  %v3594_v33 = vmax.f32 %v3530_v25, %v6080_v50  ;;  %v3462_v7 = vmax.f32 %v6665_v4, %v6044_v2 }
  0x5b   : > { %v3596_v1 = vmax.f32 %v3532_v48, %v6082_v37  ;;  %v3463_v36 = vmax.f32 %v3396_v57, %v6045_v35  ;;  %v3464_v38 = vmax.f32 %v6668_v6, %v6046_v46  ;;  %v3465_v42 = vmax.f32 %v3397_v5, %v6047_v22 }
  0x5c   : > { %v3595_v0 = vmax.f32 %v3531_v3, %v6081_v21  ;;  %v3597_v39 = vmax.f32 %v3533_v18, %v6083_v43  ;;  %v3626_v56 = vperm.slane %v3594_v33, 0  ;;  %v6060_v9 = vrot.slane %v6665_v4, 10 }
  0x5d   : > { %v3628_v41 = vperm.slane %v3596_v1, 0  ;;  %v6061_v54 = vrot.slane %v3396_v57, 10  ;;  %v6062_v60 = vrot.slane %v6668_v6, 10  ;;  %v6063_v58 = vrot.slane %v3397_v5, 10 }
  0x5e   : > { %v3627_v59 = vperm.slane %v3595_v0, 0  ;;  %v3629_v29 = vperm.slane %v3597_v39, 0  ;;  %v3526_v50 = vmax.f32 %v3462_v7, %v6060_v9  ;;  %v6076_v2 = vrot.slane %v6665_v4, 11 }
  0x5f   : > { %v3527_v16 = vmax.f32 %v3463_v36, %v6061_v54  ;;  %v3528_v37 = vmax.f32 %v3464_v38, %v6062_v60  ;;  %v3529_v23 = vmax.f32 %v3465_v42, %v6063_v58  ;;  %v6077_v24 = vrot.slane %v3396_v57, 11 }
  0x60   : > { %v3640_v22 = vsel %vm2623_vm1, %v3627_v59, %v3626_v56  ;;  %v6078_v33 = vrot.slane %v6668_v6, 11  ;;  %v6079_v18 = vrot.slane %v3397_v5, 11  ;;  %v3590_v3 = vmax.f32 %v3526_v50, %v6076_v2 }
  0x61   : > { %v3641_v1 = vsel %vm2625_vm2, %v3628_v41, %v3640_v22  ;;  %v3591_v21 = vmax.f32 %v3527_v16, %v6077_v24  ;;  %v3874_v0 = vmax.f32 %v6675_v45, %v6564_v20  ;;  %v3875_v25 = vmax.f32 %v6678_v44, %v6573_v31 }
  0x62   : > { %v3642_v4 = vsel %vm2627_vm3, %v3629_v29, %v3641_v1  ;;  %v3592_v38 = vmax.f32 %v3528_v37, %v6078_v33  ;;  %v3593_v42 = vmax.f32 %v3529_v23, %v6079_v18  ;;  %v3622_v57 = vperm.slane %v3590_v3, 0 }
  0x63   : > { %3650 = vrot.lane.b32.xlu1 %v3642_v4, %s6368_s25  ;;  %v3623_v6 = vperm.slane %v3591_v21, 0  ;;  %v3878_v5 = vmax.f32 %v3874_v0, %v6576_v34  ;;  %v3879_v43 = vmax.f32 %v3875_v25, %v6579_v40  ;;  %v3880_v48 = vmax.f32 %v6671_v47, %v6485_v10 }
  0x64   : > { %v3624_v20 = vperm.slane %v3592_v38, 0  ;;  %v3625_v45 = vperm.slane %v3593_v42, 0  ;;  %v11593_v31 = vmax.f32 %v6661_v30, %v6488_v11  ;;  %v2167_v35 = vrot.slane %v6638_v63, 2 }
  0x65   : > { %v3637_v46 = vsel %vm2623_vm1, %v3623_v6, %v3622_v57  ;;  %v3882_v7 = vmax.f32 %v3878_v5, %v6558_v17  ;;  %v3883_v34 = vmax.f32 %v3879_v43, %v6567_v27  ;;  %v6728_v40 = vmax.f32 %v3880_v48, %v6491_v12 }
  0x66   : > { %v6721_v44 = vmax.f32 %v11593_v31, %v6494_v13  ;;  %v3638_v10 = vsel %vm2625_vm2, %v3624_v20, %v3637_v46 }
  0x67   : > { %v3639_v13 = vsel %vm2627_vm3, %v3625_v45, %v3638_v10  ;;  %v6736_v30 = vmax.f32 %v3882_v7, %v6561_v19  ;;  %v6739_v39 = vmax.f32 %v3883_v34, %v6570_v28  ;;  %v3892_v56 = vrot.slane %v6728_v40, 1 }
  0x68   : > { %v3893_v47 = vrot.slane %v6721_v44, 1  ;;  %v3905_v36 = vrot.slane %v6721_v44, 2  ;;  %v3917_v11 = vrot.slane %v6721_v44, 3  ;;  %3648 = vrot.lane.b32.xlu0 %v3639_v13, %s6368_s25  ;;  %v3904_v9 = vrot.slane %v6728_v40, 2 }
  0x69   : > { %v3916_v41 = vrot.slane %v6728_v40, 3  ;;  %v3928_v54 = vrot.slane %v6728_v40, 4  ;;  %v3894_v60 = vrot.slane %v6736_v30, 1  ;;  %v3895_v58 = vrot.slane %v6739_v39, 1 }
  0x6a   : > { %v3901_v12 = vmax.f32 %v6721_v44, %v3893_v47  ;;  %v3906_v59 = vrot.slane %v6736_v30, 2  ;;  %v3907_v29 = vrot.slane %v6739_v39, 2  ;;  %v3918_v50 = vrot.slane %v6736_v30, 3 }
  0x6b   : > { %v3919_v2 = vrot.slane %v6739_v39, 3  ;;  %v3930_v16 = vrot.slane %v6736_v30, 4  ;;  %v3931_v37 = vrot.slane %v6739_v39, 4  ;;  %v3902_v23 = vmax.f32 %v6736_v30, %v3894_v60 }
  0x6c   : > { %v3903_v24 = vmax.f32 %v6739_v39, %v3895_v58  ;;  %v3942_v22 = vrot.slane %v6736_v30, 5  ;;  %v3943_v33 = vrot.slane %v6739_v39, 5  ;;  %v3954_v18 = vrot.slane %v6736_v30, 6 }
  0x6d   : > { %v3955_v3 = vrot.slane %v6739_v39, 6  ;;  %v3966_v1 = vrot.slane %v6736_v30, 7  ;;  %v3967_v21 = vrot.slane %v6739_v39, 7  ;;  %v3914_v0 = vmax.f32 %v3902_v23, %v3906_v59 }
  0x6e   : > { %v3915_v25 = vmax.f32 %v3903_v24, %v3907_v29  ;;  %v3900_v4 = vmax.f32 %v6728_v40, %v3892_v56  ;;  %v3913_v38 = vmax.f32 %v3901_v12, %v3905_v36  ;;  %v3929_v42 = vrot.slane %v6721_v44, 4 }
  0x6f   : > { %v3940_v57 = vrot.slane %v6728_v40, 5  ;;  %v3941_v6 = vrot.slane %v6721_v44, 5  ;;  %v3952_v5 = vrot.slane %v6728_v40, 6  ;;  %v3926_v43 = vmax.f32 %v3914_v0, %v3918_v50 }
  0x70   : > { %v3927_v48 = vmax.f32 %v3915_v25, %v3919_v2  ;;  %v3912_v20 = vmax.f32 %v3900_v4, %v3904_v9  ;;  %v3925_v45 = vmax.f32 %v3913_v38, %v3917_v11  ;;  %v3953_v31 = vrot.slane %v6721_v44, 6 }
  0x71   : > { %v3964_v46 = vrot.slane %v6728_v40, 7  ;;  %v3965_v7 = vrot.slane %v6721_v44, 7  ;;  %v2168_v34 = vrot.slane %v6638_v63, 4  ;;  %v3938_v10 = vmax.f32 %v3926_v43, %v3930_v16 }
  0x72   : > { %v3939_v47 = vmax.f32 %v3927_v48, %v3931_v37  ;;  %v3924_v36 = vmax.f32 %v3912_v20, %v3916_v41  ;;  %v3937_v13 = vmax.f32 %v3925_v45, %v3929_v42  ;;  %v2169_v30 = vrot.slane %v6638_v63, 6 }
  0x73   : > { %v2170_v39 = vrot.slane %v6640_v8, 2  ;;  %v2171_v56 = vrot.slane %v6640_v8, 4  ;;  %v2172_v11 = vrot.slane %v6640_v8, 6  ;;  %v3950_v12 = vmax.f32 %v3938_v10, %v3942_v22 }
  0x74   : > { %v3951_v9 = vmax.f32 %v3939_v47, %v3943_v33  ;;  %v3936_v60 = vmax.f32 %v3924_v36, %v3928_v54  ;;  %v3949_v40 = vmax.f32 %v3937_v13, %v3941_v6  ;;  %v6008_v44 = vrot.slane %v6638_v63, 9 }
  0x75   : > { %v6009_v58 = vrot.slane %v2167_v35, 9  ;;  %v6010_v59 = vrot.slane %v2168_v34, 9  ;;  %v6011_v41 = vrot.slane %v2169_v30, 9  ;;  %v3962_v29 = vmax.f32 %v3950_v12, %v3954_v18 }
  0x76   : > { %v3963_v50 = vmax.f32 %v3951_v9, %v3955_v3  ;;  %v3948_v2 = vmax.f32 %v3936_v60, %v3940_v57  ;;  %v3961_v16 = vmax.f32 %v3949_v40, %v3953_v31  ;;  %v6012_v37 = vrot.slane %v6640_v8, 9 }
  0x77   : > { %v6013_v23 = vrot.slane %v2170_v39, 9  ;;  %v6014_v24 = vrot.slane %v2171_v56, 9  ;;  %v6015_v0 = vrot.slane %v2172_v11, 9  ;;  %v3974_v22 = vmax.f32 %v3962_v29, %v3966_v1 }
  0x78   : > { %v3975_v33 = vmax.f32 %v3963_v50, %v3967_v21  ;;  %v3960_v54 = vmax.f32 %v3948_v2, %v3952_v5  ;;  %v3973_v25 = vmax.f32 %v3961_v16, %v3965_v7  ;;  %v2463_v4 = vmax.f32 %v6638_v63, %v6008_v44 }
  0x79   : > { %v2464_v38 = vmax.f32 %v2167_v35, %v6009_v58  ;;  %v2465_v42 = vmax.f32 %v2168_v34, %v6010_v59  ;;  %v2466_v6 = vmax.f32 %v2169_v30, %v6011_v41  ;;  %v2467_v43 = vmax.f32 %v6640_v8, %v6012_v37 }
  0x7a   : > { %v3982_v18 = vrot.slane %v3975_v33, 7  ;;  %v3972_v3 = vmax.f32 %v3960_v54, %v3964_v46  ;;  %v3980_v57 = vrot.slane %v3973_v25, 7  ;;  %v2468_v48 = vmax.f32 %v2170_v39, %v6013_v23 }
  0x7b   : > { %v2469_v20 = vmax.f32 %v2171_v56, %v6014_v24  ;;  %v2470_v45 = vmax.f32 %v2172_v11, %v6015_v0  ;;  %v2591_v31 = vperm.slane %v2463_v4, 0  ;;  %v2592_v5 = vperm.slane %v2464_v38, 0 }
  0x7c   : > { %v3983_v1 = vsel %vm2623_vm1, %v3982_v18, %v3974_v22  ;;  %v3981_v21 = vsel %vm2623_vm1, %v3980_v57, %v3972_v3  ;;  %v2593_v7 = vperm.slane %v2465_v42, 0  ;;  %v2594_v63 = vperm.slane %v2466_v6, 0 }
  0x7d   : > { %3986 = vrot.lane.b32.xlu1 %v3983_v1, %s6369_s26  ;;  %3984 = vrot.lane.b32.xlu0 %v3981_v21, %s6369_s26  ;;  %v2595_v35 = vperm.slane %v2467_v43, 0  ;;  %v2596_v34 = vperm.slane %v2468_v48, 0  ;;  %v2597_v46 = vperm.slane %v2469_v20, 0  ;;  %v2598_v10 = vperm.slane %v2470_v45, 0  ;;  %s6371_s26 = smov 2  }
  0x7e   : > { %v2658_v8 = vsel %vm2623_vm1, %v2592_v5, %v2591_v31  ;;  %v2121_v47 = vmax.f32 %v6632_v62, %v6644_v14  ;;  %v2122_v36 = vmax.f32 %v6635_v55, %v6647_v15  ;;  %v6793_v30 = vrot.slane %v6584_v49, 4 }
  0x7f   : > { %v2659_v13 = vsel %vm2625_vm2, %v2593_v7, %v2658_v8  ;;  %v6796_v39 = vrot.slane %v6592_v51, 4  ;;  %v6040_v56 = vrot.slane %v6584_v49, 9  ;;  %v6042_v5 = vrot.slane %v6592_v51, 9 }
  0x80   : > { %v2660_v11 = vsel %vm2627_vm3, %v2594_v63, %v2659_v13  ;;  %v2173_v12 = vrot.slane %v2121_v47, 2  ;;  %v2174_v9 = vrot.slane %v2121_v47, 4  ;;  %v2175_v60 = vrot.slane %v2121_v47, 6 }
  0x81   : > { %v2661_v40 = vsel %vm2629_vm4, %v2595_v35, %v2660_v11  ;;  %v2176_v44 = vrot.slane %v2122_v36, 2  ;;  %v2177_v58 = vrot.slane %v2122_v36, 4  ;;  %v2178_v55 = vrot.slane %v2122_v36, 6 }
  0x82   : > { %v2662_v15 = vsel %vm2631_vm5, %v2596_v34, %v2661_v40  ;;  %v6016_v59 = vrot.slane %v2121_v47, 9  ;;  %v6017_v41 = vrot.slane %v2173_v12, 9  ;;  %v6018_v29 = vrot.slane %v2174_v9, 9 }
  0x83   : > { %v2663_v50 = vsel %vm2633_vm6, %v2597_v46, %v2662_v15  ;;  %v6019_v2 = vrot.slane %v2175_v60, 9  ;;  %v6020_v16 = vrot.slane %v2122_v36, 9  ;;  %v6021_v37 = vrot.slane %v2176_v44, 9 }
  0x84   : > { %v2664_v23 = vsel %vm2635_vm7, %v2598_v10, %v2663_v50  ;;  %v6022_v24 = vrot.slane %v2177_v58, 9  ;;  %v6023_v0 = vrot.slane %v2178_v55, 9  ;;  %v2471_v22 = vmax.f32 %v2121_v47, %v6016_v59 }
  0x85   : > { %2694 = vrot.lane.b32.xlu2 %v2664_v23, %s6367_s24  ;;  %v2472_v33 = vmax.f32 %v2173_v12, %v6017_v41  ;;  %v2473_v54 = vmax.f32 %v2174_v9, %v6018_v29  ;;  %v2474_v25 = vmax.f32 %v2175_v60, %v6019_v2  ;;  %v2475_v4 = vmax.f32 %v2122_v36, %v6020_v16 }
  0x86   : > { %v2476_v38 = vmax.f32 %v2176_v44, %v6021_v37  ;;  %v2477_v42 = vmax.f32 %v2177_v58, %v6022_v24  ;;  %v2478_v6 = vmax.f32 %v2178_v55, %v6023_v0  ;;  %v2599_v18 = vperm.slane %v2471_v22, 0 }
  0x87   : > { %v2600_v3 = vperm.slane %v2472_v33, 0  ;;  %v2601_v57 = vperm.slane %v2473_v54, 0  ;;  %v2602_v43 = vperm.slane %v2474_v25, 0  ;;  %v2603_v48 = vperm.slane %v2475_v4, 0 }
  0x88   : > { %v2604_v20 = vperm.slane %v2476_v38, 0  ;;  %v2605_v45 = vperm.slane %v2477_v42, 0  ;;  %v2606_v31 = vperm.slane %v2478_v6, 0  ;;  %v6041_v1 = vrot.slane %v6793_v30, 9 }
  0x89   : > { %v2665_v21 = vsel %vm2623_vm1, %v2600_v3, %v2599_v18  ;;  %v6043_v7 = vrot.slane %v6796_v39, 9  ;;  %v3458_v63 = vmax.f32 %v6584_v49, %v6040_v56  ;;  %v6056_v46 = vrot.slane %v6584_v49, 10 }
  0x8a   : > { %v2666_v35 = vsel %vm2625_vm2, %v2601_v57, %v2665_v21  ;;  %v3459_v34 = vmax.f32 %v6793_v30, %v6041_v1  ;;  %v6057_v10 = vrot.slane %v6793_v30, 10  ;;  %v3460_v47 = vmax.f32 %v6592_v51, %v6042_v5 }
  0x8b   : > { %v2667_v8 = vsel %vm2627_vm3, %v2602_v43, %v2666_v35  ;;  %v3461_v36 = vmax.f32 %v6796_v39, %v6043_v7  ;;  %v6058_v13 = vrot.slane %v6592_v51, 10  ;;  %v6059_v56 = vrot.slane %v6796_v39, 10 }
  0x8c   : > { %v2668_v11 = vsel %vm2629_vm4, %v2603_v48, %v2667_v8  ;;  %v3522_v12 = vmax.f32 %v3458_v63, %v6056_v46  ;;  %v3523_v9 = vmax.f32 %v3459_v34, %v6057_v10  ;;  %v6072_v44 = vrot.slane %v6584_v49, 11 }
  0x8d   : > { %v2669_v60 = vsel %vm2631_vm5, %v2604_v20, %v2668_v11  ;;  %v3524_v40 = vmax.f32 %v3460_v47, %v6058_v13  ;;  %v6073_v58 = vrot.slane %v6793_v30, 11  ;;  %v3525_v15 = vmax.f32 %v3461_v36, %v6059_v56 }
  0x8e   : > { %v2670_v55 = vsel %vm2633_vm6, %v2605_v45, %v2669_v60  ;;  %v6074_v59 = vrot.slane %v6592_v51, 11  ;;  %v6075_v41 = vrot.slane %v6796_v39, 11  ;;  %v3586_v50 = vmax.f32 %v3522_v12, %v6072_v44 }
  0x8f   : > { %v2671_v29 = vsel %vm2635_vm7, %v2606_v31, %v2670_v55  ;;  %v3587_v2 = vmax.f32 %v3523_v9, %v6073_v58  ;;  %v3376_v16 = vmax.f32 %v6596_v52, %v6558_v17  ;;  %v3377_v30 = vmax.f32 %v6600_v53, %v6567_v27  ;;  %v6851_v58 = vld [vmem:[%s11359_s1 + $0x9] ss:$0 sm:$0xff]  ;;  %v6856_v55 = vld [vmem:[%s11359_s1 + $0xa] ss:$0 sm:$0xff] }
  0x90   : > { %2696 = vrot.lane.b32.xlu2 %v2671_v29, %s6367_s24  ;;  %v3588_v37 = vmax.f32 %v3524_v40, %v6074_v59  ;;  %v3589_v49 = vmax.f32 %v3525_v15, %v6075_v41  ;;  %v3618_v23 = vperm.slane %v3586_v50, 0  ;;  %v6370_v9 = vmov 0.0   ;;  %v6861_v15 = vld [vmem:[%s11359_s1 + $0xc] ss:$0 sm:$0xff]  ;;  %v6866_v59 = vld [vmem:[%s11359_s1 + $0xd] ss:$0 sm:$0xff] }
  0x91   : > { %v3619_v24 = vperm.slane %v3587_v2, 0  ;;  %v3384_v51 = vmax.f32 %v3376_v16, %v6561_v19  ;;  %v3385_v22 = vmax.f32 %v3377_v30, %v6570_v28  ;;  %v6842_v60 = vrot.slane %v6370_v9, 7 }
  0x92   : > { %v3620_v0 = vperm.slane %v3588_v37, 0  ;;  %v3621_v39 = vperm.slane %v3589_v49, 0 }
  0x93   : > { %v3634_v33 = vsel %vm2623_vm1, %v3619_v24, %v3618_v23  ;;  %v3400_v54 = vrot.slane %v3384_v51, 4  ;;  %v6052_v25 = vrot.slane %v3384_v51, 9  ;;  %v6068_v17 = vrot.slane %v3384_v51, 10  ;;  %11594 = vst [vmem:[#allocation12_spill] sm:$0xff] %v6842_v60  ;;  %v6885_v23 = vld [vmem:[%s11359_s1 + $0xf] ss:$0 sm:$0xff] }
  0x94   : > { %v3635_v52 = vsel %vm2625_vm2, %v3620_v0, %v3634_v33  ;;  %v3401_v4 = vrot.slane %v3385_v22, 4  ;;  %v6054_v38 = vrot.slane %v3385_v22, 9  ;;  %v6070_v42 = vrot.slane %v3385_v22, 10  ;;  %v2691_v29 = vpop.permute.xlu1 %2690 }
  0x95   : > { %v3636_v27 = vsel %vm2627_vm3, %v3621_v39, %v3635_v52  ;;  %v6053_v53 = vrot.slane %v3400_v54, 9  ;;  %v3470_v6 = vmax.f32 %v3384_v51, %v6052_v25  ;;  %v6069_v18 = vrot.slane %v3400_v54, 10  ;;  %v6898_v25 = vld [vmem:[%s11359_s1 + $0x10] ss:$0 sm:$0xff] }
  0x96   : > { %v6055_v19 = vrot.slane %v3401_v4, 9  ;;  %v3472_v3 = vmax.f32 %v3385_v22, %v6054_v38  ;;  %v6071_v57 = vrot.slane %v3401_v4, 10  ;;  %v6084_v43 = vrot.slane %v3384_v51, 11 }
  0x97   : > { %v3471_v28 = vmax.f32 %v3400_v54, %v6053_v53  ;;  %v3534_v48 = vmax.f32 %v3470_v6, %v6068_v17  ;;  %v6085_v20 = vrot.slane %v3400_v54, 11  ;;  %v6086_v45 = vrot.slane %v3385_v22, 11  ;;  %v6903_v17 = vld [vmem:[%s11359_s1 + $0xb] ss:$0 sm:$0xff] }
  0x98   : > { %3646 = vrot.lane.b32.xlu2 %v3636_v27, %s6368_s25  ;;  %v3473_v31 = vmax.f32 %v3401_v4, %v6055_v19  ;;  %v3536_v1 = vmax.f32 %v3472_v3, %v6070_v42  ;;  %v6087_v21 = vrot.slane %v3401_v4, 11  ;;  %v6846_v44 = vsel %vm290_vm0, %v6842_v60, 0.0  ;;  %v6911_v4 = vld [vmem:[%s11359_s1 + $0xe] ss:$0 sm:$0xff] }
  0x99   : > { %v3535_v5 = vmax.f32 %v3471_v28, %v6069_v18  ;;  %v3598_v7 = vmax.f32 %v3534_v48, %v6084_v43  ;;  %11595 = vst [vmem:[#allocation13_spill] sm:$0xff] %v6846_v44  ;;  %v6870_v41 = vsel %vm290_vm0, 0.0, %v6842_v60  ;;  %v2791_v16 = vmul.f32 %v6856_v55, %v6846_v44 }
  0x9a   : > { %v3537_v63 = vmax.f32 %v3473_v31, %v6071_v57  ;;  %v3600_v35 = vmax.f32 %v3536_v1, %v6086_v45  ;;  %11596 = vst [vmem:[#allocation14_spill] sm:$0xff] %v6870_v41  ;;  %v2790_v2 = vmul.f32 %v6856_v55, %v6870_v41  ;;  %v2704_v37 = vrot.slane %v2691_v29, 7 }
  0x9b   : > { %v3599_v34 = vmax.f32 %v3535_v5, %v6085_v20  ;;  %v3630_v46 = vperm.slane %v3598_v7, 0  ;;  %v2736_v24 = vmul.f32 %v6851_v58, %v6870_v41  ;;  %v2823_v33 = vrot.slane %v2791_v16, 1 }
  0x9c   : > { %v3601_v10 = vmax.f32 %v3537_v63, %v6087_v21  ;;  %v3632_v8 = vperm.slane %v3600_v35, 0  ;;  %v2822_v22 = vrot.slane %v2790_v2, 1  ;;  %v6906_v52 = vsel %vm290_vm0, 0.0, %v2704_v37  ;;  %v6948_v63 = vld [vmem:[%s11359_s1 + $0x11] ss:$0 sm:$0xff] }
  0x9d   : > { %v3631_v47 = vperm.slane %v3599_v34, 0  ;;  %v2687_v12 = vpop.permute.xlu0 %2686  ;;  %v6914_v38 = vsel %vm290_vm0, %v2704_v37, 0.0  ;;  %v2773_v42 = vmul.f32 %v6885_v23, %v6906_v52  ;;  %v3012_v6 = vmul.f32 %v6903_v17, %v6870_v41 }
  0x9e   : > { %v3633_v36 = vperm.slane %v3601_v10, 0  ;;  %v2702_v40 = vrot.slane %v2687_v12, 7  ;;  %v3013_v18 = vmul.f32 %v6903_v17, %v6846_v44  ;;  %v2824_v43 = vsel %vm721_vm8, %v2822_v22, %v2823_v33 }
  0x9f   : > { %v3643_v13 = vsel %vm2623_vm1, %v3631_v47, %v3630_v46  ;;  %v2868_v48 = vmul.f32 %v6866_v59, %v6906_v52  ;;  %v3044_v35 = vrot.slane %v3012_v6, 2 }
  0xa0   : > { %v3644_v11 = vsel %vm2625_vm2, %v3632_v8, %v3643_v13  ;;  %v6873_v50 = vsel %vm290_vm0, 0.0, %v2702_v40  ;;  %v6880_v49 = vsel %vm290_vm0, %v2702_v40, 0.0  ;;  %v3045_v34 = vrot.slane %v3013_v18, 2 }
  0xa1   : > { %v3645_v56 = vsel %vm2627_vm3, %v3633_v36, %v3644_v11  ;;  %v2754_v51 = vmul.f32 %v6861_v15, %v6873_v50  ;;  %v2864_v0 = vmul.f32 %v6866_v59, %v6873_v50  ;;  %v2865_v39 = vmul.f32 %v6866_v59, %v6880_v49 }
  0xa2   : > { %3652 = vrot.lane.b32.xlu2 %v3645_v56, %s6368_s25  ;;  %v2792_v20 = vmul.f32 %v6856_v55, %v6873_v50  ;;  %v2793_v1 = vmul.f32 %v6856_v55, %v6880_v49  ;;  %v3086_v21 = vmul.f32 %v6911_v4, %v6873_v50  ;;  %v3087_v5 = vmul.f32 %v6911_v4, %v6880_v49 }
  0xa3   : > { %v2762_v53 = vadd.f32 %v2754_v51, %v2736_v24  ;;  %v2896_v3 = vrot.slane %v2864_v0, 1  ;;  %v2897_v57 = vrot.slane %v2865_v39, 1  ;;  %v2869_v8 = vmul.f32 %v6866_v59, %v6914_v38 }
  0xa4   : > { %v2737_v47 = vmul.f32 %v6851_v58, %v6873_v50  ;;  %v2940_v11 = vmul.f32 %v6898_v25, %v6906_v52  ;;  %v2941_v56 = vmul.f32 %v6898_v25, %v6914_v38  ;;  %v2825_v40 = vrot.slane %v2792_v20, 1 }
  0xa5   : > { %v2898_v36 = vsel %vm721_vm8, %v2896_v3, %v2897_v57  ;;  %v2826_v29 = vrot.slane %v2793_v1, 1  ;;  %v3118_v2 = vrot.slane %v3086_v21, 2  ;;  %v3119_v37 = vrot.slane %v3087_v5, 2  ;;  %v6981_v5 = vld [vmem:[%s11360_s2 + $0x1] ss:$0 sm:$0xff] }
  0xa6   : > { %v3046_v24 = vsel %vm1448_vm9, %v3044_v35, %v3045_v34  ;;  %v2756_v39 = vmul.f32 %v6861_v15, %v6906_v52  ;;  %v2902_v22 = vrot.slane %v2868_v48, 1  ;;  %v2903_v3 = vrot.slane %v2869_v8, 1 }
  0xa7   : > { %v2973_v57 = vrot.slane %v2940_v11, 1  ;;  %v3120_v48 = vsel %vm1448_vm9, %v3118_v2, %v3119_v37 }
  0xb3   : > { %v2689_v30 = vpop.permute.xlu0 %2688 }
  0xb4   : > { %v2703_v54 = vrot.slane %v2689_v30, 7  ;;  %v2693_v30 = vpop.permute.xlu1 %2692 }
  0xb5   : > { %v2705_v33 = vrot.slane %v2693_v30, 7 }
  0xb6   : > { %v6919_v27 = vsel %vm290_vm0, 0.0, %v2703_v54  ;;  %v6929_v28 = vsel %vm290_vm0, %v2703_v54, 0.0 }
  0xb7   : > { %v2772_v19 = vmul.f32 %v6885_v23, %v6919_v27  ;;  %v2938_v31 = vmul.f32 %v6898_v25, %v6919_v27  ;;  %v2755_v7 = vmul.f32 %v6861_v15, %v6919_v27  ;;  %v2939_v10 = vmul.f32 %v6898_v25, %v6929_v28 }
  0xb8   : > { %v3160_v0 = vmul.f32 %v6948_v63, %v6919_v27  ;;  %v2867_v6 = vmul.f32 %v6866_v59, %v6929_v28  ;;  %v3161_v18 = vmul.f32 %v6948_v63, %v6929_v28  ;;  %v6976_v21 = vsel %vm290_vm0, 0.0, %v2705_v33 }
  0xb9   : > { %v2780_v45 = vadd.f32 %v2772_v19, %v2762_v53  ;;  %v2970_v13 = vrot.slane %v2938_v31, 1  ;;  %v2971_v9 = vrot.slane %v2939_v10, 1  ;;  %v2763_v16 = vadd.f32 %v2755_v7, %v2737_v47 }
  0xba   : > { %v2866_v53 = vmul.f32 %v6866_v59, %v6919_v27  ;;  %v3192_v19 = vrot.slane %v3160_v0, 2  ;;  %v2827_v31 = vsel %vm721_vm8, %v2825_v40, %v2826_v29  ;;  %v3193_v1 = vrot.slane %v3161_v18, 2 }
  0xbb   : > { %v2854_v46 = vadd.f32 %v2824_v43, %v2780_v45  ;;  %v2972_v51 = vsel %vm721_vm8, %v2970_v13, %v2971_v9  ;;  %v2781_v43 = vadd.f32 %v2773_v42, %v2763_v16  ;;  %v2974_v45 = vrot.slane %v2941_v56, 1 }
  0xbc   : > { %v2738_v7 = vmul.f32 %v6851_v58, %v6919_v27  ;;  %v2794_v42 = vmul.f32 %v6856_v55, %v6919_v27  ;;  %v2795_v34 = vmul.f32 %v6856_v55, %v6929_v28  ;;  %v2900_v10 = vrot.slane %v2867_v6, 1 }
  0xbd   : > { %v2928_v12 = vadd.f32 %v2898_v36, %v2854_v46  ;;  %v2899_v46 = vrot.slane %v2866_v53, 1  ;;  %v3194_v8 = vsel %vm1448_vm9, %v3192_v19, %v3193_v1  ;;  %v3014_v47 = vmul.f32 %v6903_v17, %v6873_v50 }
  0xbe   : > { %v3015_v36 = vmul.f32 %v6903_v17, %v6880_v49  ;;  %v2855_v13 = vadd.f32 %v2827_v31, %v2781_v43  ;;  %v2904_v56 = vsel %vm721_vm8, %v2902_v22, %v2903_v3  ;;  %v2764_v9 = vadd.f32 %v2756_v39, %v2738_v7 }
  0xbf   : > { %v3002_v54 = vadd.f32 %v2972_v51, %v2928_v12  ;;  %v2774_v12 = vmul.f32 %v6885_v23, %v6976_v21  ;;  %v7001_v29 = vsel %vm290_vm0, %v2705_v33, 0.0  ;;  %v2828_v2 = vrot.slane %v2794_v42, 1 }
  0xc0   : > { %v2829_v16 = vrot.slane %v2795_v34, 1  ;;  %v2901_v50 = vsel %vm721_vm8, %v2899_v46, %v2900_v10  ;;  %v2975_v49 = vsel %vm721_vm8, %v2973_v57, %v2974_v45  ;;  %v3047_v37 = vrot.slane %v3014_v47, 2 }
  0xc1   : > { %v3076_v20 = vadd.f32 %v3046_v24, %v3002_v54  ;;  %v3048_v30 = vrot.slane %v3015_v36, 2  ;;  %v2929_v24 = vadd.f32 %v2901_v50, %v2855_v13  ;;  %v7007_v51 = vmul.f32 %v6911_v4, %v6906_v52 }
  0xc2   : > { %v3162_v0 = vmul.f32 %v6948_v63, %v6906_v52  ;;  %v2942_v33 = vmul.f32 %v6898_v25, %v6976_v21  ;;  %v2943_v54 = vmul.f32 %v6898_v25, %v7001_v29  ;;  %v2782_v53 = vadd.f32 %v2774_v12, %v2764_v9 }
  0xc3   : > { %v3150_v35 = vadd.f32 %v3120_v48, %v3076_v20  ;;  %v2830_v18 = vsel %vm721_vm8, %v2828_v2, %v2829_v16  ;;  %v3088_v19 = vmul.f32 %v6911_v4, %v6919_v27  ;;  %v3089_v3 = vmul.f32 %v6911_v4, %v6929_v28 }
  0xc4   : > { %v3163_v43 = vmul.f32 %v6948_v63, %v6914_v38  ;;  %v3049_v20 = vsel %vm1448_vm9, %v3047_v37, %v3048_v30  ;;  %v3003_v45 = vadd.f32 %v2975_v49, %v2929_v24  ;;  %v2856_v34 = vadd.f32 %v2830_v18, %v2782_v53 }
  0xc5   : > { %v3224_v11 = vadd.f32 %v3194_v8, %v3150_v35  ;;  %v2976_v35 = vrot.slane %v2942_v33, 1  ;;  %v2977_v8 = vrot.slane %v2943_v54, 1  ;;  %v3121_v47 = vrot.slane %v3088_v19, 2 }
  0xc6   : > { %v3122_v36 = vrot.slane %v3089_v3, 2  ;;  %v3195_v12 = vrot.slane %v3162_v0, 2  ;;  %v3077_v9 = vadd.f32 %v3049_v20, %v3003_v45  ;;  %v3196_v16 = vrot.slane %v3163_v43, 2  ;;  %v7057_v0 = vld [vmem:[%s6420_s23 + $0x70] sm:$0xff]  ;;  %v7072_v3 = vld [vmem:[%s6420_s23 + $0x78] sm:$0xff] }
  0xc7   : > { %v6998_v40 = vadd.f32 %v6981_v5, %v3224_v11  ;;  %v3091_v11 = vmul.f32 %v6911_v4, %v6914_v38  ;;  %v3016_v50 = vmul.f32 %v6903_v17, %v6919_v27  ;;  %v3017_v49 = vmul.f32 %v6903_v17, %v6929_v28  ;;  %11597 = vst [vmem:[#allocation15_spill] sm:$0xff] %v7057_v0 }
  0xc8   : > { %v2930_v30 = vadd.f32 %v2904_v56, %v2856_v34  ;;  %v3123_v27 = vsel %vm1448_vm9, %v3121_v47, %v3122_v36  ;;  %v2796_v28 = vmul.f32 %v6856_v55, %v6906_v52  ;;  %v2797_v56 = vmul.f32 %v6856_v55, %v6914_v38  ;;  %11598 = vst [vmem:[#allocation16_spill] sm:$0xff] %v7072_v3 }
  0xc9   : > { %v3250_v39 = vrot.slane %v6998_v40, 1  ;;  %v3251_v22 = vrot.slane %v6998_v40, 2  ;;  %v3252_v6 = vrot.slane %v6998_v40, 3  ;;  %v3253_v57 = vrot.slane %v6998_v40, 4 }
  0xca   : > { %v3254_v31 = vrot.slane %v6998_v40, 5  ;;  %v3255_v48 = vrot.slane %v6998_v40, 6  ;;  %v3306_v1 = vperm.slane %v6998_v40, 0  ;;  %v3256_v46 = vrot.slane %v6998_v40, 7 }
  0xcb   : > { %v7030_v7 = vperm.slane %v3250_v39, 0  ;;  %v7032_v42 = vperm.slane %v3251_v22, 0  ;;  %v7035_v10 = vperm.slane %v3252_v6, 0  ;;  %v7037_v13 = vperm.slane %v3253_v57, 0 }
  0xcc   : > { %4100 = vst [vmem:[#allocation1] ss:$4 sm:$0xff] %v3306_v1  ;;  %v7043_v2 = vperm.slane %v3254_v31, 0  ;;  %v7050_v37 = vperm.slane %v3255_v48, 0  ;;  %v7053_v24 = vperm.slane %v3256_v46, 0  ;;  %v2978_v22 = vsel %vm721_vm8, %v2976_v35, %v2977_v8  ;;  %v7086_v31 = vld [vmem:[%s6420_s23 + $0xe0] sm:$0xff] }
  0xcd   : > { %4102 = vst [vmem:[#allocation1 + $0x1] ss:$4 sm:$0xff] %v7030_v7  ;;  %v3124_v33 = vrot.slane %v7007_v51, 2  ;;  %v3151_v54 = vadd.f32 %v3123_v27, %v3077_v9  ;;  %v3125_v53 = vrot.slane %v3091_v11, 2  ;;  %v3197_v6 = vsel %vm1448_vm9, %v3195_v12, %v3196_v16  ;;  %v7090_v35 = vld [vmem:[%s6420_s23 + $0xd0] sm:$0xff] }
  0xce   : > { %4104 = vst [vmem:[#allocation1 + $0x2] ss:$4 sm:$0xff] %v7032_v42  ;;  %v3050_v18 = vrot.slane %v3016_v50, 2  ;;  %v3051_v19 = vrot.slane %v3017_v49, 2  ;;  %v11599_v43 = vrot.slane %v6519_v61, 7  ;;  %v7082_v51 = vmul.f32 %v6903_v17, %v6906_v52 }
  0xcf   : > { %4106 = vst [vmem:[#allocation1 + $0x3] ss:$4 sm:$0xff] %v7035_v10  ;;  %v3004_v45 = vadd.f32 %v2978_v22, %v2930_v30  ;;  %v3164_v61 = vmul.f32 %v6948_v63, %v6976_v21  ;;  %v3165_v46 = vmul.f32 %v6948_v63, %v7001_v29  ;;  %v2831_v36 = vrot.slane %v2796_v28, 1 }
  0xd0   : > { %4108 = vst [vmem:[#allocation1 + $0x20] ss:$4 sm:$0xff] %v7037_v13  ;;  %v7078_v20 = vsel %vm290_vm0, 0.0, %v11599_v43  ;;  %v3225_v11 = vadd.f32 %v3197_v6, %v3151_v54  ;;  %v2832_v12 = vrot.slane %v2797_v56, 1  ;;  %v7101_v9 = vmul.f32 %v6903_v17, %v6914_v38 }
  0xd1   : > { %4110 = vst [vmem:[#allocation1 + $0x21] ss:$4 sm:$0xff] %v7043_v2  ;;  %v3126_v16 = vsel %vm1448_vm9, %v3124_v33, %v3125_v53  ;;  %v3052_v50 = vsel %vm1448_vm9, %v3050_v18, %v3051_v19  ;;  %v3053_v30 = vrot.slane %v7082_v51, 2  ;;  %v7108_v22 = vmul.f32 %v6856_v55, %v6976_v21 }
  0xd2   : > { %4112 = vst [vmem:[#allocation1 + $0x22] ss:$4 sm:$0xff] %v7050_v37  ;;  %v7112_v27 = vmul.f32 %v6856_v55, %v7001_v29  ;;  %v3078_v28 = vadd.f32 %v3052_v50, %v3004_v45  ;;  %v7119_v38 = vmul.f32 %v6866_v59, %v6976_v21  ;;  %v7123_v56 = vmul.f32 %v6866_v59, %v7001_v29 }
  0xd3   : > { %11600 = vst [vmem:[#allocation17_spill] sm:$0xff] %v7078_v20  ;;  %v3198_v33 = vrot.slane %v3164_v61, 2  ;;  %v3199_v54 = vrot.slane %v3165_v46, 2  ;;  %v7128_v53 = vmul.f32 %v6903_v17, %v6976_v21  ;;  %v7132_v40 = vmul.f32 %v6903_v17, %v7001_v29 }
  0xd4   : > { %4114 = vst [vmem:[#allocation1 + $0x23] ss:$4 sm:$0xff] %v7053_v24  ;;  %v7139_v6 = vadd.f32 %v6981_v5, %v3225_v11  ;;  %v7147_v18 = vsel %vm721_vm8, %v2831_v36, %v2832_v12  ;;  %v3054_v19 = vrot.slane %v7101_v9, 2  ;;  %v7152_v43 = vmul.f32 %v6911_v4, %v7001_v29  ;;  %v2699_v36 = vpop.permute.xlu0 %2698 }
  0xd5   : > { %11601 = vst [vmem:[#allocation18_spill] sm:$0xff] %v7086_v31  ;;  %v2757_v61 = vmul.f32 %v6861_v15, %v6976_v21  ;;  %v3152_v46 = vadd.f32 %v3126_v16, %v3078_v28  ;;  %v2905_v11 = vrot.slane %v7119_v38, 1  ;;  %v2906_v29 = vrot.slane %v7123_v56, 1  ;;  %v2701_v28 = vpop.permute.xlu1 %2700 }
  0xd6   : > { %11602 = vst [vmem:[#allocation19_spill] sm:$0xff] %v7090_v35  ;;  %v4115_v49 = vld.sshfl [vmem:[#allocation1] sm:$0xff pattern:$0x73625140]  ;;  %v3200_v12 = vsel %vm1448_vm9, %v3198_v33, %v3199_v54  ;;  %v3056_v50 = vrot.slane %v7128_v53, 2  ;;  %v3057_v16 = vrot.slane %v7132_v40, 2 }
  0xd7   : > { %4117 = vst [vmem:[#allocation1] ss:$4 sm:$0xff] %v3306_v1  ;;  %4267 = vrot.lane.b32.xlu1 %v4115_v49, %s6371_s26  ;;  %v7136_v1 = vmul.f32 %v6911_v4, %v6976_v21  ;;  %v3257_v49 = vrot.slane %v7139_v6, 1  ;;  %v3128_v38 = vrot.slane %v7152_v43, 2  ;;  %v3258_v56 = vrot.slane %v7139_v6, 2 }
  0xd8   : > { %4118 = vst [vmem:[#allocation1 + $0x1] ss:$4 sm:$0xff] %v7030_v7  ;;  %v7144_v7 = vmul.f32 %v6851_v58, %v6906_v52  ;;  %v2709_v33 = vrot.slane %v2701_v28, 7  ;;  %v3226_v54 = vadd.f32 %v3200_v12, %v3152_v46  ;;  %v3260_v53 = vrot.slane %v7139_v6, 4 }
  0xd9   : > { %4119 = vst [vmem:[#allocation1 + $0x2] ss:$4 sm:$0xff] %v7032_v42  ;;  %v3261_v40 = vrot.slane %v7139_v6, 5  ;;  %v7190_v46 = vperm.slane %v3257_v49, 0  ;;  %v3263_v34 = vrot.slane %v7139_v6, 7  ;;  %v7197_v47 = vperm.slane %v3258_v56, 0 }
  0xda   : > { %4120 = vst [vmem:[#allocation1 + $0x3] ss:$4 sm:$0xff] %v7035_v10  ;;  %v2708_v10 = vrot.slane %v2699_v36, 7  ;;  %v7205_v49 = vperm.slane %v3260_v53, 0  ;;  %v7209_v39 = vsel %vm290_vm0, %v2709_v33, 0.0  ;;  %v7229_v42 = vsel %vm1448_vm9, %v3053_v30, %v3054_v19 }
  0xdb   : > { %v4116_v45 = vld.sshfl [vmem:[#allocation1 + $0x20] sm:$0xff pattern:$0x73625140]  ;;  %v2765_v31 = vadd.f32 %v2757_v61, %v7144_v7  ;;  %v11604_v30 = vrot.slane %v7112_v27, 1  ;;  %v11605_v19 = vrot.slane %v7108_v22, 1  ;;  %v3321_v35 = vperm.slane %v3263_v34, 0 }
  0xdc   : > { %4121 = vst [vmem:[#allocation1 + $0x20] ss:$4 sm:$0xff] %v7037_v13  ;;  %4269 = vrot.lane.b32.xlu2 %v4116_v45, %s6371_s26  ;;  %v3127_v13 = vrot.slane %v7136_v1, 2  ;;  %v11376_v45 = vperm.slane %v7139_v6, 0  ;;  %v7184_v43 = vsel %vm290_vm0, 0.0, %v2708_v10  ;;  %v7187_v36 = vsel %vm290_vm0, %v2708_v10, 0.0 }
  0xdd   : > { %4122 = vst [vmem:[#allocation1 + $0x21] ss:$4 sm:$0xff] %v7043_v2  ;;  %v3259_v2 = vrot.slane %v7139_v6, 3  ;;  %v2743_v48 = vmul.f32 %v6851_v58, %v7184_v43  ;;  %v2804_v10 = vmul.f32 %v6856_v55, %v7184_v43  ;;  %v2805_v57 = vmul.f32 %v6856_v55, %v7187_v36 }
  0xde   : > { %4123 = vst [vmem:[#allocation1 + $0x22] ss:$4 sm:$0xff] %v7050_v37  ;;  %v7181_v37 = vsel %vm290_vm0, 0.0, %v2709_v33  ;;  %v2779_v33 = vmul.f32 %v6885_v23, %v6870_v41  ;;  %v7257_v61 = vsel %vm1448_vm9, %v3056_v50, %v3057_v16  ;;  %v2953_v34 = vmul.f32 %v6898_v25, %v6846_v44 }
  0xdf   : > { %v7165_v9 = vpop.permute.xlu2 %2694  ;;  %4124 = vst [vmem:[#allocation1 + $0x23] ss:$4 sm:$0xff] %v7053_v24  ;;  %v3262_v24 = vrot.slane %v7139_v6, 6  ;;  %v2761_v28 = vmul.f32 %v6861_v15, %v7181_v37  ;;  %v7199_v8 = vperm.slane %v3259_v2, 0  ;;  %v7219_v2 = vperm.slane %v3261_v40, 0 }
  0xe0   : > { %v11377_v1 = vrot.slane %v7165_v9, 7  ;;  %v2878_v53 = vmul.f32 %v6866_v59, %v7181_v37  ;;  %v2843_v52 = vrot.slane %v2804_v10, 1  ;;  %v2907_v10 = vsel %vm721_vm8, %v2905_v11, %v2906_v29  ;;  %11606 = vst [vmem:[#allocation21_spill] sm:$0xff] %v7257_v61  ;;  %v3649_v61 = vpop.permute.xlu0 %3648 }
  0xe1   : > { %v4125_v12 = vld.sshfl [vmem:[#allocation1] sm:$0xff pattern:$0x73625140]  ;;  %v3320_v51 = vperm.slane %v3262_v24, 0  ;;  %v2844_v7 = vrot.slane %v2805_v57, 1  ;;  %v2992_v20 = vrot.slane %v2953_v34, 1  ;;  %v3101_v34 = vmul.f32 %v6911_v4, %v7209_v39 }
  0xe2   : > { %4127 = vst [vmem:[#allocation1] ss:$4 sm:$0xff] %v11376_v45  ;;  %v7216_v56 = vsel %vm290_vm0, 0.0, %v11377_v1  ;;  %v2769_v45 = vadd.f32 %v2761_v28, %v2743_v48  ;;  %v7233_v1 = vmul.f32 %v6851_v58, %v6976_v21  ;;  %v7242_v48 = vadd.f32 %v6981_v5, %v3226_v54 }
  0xe3   : > { %4128 = vst [vmem:[#allocation1 + $0x1] ss:$4 sm:$0xff] %v7190_v46  ;;  %v2775_v21 = vmul.f32 %v6885_v23, %v7216_v56  ;;  %v7252_v28 = vsel %vm721_vm8, %v11605_v19, %v11604_v30  ;;  %v7260_v54 = vsel %vm1448_vm9, %v3127_v13, %v3128_v38  ;;  %v2917_v24 = vrot.slane %v2878_v53, 1 }
  0xe4   : > { %4271 = vrot.lane.b32.xlu2 %v4125_v12, %s6371_s26  ;;  %4129 = vst [vmem:[#allocation1 + $0x2] ss:$4 sm:$0xff] %v7197_v47  ;;  %v2879_v12 = vmul.f32 %v6866_v59, %v7209_v39  ;;  %v2787_v27 = vadd.f32 %v2779_v33, %v2769_v45  ;;  %v2952_v30 = vmul.f32 %v6898_v25, %v6870_v41  ;;  %v3264_v57 = vrot.slane %v7242_v48, 1 }
  0xe5   : > { %4130 = vst [vmem:[#allocation1 + $0x3] ss:$4 sm:$0xff] %v7199_v8  ;;  %v2845_v11 = vsel %vm721_vm8, %v2843_v52, %v2844_v7  ;;  %v3265_v29 = vrot.slane %v7242_v48, 2  ;;  %v3266_v50 = vrot.slane %v7242_v48, 3  ;;  %v2783_v16 = vadd.f32 %v2775_v21, %v2765_v31 }
  0xe6   : > { %v7235_v40 = vld.sshfl [vmem:[#allocation1 + $0x20] sm:$0xff pattern:$0x73625140]  ;;  %v2918_v22 = vrot.slane %v2879_v12, 1  ;;  %v3267_v13 = vrot.slane %v7242_v48, 4  ;;  %v3268_v38 = vrot.slane %v7242_v48, 5  ;;  %v2861_v52 = vadd.f32 %v2845_v11, %v2787_v27 }
  0xe7   : > { %11603 = vst [vmem:[#allocation20_spill] sm:$0xff] %v7235_v40  ;;  %v3269_v45 = vrot.slane %v7242_v48, 6  ;;  %v3270_v53 = vrot.slane %v7242_v48, 7  ;;  %v11608_v19 = vrot.slane %v7165_v9, 7  ;;  %v2944_v31 = vmul.f32 %v6898_v25, %v7216_v56 }
  0xe8   : > { %4131 = vst [vmem:[#allocation1 + $0x20] ss:$4 sm:$0xff] %v7205_v49  ;;  %v11609_v21 = vperm.slane %v7139_v6, 0  ;;  %v2919_v14 = vsel %vm721_vm8, %v2917_v24, %v2918_v22  ;;  %v2991_v62 = vrot.slane %v2952_v30, 1  ;;  %v3026_v33 = vmul.f32 %v6903_v17, %v7184_v43 }
  0xe9   : > { %4132 = vst [vmem:[#allocation1 + $0x21] ss:$4 sm:$0xff] %v7219_v2  ;;  %v7280_v7 = vsel %vm290_vm0, %v11608_v19, 0.0  ;;  %v7289_v26 = vperm.slane %v3264_v57, 0  ;;  %v7291_v27 = vperm.slane %v3265_v29, 0  ;;  %v3027_v9 = vmul.f32 %v6903_v17, %v7187_v36 }
  0xea   : > { %4133 = vst [vmem:[#allocation1 + $0x22] ss:$4 sm:$0xff] %v3320_v51  ;;  %v2857_v11 = vadd.f32 %v7147_v18, %v2783_v16  ;;  %v7297_v6 = vperm.slane %v3266_v50, 0  ;;  %v7299_v19 = vperm.slane %v3267_v13, 0  ;;  %v2758_v24 = vmul.f32 %v6861_v15, %v7216_v56 }
  0xeb   : > { %4134 = vst [vmem:[#allocation1 + $0x23] ss:$4 sm:$0xff] %v3321_v35  ;;  %v2945_v22 = vmul.f32 %v6898_v25, %v7280_v7  ;;  %v7306_v30 = vperm.slane %v3268_v38, 0  ;;  %v3100_v18 = vmul.f32 %v6911_v4, %v7181_v37  ;;  %v2935_v57 = vadd.f32 %v2919_v14, %v2861_v52 }
  0xec   : > { %v7275_v12 = vld.sshfl [vmem:[#allocation1] sm:$0xff pattern:$0x73625140]  ;;  %v3065_v29 = vrot.slane %v3026_v33, 2  ;;  %v3066_v50 = vrot.slane %v3027_v9, 2  ;;  %v2979_v16 = vrot.slane %v2944_v31, 1  ;;  %v7327_v14 = vadd.f32 %v2758_v24, %v7233_v1 }
  0xed   : > { %11607 = vst [vmem:[#allocation22_spill] sm:$0xff] %v7275_v12  ;;  %v7317_v13 = vperm.slane %v3269_v45, 0  ;;  %v7319_v38 = vperm.slane %v3270_v53, 0  ;;  %v3140_v45 = vrot.slane %v3101_v34, 2  ;;  %v3174_v1 = vmul.f32 %v6948_v63, %v6870_v41 }
  0xee   : > { %4137 = vst [vmem:[#allocation1] ss:$4 sm:$0xff] %v11609_v21  ;;  %v2931_v21 = vadd.f32 %v2907_v10, %v2857_v11  ;;  %v7339_v10 = vmul.f32 %v6856_v55, %v7216_v56  ;;  %v3067_v33 = vsel %vm1448_vm9, %v3065_v29, %v3066_v50  ;;  %v7353_v31 = vmul.f32 %v6856_v55, %v7280_v7 }
  0xef   : > { %4138 = vst [vmem:[#allocation1 + $0x1] ss:$4 sm:$0xff] %v7190_v46  ;;  %v3166_v11 = vmul.f32 %v6948_v63, %v7216_v56  ;;  %v7374_v29 = vmul.f32 %v6866_v59, %v7184_v43 }
  0xf0   : > { %4139 = vst [vmem:[#allocation1 + $0x2] ss:$4 sm:$0xff] %v7197_v47  ;;  %v2993_v47 = vsel %vm721_vm8, %v2991_v62, %v2992_v20  ;;  %v7331_v62 = vmul.f32 %v6866_v59, %v7216_v56  ;;  %v7335_v20 = vmul.f32 %v6866_v59, %v7280_v7 }
  0xf1   : > { %4140 = vst [vmem:[#allocation1 + $0x3] ss:$4 sm:$0xff] %v7199_v8  ;;  %v7324_v8 = vmul.f32 %v6851_v58, %v7216_v56  ;;  %v3009_v53 = vadd.f32 %v2993_v47, %v2935_v57  ;;  %v3167_v57 = vmul.f32 %v6948_v63, %v7280_v7  ;;  %v11612_v47 = vperm.slane %v7242_v48, 0 }
  0xf2   : > { %v7308_v46 = vld.sshfl [vmem:[#allocation1 + $0x20] sm:$0xff pattern:$0x73625140]  ;;  %v3201_v32 = vrot.slane %v3166_v11, 2 }
  0xf3   : > { %11610 = vst [vmem:[#allocation23_spill] sm:$0xff] %v7308_v46  ;;  %v3083_v50 = vadd.f32 %v3067_v33, %v3009_v53  ;;  %v2838_v46 = vrot.slane %v7353_v31, 1  ;;  %v3202_v53 = vrot.slane %v3167_v57, 2  ;;  %v7384_v33 = vpop.permute.xlu1 %3650  ;;  %v2914_v31 = vrot.slane %v7374_v29, 1 }
  0xf4   : > { %4141 = vst [vmem:[#allocation1 + $0x20] ss:$4 sm:$0xff] %v7205_v49  ;;  %v2980_v49 = vrot.slane %v2945_v22, 1  ;;  %v7361_v22 = vmul.f32 %v6898_v25, %v7209_v39  ;;  %v3099_v57 = vmul.f32 %v6911_v4, %v7187_v36  ;;  %v3171_v29 = vmul.f32 %v6948_v63, %v7187_v36 }
  0xf5   : > { %4142 = vst [vmem:[#allocation1 + $0x21] ss:$4 sm:$0xff] %v7219_v2  ;;  %v3139_v2 = vrot.slane %v3100_v18, 2  ;;  %v7365_v18 = vmul.f32 %v6885_v23, %v7184_v43 }
  0xf6   : > { %4143 = vst [vmem:[#allocation1 + $0x22] ss:$4 sm:$0xff] %v3320_v51  ;;  %v3175_v51 = vmul.f32 %v6948_v63, %v6846_v44  ;;  %v2981_v52 = vsel %vm721_vm8, %v2979_v16, %v2980_v49  ;;  %v2837_v16 = vrot.slane %v7339_v10, 1  ;;  %v3137_v12 = vrot.slane %v3099_v57, 2 }
  0xf7   : > { %4144 = vst [vmem:[#allocation1 + $0x23] ss:$4 sm:$0xff] %v3321_v35  ;;  %v7349_v35 = vmul.f32 %v6898_v25, %v7181_v37  ;;  %v3005_v9 = vadd.f32 %v2981_v52, %v2931_v21  ;;  %v3141_v49 = vsel %vm1448_vm9, %v3139_v2, %v3140_v45  ;;  %v3213_v52 = vrot.slane %v3174_v1, 2 }
  0xf8   : > { %v7357_v24 = vld.sshfl [vmem:[#allocation1] sm:$0xff pattern:$0x73625140]  ;;  %v3214_v34 = vrot.slane %v3175_v51, 2  ;;  %v2989_v2 = vrot.slane %v7361_v22, 1  ;;  %v2877_v45 = vmul.f32 %v6866_v59, %v7187_v36  ;;  %v2949_v1 = vmul.f32 %v6898_v25, %v7187_v36 }
  0xf9   : > { %11611 = vst [vmem:[#allocation24_spill] sm:$0xff] %v7357_v24  ;;  %v3079_v24 = vadd.f32 %v7229_v42, %v3005_v9  ;;  %v2948_v42 = vmul.f32 %v6898_v25, %v7184_v43  ;;  %v3172_v51 = vmul.f32 %v6948_v63, %v7181_v37  ;;  %v3157_v9 = vadd.f32 %v3141_v49, %v3083_v50 }
  0xfa   : > { %4147 = vst [vmem:[#allocation1] ss:$4 sm:$0xff] %v11612_v47  ;;  %v2988_v47 = vrot.slane %v7349_v35, 1  ;;  %v3173_v35 = vmul.f32 %v6948_v63, %v7209_v39  ;;  %v3215_v11 = vsel %vm1448_vm9, %v3213_v52, %v3214_v34  ;;  %v3098_v22 = vmul.f32 %v6911_v4, %v7184_v43 }
  0xfb   : > { %4148 = vst [vmem:[#allocation1 + $0x1] ss:$4 sm:$0xff] %v7289_v26  ;;  %v3153_v21 = vadd.f32 %v7260_v54, %v3079_v24  ;;  %v3170_v39 = vmul.f32 %v6948_v63, %v7184_v43  ;;  %v3022_v50 = vmul.f32 %v6903_v17, %v7216_v56  ;;  %v3203_v34 = vsel %vm1448_vm9, %v3201_v32, %v3202_v53 }
  0xfc   : > { %4149 = vst [vmem:[#allocation1 + $0x2] ss:$4 sm:$0xff] %v7291_v27  ;;  %v2915_v49 = vrot.slane %v2877_v45, 1  ;;  %v3023_v52 = vmul.f32 %v6903_v17, %v7280_v7  ;;  %v3094_v54 = vmul.f32 %v6911_v4, %v7216_v56  ;;  %v3095_v24 = vmul.f32 %v6911_v4, %v7280_v7 }
  0xfd   : > { %4150 = vst [vmem:[#allocation1 + $0x3] ss:$4 sm:$0xff] %v7297_v6  ;;  %v2985_v0 = vrot.slane %v2948_v42, 1  ;;  %v2986_v36 = vrot.slane %v2949_v1, 1  ;;  %v3231_v3 = vadd.f32 %v3215_v11, %v3157_v9  ;;  %v3211_v44 = vrot.slane %v3173_v35, 2  ;;  %v7443_v9 = vpop.permute.xlu1 %3986 }
  0xfe   : > { %v7386_v10 = vld.sshfl [vmem:[#allocation1 + $0x20] sm:$0xff pattern:$0x73625140]  ;;  %v3136_v60 = vrot.slane %v3098_v22, 2  ;;  %v3227_v32 = vadd.f32 %v3203_v34, %v3153_v21  ;;  %v7428_v45 = vmul.f32 %v6861_v15, %v7184_v43  ;;  %v3207_v17 = vrot.slane %v3170_v39, 2 }
  0xff   : > { %11613 = vst [vmem:[#allocation25_spill] sm:$0xff] %v7386_v10  ;;  %v3210_v10 = vrot.slane %v3172_v51, 2  ;;  %v3208_v40 = vrot.slane %v3171_v29, 2  ;;  %v3059_v56 = vrot.slane %v3022_v50, 2  ;;  %v11614_v4 = vperm.slane %v7242_v48, 0 }
 0x100   : > { %4151 = vst [vmem:[#allocation1 + $0x20] ss:$4 sm:$0xff] %v7299_v19  ;;  %v3060_v7 = vrot.slane %v3023_v52, 2  ;;  %v3130_v42 = vrot.slane %v3094_v54, 2  ;;  %v3131_v1 = vrot.slane %v3095_v24, 2  ;;  %v7435_v21 = vmul.f32 %v6885_v23, %v7181_v37 }
 0x101   : > { %4152 = vst [vmem:[#allocation1 + $0x21] ss:$4 sm:$0xff] %v7306_v30  ;;  %v7438_v43 = vadd.f32 %v6981_v5, %v3231_v3  ;;  %v7441_v51 = vsel %vm721_vm8, %v2837_v16, %v2838_v46  ;;  %v3655_v35 = vrot.slane %v3649_v61, 7  ;;  %v7447_v48 = vsel %vm721_vm8, %v2988_v47, %v2989_v2  ;;  %v7465_v61 = vld [vmem:[%s11359_s1 + $0x21] ss:$0 sm:$0xff]  ;;  %v2697_v16 = vpop.permute.xlu2 %2696 }
 0x102   : > { %4153 = vst [vmem:[#allocation1 + $0x22] ss:$4 sm:$0xff] %v7317_v13  ;;  %v11615_v37 = vrot.slane %v7335_v20, 1  ;;  %v11616_v11 = vrot.slane %v7331_v62, 1  ;;  %v7460_v46 = vadd.f32 %v6981_v5, %v3227_v32  ;;  %v7476_v62 = vsel %vm1448_vm9, %v3210_v10, %v3211_v44 }
 0x103   : > { %4154 = vst [vmem:[#allocation1 + $0x23] ss:$4 sm:$0xff] %v7319_v38  ;;  %v7479_v47 = vsel %vm721_vm8, %v2985_v0, %v2986_v36  ;;  %v7482_v2 = vsel %vm1448_vm9, %v3136_v60, %v3137_v12  ;;  %v7490_v22 = vsel %vm1448_vm9, %v3207_v17, %v3208_v40  ;;  %v7496_v44 = vsel %vm1448_vm9, %v3130_v42, %v3131_v1 }
 0x104   : > { %v7424_v53 = vld.sshfl [vmem:[#allocation1] sm:$0xff pattern:$0x73625140]  ;;  %v7457_v3 = vsel %vm721_vm8, %v11616_v11, %v11615_v37  ;;  %v3989_v0 = vrot.slane %v7443_v9, 7  ;;  %v3299_v60 = vrot.slane %v7438_v43, 1  ;;  %v2707_v40 = vrot.slane %v2697_v16, 7 }
 0x105   : > { %4157 = vst [vmem:[#allocation1] ss:$4 sm:$0xff] %v11614_v4  ;;  %v3300_v10 = vrot.slane %v7438_v43, 2  ;;  %v3271_v57 = vrot.slane %v7460_v46, 1  ;;  %v3301_v29 = vrot.slane %v7438_v43, 3  ;;  %v3302_v50 = vrot.slane %v7438_v43, 4 }
 0x106   : > { %4158 = vst [vmem:[#allocation1 + $0x1] ss:$4 sm:$0xff] %v7289_v26  ;;  %v7450_v26 = vsel %vm721_vm8, %v2914_v31, %v2915_v49  ;;  %v7486_v31 = vsel %vm3994_vm10, %v6870_v41, 0.0  ;;  %v3272_v34 = vrot.slane %v7460_v46, 2  ;;  %v3273_v54 = vrot.slane %v7460_v46, 3 }
 0x107   : > { %4159 = vst [vmem:[#allocation1 + $0x2] ss:$4 sm:$0xff] %v7291_v27  ;;  %v7470_v27 = vld [vmem:[%s11359_s1 + $0x1b] ss:$0 sm:$0xff]  ;;  %v7510_v39 = vmul.f32 %v7465_v61, %v7486_v31  ;;  %v7525_v24 = vsel %vm290_vm0, 0.0, %v2707_v40  ;;  %v3275_v32 = vrot.slane %v7460_v46, 5 }
 0x108   : > { %4160 = vst [vmem:[#allocation1 + $0x3] ss:$4 sm:$0xff] %v7297_v6  ;;  %v7493_v6 = vsel %vm1448_vm9, %v3059_v56, %v3060_v7  ;;  %v11397_v17 = vperm.slane %v7460_v46, 0  ;;  %v3985_v56 = vpop.permute.xlu0 %3984  ;;  %v7533_v7 = vperm.slane %v3299_v60, 0  ;;  %v7535_v42 = vperm.slane %v3271_v57, 0 }
 0x109   : > { %v2759_v1 = vmul.f32 %v6861_v15, %v7525_v24  ;;  %v7541_v9 = vperm.slane %v3300_v10, 0  ;;  %v7543_v37 = vperm.slane %v3301_v29, 0  ;;  %v3276_v11 = vrot.slane %v7460_v46, 6 }
 0x10a   : > { %v7472_v20 = vld.sshfl [vmem:[#allocation1 + $0x20] sm:$0xff pattern:$0x73625140]  ;;  %11618 = vst [vmem:[#allocation27_spill] sm:$0xff] %v7533_v7  ;;  %v7546_v16 = vperm.slane %v3272_v34, 0  ;;  %v3277_v60 = vrot.slane %v7460_v46, 7  ;;  %v2742_v36 = vmul.f32 %v6851_v58, %v7525_v24 }
 0x10b   : > { %4161 = vst [vmem:[#allocation1 + $0x20] ss:$4 sm:$0xff] %v7299_v19  ;;  %v7503_v19 = vsel %vm290_vm0, 0.0, %v3655_v35  ;;  %v2776_v35 = vmul.f32 %v6885_v23, %v7525_v24  ;;  %v7551_v57 = vperm.slane %v3273_v54, 0  ;;  %v3988_v15 = vrot.slane %v3985_v56, 7 }
 0x10c   : > { %4162 = vst [vmem:[#allocation1 + $0x21] ss:$4 sm:$0xff] %v7306_v30  ;;  %v7514_v30 = vmul.f32 %v7470_v27, %v7486_v31  ;;  %v7557_v29 = vperm.slane %v3275_v32, 0  ;;  %v7561_v34 = vsel %vm290_vm0, %v2707_v40, 0.0  ;;  %v2767_v54 = vadd.f32 %v2759_v1, %v7324_v8  ;;  %v7580_v58 = vld [vmem:[%s11359_s1 + $0x1c] ss:$0 sm:$0xff] }
 0x10d   : > { %4163 = vst [vmem:[#allocation1 + $0x22] ss:$4 sm:$0xff] %v7317_v13  ;;  %v2784_v23 = vadd.f32 %v2776_v35, %v7327_v14  ;;  %v2802_v14 = vmul.f32 %v6856_v55, %v7525_v24  ;;  %v7574_v56 = vperm.slane %v3276_v11, 0  ;;  %v2874_v8 = vmul.f32 %v6866_v59, %v7525_v24 }
 0x10e   : > { %4164 = vst [vmem:[#allocation1 + $0x23] ss:$4 sm:$0xff] %v7319_v38  ;;  %v3274_v38 = vrot.slane %v7460_v46, 4  ;;  %v2875_v40 = vmul.f32 %v6866_v59, %v7561_v34  ;;  %v7588_v1 = vperm.slane %v3302_v50, 0  ;;  %v7595_v35 = vsel %vm3666_vm11, %v6870_v41, 0.0 }
 0x10f   : > { %v7531_v4 = vld.sshfl [vmem:[#allocation1] sm:$0xff pattern:$0x73625140]  ;;  %11619 = vst [vmem:[#allocation28_spill] sm:$0xff] %v7541_v9  ;;  %v2858_v32 = vadd.f32 %v7252_v28, %v2784_v23  ;;  %v7590_v28 = vperm.slane %v3277_v60, 0  ;;  %v3993_v11 = vsel %vm290_vm0, 0.0, %v3989_v0  ;;  %v2768_v59 = vadd.f32 %v7428_v45, %v2742_v36 }
 0x110   : > { %11617 = vst [vmem:[#allocation26_spill] sm:$0xff] %v7531_v4  ;;  %v7555_v10 = vperm.slane %v3274_v38, 0  ;;  %v2803_v38 = vmul.f32 %v6856_v55, %v7561_v34  ;;  %v2946_v55 = vmul.f32 %v6898_v25, %v7525_v24  ;;  %v3992_v23 = vsel %vm290_vm0, 0.0, %v3988_v15  ;;  %v6154_v45 = vld [vmem:[%s11359_s1 + $0x1f] ss:$0 sm:$0xff] }
 0x111   : > { %11620 = vst [vmem:[#allocation29_spill] sm:$0xff] %v7543_v37  ;;  %v2947_v50 = vmul.f32 %v6898_v25, %v7561_v34  ;;  %v2785_v60 = vadd.f32 %v7365_v18, %v2767_v54  ;;  %v2840_v13 = vrot.slane %v2802_v14, 1  ;;  %v2932_v12 = vadd.f32 %v7457_v3, %v2858_v32  ;;  %v6152_v18 = vld [vmem:[%s11359_s1 + $0x1e] ss:$0 sm:$0xff] }
 0x112   : > { %4167 = vst [vmem:[#allocation1] ss:$4 sm:$0xff] %v11397_v17  ;;  %v2982_v49 = vrot.slane %v2946_v55, 1  ;;  %v2841_v17 = vrot.slane %v2803_v38, 1  ;;  %v11622_v0 = vrot.slane %v7384_v33, 7  ;;  %v2911_v36 = vrot.slane %v2874_v8, 1 }
 0x113   : > { %4168 = vst [vmem:[#allocation1 + $0x1] ss:$4 sm:$0xff] %v7535_v42  ;;  %v2912_v15 = vrot.slane %v2875_v40, 1  ;;  %v2983_v25 = vrot.slane %v2947_v50, 1  ;;  %v7614_v55 = vsel %vm3666_vm11, %v7503_v19, 0.0  ;;  %v7620_v3 = vsel %vm3994_vm10, %v3993_v11, 0.0 }
 0x114   : > { %4169 = vst [vmem:[#allocation1 + $0x2] ss:$4 sm:$0xff] %v7546_v16  ;;  %v3664_v41 = vsel %vm290_vm0, 0.0, %v11622_v0  ;;  %v7624_v33 = vmul.f32 %v7580_v58, %v7486_v31  ;;  %v3168_v54 = vmul.f32 %v6948_v63, %v7525_v24  ;;  %v7631_v38 = vsel %vm3994_vm10, %v3992_v23, 0.0  ;;  %v7642_v11 = vld [vmem:[%s11359_s1 + $0x22] ss:$0 sm:$0xff] }
 0x115   : > { %v7565_v52 = vld.sshfl [vmem:[#allocation1 + $0x20] sm:$0xff pattern:$0x73625140]  ;;  %4170 = vst [vmem:[#allocation1 + $0x3] ss:$4 sm:$0xff] %v7551_v57  ;;  %v2786_v19 = vadd.f32 %v7435_v21, %v2768_v59  ;;  %v2984_v32 = vsel %vm721_vm8, %v2982_v49, %v2983_v25  ;;  %v3169_v8 = vmul.f32 %v6948_v63, %v7561_v34  ;;  %v11623_v40 = vperm.slane %v7460_v46, 0  ;;  %v3647_v59 = vpop.permute.xlu2 %3646 }
 0x116   : > { %4171 = vst [vmem:[#allocation1 + $0x20] ss:$4 sm:$0xff] %v7555_v10  ;;  %v2842_v50 = vsel %vm721_vm8, %v2840_v13, %v2841_v17  ;;  %v2859_v23 = vadd.f32 %v7441_v51, %v2785_v60  ;;  %v3006_v0 = vadd.f32 %v2984_v32, %v2932_v12  ;;  %v7648_v21 = vsel %vm3666_vm11, %v3664_v41, 0.0  ;;  %v11624_v12 = vld [vmem:[#allocation21_spill] sm:$0xff] }
 0x117   : > { %11621 = vst [vmem:[#allocation30_spill] sm:$0xff] %v7588_v1  ;;  %v3204_v1 = vrot.slane %v3168_v54, 2  ;;  %v7651_v63 = vmul.f32 %v6154_v45, %v7620_v3  ;;  %v2913_v46 = vsel %vm721_vm8, %v2911_v36, %v2912_v15  ;;  %v3205_v49 = vrot.slane %v3169_v8, 2  ;;  %v6315_v36 = vld [vmem:[%s11359_s1 + $0xb] ss:$0 sm:$0xff] }
 0x118   : > { %4172 = vst [vmem:[#allocation1 + $0x21] ss:$4 sm:$0xff] %v7557_v29  ;;  %v4007_v13 = vmul.f32 %v6152_v18, %v7620_v3  ;;  %v4006_v51 = vmul.f32 %v6152_v18, %v7631_v38  ;;  %v3080_v17 = vadd.f32 %v11624_v12, %v3006_v0  ;;  %v3654_v60 = vrot.slane %v3647_v59, 7 }
 0x119   : > { %4173 = vst [vmem:[#allocation1 + $0x22] ss:$4 sm:$0xff] %v7574_v56  ;;  %v2860_v41 = vadd.f32 %v2842_v50, %v2786_v19  ;;  %v3024_v15 = vmul.f32 %v6315_v36, %v7525_v24  ;;  %v3206_v25 = vsel %vm1448_vm9, %v3204_v1, %v3205_v49  ;;  %v4012_v18 = vmul.f32 %v7465_v61, %v7620_v3  ;;  %v7710_v49 = vld [vmem:[%s11359_s1 + $0x12] ss:$0 sm:$0xff] }
 0x11a   : > { %4174 = vst [vmem:[#allocation1 + $0x23] ss:$4 sm:$0xff] %v7590_v28  ;;  %v7672_v54 = vmul.f32 %v7642_v11, %v7620_v3  ;;  %v3154_v19 = vadd.f32 %v7496_v44, %v3080_v17  ;;  %v4001_v8 = vmul.f32 %v7470_v27, %v7631_v38  ;;  %v7688_v44 = vld [vmem:[%s11359_s1 + $0x1d] ss:$0 sm:$0xff]  ;;  %v7695_v27 = vmul.f32 %v6154_v45, %v7631_v38 }
 0x11b   : > { %v3662_v50 = vsel %vm290_vm0, 0.0, %v3654_v60 }
 0x11c   : > { %v7628_v14 = vld.sshfl [vmem:[#allocation1] sm:$0xff pattern:$0x73625140] }
 0x11d   : > { %4177 = vst [vmem:[#allocation1] ss:$4 sm:$0xff] %v11623_v40  ;;  %v3228_v40 = vadd.f32 %v3206_v25, %v3154_v19  ;;  %v7737_v25 = vld [vmem:[%s11359_s1 + $0x18] ss:$0 sm:$0xff] }
 0x11e   : > { %4178 = vst [vmem:[#allocation1 + $0x1] ss:$4 sm:$0xff] %v7535_v42 }
 0x11f   : > { %4179 = vst [vmem:[#allocation1 + $0x2] ss:$4 sm:$0xff] %v7546_v16  ;;  %v3025_v16 = vmul.f32 %v6315_v36, %v7561_v34  ;;  %v7705_v45 = vadd.f32 %v6981_v5, %v3228_v40  ;;  %v4034_v5 = vrot.slane %v7695_v27, 1  ;;  %v7765_v27 = vld [vmem:[%s11359_s1 + $0x1a] ss:$0 sm:$0xff] }
 0x120   : > { %4180 = vst [vmem:[#allocation1 + $0x3] ss:$4 sm:$0xff] %v7551_v57  ;;  %v2933_v57 = vadd.f32 %v2913_v46, %v2859_v23  ;;  %v4022_v46 = vrot.slane %v7624_v33, 1  ;;  %v7718_v33 = vsel %vm3666_vm11, %v3662_v50, 0.0 }
 0x121   : > { %v7658_v42 = vld.sshfl [vmem:[#allocation1 + $0x20] sm:$0xff pattern:$0x73625140]  ;;  %v3063_v23 = vrot.slane %v3025_v16, 2  ;;  %v3278_v12 = vrot.slane %v7705_v45, 1  ;;  %v3280_v16 = vrot.slane %v7705_v45, 3 }
 0x122   : > { %11625 = vst [vmem:[#allocation21_spill] sm:$0xff] %v7658_v42 }
 0x123   : > { %4181 = vst [vmem:[#allocation1 + $0x20] ss:$4 sm:$0xff] %v7555_v10  ;;  %v6316_v10 = vld [vmem:[%s11359_s1 + $0xe] ss:$0 sm:$0xff] }
 0x124   : > { %4182 = vst [vmem:[#allocation1 + $0x21] ss:$4 sm:$0xff] %v7557_v29  ;;  %v3096_v61 = vmul.f32 %v6316_v10, %v7525_v24  ;;  %v3097_v1 = vmul.f32 %v6316_v10, %v7561_v34  ;;  %v7692_v29 = vmul.f32 %v7580_v58, %v7631_v38  ;;  %v4008_v24 = vadd.f32 %v4006_v51, %v7514_v30  ;;  %v7750_v10 = vld [vmem:[%s11359_s1 + $0x13] ss:$0 sm:$0xff] }
 0x125   : > { %4183 = vst [vmem:[#allocation1 + $0x22] ss:$4 sm:$0xff] %v7574_v56  ;;  %v2934_v34 = vadd.f32 %v7450_v26, %v2860_v41  ;;  %v3062_v56 = vrot.slane %v3024_v15, 2  ;;  %v3007_v58 = vadd.f32 %v7479_v47, %v2933_v57  ;;  %v7715_v26 = vld [vmem:[%s11359_s1 + $0x15] ss:$0 sm:$0xff]  ;;  %v4009_v30 = vadd.f32 %v4007_v13, %v4001_v8 }
 0x126   : > { %4184 = vst [vmem:[#allocation1 + $0x23] ss:$4 sm:$0xff] %v7590_v28  ;;  %v3133_v28 = vrot.slane %v3096_v61, 2  ;;  %v3134_v59 = vrot.slane %v3097_v1, 2  ;;  %v4023_v47 = vrot.slane %v7692_v29, 1  ;;  %v7724_v51 = vmul.f32 %v7688_v44, %v7631_v38 }
 0x127   : > { %v4014_v17 = vadd.f32 %v4012_v18, %v4008_v24  ;;  %v3008_v60 = vadd.f32 %v7447_v48, %v2934_v34  ;;  %v3064_v13 = vsel %vm1448_vm9, %v3062_v56, %v3063_v23  ;;  %v3279_v41 = vrot.slane %v7705_v45, 2  ;;  %v7730_v36 = vld.sshfl [vmem:[#allocation1] sm:$0xff pattern:$0x73625140]  ;;  %v7778_v23 = vld [vmem:[%s11359_s1 + $0x16] ss:$0 sm:$0xff] }
 0x128   : > { %11626 = vst [vmem:[#allocation31_spill] sm:$0xff] %v7730_v36  ;;  %v3081_v15 = vadd.f32 %v7493_v6, %v3007_v58  ;;  %v3675_v18 = vmul.f32 %v7710_v49, %v7718_v33  ;;  %v3685_v48 = vmul.f32 %v7715_v26, %v7614_v55  ;;  %v4015_v57 = vadd.f32 %v7510_v39, %v4009_v30  ;;  %v7760_v39 = vld [vmem:[%s11359_s1 + $0x19] ss:$0 sm:$0xff]  ;;  %v6317_v36 = vld [vmem:[%s11360_s2 + $0x1] ss:$0 sm:$0xff] }
 0x129   : > { %v3135_v19 = vsel %vm1448_vm9, %v3133_v28, %v3134_v59  ;;  %v3281_v8 = vrot.slane %v7705_v45, 4  ;;  %v11401_v6 = vperm.slane %v7705_v45, 0  ;;  %v3282_v61 = vrot.slane %v7705_v45, 5 }
 0x12a   : > { %v7753_v1 = vperm.slane %v3278_v12, 0  ;;  %v3674_v29 = vmul.f32 %v7710_v49, %v7595_v35  ;;  %v3684_v40 = vmul.f32 %v7715_v26, %v7718_v33  ;;  %v3082_v50 = vadd.f32 %v3064_v13, %v3008_v60 }
 0x12b   : > { %v3283_v24 = vrot.slane %v7705_v45, 6  ;;  %v3284_v34 = vrot.slane %v7705_v45, 7  ;;  %v7771_v56 = vperm.slane %v3279_v41, 0  ;;  %4187 = vst [vmem:[#allocation1] ss:$4 sm:$0xff] %v11401_v6  ;;  %v3155_v30 = vadd.f32 %v3135_v19, %v3081_v15 }
 0x12c   : > { %v7782_v28 = vperm.slane %v3280_v16, 0  ;;  %4188 = vst [vmem:[#allocation1 + $0x1] ss:$4 sm:$0xff] %v7753_v1  ;;  %v3695_v59 = vmul.f32 %v7737_v25, %v7648_v21  ;;  %v3689_v12 = vadd.f32 %v3685_v48, %v3675_v18  ;;  %v4026_v60 = vadd.f32 %v4022_v46, %v4014_v17  ;;  %v7796_v15 = vld [vmem:[%s11359_s1 + $0x14] ss:$0 sm:$0xff] }
 0x12d   : > { %v7780_v58 = vld.sshfl [vmem:[#allocation1 + $0x20] sm:$0xff pattern:$0x73625140]  ;;  %v7788_v41 = vperm.slane %v3281_v8, 0  ;;  %4189 = vst [vmem:[#allocation1 + $0x2] ss:$4 sm:$0xff] %v7771_v56  ;;  %v3704_v32 = vmul.f32 %v7750_v10, %v7595_v35  ;;  %v4027_v16 = vadd.f32 %v4023_v47, %v4015_v57  ;;  %v3688_v46 = vadd.f32 %v3684_v40, %v3674_v29 }
 0x12e   : > { %11627 = vst [vmem:[#allocation32_spill] sm:$0xff] %v7780_v58  ;;  %v7798_v19 = vperm.slane %v3282_v61, 0  ;;  %v3694_v17 = vmul.f32 %v7737_v25, %v7614_v55  ;;  %v3156_v18 = vadd.f32 %v7482_v2, %v3082_v50  ;;  %v7804_v48 = vperm.slane %v3283_v24, 0  ;;  %v6169_v57 = vld [vmem:[%s11359_s1 + $0x20] ss:$0 sm:$0xff] }
 0x12f   : > { %4190 = vst [vmem:[#allocation1 + $0x3] ss:$4 sm:$0xff] %v7782_v28  ;;  %v3749_v8 = vmul.f32 %v7760_v39, %v7648_v21  ;;  %v7811_v47 = vmul.f32 %v7765_v27, %v7648_v21  ;;  %v3229_v61 = vadd.f32 %v7490_v22, %v3155_v30  ;;  %v7817_v29 = vperm.slane %v3284_v34, 0  ;;  %v7823_v2 = vld [vmem:[%s11359_s1 + $0x17] ss:$0 sm:$0xff] }
 0x130   : > { %4191 = vst [vmem:[#allocation1 + $0x20] ss:$4 sm:$0xff] %v7788_v41  ;;  %v3699_v40 = vadd.f32 %v3695_v59, %v3689_v12  ;;  %v3705_v50 = vmul.f32 %v7750_v10, %v7718_v33  ;;  %v4038_v24 = vadd.f32 %v4034_v5, %v4026_v60  ;;  %v3712_v13 = vrot.slane %v3704_v32, 1  ;;  %v6170_v30 = vld [vmem:[%s11359_s1 + $0x23] ss:$0 sm:$0xff] }
 0x131   : > { %4192 = vst [vmem:[#allocation1 + $0x21] ss:$4 sm:$0xff] %v7798_v19  ;;  %v7830_v22 = vmul.f32 %v7796_v15, %v7595_v35  ;;  %v3727_v34 = vmul.f32 %v7778_v23, %v7614_v55  ;;  %v3698_v59 = vadd.f32 %v3694_v17, %v3688_v46  ;;  %v3726_v5 = vmul.f32 %v7778_v23, %v7718_v33 }
 0x132   : > { %4193 = vst [vmem:[#allocation1 + $0x22] ss:$4 sm:$0xff] %v7804_v48  ;;  %v3713_v12 = vrot.slane %v3705_v50, 1  ;;  %v3771_v32 = vmul.f32 %v7796_v15, %v7718_v33  ;;  %v7843_v60 = vadd.f32 %v7476_v62, %v3156_v18  ;;  %v3757_v6 = vrot.slane %v3749_v8, 1 }
 0x133   : > { %4194 = vst [vmem:[#allocation1 + $0x23] ss:$4 sm:$0xff] %v7817_v29  ;;  %v3823_v0 = vrot.slane %v7811_v47, 2  ;;  %v3735_v58 = vrot.slane %v3727_v34, 1  ;;  %v7849_v42 = vadd.f32 %v6317_v36, %v3229_v61  ;;  %v3748_v17 = vmul.f32 %v7760_v39, %v7614_v55 }
 0x134   : > { %v3721_v46 = vadd.f32 %v3713_v12, %v3699_v40  ;;  %v3793_v50 = vmul.f32 %v7823_v2, %v7614_v55  ;;  %v11629_v62 = vrot.slane %v7672_v54, 1  ;;  %v4054_v8 = vmul.f32 %v7688_v44, %v7486_v31 }
 0x135   : > { %v4066_v47 = vmul.f32 %v6169_v57, %v7631_v38  ;;  %v4078_v61 = vmul.f32 %v6170_v30, %v7620_v3  ;;  %v11630_v40 = vperm.slane %v7705_v45, 0  ;;  %v3720_v34 = vadd.f32 %v3712_v13, %v3698_v59 }
 0x136   : > { %v7855_v37 = vld.sshfl [vmem:[#allocation1] sm:$0xff pattern:$0x73625140]  ;;  %v4050_v18 = vadd.f32 %v11629_v62, %v4038_v24  ;;  %v3734_v12 = vrot.slane %v3726_v5, 1  ;;  %v3743_v9 = vadd.f32 %v3735_v58, %v3721_v46  ;;  %v3779_v7 = vrot.slane %v3771_v32, 2 }
 0x137   : > { %11628 = vst [vmem:[#allocation33_spill] sm:$0xff] %v7855_v37  ;;  %v4058_v37 = vrot.slane %v4054_v8, 2  ;;  %v4070_v4 = vrot.slane %v4066_v47, 2  ;;  %v11631_v54 = vrot.slane %v7651_v63, 1  ;;  %v4043_v44 = vmul.f32 %v7642_v11, %v7486_v31 }
 0x138   : > { %4197 = vst [vmem:[#allocation1] ss:$4 sm:$0xff] %v11630_v40  ;;  %v3765_v38 = vadd.f32 %v3757_v6, %v3743_v9  ;;  %v3801_v62 = vrot.slane %v3793_v50, 2  ;;  %v4082_v45 = vrot.slane %v4078_v61, 2  ;;  %v4067_v13 = vmul.f32 %v6169_v57, %v7620_v3 }
 0x139   : > { %4198 = vst [vmem:[#allocation1 + $0x1] ss:$4 sm:$0xff] %v7753_v1  ;;  %v4039_v24 = vadd.f32 %v11631_v54, %v4027_v16  ;;  %v4062_v1 = vadd.f32 %v4058_v37, %v4050_v18  ;;  %v4047_v58 = vrot.slane %v4043_v44, 1  ;;  %v4079_v5 = vmul.f32 %v6170_v30, %v7486_v31  ;;  %v6171_v37 = vld [vmem:[%s11360_s2 + $0x3] ss:$0 sm:$0xff] }
 0x13a   : > { %4199 = vst [vmem:[#allocation1 + $0x2] ss:$4 sm:$0xff] %v7771_v56  ;;  %v7872_v59 = vld.sshfl [vmem:[#allocation1 + $0x20] sm:$0xff pattern:$0x73625140]  ;;  %v7878_v63 = vmul.f32 %v7710_v49, %v7648_v21  ;;  %v3285_v11 = vrot.slane %v7849_v42, 1  ;;  %v3787_v6 = vadd.f32 %v3779_v7, %v3765_v38  ;;  %v7893_v16 = vmul.f32 %v7750_v10, %v7648_v21 }
 0x13b   : > { %4200 = vst [vmem:[#allocation1 + $0x3] ss:$4 sm:$0xff] %v7782_v28  ;;  %v3286_v9 = vrot.slane %v7849_v42, 2  ;;  %v4071_v3 = vrot.slane %v4067_v13, 2  ;;  %v4074_v56 = vadd.f32 %v4070_v4, %v4062_v1  ;;  %v4051_v31 = vadd.f32 %v4047_v58, %v4039_v24 }
 0x13c   : > { %4201 = vst [vmem:[#allocation1 + $0x20] ss:$4 sm:$0xff] %v7788_v41  ;;  %v7889_v28 = vmul.f32 %v7737_v25, %v7595_v35  ;;  %v3742_v7 = vadd.f32 %v3734_v12, %v3720_v34  ;;  %v3756_v41 = vrot.slane %v3748_v17, 1  ;;  %v3809_v57 = vadd.f32 %v3801_v62, %v3787_v6 }
 0x13d   : > { %4202 = vst [vmem:[#allocation1 + $0x21] ss:$4 sm:$0xff] %v7798_v19  ;;  %v7898_v4 = vmul.f32 %v7760_v39, %v7595_v35  ;;  %v4086_v19 = vadd.f32 %v4082_v45, %v4074_v56  ;;  %v11632_v30 = vrot.slane %v7724_v51, 2  ;;  %v4083_v46 = vrot.slane %v4079_v5, 2  ;;  %v3653_v45 = vpop.permute.xlu2 %3652 }
 0x13e   : > { %4203 = vst [vmem:[#allocation1 + $0x22] ss:$4 sm:$0xff] %v7804_v48  ;;  %v7905_v50 = vmul.f32 %v7796_v15, %v7648_v21  ;;  %v3287_v48 = vrot.slane %v7849_v42, 3  ;;  %v3288_v17 = vrot.slane %v7849_v42, 4  ;;  %v3289_v18 = vrot.slane %v7849_v42, 5 }
 0x13f   : > { %4204 = vst [vmem:[#allocation1 + $0x23] ss:$4 sm:$0xff] %v7817_v29  ;;  %v4063_v32 = vadd.f32 %v11632_v30, %v4051_v31  ;;  %v7910_v8 = vadd.f32 %v3823_v0, %v3809_v57  ;;  %v3346_v47 = vperm.slane %v7849_v42, 0  ;;  %v3792_v29 = vmul.f32 %v7823_v2, %v7718_v33 }
 0x140   : > { %v4090_v51 = vadd.f32 %v6171_v37, %v4086_v19  ;;  %v7916_v40 = vadd.f32 %v6317_v36, %v7843_v60  ;;  %v7918_v34 = vperm.slane %v3285_v11, 0  ;;  %v3778_v54 = vrot.slane %v7830_v22, 2 }
 0x141   : > { %v4075_v61 = vadd.f32 %v4071_v3, %v4063_v32  ;;  %v3764_v24 = vadd.f32 %v3756_v41, %v3742_v7  ;;  %v3290_v0 = vrot.slane %v7849_v42, 6  ;;  %v7924_v44 = vperm.slane %v3286_v9, 0 }
 0x142   : > { %v7920_v12 = vld.sshfl [vmem:[#allocation1] sm:$0xff pattern:$0x73625140]  ;;  %v4096_v33 = vperm.slane %v4090_v51, 0  ;;  %v3291_v62 = vrot.slane %v7849_v42, 7  ;;  %v7929_v36 = vperm.slane %v3287_v48, 0  ;;  %v3686_v22 = vmul.f32 %v7715_v26, %v7648_v21 }
 0x143   : > { %4207 = vst [vmem:[#allocation1] ss:$4 sm:$0xff] %v3346_v47  ;;  %v4087_v38 = vadd.f32 %v4083_v46, %v4075_v61  ;;  %v7931_v60 = vperm.slane %v3288_v17, 0  ;;  %v7936_v13 = vperm.slane %v3289_v18, 0  ;;  %v3800_v1 = vrot.slane %v3792_v29, 2 }
 0x144   : > { %4208 = vst [vmem:[#allocation1 + $0x1] ss:$4 sm:$0xff] %v7918_v34  ;;  %v3814_v58 = vmul.f32 %v7765_v27, %v7614_v55  ;;  %4562 = vrot.lane.b32.xlu1 %v4096_v33, %s6372_s6  ;;  %v3786_v9 = vadd.f32 %v3778_v54, %v3764_v24  ;;  %v7949_v6 = vmul.f32 %v7765_v27, %v7595_v35  ;;  %v11633_v31 = vrot.slane %v7438_v43, 5 }
 0x145   : > { %4209 = vst [vmem:[#allocation1 + $0x2] ss:$4 sm:$0xff] %v7924_v44  ;;  %v7942_v5 = vadd.f32 %v6171_v37, %v4087_v38  ;;  %v3676_v3 = vmul.f32 %v7710_v49, %v7614_v55  ;;  %v3706_v56 = vmul.f32 %v7750_v10, %v7614_v55  ;;  %v7959_v37 = vperm.slane %v3290_v0, 0 }
 0x146   : > { %v7944_v11 = vld.sshfl [vmem:[#allocation1 + $0x20] sm:$0xff pattern:$0x73625140]  ;;  %4210 = vst [vmem:[#allocation1 + $0x3] ss:$4 sm:$0xff] %v7929_v36  ;;  %v7957_v7 = vperm.slane %v11633_v31, 0  ;;  %v3728_v48 = vmul.f32 %v7778_v23, %v7648_v21  ;;  %v3808_v29 = vadd.f32 %v3800_v1, %v3786_v9 }
 0x147   : > { %4211 = vst [vmem:[#allocation1 + $0x20] ss:$4 sm:$0xff] %v7931_v60  ;;  %v4098_v41 = vperm.slane %v7942_v5, 0  ;;  %v3657_v57 = vrot.slane %v3653_v45, 7  ;;  %v11634_v35 = vrot.slane %v7438_v43, 6  ;;  %v11635_v49 = vrot.slane %v7438_v43, 7 }
 0x148   : > { %v7971_v10 = vperm.slane %v3291_v62, 0  ;;  %4212 = vst [vmem:[#allocation1 + $0x21] ss:$4 sm:$0xff] %v7936_v13  ;;  %v3690_v32 = vadd.f32 %v3686_v22, %v3676_v3  ;;  %v3292_v46 = vrot.slane %v7916_v40, 1  ;;  %v4094_v18 = vrot.slane %v4090_v51, 1 }
 0x149   : > { %v7965_v19 = vperm.slane %v11634_v35, 0  ;;  %v7969_v30 = vperm.slane %v11635_v49, 0  ;;  %4213 = vst [vmem:[#allocation1 + $0x22] ss:$4 sm:$0xff] %v7959_v37  ;;  %4566 = vrot.lane.b32.xlu0 %v4098_v41, %s6372_s6  ;;  %v3665_v17 = vsel %vm290_vm0, 0.0, %v3657_v57  ;;  %v3822_v61 = vrot.slane %v3814_v58, 2 }
 0x14a   : > { %4214 = vst [vmem:[#allocation1 + $0x23] ss:$4 sm:$0xff] %v7971_v10  ;;  %v3671_v54 = vsel %vm3666_vm11, %v3665_v17, 0.0  ;;  %v3714_v24 = vrot.slane %v3706_v56, 1  ;;  %v3293_v22 = vrot.slane %v7916_v40, 2  ;;  %v3715_v45 = vrot.slane %v7893_v16, 1 }
 0x14b   : > { %v3687_v0 = vmul.f32 %v7715_v26, %v3671_v54  ;;  %v3696_v33 = vmul.f32 %v7737_v25, %v3671_v54  ;;  %v3729_v38 = vmul.f32 %v7778_v23, %v3671_v54  ;;  %v3750_v62 = vmul.f32 %v7760_v39, %v3671_v54  ;;  %v11636_v25 = vld [vmem:[#allocation20_spill] sm:$0xff] }
 0x14c   : > { %v3772_v51 = vmul.f32 %v7796_v15, %v7614_v55  ;;  %v4097_v1 = vperm.slane %v4094_v18, 0  ;;  %v3736_v9 = vrot.slane %v3728_v48, 1  ;;  %4273 = vrot.lane.b32.xlu1 %v11636_v25, %s6371_s26  ;;  %v4095_v23 = vrot.slane %v7942_v5, 1  ;;  %v8003_v55 = vld [vmem:[%s11360_s2 + $0x2] ss:$0 sm:$0xff] }
 0x14d   : > { %v7990_v58 = vld.sshfl [vmem:[#allocation1] sm:$0xff pattern:$0x73625140]  ;;  %v3691_v3 = vadd.f32 %v3687_v0, %v7878_v63  ;;  %v3700_v26 = vadd.f32 %v3696_v33, %v3690_v32  ;;  %v3294_v39 = vrot.slane %v7916_v40, 3  ;;  %v3295_v56 = vrot.slane %v7916_v40, 4  ;;  %v11637_v32 = vld [vmem:[#allocation22_spill] sm:$0xff] }
 0x14e   : > { %4217 = vst [vmem:[#allocation1] ss:$4 sm:$0xff] %v3346_v47  ;;  %v3830_v15 = vadd.f32 %v3822_v61, %v3808_v29  ;;  %v3794_v63 = vmul.f32 %v7823_v2, %v7648_v21  ;;  %4564 = vrot.lane.b32.xlu2 %v4097_v1, %s6372_s6  ;;  %v3737_v31 = vrot.slane %v3729_v38, 1  ;;  %v3758_v41 = vrot.slane %v3750_v62, 1 }
 0x14f   : > { %4218 = vst [vmem:[#allocation1 + $0x1] ss:$4 sm:$0xff] %v7918_v34  ;;  %v3701_v16 = vadd.f32 %v7889_v28, %v3691_v3  ;;  %v3722_v5 = vadd.f32 %v3714_v24, %v3700_v26  ;;  %v3296_v42 = vrot.slane %v7916_v40, 5  ;;  %v3759_v47 = vrot.slane %v7898_v4, 1 }
 0x150   : > { %4219 = vst [vmem:[#allocation1 + $0x2] ss:$4 sm:$0xff] %v7924_v44  ;;  %v3780_v57 = vrot.slane %v3772_v51, 2  ;;  %v3795_v35 = vmul.f32 %v7823_v2, %v3671_v54  ;;  %v3816_v28 = vmul.f32 %v7765_v27, %v3671_v54  ;;  %v4099_v48 = vperm.slane %v4095_v23, 0 }
 0x151   : > { %v8014_v49 = vld.sshfl [vmem:[#allocation1 + $0x20] sm:$0xff pattern:$0x73625140]  ;;  %4220 = vst [vmem:[#allocation1 + $0x3] ss:$4 sm:$0xff] %v7929_v36  ;;  %v3723_v21 = vadd.f32 %v3715_v45, %v3701_v16  ;;  %v3744_v34 = vadd.f32 %v3736_v9, %v3722_v5  ;;  %4275 = vrot.lane.b32.xlu0 %v11637_v32, %s6371_s26  ;;  %v3297_v17 = vrot.slane %v7916_v40, 6  ;;  %v3836_v2 = vadd.f32 %v8003_v55, %v3830_v15 }
 0x152   : > { %v3298_v44 = vrot.slane %v7916_v40, 7  ;;  %4221 = vst [vmem:[#allocation1 + $0x20] ss:$4 sm:$0xff] %v7931_v60  ;;  %v3781_v4 = vrot.slane %v7905_v50, 2  ;;  %v8028_v36 = vadd.f32 %v8003_v55, %v7910_v8  ;;  %v3802_v27 = vrot.slane %v3794_v63, 2 }
 0x153   : > { %4222 = vst [vmem:[#allocation1 + $0x21] ss:$4 sm:$0xff] %v7936_v13  ;;  %v3745_v18 = vadd.f32 %v3737_v31, %v3723_v21  ;;  %v3766_v29 = vadd.f32 %v3758_v41, %v3744_v34  ;;  %v3354_v61 = vperm.slane %v7916_v40, 0  ;;  %v8031_v54 = vperm.slane %v3292_v46, 0  ;;  %v6318_v21 = vld [vmem:[%s6420_s23 + $0x8] sm:$0xff] }
 0x154   : > { %v8033_v24 = vperm.slane %v3293_v22, 0  ;;  %v8035_v60 = vperm.slane %v3294_v39, 0  ;;  %4223 = vst [vmem:[#allocation1 + $0x22] ss:$4 sm:$0xff] %v7959_v37  ;;  %v3803_v0 = vrot.slane %v3795_v35, 2  ;;  %v3824_v8 = vrot.slane %v3816_v28, 2  ;;  %4568 = vrot.lane.b32.xlu1 %v4099_v48, %s6372_s6 }
 0x155   : > { %4224 = vst [vmem:[#allocation1 + $0x23] ss:$4 sm:$0xff] %v7971_v10  ;;  %v3767_v50 = vadd.f32 %v3759_v47, %v3745_v18  ;;  %v3788_v13 = vadd.f32 %v3780_v57, %v3766_v29  ;;  %v8040_v33 = vperm.slane %v3295_v56, 0  ;;  %v3844_v38 = vrot.slane %v3836_v2, 1  ;;  %v6319_v28 = vld [vmem:[%s6420_s23 + $0x10] sm:$0xff]  ;;  %v6320_v48 = vld [vmem:[%s6420_s23 + $0x18] sm:$0xff] }
 0x156   : > { %v3845_v62 = vrot.slane %v3836_v2, 2  ;;  %v3846_v46 = vrot.slane %v3836_v2, 3  ;;  %4283 = vrot.lane.b32.xlu2 %v7424_v53, %s6371_s26  ;;  %v3847_v22 = vrot.slane %v8028_v36, 1  ;;  %v3825_v37 = vrot.slane %v7949_v6, 2  ;;  %v8174_v40 = vld [vmem:[%s11359_s1 + $0x2] ss:$0 sm:$0xff] }
 0x157   : > { %v3789_v45 = vadd.f32 %v3781_v4, %v3767_v50  ;;  %v3810_v10 = vadd.f32 %v3802_v27, %v3788_v13  ;;  %v8046_v51 = vperm.slane %v3296_v42, 0  ;;  %v8048_v1 = vperm.slane %v3297_v17, 0 }
 0x158   : > { %v8050_v9 = vld.sshfl [vmem:[#allocation1] sm:$0xff pattern:$0x73625140]  ;;  %v3848_v3 = vrot.slane %v8028_v36, 2  ;;  %v8053_v26 = vperm.slane %v3298_v44, 0  ;;  %v8057_v53 = vperm.slane %v3836_v2, 0 }
 0x159   : > { %11638 = vst [vmem:[#allocation20_spill] sm:$0xff] %v8050_v9  ;;  %v3811_v25 = vadd.f32 %v3803_v0, %v3789_v45  ;;  %v3832_v23 = vadd.f32 %v3824_v8, %v3810_v10  ;;  %4285 = vrot.lane.b32.xlu0 %v7472_v20, %s6371_s26  ;;  %v3849_v6 = vrot.slane %v8028_v36, 3  ;;  %v8063_v39 = vperm.slane %v3844_v38, 0  ;;  %v8092_v44 = vld [vmem:[%s6420_s23] sm:$0xff]  ;;  %v11649_v8 = vld [vmem:[#allocation26_spill] sm:$0xff] }
 0x15a   : > { %4227 = vst [vmem:[#allocation1] ss:$4 sm:$0xff] %v3354_v61  ;;  %v8065_v56 = vperm.slane %v3845_v62, 0  ;;  %v8067_v15 = vperm.slane %v3846_v46, 0  ;;  %v8071_v63 = vperm.slane %v8028_v36, 0  ;;  %v8073_v16 = vperm.slane %v3847_v22, 0 }
 0x15b   : > { %4228 = vst [vmem:[#allocation1 + $0x1] ss:$4 sm:$0xff] %v8031_v54  ;;  %v3833_v20 = vadd.f32 %v3825_v37, %v3811_v25  ;;  %v3838_v5 = vadd.f32 %v8003_v55, %v3832_v23  ;;  %v8079_v41 = vperm.slane %v3848_v3, 0  ;;  %v294_v34 = vrot.slane %v6318_v21, 7  ;;  %v8121_v62 = vld [vmem:[%s11359_s1] ss:$0 sm:$0xff] }
 0x15c   : > { %4229 = vst [vmem:[#allocation1 + $0x2] ss:$4 sm:$0xff] %v8033_v24  ;;  %v8076_v31 = vld.sshfl [vmem:[#allocation1 + $0x20] sm:$0xff pattern:$0x73625140]  ;;  %4291 = vrot.lane.b32.xlu1 %v7628_v14, %s6371_s26  ;;  %v296_v32 = vrot.slane %v6319_v28, 7 }
 0x15d   : > { %11639 = vst [vmem:[#allocation22_spill] sm:$0xff] %v8071_v63  ;;  %v3839_v42 = vadd.f32 %v8003_v55, %v3833_v20  ;;  %v3850_v47 = vrot.slane %v3838_v5, 1  ;;  %v3851_v57 = vrot.slane %v3838_v5, 2  ;;  %v3852_v35 = vrot.slane %v3838_v5, 3  ;;  %v8129_v22 = vld [vmem:[%s11359_s1 + $0x3] ss:$0 sm:$0xff] }
 0x15e   : > { %11640 = vst [vmem:[#allocation34_spill] sm:$0xff] %v8073_v16  ;;  %4289 = vrot.lane.b32.xlu2 %v7565_v52, %s6371_s26  ;;  %v297_v17 = vrot.slane %v6320_v48, 7  ;;  %v11405_v55 = vrot.slane %v8092_v44, 7  ;;  %v8096_v2 = vperm.slane %v3849_v6, 0  ;;  %v8098_v36 = vperm.slane %v3838_v5, 0  ;;  %v11652_v6 = vld [vmem:[#allocation12_spill] sm:$0xff] }
 0x15f   : > { %11641 = vst [vmem:[#allocation35_spill] sm:$0xff] %v8076_v31  ;;  %v3853_v14 = vrot.slane %v3839_v42, 1  ;;  %v3854_v4 = vrot.slane %v3839_v42, 2  ;;  %v3855_v52 = vrot.slane %v3839_v42, 3  ;;  %v8101_v27 = vperm.slane %v3850_v47, 0  ;;  %v11655_v48 = vld [vmem:[#allocation33_spill] sm:$0xff] }
 0x160   : > { %4230 = vst [vmem:[#allocation1 + $0x3] ss:$4 sm:$0xff] %v8035_v60  ;;  %v8103_v18 = vperm.slane %v3851_v57, 0  ;;  %v8105_v29 = vperm.slane %v3852_v35, 0  ;;  %v8107_v50 = vperm.slane %v3839_v42, 0  ;;  %v8116_v38 = vsel %vm290_vm0, %v294_v34, 0.0 }
 0x161   : > { %4231 = vst [vmem:[#allocation1 + $0x20] ss:$4 sm:$0xff] %v8040_v33  ;;  %v8109_v13 = vperm.slane %v3853_v14, 0  ;;  %v8111_v0 = vperm.slane %v3854_v4, 0  ;;  %4287 = vrot.lane.b32.xlu0 %v11649_v8, %s6371_s26  ;;  %v8124_v46 = vsel %vm290_vm0, %v296_v32, %v297_v17  ;;  %v8134_v37 = vld [vmem:[%s11359_s1 + $0x6] ss:$0 sm:$0xff]  ;;  %v8144_v10 = vsel %vm290_vm0, %v11405_v55, %v294_v34 }
 0x162   : > { %4232 = vst [vmem:[#allocation1 + $0x21] ss:$4 sm:$0xff] %v8046_v51  ;;  %v8139_v45 = vld [vmem:[%s11359_s1 + $0x1] ss:$0 sm:$0xff]  ;;  %v8149_v25 = vsel %vm290_vm0, %v297_v17, 0.0  ;;  %v428_v20 = vmul.f32 %v8121_v62, %v11652_v6  ;;  %v8179_v35 = vperm.slane %v3855_v52, 0  ;;  %v560_v21 = vmul.f32 %v8134_v37, %v8124_v46 }
 0x163   : > { %4233 = vst [vmem:[#allocation1 + $0x22] ss:$4 sm:$0xff] %v8048_v1  ;;  %v8154_v23 = vld [vmem:[%s11359_s1 + $0x4] ss:$0 sm:$0xff]  ;;  %v8162_v5 = vmul.f32 %v8139_v45, %v11652_v6  ;;  %v8169_v57 = vld [vmem:[%s11359_s1 + $0x7] ss:$0 sm:$0xff]  ;;  %v8209_v8 = vmul.f32 %v8174_v40, %v11652_v6 }
 0x164   : > { %11642 = vst [vmem:[#allocation36_spill] sm:$0xff] %v8098_v36  ;;  %v11653_v42 = vld [vmem:[#allocation13_spill] sm:$0xff]  ;;  %4309 = vrot.lane.b32.xlu1 %v8014_v49, %s6371_s26  ;;  %v870_v34 = vmul.f32 %v8154_v23, %v8116_v38  ;;  %v8189_v28 = vmul.f32 %v8154_v23, %v8144_v10  ;;  %v8200_v14 = vmul.f32 %v8169_v57, %v8124_v46  ;;  %v11658_v55 = vld [vmem:[#allocation15_spill] sm:$0xff]  ;;  %v11677_v36 = vld [vmem:[#allocation30_spill] sm:$0xff] }
 0x165   : > { %4234 = vst [vmem:[#allocation1 + $0x23] ss:$4 sm:$0xff] %v8053_v26  ;;  %v627_v47 = vmul.f32 %v8139_v45, %v11653_v42  ;;  %v11659_v49 = vrot.slane %v11658_v55, 7 }
 0x166   : > { %11643 = vst [vmem:[#allocation37_spill] sm:$0xff] %v8101_v27  ;;  %4299 = vrot.lane.b32.xlu2 %v11655_v48, %s6371_s26  ;;  %v967_v52 = vrot.slane %v870_v34, 1  ;;  %v8225_v34 = vld [vmem:[%s11359_s1 + $0x5] ss:$0 sm:$0xff]  ;;  %v8301_v27 = vmul.f32 %v8139_v45, %v8144_v10 }
 0x167   : > { %11644 = vst [vmem:[#allocation38_spill] sm:$0xff] %v8103_v18  ;;  %v8146_v3 = vld.sshfl [vmem:[#allocation1] sm:$0xff pattern:$0x73625140]  ;;  %v725_v17 = vrot.slane %v627_v47, 1  ;;  %v11656_v47 = vld [vmem:[#allocation16_spill] sm:$0xff] }
 0x168   : > { %11645 = vst [vmem:[#allocation39_spill] sm:$0xff] %v8105_v29  ;;  %v11657_v48 = vrot.slane %v11656_v47, 7  ;;  %v11670_v47 = vperm.slane %v7438_v43, 0 }
 0x169   : > { %11646 = vst [vmem:[#allocation40_spill] sm:$0xff] %v8107_v50  ;;  %4303 = vrot.lane.b32.xlu0 %v7920_v12, %s6371_s26  ;;  %v8245_v12 = vmul.f32 %v8225_v34, %v8144_v10 }
 0x16a   : > { %11647 = vst [vmem:[#allocation41_spill] sm:$0xff] %v8109_v13  ;;  %v8218_v31 = vsel %vm290_vm0, %v11659_v49, %v11657_v48  ;;  %v11661_v49 = vrot.slane %v8162_v5, 1 }
 0x16b   : > { %11648 = vst [vmem:[#allocation42_spill] sm:$0xff] %v8111_v0 }
 0x16c   : > { %11650 = vst [vmem:[#allocation26_spill] sm:$0xff] %v8124_v46  ;;  %v8202_v4 = vld.sshfl [vmem:[#allocation1 + $0x20] sm:$0xff pattern:$0x73625140]  ;;  %v726_v48 = vsel %vm721_vm8, %v11661_v49, %v725_v17 }
 0x16d   : > { %11651 = vst [vmem:[#allocation43_spill] sm:$0xff] %v8149_v25  ;;  %v11662_v17 = vld [vmem:[#allocation5_spill] sm:$0xff] }
 0x16e   : > { %4237 = vst [vmem:[#allocation1] ss:$4 sm:$0xff] %v3354_v61  ;;  %v494_v61 = vmul.f32 %v8129_v22, %v8144_v10  ;;  %4301 = vrot.lane.b32.xlu2 %v7872_v59, %s6371_s26 }
 0x16f   : > { %4238 = vst [vmem:[#allocation1 + $0x1] ss:$4 sm:$0xff] %v8031_v54  ;;  %v8195_v54 = vsel %vm290_vm0, 0.0, %v296_v32  ;;  %v1354_v32 = vmul.f32 %v8174_v40, %v11653_v42 }
 0x170   : > { %11654 = vst [vmem:[#allocation44_spill] sm:$0xff] %v8179_v35  ;;  %v526_v6 = vadd.f32 %v494_v61, %v428_v20  ;;  %v1597_v20 = vmul.f32 %v8225_v34, %v8116_v38  ;;  %v11671_v35 = vrot.slane %v8245_v12, 2 }
 0x171   : > { %4239 = vst [vmem:[#allocation1 + $0x2] ss:$4 sm:$0xff] %v8033_v24  ;;  %v1112_v24 = vmul.f32 %v8169_v57, %v8149_v25  ;;  %v1452_v42 = vrot.slane %v1354_v32, 2  ;;  %4305 = vrot.lane.b32.xlu0 %v7944_v11, %s6371_s26 }
 0x172   : > { %4240 = vst [vmem:[#allocation1 + $0x3] ss:$4 sm:$0xff] %v8035_v60  ;;  %v11409_v60 = vrot.slane %v8209_v8, 2  ;;  %v592_v61 = vadd.f32 %v560_v21, %v526_v6  ;;  %v11666_v6 = vrot.slane %v8189_v28, 1  ;;  %v1694_v13 = vrot.slane %v1597_v20, 2 }
 0x173   : > { %11660 = vst [vmem:[#allocation33_spill] sm:$0xff] %v8218_v31 }
 0x174   : > { %4241 = vst [vmem:[#allocation1 + $0x20] ss:$4 sm:$0xff] %v8040_v33  ;;  %v1209_v33 = vrot.slane %v1112_v24, 1  ;;  %v11663_v24 = vrot.slane %v11662_v17, 7  ;;  %v1453_v9 = vsel %vm1448_vm9, %v11409_v60, %v1452_v42  ;;  %v968_v21 = vsel %vm721_vm8, %v11666_v6, %v967_v52 }
 0x175   : > { %4242 = vst [vmem:[#allocation1 + $0x21] ss:$4 sm:$0xff] %v8046_v51  ;;  %v8241_v51 = vld [vmem:[%s11359_s1 + $0x8] ss:$0 sm:$0xff]  ;;  %v495_v17 = vmul.f32 %v8129_v22, %v8195_v54  ;;  %v871_v42 = vmul.f32 %v8154_v23, %v8195_v54  ;;  %v8275_v52 = vmul.f32 %v8154_v23, %v8124_v46  ;;  %v1695_v0 = vsel %vm1448_vm9, %v11671_v35, %v1694_v13  ;;  %v11673_v13 = vld [vmem:[#allocation28_spill] sm:$0xff] }
 0x176   : > { %4243 = vst [vmem:[#allocation1 + $0x22] ss:$4 sm:$0xff] %v8048_v1  ;;  %v8250_v49 = vsel %vm290_vm0, 0.0, %v11663_v24  ;;  %v11665_v1 = vrot.slane %v8200_v14, 1  ;;  %v8266_v24 = vmul.f32 %v8241_v51, %v8124_v46  ;;  %4307 = vrot.lane.b32.xlu2 %v7990_v58, %s6371_s26  ;;  %v11681_v58 = vld [vmem:[#allocation14_spill] sm:$0xff] }
 0x177   : > { %11664 = vst [vmem:[#allocation5_spill] sm:$0xff] %v8250_v49  ;;  %v1113_v20 = vmul.f32 %v8169_v57, %v8250_v49  ;;  %v561_v31 = vmul.f32 %v8134_v37, %v8250_v49  ;;  %v969_v55 = vrot.slane %v871_v42, 1  ;;  %v11419_v59 = vrot.slane %v8275_v52, 1 }
 0x178   : > { %4244 = vst [vmem:[#allocation1 + $0x23] ss:$4 sm:$0xff] %v8053_v26  ;;  %v1210_v32 = vsel %vm721_vm8, %v11665_v1, %v1209_v33  ;;  %v1839_v26 = vmul.f32 %v8241_v51, %v8149_v25  ;;  %v835_v33 = vadd.f32 %v726_v48, %v592_v61  ;;  %v11415_v60 = vrot.slane %v8266_v24, 2  ;;  %v11668_v61 = vld [vmem:[#allocation8_spill] sm:$0xff] }
 0x179   : > { %11667 = vst [vmem:[#allocation45_spill] sm:$0xff] %v8275_v52  ;;  %v4245_v6 = vld.sshfl [vmem:[#allocation1] sm:$0xff pattern:$0x73625140]  ;;  %v8284_v1 = vmul.f32 %v8169_v57, %v11668_v61  ;;  %v1598_v42 = vmul.f32 %v8225_v34, %v8195_v54  ;;  %v971_v11 = vsel %vm721_vm8, %v969_v55, %v11419_v59  ;;  %v1840_v35 = vmul.f32 %v8241_v51, %v8250_v49 }
 0x17a   : > { %v1936_v50 = vrot.slane %v1839_v26, 2  ;;  %v1077_v48 = vadd.f32 %v968_v21, %v835_v33  ;;  %4247 = vst [vmem:[#allocation1] ss:$4 sm:$0xff] %v11670_v47  ;;  %4319 = vrot.lane.b32.xlu1 %v4245_v6, %s6371_s26  ;;  %v11672_v21 = vld [vmem:[#allocation27_spill] sm:$0xff]  ;;  %v1211_v47 = vrot.slane %v1113_v20, 1  ;;  %v8311_v6 = vmul.f32 %v8225_v34, %v8124_v46  ;;  %4315 = vrot.lane.b32.xlu0 %v8146_v3, %s6371_s26 }
 0x17b   : > { %11669 = vst [vmem:[#allocation46_spill] sm:$0xff] %v8284_v1  ;;  %v1696_v29 = vrot.slane %v1598_v42, 2  ;;  %v11679_v18 = vrot.slane %v8284_v1, 1  ;;  %v8351_v1 = vmul.f32 %v8174_v40, %v8144_v10 }
 0x17c   : > { %4248 = vst [vmem:[#allocation1 + $0x1] ss:$4 sm:$0xff] %v11672_v21  ;;  %v1937_v26 = vsel %vm1448_vm9, %v11415_v60, %v1936_v50  ;;  %v1319_v33 = vadd.f32 %v1210_v32, %v1077_v48  ;;  %v11675_v50 = vrot.slane %v8092_v44, 7  ;;  %v11676_v48 = vld [vmem:[#allocation29_spill] sm:$0xff]  ;;  %v8326_v44 = vmul.f32 %v8241_v51, %v11668_v61 }
 0x17d   : > { %4249 = vst [vmem:[#allocation1 + $0x2] ss:$4 sm:$0xff] %v11673_v13  ;;  %v1213_v49 = vsel %vm721_vm8, %v1211_v47, %v11679_v18  ;;  %v4270_v18 = vpop.permute.xlu2 %4269 }
 0x17e   : > { %11674 = vst [vmem:[#allocation27_spill] sm:$0xff] %v8311_v6  ;;  %v392_v32 = vsel %vm290_vm0, 0.0, %v11675_v50  ;;  %v1562_v60 = vadd.f32 %v1453_v9, %v1319_v33  ;;  %v8333_v9 = vld [vmem:[%s11360_s2] ss:$0 sm:$0xff]  ;;  %v1938_v33 = vrot.slane %v1840_v35, 2  ;;  %v11427_v52 = vrot.slane %v8326_v44, 2 }
 0x17f   : > { %v4246_v20 = vld.sshfl [vmem:[#allocation1 + $0x20] sm:$0xff pattern:$0x73625140]  ;;  %4250 = vst [vmem:[#allocation1 + $0x3] ss:$4 sm:$0xff] %v11676_v48  ;;  %v429_v50 = vmul.f32 %v8121_v62, %v392_v32  ;;  %v628_v59 = vmul.f32 %v8139_v45, %v392_v32  ;;  %v1355_v63 = vmul.f32 %v8174_v40, %v392_v32 }
 0x180   : > { %4251 = vst [vmem:[#allocation1 + $0x20] ss:$4 sm:$0xff] %v11677_v36  ;;  %v1804_v55 = vadd.f32 %v1695_v0, %v1562_v60  ;;  %v11680_v60 = vrot.slane %v8311_v6, 2 }
 0x181   : > { %11678 = vst [vmem:[#allocation28_spill] sm:$0xff] %v8326_v44  ;;  %v527_v16 = vadd.f32 %v495_v17, %v429_v50  ;;  %v727_v42 = vrot.slane %v628_v59, 1  ;;  %v8356_v17 = vsel %vm1448_vm9, %v1938_v33, %v11427_v52  ;;  %v1454_v50 = vrot.slane %v1355_v63, 2 }
 0x182   : > { %4252 = vst [vmem:[#allocation1 + $0x21] ss:$4 sm:$0xff] %v7957_v7  ;;  %v2046_v0 = vadd.f32 %v1937_v26, %v1804_v55  ;;  %v1698_v35 = vsel %vm1448_vm9, %v1696_v29, %v11680_v60  ;;  %4321 = vrot.lane.b32.xlu1 %v4246_v20, %s6371_s26  ;;  %v427_v26 = vmul.f32 %v8121_v62, %v11681_v58  ;;  %v11682_v59 = vrot.slane %v8301_v27, 1 }
 0x183   : > { %4253 = vst [vmem:[#allocation1 + $0x22] ss:$4 sm:$0xff] %v7965_v19  ;;  %v593_v47 = vadd.f32 %v561_v31, %v527_v16  ;;  %v11430_v60 = vrot.slane %v8351_v1, 2  ;;  %v559_v44 = vmul.f32 %v8134_v37, %v8195_v54  ;;  %v625_v16 = vmul.f32 %v8139_v45, %v11681_v58  ;;  %4317 = vrot.lane.b32.xlu0 %v8202_v4, %s6371_s26 }
 0x184   : > { %4254 = vst [vmem:[#allocation1 + $0x23] ss:$4 sm:$0xff] %v7969_v30  ;;  %v2080_v29 = vadd.f32 %v8333_v9, %v2046_v0  ;;  %v729_v55 = vsel %vm721_vm8, %v727_v42, %v11682_v59  ;;  %v1110_v31 = vmul.f32 %v8169_v57, %v8195_v54  ;;  %v1352_v20 = vmul.f32 %v8174_v40, %v11681_v58 }
 0x185   : > { %v836_v63 = vadd.f32 %v729_v55, %v593_v47  ;;  %v11683_v42 = vperm.slane %v7438_v43, 0  ;;  %v1456_v3 = vsel %vm1448_vm9, %v1454_v50, %v11430_v60  ;;  %v1837_v47 = vmul.f32 %v8241_v51, %v8195_v54 }
 0x186   : > { %v8368_v33 = vld.sshfl [vmem:[#allocation1] sm:$0xff pattern:$0x73625140]  ;;  %v8381_v0 = vsel %vm4574_vm12, %v2080_v29, %v4270_v18  ;;  %v493_v59 = vmul.f32 %v8129_v22, %v392_v32  ;;  %v722_v52 = vrot.slane %v625_v16, 1  ;;  %v1206_v58 = vrot.slane %v1110_v31, 1  ;;  %v11689_v16 = vld [vmem:[#allocation2_spill] sm:$0xff] }
 0x187   : > { %4257 = vst [vmem:[#allocation1] ss:$4 sm:$0xff] %v11683_v42  ;;  %v1078_v55 = vadd.f32 %v971_v11, %v836_v63  ;;  %v1449_v6 = vrot.slane %v1352_v20, 2  ;;  %v1933_v43 = vrot.slane %v1837_v47, 2  ;;  %v868_v29 = vmul.f32 %v8154_v23, %v392_v32  ;;  %v11692_v31 = vld [vmem:[#allocation17_spill] sm:$0xff] }
 0x188   : > { %11684 = vst [vmem:[#allocation29_spill] sm:$0xff] %v8381_v0  ;;  %v525_v18 = vadd.f32 %v493_v59, %v427_v26  ;;  %v1595_v50 = vmul.f32 %v8225_v34, %v392_v32  ;;  %v11685_v0 = vrot.slane %v8162_v5, 1  ;;  %v11686_v11 = vrot.slane %v8200_v14, 1  ;;  %v8432_v59 = vld [vmem:[%s6420_s23 + $0x58] sm:$0xff] }
 0x189   : > { %4258 = vst [vmem:[#allocation1 + $0x1] ss:$4 sm:$0xff] %v11672_v21  ;;  %v1320_v60 = vadd.f32 %v1213_v49, %v1078_v55  ;;  %v11688_v32 = vrot.slane %v8266_v24, 2  ;;  %v435_v24 = vmul.f32 %v8121_v62, %v11692_v31 }
 0x18a   : > { %4259 = vst [vmem:[#allocation1 + $0x2] ss:$4 sm:$0xff] %v11673_v13  ;;  %v724_v21 = vsel %vm721_vm8, %v722_v52, %v11685_v0  ;;  %v1208_v63 = vsel %vm721_vm8, %v1206_v58, %v11686_v11  ;;  %v11687_v13 = vrot.slane %v8209_v8, 2  ;;  %v591_v5 = vadd.f32 %v559_v44, %v525_v18  ;;  %v6322_v58 = vld [vmem:[%s6420_s23 + $0x50] sm:$0xff]  ;;  %v4272_v11 = vpop.permute.xlu2 %4271 }
 0x18b   : > { %v4256_v42 = vld.sshfl [vmem:[#allocation1 + $0x20] sm:$0xff pattern:$0x73625140]  ;;  %4260 = vst [vmem:[#allocation1 + $0x3] ss:$4 sm:$0xff] %v11676_v48  ;;  %v8408_v49 = vsel %vm1448_vm9, %v1933_v43, %v11688_v32  ;;  %v964_v48 = vrot.slane %v868_v29, 1  ;;  %v1563_v14 = vadd.f32 %v1456_v3, %v1320_v60  ;;  %4323 = vrot.lane.b32.xlu0 %v8368_v33, %s6371_s26 }
 0x18c   : > { %v1451_v26 = vsel %vm1448_vm9, %v1449_v6, %v11687_v13  ;;  %4261 = vst [vmem:[#allocation1 + $0x20] ss:$4 sm:$0xff] %v11677_v36  ;;  %4325 = vrot.lane.b32.xlu2 %v4256_v42, %s6371_s26  ;;  %v1691_v52 = vrot.slane %v1595_v50, 2  ;;  %v308_v8 = vrot.slane %v6322_v58, 7  ;;  %v11690_v6 = vrot.slane %v11689_v16, 7 }
 0x18d   : > { %4262 = vst [vmem:[#allocation1 + $0x21] ss:$4 sm:$0xff] %v7957_v7  ;;  %v834_v20 = vadd.f32 %v724_v21, %v591_v5  ;;  %v11693_v44 = vrot.slane %v8189_v28, 1  ;;  %v11694_v7 = vrot.slane %v8245_v12, 2  ;;  %v1805_v47 = vadd.f32 %v1698_v35, %v1563_v14  ;;  %v11695_v35 = vld [vmem:[#allocation9_spill] sm:$0xff] }
 0x18e   : > { %v8415_v36 = vsel %vm290_vm0, 0.0, %v11690_v6  ;;  %4263 = vst [vmem:[#allocation1 + $0x22] ss:$4 sm:$0xff] %v7965_v19  ;;  %v309_v19 = vrot.slane %v8432_v59, 7  ;;  %v8436_v28 = vsel %vm290_vm0, 0.0, %v308_v8  ;;  %v637_v12 = vmul.f32 %v8139_v45, %v11692_v31 }
 0x18f   : > { %11691 = vst [vmem:[#allocation30_spill] sm:$0xff] %v8415_v36  ;;  %v966_v0 = vsel %vm721_vm8, %v964_v48, %v11693_v44  ;;  %v1693_v60 = vsel %vm1448_vm9, %v1691_v52, %v11694_v7  ;;  %v501_v3 = vmul.f32 %v8129_v22, %v8415_v36  ;;  %v8445_v4 = vmul.f32 %v8139_v45, %v11695_v35  ;;  %v11698_v48 = vld [vmem:[#allocation4_spill] sm:$0xff] }
 0x190   : > { %4264 = vst [vmem:[#allocation1 + $0x23] ss:$4 sm:$0xff] %v7969_v30  ;;  %v1076_v55 = vadd.f32 %v966_v0, %v834_v20  ;;  %v567_v30 = vmul.f32 %v8134_v37, %v8436_v28  ;;  %v2047_v18 = vadd.f32 %v8356_v17, %v1805_v47  ;;  %v8452_v29 = vsel %vm290_vm0, %v308_v8, %v309_v19 }
 0x191   : > { %4367 = vst [vmem:[#allocation1 + $0x10] ss:$2 sm:$0xff] %v8065_v56  ;;  %v533_v43 = vadd.f32 %v501_v3, %v435_v24  ;;  %v742_v50 = vrot.slane %v637_v12, 1  ;;  %v880_v42 = vmul.f32 %v8154_v23, %v8415_v36  ;;  %v11437_v5 = vrot.slane %v8445_v4, 1 }
 0x192   : > { %4369 = vst [vmem:[#allocation1 + $0x11] ss:$2 sm:$0xff] %v8067_v15  ;;  %v8456_v21 = vld.sshfl [vmem:[#allocation1] sm:$0xff pattern:$0x73625140]  ;;  %v1318_v13 = vadd.f32 %v1208_v63, %v1076_v55  ;;  %v8462_v17 = vmul.f32 %v8154_v23, %v11698_v48  ;;  %v2081_v52 = vadd.f32 %v8333_v9, %v2047_v18  ;;  %v1122_v58 = vmul.f32 %v8169_v57, %v8436_v28 }
 0x193   : > { %11696 = vst [vmem:[#allocation2_spill] sm:$0xff] %v8452_v29  ;;  %v599_v32 = vadd.f32 %v567_v30, %v533_v43  ;;  %v984_v14 = vrot.slane %v880_v42, 1  ;;  %v8470_v8 = vmul.f32 %v8169_v57, %v8452_v29  ;;  %v744_v16 = vsel %vm721_vm8, %v742_v50, %v11437_v5  ;;  %v8502_v18 = vld [vmem:[%s6420_s23 + $0x60] sm:$0xff] }
 0x194   : > { %11697 = vst [vmem:[#allocation47_spill] sm:$0xff] %v8456_v21  ;;  %v1561_v63 = vadd.f32 %v1451_v26, %v1318_v13  ;;  %v11436_v6 = vrot.slane %v8462_v17, 1  ;;  %v1364_v24 = vmul.f32 %v8174_v40, %v11692_v31  ;;  %v8481_v20 = vsel %vm4574_vm12, %v2081_v52, %v4272_v11  ;;  %v4268_v52 = vpop.permute.xlu1 %4267 }
 0x195   : > { %4375 = vst [vmem:[#allocation1 + $0x30] ss:$2 sm:$0xff] %v8065_v56  ;;  %v842_v44 = vadd.f32 %v744_v16, %v599_v32  ;;  %v1226_v0 = vrot.slane %v1122_v58, 1  ;;  %v11435_v7 = vrot.slane %v8470_v8, 1  ;;  %v8491_v12 = vmul.f32 %v8174_v40, %v11695_v35 }
 0x196   : > { %4377 = vst [vmem:[#allocation1 + $0x31] ss:$2 sm:$0xff] %v8067_v15  ;;  %v1803_v3 = vadd.f32 %v1693_v60, %v1561_v63  ;;  %v986_v47 = vsel %vm721_vm8, %v984_v14, %v11436_v6  ;;  %v1469_v55 = vrot.slane %v1364_v24, 2  ;;  %v1607_v60 = vmul.f32 %v8225_v34, %v8415_v36  ;;  %v6325_v63 = vld [vmem:[%s6420_s23 + $0x68] sm:$0xff] }
 0x197   : > { %4363 = vst [vmem:[#allocation1] ss:$2 sm:$0xff] %v8057_v53  ;;  %v8484_v26 = vld.sshfl [vmem:[#allocation1 + $0x20] sm:$0xff pattern:$0x73625140]  ;;  %v1084_v43 = vadd.f32 %v986_v47, %v842_v44  ;;  %v1228_v30 = vsel %vm721_vm8, %v1226_v0, %v11435_v7  ;;  %v11431_v50 = vrot.slane %v8502_v18, 7  ;;  %v8510_v13 = vmul.f32 %v8225_v34, %v11698_v48 }
 0x198   : > { %4365 = vst [vmem:[#allocation1 + $0x1] ss:$2 sm:$0xff] %v8063_v39  ;;  %v2045_v11 = vadd.f32 %v8408_v49, %v1803_v3  ;;  %v11434_v33 = vrot.slane %v8491_v12, 2  ;;  %v1849_v32 = vmul.f32 %v8241_v51, %v8436_v28  ;;  %v1711_v58 = vrot.slane %v1607_v60, 2 }
 0x199   : > { %11699 = vst [vmem:[#allocation48_spill] sm:$0xff] %v8481_v20  ;;  %v4379_v42 = vld.sshfl [vmem:[#allocation1 + $0x10] sm:$0xff pattern:$0x75316420]  ;;  %v1326_v14 = vadd.f32 %v1228_v30, %v1084_v43  ;;  %v8518_v49 = vmul.f32 %v8241_v51, %v8452_v29  ;;  %v312_v16 = vrot.slane %v6325_v63, 7  ;;  %v11433_v3 = vrot.slane %v8510_v13, 2 }
 0x19a   : > { %11700 = vst [vmem:[#allocation49_spill] sm:$0xff] %v8484_v26  ;;  %4468 = vrot.lane.b32.xlu1 %v4379_v42, %s6373_s9  ;;  %v2079_v44 = vadd.f32 %v8333_v9, %v2045_v11  ;;  %v1471_v0 = vsel %vm1448_vm9, %v1469_v55, %v11434_v33  ;;  %v438_v47 = vmul.f32 %v8121_v62, %v11698_v48  ;;  %v1953_v30 = vrot.slane %v1849_v32, 2  ;;  %v11703_v63 = vld [vmem:[#allocation3_spill] sm:$0xff]  ;;  %v11713_v20 = vld [vmem:[#allocation6_spill] sm:$0xff] }
 0x19b   : > { %4371 = vst [vmem:[#allocation1 + $0x20] ss:$2 sm:$0xff] %v8057_v53  ;;  %v1569_v43 = vadd.f32 %v1471_v0, %v1326_v14  ;;  %v11432_v60 = vrot.slane %v8518_v49, 2  ;;  %v8534_v42 = vsel %vm290_vm0, %v11431_v50, %v312_v16  ;;  %v1713_v11 = vsel %vm1448_vm9, %v1711_v58, %v11433_v3 }
 0x19c   : > { %4373 = vst [vmem:[#allocation1 + $0x21] ss:$2 sm:$0xff] %v8063_v39  ;;  %v8538_v55 = vsel %vm4574_vm12, %v2079_v44, %v4268_v52  ;;  %v8551_v14 = vsel %vm290_vm0, %v309_v19, 0.0  ;;  %v8557_v52 = vsel %vm290_vm0, %v312_v16, 0.0  ;;  %v504_v58 = vmul.f32 %v8129_v22, %v8452_v29 }
 0x19d   : > { %4384 = vst [vmem:[#allocation1 + $0x10] ss:$2 sm:$0xff] %v8065_v56  ;;  %v4381_v24 = vld.sshfl [vmem:[#allocation1 + $0x30] sm:$0xff pattern:$0x75316420]  ;;  %v1811_v0 = vadd.f32 %v1713_v11, %v1569_v43  ;;  %v570_v44 = vmul.f32 %v8134_v37, %v8534_v42  ;;  %v8565_v59 = vmul.f32 %v8139_v45, %v11698_v48  ;;  %v8571_v43 = vmul.f32 %v8154_v23, %v8452_v29 }
 0x19e   : > { %4385 = vst [vmem:[#allocation1 + $0x11] ss:$2 sm:$0xff] %v8067_v15  ;;  %4472 = vrot.lane.b32.xlu0 %v4381_v24, %s6373_s9  ;;  %v8578_v50 = vmul.f32 %v8169_v57, %v8534_v42  ;;  %v1127_v24 = vmul.f32 %v8169_v57, %v8557_v52  ;;  %v8594_v7 = vmul.f32 %v8174_v40, %v11698_v48 }
 0x19f   : > { %4388 = vst [vmem:[#allocation1 + $0x30] ss:$2 sm:$0xff] %v8065_v56  ;;  %v11704_v56 = vrot.slane %v11703_v63, 7  ;;  %v536_v63 = vadd.f32 %v504_v58, %v438_v47 }
 0x1a0   : > { %11701 = vst [vmem:[#allocation50_spill] sm:$0xff] %v8534_v42  ;;  %v11439_v6 = vrot.slane %v8578_v50, 1 }
 0x1a1   : > { %4389 = vst [vmem:[#allocation1 + $0x31] ss:$2 sm:$0xff] %v8067_v15  ;;  %v8546_v32 = vsel %vm290_vm0, %v11704_v56, 0.0  ;;  %v1955_v15 = vsel %vm1448_vm9, %v1953_v30, %v11432_v60  ;;  %v4378_v30 = vld.sshfl [vmem:[#allocation1] sm:$0xff pattern:$0x75316420]  ;;  %v885_v56 = vmul.f32 %v8154_v23, %v8551_v14 }
 0x1a2   : > { %11702 = vst [vmem:[#allocation51_spill] sm:$0xff] %v8538_v55  ;;  %v642_v19 = vmul.f32 %v8139_v45, %v8546_v32  ;;  %v2053_v16 = vadd.f32 %v1955_v15, %v1811_v0  ;;  %v11438_v60 = vrot.slane %v8565_v59, 1  ;;  %v602_v15 = vadd.f32 %v570_v44, %v536_v63 }
 0x1a3   : > { %11705 = vst [vmem:[#allocation3_spill] sm:$0xff] %v8546_v32  ;;  %v4380_v11 = vld.sshfl [vmem:[#allocation1 + $0x20] sm:$0xff pattern:$0x75316420]  ;;  %v992_v58 = vrot.slane %v885_v56, 1  ;;  %v1369_v5 = vmul.f32 %v8174_v40, %v8546_v32  ;;  %v1854_v56 = vmul.f32 %v8241_v51, %v8557_v52  ;;  %v11714_v55 = vrot.slane %v11713_v20, 7 }
 0x1a4   : > { %11706 = vst [vmem:[#allocation52_spill] sm:$0xff] %v8551_v14  ;;  %v750_v3 = vrot.slane %v642_v19, 1  ;;  %v8588_v47 = vadd.f32 %v8333_v9, %v2053_v16  ;;  %4470 = vrot.lane.b32.xlu1 %v4380_v11, %s6373_s9  ;;  %v1234_v16 = vrot.slane %v1127_v24, 1  ;;  %v11710_v11 = vrot.slane %v8571_v43, 1 }
 0x1a5   : > { %11707 = vst [vmem:[#allocation53_spill] sm:$0xff] %v8557_v52  ;;  %v8585_v0 = vld.sshfl [vmem:[#allocation1 + $0x10] sm:$0xff pattern:$0x75316420]  ;;  %v1600_v52 = vmul.f32 %v8225_v34, %v8149_v25 }
 0x1a6   : > { %4382 = vst [vmem:[#allocation1] ss:$2 sm:$0xff] %v8057_v53  ;;  %v751_v19 = vsel %vm721_vm8, %v11438_v60, %v750_v3  ;;  %v993_v63 = vsel %vm721_vm8, %v11710_v11, %v992_v58  ;;  %v8612_v3 = vmul.f32 %v8225_v34, %v8452_v29  ;;  %v1235_v24 = vsel %vm721_vm8, %v11439_v6, %v1234_v16 }
 0x1a7   : > { %11708 = vst [vmem:[#allocation54_spill] sm:$0xff] %v8585_v0  ;;  %v845_v44 = vadd.f32 %v751_v19, %v602_v15  ;;  %v1477_v60 = vrot.slane %v1369_v5, 2  ;;  %v1612_v15 = vmul.f32 %v8225_v34, %v8551_v14  ;;  %v8622_v19 = vmul.f32 %v8241_v51, %v8534_v42  ;;  %4466 = vrot.lane.b32.xlu0 %v4378_v30, %s6373_s9 }
 0x1a8   : > { %4383 = vst [vmem:[#allocation1 + $0x1] ss:$2 sm:$0xff] %v8063_v39  ;;  %v8603_v33 = vld.sshfl [vmem:[#allocation1 + $0x30] sm:$0xff pattern:$0x75316420]  ;;  %v11442_v11 = vrot.slane %v8612_v3, 2 }
 0x1a9   : > { %4396 = vst [vmem:[#allocation1 + $0x10] ss:$2 sm:$0xff] %v8079_v41  ;;  %v1087_v58 = vadd.f32 %v993_v63, %v845_v44  ;;  %v8631_v16 = vsel %vm290_vm0, %v11714_v55, 0.0  ;;  %v11716_v5 = vrot.slane %v8594_v7, 2  ;;  %v11445_v26 = vrot.slane %v8622_v19, 2 }
 0x1aa   : > { %11709 = vst [vmem:[#allocation55_spill] sm:$0xff] %v8603_v33  ;;  %v1719_v33 = vrot.slane %v1612_v15, 2  ;;  %v496_v44 = vmul.f32 %v8129_v22, %v8124_v46  ;;  %v1961_v63 = vrot.slane %v1854_v56, 2  ;;  %v562_v55 = vmul.f32 %v8134_v37, %v11668_v61 }
 0x1ab   : > { %4397 = vst [vmem:[#allocation1 + $0x11] ss:$2 sm:$0xff] %v8096_v2  ;;  %v1478_v6 = vsel %vm1448_vm9, %v11716_v5, %v1477_v60  ;;  %v1329_v20 = vadd.f32 %v1235_v24, %v1087_v58  ;;  %v873_v15 = vmul.f32 %v8154_v23, %v8149_v25  ;;  %v1115_v30 = vmul.f32 %v8169_v57, %v8631_v16  ;;  %v11720_v25 = vld [vmem:[#allocation45_spill] sm:$0xff] }
 0x1ac   : > { %11711 = vst [vmem:[#allocation56_spill] sm:$0xff] %v8612_v3  ;;  %v1720_v60 = vsel %vm1448_vm9, %v11442_v11, %v1719_v33  ;;  %v1962_v24 = vsel %vm1448_vm9, %v11445_v26, %v1961_v63  ;;  %v11717_v33 = vld [vmem:[#allocation22_spill] sm:$0xff]  ;;  %v1699_v0 = vrot.slane %v1600_v52, 2  ;;  %v430_v63 = vmul.f32 %v8121_v62, %v8144_v10 }
 0x1ad   : > { %4400 = vst [vmem:[#allocation1 + $0x30] ss:$2 sm:$0xff] %v8079_v41  ;;  %v1572_v56 = vadd.f32 %v1478_v6, %v1329_v20  ;;  %v972_v11 = vrot.slane %v873_v15, 1  ;;  %v1214_v21 = vrot.slane %v1115_v30, 1  ;;  %v11718_v20 = vld [vmem:[#allocation34_spill] sm:$0xff] }
 0x1ae   : > { %11712 = vst [vmem:[#allocation57_spill] sm:$0xff] %v8622_v19  ;;  %v11721_v19 = vrot.slane %v11720_v25, 1  ;;  %v11722_v30 = vld [vmem:[#allocation46_spill] sm:$0xff] }
 0x1af   : > { %4401 = vst [vmem:[#allocation1 + $0x31] ss:$2 sm:$0xff] %v8096_v2  ;;  %v4390_v58 = vld.sshfl [vmem:[#allocation1] sm:$0xff pattern:$0x75316420]  ;;  %v1814_v6 = vadd.f32 %v1720_v60, %v1572_v56  ;;  %v11724_v56 = vrot.slane %v8351_v1, 2 }
 0x1b0   : > { %11715 = vst [vmem:[#allocation6_spill] sm:$0xff] %v8631_v16  ;;  %4474 = vrot.lane.b32.xlu2 %v4390_v58, %s6373_s9  ;;  %v973_v15 = vsel %vm721_vm8, %v11721_v19, %v972_v11  ;;  %v11727_v19 = vld [vmem:[#allocation7_spill] sm:$0xff]  ;;  %v11730_v1 = vld [vmem:[#allocation28_spill] sm:$0xff] }
 0x1b1   : > { %4386 = vst [vmem:[#allocation1 + $0x20] ss:$2 sm:$0xff] %v8057_v53  ;;  %v630_v53 = vmul.f32 %v8139_v45, %v8116_v38  ;;  %v2056_v3 = vadd.f32 %v1962_v24, %v1814_v6  ;;  %v11728_v11 = vrot.slane %v11727_v19, 7  ;;  %v431_v24 = vmul.f32 %v8121_v62, %v8195_v54 }
 0x1b2   : > { %4387 = vst [vmem:[#allocation1 + $0x21] ss:$2 sm:$0xff] %v8063_v39  ;;  %v1357_v39 = vmul.f32 %v8174_v40, %v8116_v38  ;;  %v1842_v38 = vmul.f32 %v8241_v51, %v8631_v16 }
 0x1b3   : > { %v730_v5 = vrot.slane %v630_v53, 1  ;;  %4394 = vst [vmem:[#allocation1] ss:$2 sm:$0xff] %v11717_v33  ;;  %v11719_v53 = vrot.slane %v8301_v27, 1  ;;  %v11725_v27 = vld [vmem:[#allocation27_spill] sm:$0xff] }
 0x1b4   : > { %v1457_v42 = vrot.slane %v1357_v39, 2  ;;  %4395 = vst [vmem:[#allocation1 + $0x1] ss:$2 sm:$0xff] %v11718_v20  ;;  %v11723_v39 = vrot.slane %v11722_v30, 1  ;;  %v1941_v60 = vrot.slane %v1842_v38, 2  ;;  %v11726_v10 = vrot.slane %v11725_v27, 2 }
 0x1b5   : > { %v731_v26 = vsel %vm721_vm8, %v11719_v53, %v730_v5  ;;  %v528_v5 = vadd.f32 %v496_v44, %v430_v63  ;;  %v8687_v53 = vsel %vm290_vm0, %v11728_v11, 0.0  ;;  %v11732_v38 = vld [vmem:[#allocation5_spill] sm:$0xff]  ;;  %v4403_v44 = vld.sshfl [vmem:[#allocation1 + $0x10] sm:$0xff pattern:$0x75316420]  ;;  %v8702_v63 = vadd.f32 %v8333_v9, %v2056_v3 }
 0x1b6   : > { %v4405_v58 = vld.sshfl [vmem:[#allocation1 + $0x30] sm:$0xff pattern:$0x75316420]  ;;  %v1215_v16 = vsel %vm721_vm8, %v11723_v39, %v1214_v21  ;;  %v1458_v52 = vsel %vm1448_vm9, %v11724_v56, %v1457_v42  ;;  %v1700_v25 = vsel %vm1448_vm9, %v11726_v10, %v1699_v0  ;;  %11729 = vst [vmem:[#allocation22_spill] sm:$0xff] %v8687_v53  ;;  %v11731_v21 = vrot.slane %v11730_v1, 2 }
 0x1b7   : > { %4488 = vrot.lane.b32.xlu1 %v4405_v58, %s6373_s9  ;;  %4412 = vst [vmem:[#allocation1 + $0x30] ss:$2 sm:$0xff] %v8079_v41  ;;  %v497_v6 = vmul.f32 %v8129_v22, %v11732_v38  ;;  %v563_v0 = vmul.f32 %v8134_v37, %v11692_v31  ;;  %v594_v58 = vadd.f32 %v562_v55, %v528_v5 }
 0x1b8   : > { %4413 = vst [vmem:[#allocation1 + $0x31] ss:$2 sm:$0xff] %v8096_v2  ;;  %v8693_v42 = vsel %vm1448_vm9, %v11731_v21, %v1941_v60  ;;  %v631_v30 = vmul.f32 %v8139_v45, %v8195_v54  ;;  %v8708_v39 = vmul.f32 %v8139_v45, %v8124_v46  ;;  %v874_v27 = vmul.f32 %v8154_v23, %v11732_v38 }
 0x1b9   : > { %4408 = vst [vmem:[#allocation1 + $0x10] ss:$2 sm:$0xff] %v8079_v41  ;;  %v8711_v60 = vld.sshfl [vmem:[#allocation1 + $0x20] sm:$0xff pattern:$0x75316420]  ;;  %v529_v56 = vadd.f32 %v497_v6, %v431_v24  ;;  %v8717_v3 = vmul.f32 %v8154_v23, %v11668_v61  ;;  %v1116_v55 = vmul.f32 %v8169_v57, %v11692_v31  ;;  %v837_v10 = vadd.f32 %v731_v26, %v594_v58 }
 0x1ba   : > { %11733 = vst [vmem:[#allocation34_spill] sm:$0xff] %v8708_v39  ;;  %v732_v5 = vrot.slane %v631_v30, 1  ;;  %v11454_v19 = vrot.slane %v8708_v39, 1  ;;  %v8725_v41 = vmul.f32 %v8169_v57, %v11695_v35  ;;  %v974_v1 = vrot.slane %v874_v27, 1  ;;  %4484 = vrot.lane.b32.xlu2 %v4403_v44, %s6373_s9  ;;  %v11763_v39 = vld [vmem:[#allocation44_spill] sm:$0xff] }
 0x1bb   : > { %11734 = vst [vmem:[#allocation45_spill] sm:$0xff] %v8711_v60  ;;  %v595_v11 = vadd.f32 %v563_v0, %v529_v56  ;;  %v11453_v21 = vrot.slane %v8717_v3, 1  ;;  %v1216_v24 = vrot.slane %v1116_v55, 1  ;;  %v4402_v6 = vld.sshfl [vmem:[#allocation1] sm:$0xff pattern:$0x75316420]  ;;  %v1079_v60 = vadd.f32 %v973_v15, %v837_v10  ;;  %v8756_v10 = vpop.permute.xlu2 %4564 }
 0x1bc   : > { %11735 = vst [vmem:[#allocation46_spill] sm:$0xff] %v8717_v3  ;;  %v11452_v26 = vrot.slane %v8725_v41, 1  ;;  %v1358_v58 = vmul.f32 %v8174_v40, %v8195_v54  ;;  %v8742_v44 = vmul.f32 %v8174_v40, %v8124_v46  ;;  %v1601_v15 = vmul.f32 %v8225_v34, %v11732_v38 }
 0x1bd   : > { %4409 = vst [vmem:[#allocation1 + $0x11] ss:$2 sm:$0xff] %v8096_v2  ;;  %v734_v2 = vsel %vm721_vm8, %v732_v5, %v11454_v19  ;;  %v976_v30 = vsel %vm721_vm8, %v974_v1, %v11453_v21  ;;  %v1321_v56 = vadd.f32 %v1215_v16, %v1079_v60  ;;  %v8752_v55 = vmul.f32 %v8225_v34, %v11668_v61 }
 0x1be   : > { %11736 = vst [vmem:[#allocation27_spill] sm:$0xff] %v8725_v41  ;;  %v838_v0 = vadd.f32 %v734_v2, %v595_v11  ;;  %v1218_v54 = vsel %vm721_vm8, %v1216_v24, %v11452_v26  ;;  %v1459_v27 = vrot.slane %v1358_v58, 2  ;;  %v11456_v11 = vrot.slane %v8742_v44, 2 }
 0x1bf   : > { %4398 = vst [vmem:[#allocation1 + $0x20] ss:$2 sm:$0xff] %v11717_v33  ;;  %4482 = vrot.lane.b32.xlu1 %v4402_v6, %s6373_s9  ;;  %v1701_v1 = vrot.slane %v1601_v15, 2  ;;  %v1843_v16 = vmul.f32 %v8241_v51, %v11692_v31  ;;  %v1564_v60 = vadd.f32 %v1458_v52, %v1321_v56  ;;  %v11457_v24 = vrot.slane %v8752_v55, 2  ;;  %v11741_v15 = vld [vmem:[#allocation38_spill] sm:$0xff] }
 0x1c0   : > { %4406 = vst [vmem:[#allocation1] ss:$2 sm:$0xff] %v11717_v33  ;;  %v1080_v5 = vadd.f32 %v976_v30, %v838_v0  ;;  %v8764_v2 = vmul.f32 %v8241_v51, %v11695_v35  ;;  %v436_v6 = vmul.f32 %v8121_v62, %v11695_v35  ;;  %v1461_v0 = vsel %vm1448_vm9, %v1459_v27, %v11456_v11 }
 0x1c1   : > { %11737 = vst [vmem:[#allocation7_spill] sm:$0xff] %v8742_v44  ;;  %v1943_v30 = vrot.slane %v1843_v16, 2  ;;  %v502_v52 = vmul.f32 %v8129_v22, %v11698_v48  ;;  %v1806_v56 = vadd.f32 %v1700_v25, %v1564_v60  ;;  %v1703_v21 = vsel %vm1448_vm9, %v1701_v1, %v11457_v24 }
 0x1c2   : > { %4407 = vst [vmem:[#allocation1 + $0x1] ss:$2 sm:$0xff] %v11718_v20  ;;  %v1322_v26 = vadd.f32 %v1218_v54, %v1080_v5  ;;  %v11461_v19 = vrot.slane %v8764_v2, 2  ;;  %v568_v54 = vmul.f32 %v8134_v37, %v8452_v29  ;;  %v11742_v5 = vld [vmem:[#allocation39_spill] sm:$0xff]  ;;  %v639_v16 = vmul.f32 %v8139_v45, %v8687_v53 }
 0x1c3   : > { %11738 = vst [vmem:[#allocation28_spill] sm:$0xff] %v8752_v55  ;;  %v534_v27 = vadd.f32 %v502_v52, %v436_v6  ;;  %v882_v11 = vmul.f32 %v8154_v23, %v8546_v32  ;;  %v2048_v25 = vadd.f32 %v8693_v42, %v1806_v56  ;;  %v1124_v60 = vmul.f32 %v8169_v57, %v8551_v14 }
 0x1c4   : > { %4399 = vst [vmem:[#allocation1 + $0x21] ss:$2 sm:$0xff] %v11718_v20  ;;  %v8768_v58 = vld.sshfl [vmem:[#allocation1 + $0x10] sm:$0xff pattern:$0x75316420]  ;;  %v1565_v31 = vadd.f32 %v1461_v0, %v1322_v26  ;;  %v1945_v1 = vsel %vm1448_vm9, %v1943_v30, %v11461_v19  ;;  %v1366_v24 = vmul.f32 %v8174_v40, %v8687_v53  ;;  %v745_v52 = vrot.slane %v639_v16, 1 }
 0x1c5   : > { %11739 = vst [vmem:[#allocation58_spill] sm:$0xff] %v8756_v10  ;;  %v600_v0 = vadd.f32 %v568_v54, %v534_v27  ;;  %v987_v48 = vrot.slane %v882_v11, 1  ;;  %v8797_v42 = vadd.f32 %v8333_v9, %v2048_v25  ;;  %v1229_v56 = vrot.slane %v1124_v60, 1 }
 0x1c6   : > { %11740 = vst [vmem:[#allocation59_spill] sm:$0xff] %v8764_v2  ;;  %v1807_v6 = vadd.f32 %v1703_v21, %v1565_v31  ;;  %v1472_v2 = vrot.slane %v1366_v24, 2  ;;  %v1609_v30 = vmul.f32 %v8225_v34, %v8546_v32  ;;  %v4284_v31 = vpop.permute.xlu2 %4283  ;;  %v11743_v11 = vrot.slane %v8445_v4, 1 }
 0x1c7   : > { %4420 = vst [vmem:[#allocation1 + $0x10] ss:$2 sm:$0xff] %v11741_v15  ;;  %v11744_v27 = vrot.slane %v8462_v17, 1  ;;  %v1851_v24 = vmul.f32 %v8241_v51, %v8551_v14  ;;  %v11746_v4 = vrot.slane %v8470_v8, 1  ;;  %v11747_v17 = vrot.slane %v8491_v12, 2 }
 0x1c8   : > { %4421 = vst [vmem:[#allocation1 + $0x11] ss:$2 sm:$0xff] %v11742_v5  ;;  %v2049_v21 = vadd.f32 %v1945_v1, %v1807_v6  ;;  %v746_v54 = vsel %vm721_vm8, %v11743_v11, %v745_v52  ;;  %v11748_v1 = vld [vmem:[#allocation36_spill] sm:$0xff]  ;;  %v11749_v6 = vld [vmem:[#allocation37_spill] sm:$0xff]  ;;  %v1610_v3 = vmul.f32 %v8225_v34, %v8436_v28  ;;  %v11764_v35 = vrot.slane %v8565_v59, 1 }
 0x1c9   : > { %v4414_v26 = vld.sshfl [vmem:[#allocation1] sm:$0xff pattern:$0x75316420]  ;;  %v988_v16 = vsel %vm721_vm8, %v11744_v27, %v987_v48  ;;  %v1230_v25 = vsel %vm721_vm8, %v11746_v4, %v1229_v56  ;;  %v1473_v48 = vsel %vm1448_vm9, %v11747_v17, %v1472_v2  ;;  %v6328_v56 = vld [vmem:[%s6420_s23 + $0x90] sm:$0xff]  ;;  %v8834_v11 = vld [vmem:[%s6420_s23 + $0x98] sm:$0xff]  ;;  %v11751_v27 = vrot.slane %v8518_v49, 2 }
 0x1ca   : > { %4490 = vrot.lane.b32.xlu0 %v4414_v26, %s6373_s9  ;;  %4418 = vst [vmem:[#allocation1] ss:$2 sm:$0xff] %v11748_v1  ;;  %v8824_v60 = vadd.f32 %v8333_v9, %v2049_v21  ;;  %v1956_v26 = vrot.slane %v1851_v24, 2  ;;  %v320_v12 = vrot.slane %v6328_v56, 7  ;;  %v11462_v2 = vrot.slane %v8834_v11, 7 }
 0x1cb   : > { %v4404_v38 = vld.sshfl [vmem:[#allocation1 + $0x20] sm:$0xff pattern:$0x75316420]  ;;  %4419 = vst [vmem:[#allocation1 + $0x1] ss:$2 sm:$0xff] %v11749_v6  ;;  %v11750_v21 = vrot.slane %v8510_v13, 2 }
 0x1cc   : > { %4410 = vst [vmem:[#allocation1 + $0x20] ss:$2 sm:$0xff] %v11717_v33  ;;  %4486 = vrot.lane.b32.xlu2 %v4404_v38, %s6373_s9  ;;  %v8814_v33 = vsel %vm4574_vm12, %v8588_v47, %v4284_v31  ;;  %v843_v38 = vadd.f32 %v746_v54, %v600_v0  ;;  %v6326_v47 = vld [vmem:[%s6420_s23 + $0x80] sm:$0xff]  ;;  %v8829_v31 = vld [vmem:[%s6420_s23 + $0x88] sm:$0xff]  ;;  %v1957_v24 = vsel %vm1448_vm9, %v11751_v27, %v1956_v26 }
 0x1cd   : > { %4411 = vst [vmem:[#allocation1 + $0x21] ss:$2 sm:$0xff] %v11718_v20  ;;  %v1714_v20 = vrot.slane %v1609_v30, 2  ;;  %v317_v52 = vrot.slane %v6326_v47, 7  ;;  %v11463_v8 = vrot.slane %v8829_v31, 7  ;;  %v8860_v49 = vsel %vm290_vm0, %v320_v12, %v11462_v2  ;;  %v11757_v27 = vld [vmem:[#allocation33_spill] sm:$0xff] }
 0x1ce   : > { %11745 = vst [vmem:[#allocation38_spill] sm:$0xff] %v8814_v33  ;;  %v1085_v0 = vadd.f32 %v988_v16, %v843_v38  ;;  %v11752_v16 = vld [vmem:[#allocation15_spill] sm:$0xff]  ;;  %v4290_v19 = vpop.permute.xlu2 %4289  ;;  %v8907_v33 = vpop.permute.xlu0 %4566 }
 0x1cf   : > { %v4427_v54 = vld.sshfl [vmem:[#allocation1 + $0x10] sm:$0xff pattern:$0x75316420]  ;;  %v1715_v30 = vsel %vm1448_vm9, %v11750_v21, %v1714_v20  ;;  %v11753_v38 = vrot.slane %v11752_v16, 7  ;;  %v8849_v17 = vsel %vm290_vm0, 0.0, %v317_v52  ;;  %v8855_v13 = vsel %vm290_vm0, %v317_v52, %v11463_v8  ;;  %11759 = vst [vmem:[#allocation60_spill] sm:$0xff] %v8907_v33 }
 0x1d0   : > { %11755 = vst [vmem:[#allocation36_spill] sm:$0xff] %v8849_v17  ;;  %v1327_v47 = vadd.f32 %v1230_v25, %v1085_v0  ;;  %v8863_v20 = vsel %vm290_vm0, 0.0, %v320_v12  ;;  %v8866_v26 = vld.sshfl [vmem:[#allocation1 + $0x30] sm:$0xff pattern:$0x75316420]  ;;  %v509_v0 = vmul.f32 %v8129_v22, %v8849_v17  ;;  %v8877_v12 = vpop.permute.xlu1 %4562  ;;  %v8881_v16 = vmul.f32 %v8139_v45, %v11757_v27 }
 0x1d1   : > { %v8846_v4 = vsel %vm290_vm0, 0.0, %v11753_v38  ;;  %4432 = vst [vmem:[#allocation1 + $0x10] ss:$2 sm:$0xff] %v11741_v15  ;;  %v575_v52 = vmul.f32 %v8134_v37, %v8863_v20  ;;  %v892_v38 = vmul.f32 %v8154_v23, %v8849_v17  ;;  %v8887_v22 = vmul.f32 %v8154_v23, %v8855_v13 }
 0x1d2   : > { %11754 = vst [vmem:[#allocation39_spill] sm:$0xff] %v8846_v4  ;;  %v443_v25 = vmul.f32 %v8121_v62, %v8846_v4  ;;  %v649_v56 = vmul.f32 %v8139_v45, %v8846_v4  ;;  %v1570_v21 = vadd.f32 %v1473_v48, %v1327_v47  ;;  %v1134_v48 = vmul.f32 %v8169_v57, %v8863_v20  ;;  %v4426_v55 = vld.sshfl [vmem:[#allocation1] sm:$0xff pattern:$0x75316420] }
 0x1d3   : > { %11756 = vst [vmem:[#allocation37_spill] sm:$0xff] %v8855_v13  ;;  %v8896_v45 = vmul.f32 %v8169_v57, %v8860_v49  ;;  %v8901_v23 = vsel %vm4574_vm12, %v8702_v63, %v4290_v19  ;;  %v1004_v32 = vrot.slane %v892_v38, 1  ;;  %v1376_v19 = vmul.f32 %v8174_v40, %v8846_v4  ;;  %4498 = vrot.lane.b32.xlu1 %v4426_v55, %s6373_s9 }
 0x1d4   : > { %4433 = vst [vmem:[#allocation1 + $0x11] ss:$2 sm:$0xff] %v11742_v5  ;;  %4500 = vrot.lane.b32.xlu2 %v4427_v54, %s6373_s9  ;;  %v8890_v37 = vld.sshfl [vmem:[#allocation1 + $0x20] sm:$0xff pattern:$0x75316420]  ;;  %v541_v2 = vadd.f32 %v509_v0, %v443_v25  ;;  %v762_v8 = vrot.slane %v649_v56, 1  ;;  %v1812_v47 = vadd.f32 %v1715_v30, %v1570_v21  ;;  %v8916_v30 = vmul.f32 %v8174_v40, %v11757_v27 }
 0x1d5   : > { %4424 = vst [vmem:[#allocation1 + $0x30] ss:$2 sm:$0xff] %v11741_v15  ;;  %v11472_v54 = vrot.slane %v8881_v16, 1  ;;  %v11471_v0 = vrot.slane %v8887_v22, 1  ;;  %v1246_v56 = vrot.slane %v1134_v48, 1  ;;  %v11470_v14 = vrot.slane %v8896_v45, 1 }
 0x1d6   : > { %4422 = vst [vmem:[#allocation1 + $0x20] ss:$2 sm:$0xff] %v11748_v1  ;;  %v607_v25 = vadd.f32 %v575_v52, %v541_v2  ;;  %v2054_v44 = vadd.f32 %v1957_v24, %v1812_v47  ;;  %v1489_v40 = vrot.slane %v1376_v19, 2  ;;  %v11475_v55 = vrot.slane %v8916_v30, 2 }
 0x1d7   : > { %11758 = vst [vmem:[#allocation15_spill] sm:$0xff] %v8901_v23  ;;  %v764_v63 = vsel %vm721_vm8, %v762_v8, %v11472_v54  ;;  %v1006_v52 = vsel %vm721_vm8, %v1004_v32, %v11471_v0  ;;  %v1248_v24 = vsel %vm721_vm8, %v1246_v56, %v11470_v14  ;;  %v1619_v8 = vmul.f32 %v8225_v34, %v8849_v17 }
 0x1d8   : > { %4423 = vst [vmem:[#allocation1 + $0x21] ss:$2 sm:$0xff] %v11749_v6  ;;  %v850_v2 = vadd.f32 %v764_v63, %v607_v25  ;;  %v8929_v21 = vadd.f32 %v8333_v9, %v2054_v44  ;;  %v8934_v38 = vmul.f32 %v8225_v34, %v8855_v13  ;;  %v1861_v47 = vmul.f32 %v8241_v51, %v8863_v20  ;;  %v4274_v44 = vpop.permute.xlu1 %4273 }
 0x1d9   : > { %4430 = vst [vmem:[#allocation1] ss:$2 sm:$0xff] %v11748_v1  ;;  %v1731_v48 = vrot.slane %v1619_v8, 2  ;;  %v8941_v25 = vmul.f32 %v8241_v51, %v8860_v49  ;;  %v1491_v56 = vsel %vm1448_vm9, %v1489_v40, %v11475_v55  ;;  %v11760_v19 = vrot.slane %v8502_v18, 7  ;;  %v8966_v18 = vld [vmem:[%s11359_s1 + $0x3] ss:$0 sm:$0xff] }
 0x1da   : > { %4431 = vst [vmem:[#allocation1 + $0x1] ss:$2 sm:$0xff] %v11749_v6  ;;  %v1092_v32 = vadd.f32 %v1006_v52, %v850_v2  ;;  %v11474_v63 = vrot.slane %v8934_v38, 2  ;;  %v437_v52 = vmul.f32 %v8121_v62, %v8415_v36  ;;  %v8957_v8 = vsel %vm4574_vm12, %v8797_v42, %v4274_v44  ;;  %v8973_v42 = vld [vmem:[%s11359_s1 + $0x6] ss:$0 sm:$0xff] }
 0x1db   : > { %4425 = vst [vmem:[#allocation1 + $0x31] ss:$2 sm:$0xff] %v11742_v5  ;;  %v8951_v2 = vsel %vm290_vm0, 0.0, %v11760_v19  ;;  %v1973_v0 = vrot.slane %v1861_v47, 2  ;;  %v11477_v54 = vrot.slane %v8941_v25, 2  ;;  %v503_v62 = vmul.f32 %v8966_v18, %v8436_v28 }
 0x1dc   : > { %11761 = vst [vmem:[#allocation61_spill] sm:$0xff] %v8951_v2  ;;  %v1334_v14 = vadd.f32 %v1248_v24, %v1092_v32  ;;  %v1733_v40 = vsel %vm1448_vm9, %v1731_v48, %v11474_v63  ;;  %v569_v24 = vmul.f32 %v8973_v42, %v8951_v2  ;;  %v8980_v32 = vld [vmem:[%s11359_s1 + $0x1] ss:$0 sm:$0xff]  ;;  %v8991_v19 = vld [vmem:[%s11359_s1 + $0x4] ss:$0 sm:$0xff]  ;;  %v1125_v55 = vmul.f32 %v8169_v57, %v8951_v2  ;;  %v11762_v57 = vld [vmem:[#allocation42_spill] sm:$0xff] }
 0x1dd   : > { %v640_v48 = vmul.f32 %v8980_v32, %v8415_v36  ;;  %v1975_v44 = vsel %vm1448_vm9, %v1973_v0, %v11477_v54  ;;  %v883_v63 = vmul.f32 %v8991_v19, %v8436_v28  ;;  %v4439_v41 = vld.sshfl [vmem:[#allocation1 + $0x10] sm:$0xff pattern:$0x75316420]  ;;  %v9001_v0 = vld [vmem:[%s11359_s1 + $0x2] ss:$0 sm:$0xff]  ;;  %v1716_v34 = vrot.slane %v1610_v3, 2 }
 0x1de   : > { %v1577_v47 = vadd.f32 %v1491_v56, %v1334_v14  ;;  %v535_v14 = vadd.f32 %v503_v62, %v437_v52  ;;  %v1367_v54 = vmul.f32 %v9001_v0, %v8415_v36  ;;  %4444 = vst [vmem:[#allocation1 + $0x10] ss:$2 sm:$0xff] %v11762_v57  ;;  %v11765_v23 = vrot.slane %v8571_v43, 1 }
 0x1df   : > { %v4428_v33 = vld.sshfl [vmem:[#allocation1 + $0x20] sm:$0xff pattern:$0x75316420]  ;;  %v747_v56 = vrot.slane %v640_v48, 1  ;;  %v989_v62 = vrot.slane %v883_v63, 1  ;;  %v1231_v48 = vrot.slane %v1125_v55, 1  ;;  %v1852_v55 = vmul.f32 %v8241_v51, %v8951_v2 }
 0x1e0   : > { %4434 = vst [vmem:[#allocation1 + $0x20] ss:$2 sm:$0xff] %v11748_v1  ;;  %v4276_v1 = vpop.permute.xlu0 %4275  ;;  %4502 = vrot.lane.b32.xlu0 %v4428_v33, %s6373_s9  ;;  %v1819_v52 = vadd.f32 %v1733_v40, %v1577_v47  ;;  %v601_v53 = vadd.f32 %v569_v24, %v535_v14  ;;  %v1474_v61 = vrot.slane %v1367_v54, 2  ;;  %v4300_v40 = vpop.permute.xlu2 %4299  ;;  %v11767_v3 = vrot.slane %v8594_v7, 2  ;;  %v11768_v24 = vld [vmem:[#allocation56_spill] sm:$0xff] }
 0x1e1   : > { %4435 = vst [vmem:[#allocation1 + $0x21] ss:$2 sm:$0xff] %v11749_v6  ;;  %v9011_v6 = vsel %vm4574_vm12, %v8824_v60, %v4276_v1  ;;  %v749_v36 = vsel %vm721_vm8, %v747_v56, %v11764_v35  ;;  %v991_v10 = vsel %vm721_vm8, %v989_v62, %v11765_v23  ;;  %v11766_v60 = vrot.slane %v8578_v50, 1  ;;  %v4438_v59 = vld.sshfl [vmem:[#allocation1] sm:$0xff pattern:$0x75316420] }
 0x1e2   : > { %4445 = vst [vmem:[#allocation1 + $0x11] ss:$2 sm:$0xff] %v11763_v39  ;;  %v4429_v46 = vld.sshfl [vmem:[#allocation1 + $0x30] sm:$0xff pattern:$0x75316420]  ;;  %v2061_v33 = vadd.f32 %v1975_v44, %v1819_v52  ;;  %v844_v35 = vadd.f32 %v749_v36, %v601_v53  ;;  %v1476_v54 = vsel %vm1448_vm9, %v1474_v61, %v11767_v3  ;;  %v11769_v43 = vrot.slane %v11768_v24, 2  ;;  %4506 = vrot.lane.b32.xlu1 %v4438_v59, %s6373_s9 }
 0x1e3   : > { %v1233_v63 = vsel %vm721_vm8, %v1231_v48, %v11766_v60  ;;  %4436 = vst [vmem:[#allocation1 + $0x30] ss:$2 sm:$0xff] %v11741_v15  ;;  %v11770_v47 = vld [vmem:[#allocation16_spill] sm:$0xff]  ;;  %4504 = vrot.lane.b32.xlu2 %v4429_v46, %s6373_s9  ;;  %v1958_v36 = vrot.slane %v1852_v55, 2  ;;  %v11773_v7 = vrot.slane %v8829_v31, 7  ;;  %v11775_v53 = vrot.slane %v8834_v11, 7 }
 0x1e4   : > { %v1718_v23 = vsel %vm1448_vm9, %v1716_v34, %v11769_v43  ;;  %v11771_v50 = vrot.slane %v11770_v47, 7  ;;  %4437 = vst [vmem:[#allocation1 + $0x31] ss:$2 sm:$0xff] %v11742_v5  ;;  %v2095_v51 = vadd.f32 %v8333_v9, %v2061_v33  ;;  %v11776_v1 = vld [vmem:[#allocation40_spill] sm:$0xff]  ;;  %v1086_v5 = vadd.f32 %v991_v10, %v844_v35  ;;  %v9057_v46 = vld [vmem:[%s11359_s1] ss:$0 sm:$0xff] }
 0x1e5   : > { %v9043_v61 = vsel %vm290_vm0, %v11773_v7, 0.0  ;;  %v9048_v15 = vsel %vm290_vm0, %v11775_v53, 0.0  ;;  %4442 = vst [vmem:[#allocation1] ss:$2 sm:$0xff] %v11776_v1  ;;  %v444_v9 = vmul.f32 %v9057_v46, %v11757_v27  ;;  %v510_v31 = vmul.f32 %v8966_v18, %v8855_v13  ;;  %v11777_v56 = vld [vmem:[#allocation41_spill] sm:$0xff] }
 0x1e6   : > { %v9035_v44 = vsel %vm290_vm0, %v11771_v50, 0.0  ;;  %11774 = vst [vmem:[#allocation44_spill] sm:$0xff] %v9043_v61  ;;  %v576_v11 = vmul.f32 %v8973_v42, %v8860_v49  ;;  %v9067_v10 = vsel %vm4574_vm12, %v2095_v51, %v4300_v40  ;;  %v11779_v52 = vld [vmem:[#allocation57_spill] sm:$0xff]  ;;  %v894_v33 = vmul.f32 %v8991_v19, %v9043_v61 }
 0x1e7   : > { %11772 = vst [vmem:[#allocation42_spill] sm:$0xff] %v9035_v44  ;;  %v11780_v62 = vrot.slane %v11779_v52, 2  ;;  %v651_v34 = vmul.f32 %v8980_v32, %v9035_v44  ;;  %v1328_v55 = vadd.f32 %v1233_v63, %v1086_v5  ;;  %v542_v59 = vadd.f32 %v510_v31, %v444_v9  ;;  %v9081_v40 = vld [vmem:[%s11359_s1 + $0x7] ss:$0 sm:$0xff]  ;;  %v9094_v47 = vld [vmem:[%s11359_s1 + $0x5] ss:$0 sm:$0xff] }
 0x1e8   : > { %v9052_v14 = vld.sshfl [vmem:[#allocation1 + $0x20] sm:$0xff pattern:$0x75316420]  ;;  %4443 = vst [vmem:[#allocation1 + $0x1] ss:$2 sm:$0xff] %v11777_v56  ;;  %v4286_v60 = vpop.permute.xlu0 %4285  ;;  %v1136_v35 = vmul.f32 %v9081_v40, %v9048_v15  ;;  %v1378_v3 = vmul.f32 %v9001_v0, %v9035_v44  ;;  %v1007_v63 = vrot.slane %v894_v33, 1  ;;  %v1621_v50 = vmul.f32 %v9094_v47, %v9043_v61  ;;  %4508 = vrot.lane.b32.xlu0 %v4439_v41, %s6373_s9 }
 0x1e9   : > { %11778 = vst [vmem:[#allocation56_spill] sm:$0xff] %v9067_v10  ;;  %v1960_v48 = vsel %vm1448_vm9, %v1958_v36, %v11780_v62  ;;  %v9089_v24 = vsel %vm4574_vm12, %v8929_v21, %v4286_v60  ;;  %v765_v43 = vrot.slane %v651_v34, 1  ;;  %v1571_v51 = vadd.f32 %v1476_v54, %v1328_v55  ;;  %v9108_v62 = vld [vmem:[%s11359_s1 + $0x8] ss:$0 sm:$0xff] }
 0x1ea   : > { %4446 = vst [vmem:[#allocation1 + $0x20] ss:$2 sm:$0xff] %v11776_v1  ;;  %v608_v36 = vadd.f32 %v576_v11, %v542_v59  ;;  %v1249_v7 = vrot.slane %v1136_v35, 1  ;;  %v1492_v53 = vrot.slane %v1378_v3, 2  ;;  %v11781_v5 = vrot.slane %v8881_v16, 1 }
 0x1eb   : > { %4447 = vst [vmem:[#allocation1 + $0x21] ss:$2 sm:$0xff] %v11777_v56  ;;  %v11782_v9 = vrot.slane %v8887_v22, 1  ;;  %v1734_v52 = vrot.slane %v1621_v50, 2  ;;  %v1863_v41 = vmul.f32 %v9108_v62, %v9048_v15  ;;  %v1813_v11 = vadd.f32 %v1718_v23, %v1571_v51 }
 0x1ec   : > { %v766_v21 = vsel %vm721_vm8, %v11781_v5, %v765_v43  ;;  %v9112_v54 = vld.sshfl [vmem:[#allocation1 + $0x30] sm:$0xff pattern:$0x75316420]  ;;  %v11783_v16 = vrot.slane %v8896_v45, 1  ;;  %v11784_v22 = vrot.slane %v8916_v30, 2  ;;  %v11785_v59 = vrot.slane %v8934_v38, 2 }
 0x1ed   : > { %v1008_v31 = vsel %vm721_vm8, %v11782_v9, %v1007_v63  ;;  %v851_v34 = vadd.f32 %v766_v21, %v608_v36  ;;  %4448 = vst [vmem:[#allocation1 + $0x30] ss:$2 sm:$0xff] %v11762_v57  ;;  %v4451_v55 = vld.sshfl [vmem:[#allocation1 + $0x10] sm:$0xff pattern:$0x75316420]  ;;  %v1976_v3 = vrot.slane %v1863_v41, 2  ;;  %v439_v23 = vmul.f32 %v9057_v46, %v8436_v28 }
 0x1ee   : > { %v1250_v33 = vsel %vm721_vm8, %v11783_v16, %v1249_v7  ;;  %v1493_v60 = vsel %vm1448_vm9, %v11784_v22, %v1492_v53  ;;  %v1735_v35 = vsel %vm1448_vm9, %v11785_v59, %v1734_v52  ;;  %v505_v45 = vmul.f32 %v8966_v18, %v8951_v2  ;;  %4449 = vst [vmem:[#allocation1 + $0x31] ss:$2 sm:$0xff] %v11763_v39  ;;  %v11786_v30 = vld [vmem:[#allocation54_spill] sm:$0xff]  ;;  %v9149_v21 = vld [vmem:[%s11360_s2] ss:$0 sm:$0xff] }
 0x1ef   : > { %4476 = vrot.lane.b32.xlu1 %v11786_v30, %s6373_s9  ;;  %v2055_v43 = vadd.f32 %v1960_v48, %v1813_v11  ;;  %v1093_v63 = vadd.f32 %v1008_v31, %v851_v34  ;;  %v571_v50 = vmul.f32 %v8973_v42, %v8846_v4  ;;  %v643_v38 = vmul.f32 %v8980_v32, %v8436_v28  ;;  %v4450_v5 = vld.sshfl [vmem:[#allocation1] sm:$0xff pattern:$0x75316420]  ;;  %v11789_v41 = vld [vmem:[#allocation50_spill] sm:$0xff] }
 0x1f0   : > { %4456 = vst [vmem:[#allocation1 + $0x10] ss:$2 sm:$0xff] %v11762_v57  ;;  %v11787_v51 = vrot.slane %v8941_v25, 2  ;;  %v537_v7 = vadd.f32 %v505_v45, %v439_v23  ;;  %v9141_v53 = vmul.f32 %v8980_v32, %v8452_v29  ;;  %v886_v48 = vmul.f32 %v8991_v19, %v8951_v2  ;;  %v4288_v9 = vpop.permute.xlu0 %4287  ;;  %4514 = vrot.lane.b32.xlu2 %v4450_v5, %s6373_s9 }
 0x1f1   : > { %4457 = vst [vmem:[#allocation1 + $0x11] ss:$2 sm:$0xff] %v11763_v39  ;;  %v2089_v25 = vadd.f32 %v9149_v21, %v2055_v43  ;;  %v1335_v31 = vadd.f32 %v1250_v33, %v1093_v63  ;;  %v752_v52 = vrot.slane %v643_v38, 1  ;;  %v9154_v11 = vmul.f32 %v8991_v19, %v11789_v41  ;;  %4516 = vrot.lane.b32.xlu0 %v4451_v55, %s6373_s9 }
 0x1f2   : > { %v1977_v36 = vsel %vm1448_vm9, %v11787_v51, %v1976_v3  ;;  %11788 = vst [vmem:[#allocation16_spill] sm:$0xff] %v9141_v53  ;;  %v4452_v34 = vld.sshfl [vmem:[#allocation1 + $0x20] sm:$0xff pattern:$0x75316420]  ;;  %v603_v16 = vadd.f32 %v571_v50, %v537_v7  ;;  %v11493_v22 = vrot.slane %v9141_v53, 1  ;;  %v994_v59 = vrot.slane %v886_v48, 1  ;;  %v9186_v48 = vpop.permute.xlu1 %4568 }
 0x1f3   : > { %11790 = vst [vmem:[#allocation40_spill] sm:$0xff] %v9154_v11  ;;  %v1128_v3 = vmul.f32 %v9081_v40, %v8846_v4  ;;  %v9164_v33 = vsel %vm4574_vm12, %v2089_v25, %v4288_v9  ;;  %v1578_v23 = vadd.f32 %v1493_v60, %v1335_v31  ;;  %v11492_v45 = vrot.slane %v9154_v11, 1 }
 0x1f4   : > { %4454 = vst [vmem:[#allocation1] ss:$2 sm:$0xff] %v11776_v1  ;;  %v9169_v30 = vmul.f32 %v9081_v40, %v11757_v27  ;;  %v754_v43 = vsel %vm721_vm8, %v752_v52, %v11493_v22  ;;  %v1370_v55 = vmul.f32 %v9001_v0, %v8436_v28  ;;  %v9179_v50 = vmul.f32 %v9001_v0, %v8452_v29  ;;  %v11811_v29 = vld [vmem:[#allocation20_spill] sm:$0xff] }
 0x1f5   : > { %4455 = vst [vmem:[#allocation1 + $0x1] ss:$2 sm:$0xff] %v11777_v56  ;;  %v1236_v63 = vrot.slane %v1128_v3, 1  ;;  %v1820_v60 = vadd.f32 %v1735_v35, %v1578_v23  ;;  %v846_v38 = vadd.f32 %v754_v43, %v603_v16  ;;  %v4453_v7 = vld.sshfl [vmem:[#allocation1 + $0x30] sm:$0xff pattern:$0x75316420]  ;;  %v1613_v25 = vmul.f32 %v9094_v47, %v8951_v2  ;;  %v4302_v16 = vpop.permute.xlu2 %4301 }
 0x1f6   : > { %11791 = vst [vmem:[#allocation41_spill] sm:$0xff] %v9169_v30  ;;  %v11490_v51 = vrot.slane %v9169_v30, 1  ;;  %v1479_v5 = vrot.slane %v1370_v55, 2  ;;  %v11489_v28 = vrot.slane %v9179_v50, 2  ;;  %v1855_v52 = vmul.f32 %v9108_v62, %v8846_v4  ;;  %v11796_v55 = vld [vmem:[#allocation23_spill] sm:$0xff] }
 0x1f7   : > { %4458 = vst [vmem:[#allocation1 + $0x20] ss:$2 sm:$0xff] %v11776_v1  ;;  %v996_v1 = vsel %vm721_vm8, %v994_v59, %v11492_v45  ;;  %4518 = vrot.lane.b32.xlu1 %v4452_v34, %s6373_s9  ;;  %v2062_v35 = vadd.f32 %v1977_v36, %v1820_v60  ;;  %v9209_v36 = vmul.f32 %v9108_v62, %v11757_v27 }
 0x1f8   : > { %11792 = vst [vmem:[#allocation57_spill] sm:$0xff] %v9179_v50  ;;  %v1088_v9 = vadd.f32 %v996_v1, %v846_v38  ;;  %v1238_v31 = vsel %vm721_vm8, %v1236_v63, %v11490_v51  ;;  %v1481_v59 = vsel %vm1448_vm9, %v1479_v5, %v11489_v28  ;;  %v1963_v43 = vrot.slane %v1855_v52, 2  ;;  %v9213_v63 = vld [vmem:[%s6420_s23 + $0xa8] sm:$0xff]  ;;  %4277 = vrot.lane.b32.xlu2 %v11796_v55, %s6371_s26  ;;  %v9223_v1 = vld [vmem:[%s6420_s23 + $0xb8] sm:$0xff] }
 0x1f9   : > { %4459 = vst [vmem:[#allocation1 + $0x21] ss:$2 sm:$0xff] %v11777_v56  ;;  %v9193_v56 = vmul.f32 %v9094_v47, %v11789_v41  ;;  %v2096_v3 = vadd.f32 %v9149_v21, %v2062_v35  ;;  %v11491_v38 = vrot.slane %v9209_v36, 2  ;;  %v11494_v5 = vrot.slane %v9223_v1, 7  ;;  %4520 = vrot.lane.b32.xlu0 %v4453_v7, %s6373_s9 }
 0x1fa   : > { %11793 = vst [vmem:[#allocation54_spill] sm:$0xff] %v9186_v48  ;;  %v1330_v23 = vadd.f32 %v1238_v31, %v1088_v9  ;;  %v1623_v41 = vmul.f32 %v9094_v47, %v8860_v49 }
 0x1fb   : > { %11794 = vst [vmem:[#allocation62_spill] sm:$0xff] %v9193_v56  ;;  %v11488_v34 = vrot.slane %v9193_v56, 2  ;;  %v9233_v31 = vsel %vm4574_vm12, %v2096_v3, %v4302_v16  ;;  %v1965_v7 = vsel %vm1448_vm9, %v1963_v43, %v11491_v38  ;;  %v447_v3 = vmul.f32 %v9057_v46, %v8863_v20 }
 0x1fc   : > { %4460 = vst [vmem:[#allocation1 + $0x30] ss:$2 sm:$0xff] %v11762_v57  ;;  %v1721_v57 = vrot.slane %v1613_v25, 2  ;;  %v11797_v25 = vld [vmem:[#allocation10_spill] sm:$0xff]  ;;  %v1573_v52 = vadd.f32 %v1481_v59, %v1330_v23  ;;  %v655_v43 = vmul.f32 %v8980_v32, %v8863_v20 }
 0x1fd   : > { %4461 = vst [vmem:[#allocation1 + $0x31] ss:$2 sm:$0xff] %v11763_v39  ;;  %v11495_v39 = vrot.slane %v9213_v63, 7  ;;  %v11798_v35 = vrot.slane %v11797_v25, 7 }
 0x1fe   : > { %11795 = vst [vmem:[#allocation63_spill] sm:$0xff] %v9209_v36  ;;  %v1723_v60 = vsel %vm1448_vm9, %v1721_v57, %v11488_v34  ;;  %v11802_v34 = vld [vmem:[#allocation11_spill] sm:$0xff]  ;;  %v772_v45 = vrot.slane %v655_v43, 1 }
 0x1ff   : > { %v9229_v9 = vsel %vm290_vm0, 0.0, %v11798_v35  ;;  %v11800_v57 = vmov %v11798_v35  ;;  %v11803_v28 = vrot.slane %v11802_v34, 7  ;;  %v1815_v25 = vadd.f32 %v1723_v60, %v1573_v52  ;;  %v11807_v52 = vld [vmem:[#allocation47_spill] sm:$0xff] }
 0x200   : > { %11799 = vst [vmem:[#allocation23_spill] sm:$0xff] %v9229_v9  ;;  %v9240_v55 = vsel %vm290_vm0, %v11800_v57, %v11495_v39  ;;  %v513_v23 = vmul.f32 %v8966_v18, %v9229_v9  ;;  %v9267_v35 = vmul.f32 %v8980_v32, %v8860_v49  ;;  %v898_v57 = vmul.f32 %v8991_v19, %v9229_v9 }
 0x201   : > { %11801 = vst [vmem:[#allocation10_spill] sm:$0xff] %v9240_v55  ;;  %v9245_v51 = vsel %vm290_vm0, 0.0, %v11803_v28  ;;  %v11805_v16 = vmov %v11803_v28  ;;  %4327 = vrot.lane.b32.xlu1 %v11807_v52, %s6371_s26  ;;  %v2057_v38 = vadd.f32 %v1965_v7, %v1815_v25  ;;  %v1382_v25 = vmul.f32 %v9001_v0, %v8863_v20  ;;  %4492 = vrot.lane.b32.xlu2 %v8768_v58, %s6373_s9 }
 0x202   : > { %11804 = vst [vmem:[#allocation11_spill] sm:$0xff] %v9245_v51  ;;  %v9255_v59 = vsel %vm290_vm0, %v11805_v16, %v11494_v5  ;;  %v579_v28 = vmul.f32 %v8973_v42, %v9245_v51  ;;  %v545_v34 = vadd.f32 %v513_v23, %v447_v3  ;;  %v9273_v16 = vmul.f32 %v8991_v19, %v9240_v55  ;;  %v4292_v23 = vpop.permute.xlu1 %4291 }
 0x203   : > { %11806 = vst [vmem:[#allocation64_spill] sm:$0xff] %v9255_v59  ;;  %v1140_v60 = vmul.f32 %v9081_v40, %v9245_v51  ;;  %v11500_v22 = vrot.slane %v9267_v35, 1  ;;  %v9282_v3 = vmul.f32 %v9081_v40, %v9255_v59  ;;  %v1014_v39 = vrot.slane %v898_v57, 1 }
 0x204   : > { %v611_v5 = vadd.f32 %v579_v28, %v545_v34  ;;  %v11499_v36 = vrot.slane %v9273_v16, 1  ;;  %v2091_v50 = vadd.f32 %v9149_v21, %v2057_v38  ;;  %v9299_v38 = vmul.f32 %v9001_v0, %v8860_v49  ;;  %v11808_v34 = vld [vmem:[#allocation21_spill] sm:$0xff] }
 0x205   : > { %v1256_v56 = vrot.slane %v1140_v60, 1  ;;  %v774_v52 = vsel %vm721_vm8, %v772_v45, %v11500_v22  ;;  %v11501_v7 = vrot.slane %v9282_v3, 1  ;;  %v1625_v45 = vmul.f32 %v9094_v47, %v9229_v9  ;;  %4293 = vrot.lane.b32.xlu0 %v11808_v34, %s6371_s26 }
 0x206   : > { %v854_v43 = vadd.f32 %v774_v52, %v611_v5  ;;  %v1016_v28 = vsel %vm721_vm8, %v1014_v39, %v11499_v36  ;;  %v9306_v57 = vsel %vm4574_vm12, %v2091_v50, %v4292_v23  ;;  %v1499_v5 = vrot.slane %v1382_v25, 2 }
 0x207   : > { %11809 = vst [vmem:[#allocation47_spill] sm:$0xff] %v9306_v57  ;;  %v1258_v58 = vsel %vm721_vm8, %v1256_v56, %v11501_v7  ;;  %v9313_v39 = vmul.f32 %v9094_v47, %v9240_v55  ;;  %v11506_v52 = vrot.slane %v9299_v38, 2  ;;  %v1741_v36 = vrot.slane %v1625_v45, 2  ;;  %v11810_v7 = vld [vmem:[#allocation24_spill] sm:$0xff] }
 0x208   : > { %v1096_v60 = vadd.f32 %v1016_v28, %v854_v43  ;;  %v1867_v22 = vmul.f32 %v9108_v62, %v9245_v51  ;;  %v9321_v50 = vmul.f32 %v9108_v62, %v9255_v59  ;;  %v445_v56 = vmul.f32 %v9057_v46, %v8849_v17 }
 0x209   : > { %v11505_v34 = vrot.slane %v9313_v39, 2  ;;  %v511_v23 = vmul.f32 %v8966_v18, %v8863_v20  ;;  %v1501_v43 = vsel %vm1448_vm9, %v1499_v5, %v11506_v52  ;;  %v577_v45 = vmul.f32 %v8973_v42, %v9229_v9  ;;  %4279 = vrot.lane.b32.xlu1 %v11810_v7, %s6371_s26  ;;  %4510 = vrot.lane.b32.xlu2 %v9052_v14, %s6373_s9 }
 0x20a   : > { %v1338_v25 = vadd.f32 %v1258_v58, %v1096_v60  ;;  %v1983_v28 = vrot.slane %v1867_v22, 2  ;;  %v11510_v11 = vrot.slane %v9321_v50, 2  ;;  %v652_v58 = vmul.f32 %v8980_v32, %v8849_v17 }
 0x20b   : > { %v1743_v30 = vsel %vm1448_vm9, %v1741_v36, %v11505_v34  ;;  %v543_v53 = vadd.f32 %v511_v23, %v445_v56  ;;  %v9342_v22 = vmul.f32 %v8980_v32, %v8855_v13  ;;  %v895_v5 = vmul.f32 %v8991_v19, %v8863_v20 }
 0x20c   : > { %v1581_v60 = vadd.f32 %v1501_v43, %v1338_v25  ;;  %v9348_v7 = vmul.f32 %v8991_v19, %v8860_v49  ;;  %v1985_v36 = vsel %vm1448_vm9, %v1983_v28, %v11510_v11  ;;  %v767_v23 = vrot.slane %v652_v58, 1 }
 0x20d   : > { %v609_v56 = vadd.f32 %v577_v45, %v543_v53  ;;  %v1137_v25 = vmul.f32 %v9081_v40, %v9229_v9  ;;  %v768_v34 = vrot.slane %v9342_v22, 1  ;;  %v1009_v52 = vrot.slane %v895_v5, 1  ;;  %4311 = vrot.lane.b32.xlu0 %v11811_v29, %s6371_s26  ;;  %v4308_v5 = vpop.permute.xlu2 %4307 }
 0x20e   : > { %v1823_v43 = vadd.f32 %v1743_v30, %v1581_v60  ;;  %v1010_v44 = vrot.slane %v9348_v7, 1  ;;  %v1138_v28 = vmul.f32 %v9081_v40, %v9240_v55  ;;  %v1379_v45 = vmul.f32 %v9001_v0, %v8849_v17 }
 0x20f   : > { %v1251_v53 = vrot.slane %v1137_v25, 1  ;;  %v1380_v58 = vmul.f32 %v9001_v0, %v8855_v13  ;;  %v769_v30 = vsel %vm721_vm8, %v767_v23, %v768_v34  ;;  %v1622_v22 = vmul.f32 %v9094_v47, %v8863_v20  ;;  %v4463_v25 = vld.sshfl [vmem:[#allocation1 + $0x10] sm:$0xff pattern:$0x75316420] }
 0x210   : > { %v2065_v14 = vadd.f32 %v1985_v36, %v1823_v43  ;;  %v1011_v60 = vsel %vm721_vm8, %v1009_v52, %v1010_v44  ;;  %v852_v29 = vadd.f32 %v769_v30, %v609_v56  ;;  %v1252_v7 = vrot.slane %v1138_v28, 1  ;;  %v4462_v30 = vld.sshfl [vmem:[#allocation1] sm:$0xff pattern:$0x75316420] }
 0x211   : > { %v1494_v11 = vrot.slane %v1379_v45, 2  ;;  %v1495_v10 = vrot.slane %v1380_v58, 2  ;;  %v1736_v17 = vrot.slane %v1622_v22, 2  ;;  %v1864_v36 = vmul.f32 %v9108_v62, %v9229_v9  ;;  %4524 = vrot.lane.b32.xlu1 %v4463_v25, %s6373_s9  ;;  %4522 = vrot.lane.b32.xlu2 %v4462_v30, %s6373_s9 }
 0x212   : > { %v2099_v27 = vadd.f32 %v9149_v21, %v2065_v14  ;;  %v1094_v52 = vadd.f32 %v1011_v60, %v852_v29  ;;  %v1253_v20 = vsel %vm721_vm8, %v1251_v53, %v1252_v7  ;;  %v1865_v23 = vmul.f32 %v9108_v62, %v9240_v55  ;;  %v11815_v29 = vld [vmem:[#allocation45_spill] sm:$0xff] }
 0x213   : > { %v1496_v56 = vsel %vm1448_vm9, %v1494_v11, %v1495_v10  ;;  %v1737_v28 = vrot.slane %v1623_v41, 2  ;;  %v1978_v45 = vrot.slane %v1864_v36, 2  ;;  %v11813_v58 = vrot.slane %v9213_v63, 7 }
 0x214   : > { %v9382_v43 = vsel %vm4574_vm12, %v2099_v27, %v4308_v5  ;;  %v1336_v22 = vadd.f32 %v1253_v20, %v1094_v52  ;;  %v1979_v60 = vrot.slane %v1865_v23, 2  ;;  %v446_v53 = vmul.f32 %v9057_v46, %v8855_v13 }
 0x215   : > { %11812 = vst [vmem:[#allocation21_spill] sm:$0xff] %v9382_v43  ;;  %v9387_v14 = vsel %vm290_vm0, %v11813_v58, 0.0  ;;  %v512_v11 = vmul.f32 %v8966_v18, %v8860_v49  ;;  %v1738_v27 = vsel %vm1448_vm9, %v1736_v17, %v1737_v28  ;;  %v578_v41 = vmul.f32 %v8973_v42, %v9240_v55  ;;  %4478 = vrot.lane.b32.xlu0 %v11815_v29, %s6373_s9 }
 0x216   : > { %11814 = vst [vmem:[#allocation24_spill] sm:$0xff] %v9387_v14  ;;  %v654_v63 = vmul.f32 %v8980_v32, %v9043_v61  ;;  %v897_v5 = vmul.f32 %v8991_v19, %v9048_v15  ;;  %v1579_v25 = vadd.f32 %v1496_v56, %v1336_v22  ;;  %v1980_v36 = vsel %vm1448_vm9, %v1978_v45, %v1979_v60 }
 0x217   : > { %v544_v52 = vadd.f32 %v512_v11, %v446_v53  ;;  %v1139_v20 = vmul.f32 %v9081_v40, %v9387_v14  ;;  %v1381_v58 = vmul.f32 %v9001_v0, %v9043_v61  ;;  %v1624_v30 = vmul.f32 %v9094_v47, %v9048_v15 }
 0x218   : > { %v770_v17 = vrot.slane %v654_v63, 1  ;;  %v1012_v23 = vrot.slane %v897_v5, 1  ;;  %v1821_v9 = vadd.f32 %v1738_v27, %v1579_v25  ;;  %v1866_v56 = vmul.f32 %v9108_v62, %v9387_v14  ;;  %v4304_v27 = vpop.permute.xlu0 %4303 }
 0x219   : > { %v610_v43 = vadd.f32 %v578_v41, %v544_v52  ;;  %v1254_v13 = vrot.slane %v1139_v20, 1  ;;  %v1497_v53 = vrot.slane %v1381_v58, 2  ;;  %v1739_v11 = vrot.slane %v1624_v30, 2  ;;  %4494 = vrot.lane.b32.xlu1 %v8890_v37, %s6373_s9 }
 0x21a   : > { %v771_v45 = vsel %vm721_vm8, %v768_v34, %v770_v17  ;;  %v1013_v22 = vsel %vm721_vm8, %v1010_v44, %v1012_v23  ;;  %v2063_v63 = vadd.f32 %v1980_v36, %v1821_v9  ;;  %v1981_v61 = vrot.slane %v1866_v56, 2 }
 0x21b   : > { %v853_v5 = vadd.f32 %v771_v45, %v610_v43  ;;  %v1255_v29 = vsel %vm721_vm8, %v1252_v7, %v1254_v13  ;;  %v1498_v41 = vsel %vm1448_vm9, %v1495_v10, %v1497_v53  ;;  %v1740_v25 = vsel %vm1448_vm9, %v1737_v28, %v1739_v11  ;;  %v11818_v10 = vld [vmem:[#allocation31_spill] sm:$0xff] }
 0x21c   : > { %v11816_v52 = vrot.slane %v9223_v1, 7  ;;  %v448_v44 = vmul.f32 %v9057_v46, %v8860_v49  ;;  %v2097_v37 = vadd.f32 %v9149_v21, %v2063_v63  ;;  %v1982_v43 = vsel %vm1448_vm9, %v1979_v60, %v1981_v61  ;;  %4295 = vrot.lane.b32.xlu2 %v11818_v10, %s6371_s26  ;;  %v11819_v61 = vld [vmem:[#allocation49_spill] sm:$0xff] }
 0x21d   : > { %v1095_v9 = vadd.f32 %v1013_v22, %v853_v5  ;;  %v514_v13 = vmul.f32 %v8966_v18, %v9240_v55  ;;  %v580_v1 = vmul.f32 %v8973_v42, %v9255_v59  ;;  %v657_v7 = vmul.f32 %v8980_v32, %v9048_v15  ;;  %4329 = vrot.lane.b32.xlu0 %v11819_v61, %s6371_s26 }
 0x21e   : > { %v9422_v34 = vsel %vm290_vm0, %v11816_v52, 0.0  ;;  %v900_v49 = vmul.f32 %v8991_v19, %v9387_v14  ;;  %v9443_v60 = vsel %vm4574_vm12, %v2097_v37, %v4304_v27  ;;  %v1384_v17 = vmul.f32 %v9001_v0, %v9048_v15 }
 0x21f   : > { %11817 = vst [vmem:[#allocation20_spill] sm:$0xff] %v9422_v34  ;;  %v1142_v28 = vmul.f32 %v9081_v40, %v9422_v34  ;;  %v1337_v36 = vadd.f32 %v1255_v29, %v1095_v9  ;;  %v546_v20 = vadd.f32 %v514_v13, %v448_v44  ;;  %v775_v23 = vrot.slane %v657_v7, 1  ;;  %v6343_v7 = vld [vmem:[%s6420_s23 + $0xe8] sm:$0xff] }
 0x220   : > { %11820 = vst [vmem:[#allocation45_spill] sm:$0xff] %v9443_v60  ;;  %v1017_v58 = vrot.slane %v900_v49, 1  ;;  %v1627_v56 = vmul.f32 %v9094_v47, %v9387_v14  ;;  %v1502_v53 = vrot.slane %v1384_v17, 2  ;;  %v1869_v11 = vmul.f32 %v9108_v62, %v9422_v34 }
 0x221   : > { %v1259_v30 = vrot.slane %v1142_v28, 1  ;;  %v1580_v45 = vadd.f32 %v1498_v41, %v1337_v36  ;;  %v612_v22 = vadd.f32 %v580_v1, %v546_v20  ;;  %v11821_v63 = vrot.slane %v9267_v35, 1  ;;  %4512 = vrot.lane.b32.xlu1 %v9112_v54, %s6373_s9  ;;  %v6342_v1 = vld [vmem:[%s6420_s23 + $0xd8] sm:$0xff]  ;;  %v9471_v28 = vld [vmem:[%s6420_s23 + $0xf0] sm:$0xff] }
 0x222   : > { %v11822_v15 = vrot.slane %v9273_v16, 1  ;;  %v11823_v27 = vrot.slane %v9282_v3, 1  ;;  %v1744_v41 = vrot.slane %v1627_v56, 2  ;;  %v11824_v9 = vrot.slane %v9299_v38, 2  ;;  %v6345_v20 = vld [vmem:[%s6420_s23 + $0xf8] sm:$0xff] }
 0x223   : > { %v776_v5 = vsel %vm721_vm8, %v11821_v63, %v775_v23  ;;  %v1822_v44 = vadd.f32 %v1740_v25, %v1580_v45  ;;  %v1986_v13 = vrot.slane %v1869_v11, 2  ;;  %v11825_v16 = vrot.slane %v9313_v39, 2  ;;  %v11827_v39 = vld [vmem:[#allocation35_spill] sm:$0xff]  ;;  %v4464_v23 = vld.sshfl [vmem:[#allocation1 + $0x20] sm:$0xff pattern:$0x75316420] }
 0x224   : > { %v1018_v29 = vsel %vm721_vm8, %v11822_v15, %v1017_v58  ;;  %v1260_v52 = vsel %vm721_vm8, %v11823_v27, %v1259_v30  ;;  %v855_v37 = vadd.f32 %v776_v5, %v612_v22  ;;  %v1503_v35 = vsel %vm1448_vm9, %v11824_v9, %v1502_v53  ;;  %4313 = vrot.lane.b32.xlu2 %v11827_v39, %s6371_s26  ;;  %v4306_v58 = vpop.permute.xlu0 %4305  ;;  %v11828_v30 = vld [vmem:[#allocation19_spill] sm:$0xff]  ;;  %v11830_v22 = vld [vmem:[#allocation18_spill] sm:$0xff] }
 0x225   : > { %v1745_v10 = vsel %vm1448_vm9, %v11825_v16, %v1744_v41  ;;  %v333_v3 = vrot.slane %v6342_v1, 7  ;;  %v336_v49 = vrot.slane %v6343_v7, 7  ;;  %v11527_v61 = vrot.slane %v9471_v28, 7  ;;  %4526 = vrot.lane.b32.xlu0 %v4464_v23, %s6373_s9 }
 0x226   : > { %v2064_v54 = vadd.f32 %v1982_v43, %v1822_v44  ;;  %v1097_v25 = vadd.f32 %v1018_v29, %v855_v37  ;;  %v11826_v36 = vrot.slane %v9321_v50, 2  ;;  %v339_v17 = vrot.slane %v6345_v20, 7 }
 0x227   : > { %v11829_v56 = vrot.slane %v11828_v30, 7  ;;  %v11831_v53 = vrot.slane %v11830_v22, 7  ;;  %v9491_v50 = vsel %vm290_vm0, %v333_v3, 0.0  ;;  %v9494_v11 = vsel %vm290_vm0, %v336_v49, 0.0 }
 0x228   : > { %v1987_v38 = vsel %vm1448_vm9, %v11826_v36, %v1986_v13  ;;  %v2098_v63 = vadd.f32 %v9149_v21, %v2064_v54  ;;  %v1339_v5 = vadd.f32 %v1260_v52, %v1097_v25  ;;  %v9501_v15 = vsel %vm290_vm0, %v11527_v61, %v339_v17  ;;  %v11835_v54 = vld [vmem:[#allocation32_spill] sm:$0xff] }
 0x229   : > { %v9483_v45 = vsel %vm290_vm0, %v11829_v56, %v333_v3  ;;  %v9488_v43 = vsel %vm290_vm0, %v11831_v53, %v336_v49  ;;  %11832 = vst [vmem:[#allocation31_spill] sm:$0xff] %v9501_v15  ;;  %v9504_v29 = vsel %vm290_vm0, %v339_v17, 0.0  ;;  %v588_v44 = vmul.f32 %v8973_v42, %v9501_v15  ;;  %4297 = vrot.lane.b32.xlu1 %v11835_v54, %s6371_s26  ;;  %v4465_v56 = vld.sshfl [vmem:[#allocation1 + $0x30] sm:$0xff pattern:$0x75316420] }
 0x22a   : > { %11833 = vst [vmem:[#allocation49_spill] sm:$0xff] %v9504_v29  ;;  %v456_v27 = vmul.f32 %v9057_v46, %v9483_v45  ;;  %v522_v41 = vmul.f32 %v8966_v18, %v9488_v43  ;;  %v9514_v52 = vmul.f32 %v8980_v32, %v9483_v45  ;;  %v9517_v37 = vsel %vm4574_vm12, %v2098_v63, %v4306_v58 }
 0x22b   : > { %11834 = vst [vmem:[#allocation35_spill] sm:$0xff] %v9517_v37  ;;  %v1582_v9 = vadd.f32 %v1503_v35, %v1339_v5  ;;  %v669_v13 = vmul.f32 %v8980_v32, %v9491_v50  ;;  %v9523_v16 = vmul.f32 %v8991_v19, %v9488_v43  ;;  %v912_v7 = vmul.f32 %v8991_v19, %v9494_v11 }
 0x22c   : > { %v554_v1 = vadd.f32 %v522_v41, %v456_v27  ;;  %v11523_v3 = vrot.slane %v9514_v52, 1  ;;  %v9530_v49 = vmul.f32 %v9081_v40, %v9501_v15  ;;  %v1154_v20 = vmul.f32 %v9081_v40, %v9504_v29  ;;  %4528 = vrot.lane.b32.xlu2 %v4465_v56, %s6373_s9  ;;  %v4310_v27 = vpop.permute.xlu1 %4309 }
 0x22d   : > { %v1824_v35 = vadd.f32 %v1745_v10, %v1582_v9  ;;  %v795_v25 = vrot.slane %v669_v13, 1  ;;  %v11522_v36 = vrot.slane %v9523_v16, 1  ;;  %v1037_v39 = vrot.slane %v912_v7, 1  ;;  %v11836_v13 = vld [vmem:[#allocation25_spill] sm:$0xff] }
 0x22e   : > { %v620_v17 = vadd.f32 %v588_v44, %v554_v1  ;;  %v11521_v23 = vrot.slane %v9530_v49, 1  ;;  %v9540_v58 = vmul.f32 %v9001_v0, %v9483_v45  ;;  %v1279_v63 = vrot.slane %v1154_v20, 1  ;;  %4281 = vrot.lane.b32.xlu0 %v11836_v13, %s6371_s26 }
 0x22f   : > { %v2066_v53 = vadd.f32 %v1987_v38, %v1824_v35  ;;  %v796_v10 = vsel %vm721_vm8, %v11523_v3, %v795_v25  ;;  %v1396_v5 = vmul.f32 %v9001_v0, %v9491_v50  ;;  %v1038_v44 = vsel %vm721_vm8, %v11522_v36, %v1037_v39  ;;  %v6347_v36 = vld [vmem:[%s6420_s23 + $0xc8] sm:$0xff] }
 0x230   : > { %v863_v41 = vadd.f32 %v796_v10, %v620_v17  ;;  %v11526_v9 = vrot.slane %v9540_v58, 2  ;;  %v9554_v38 = vmul.f32 %v9094_v47, %v9488_v43  ;;  %v1280_v7 = vsel %vm721_vm8, %v11521_v23, %v1279_v63  ;;  %v6346_v63 = vld [vmem:[%s6420_s23 + $0xc0] sm:$0xff] }
 0x231   : > { %v2100_v1 = vadd.f32 %v9149_v21, %v2066_v53  ;;  %v1522_v54 = vrot.slane %v1396_v5, 2  ;;  %v1639_v35 = vmul.f32 %v9094_v47, %v9494_v11  ;;  %v9567_v17 = vmul.f32 %v9108_v62, %v9501_v15 }
 0x232   : > { %v1105_v25 = vadd.f32 %v1038_v44, %v863_v41  ;;  %v11525_v20 = vrot.slane %v9554_v38, 2  ;;  %v1881_v39 = vmul.f32 %v9108_v62, %v9504_v29  ;;  %v329_v5 = vrot.slane %v6346_v63, 7  ;;  %v9578_v41 = vpop.permute.xlu0 %4315 }
 0x233   : > { %v9572_v56 = vsel %vm4574_vm12, %v2100_v1, %v4310_v27  ;;  %v1523_v53 = vsel %vm1448_vm9, %v11526_v9, %v1522_v54  ;;  %v1764_v10 = vrot.slane %v1639_v35, 2  ;;  %v11524_v13 = vrot.slane %v9567_v17, 2 }
 0x234   : > { %11837 = vst [vmem:[#allocation19_spill] sm:$0xff] %v9572_v56  ;;  %v1347_v44 = vadd.f32 %v1280_v7, %v1105_v25  ;;  %v2006_v23 = vrot.slane %v1881_v39, 2  ;;  %v330_v3 = vrot.slane %v6347_v36, 7  ;;  %v9586_v1 = vsel %vm290_vm0, 0.0, %v329_v5 }
 0x235   : > { %v1765_v27 = vsel %vm1448_vm9, %v11525_v20, %v1764_v10  ;;  %11838 = vst [vmem:[#allocation18_spill] sm:$0xff] %v9586_v1  ;;  %v11839_v54 = vrot.slane %v11828_v30, 7  ;;  %v451_v7 = vmul.f32 %v9057_v46, %v9245_v51  ;;  %v517_v10 = vmul.f32 %v8966_v18, %v9586_v1 }
 0x236   : > { %v1590_v25 = vadd.f32 %v1523_v53, %v1347_v44  ;;  %v2007_v36 = vsel %vm1448_vm9, %v11524_v13, %v2006_v23  ;;  %v9599_v39 = vsel %vm290_vm0, %v329_v5, %v330_v3  ;;  %v661_v63 = vmul.f32 %v8980_v32, %v9245_v51  ;;  %v11840_v23 = vld [vmem:[#allocation55_spill] sm:$0xff]  ;;  %4496 = vrot.lane.b32.xlu0 %v8866_v26, %s6373_s9 }
 0x237   : > { %v9591_v35 = vsel %vm290_vm0, 0.0, %v11839_v54  ;;  %v662_v54 = vmul.f32 %v8980_v32, %v9255_v59  ;;  %v904_v53 = vmul.f32 %v8991_v19, %v9586_v1  ;;  %4480 = vrot.lane.b32.xlu2 %v11840_v23, %s6373_s9  ;;  %v549_v44 = vadd.f32 %v517_v10, %v451_v7  ;;  %v4326_v7 = vpop.permute.xlu2 %4325 }
 0x238   : > { %v583_v30 = vmul.f32 %v8973_v42, %v9591_v35  ;;  %v1832_v5 = vadd.f32 %v1765_v27, %v1590_v25  ;;  %v905_v13 = vmul.f32 %v8991_v19, %v9599_v39  ;;  %v1146_v20 = vmul.f32 %v9081_v40, %v9591_v35 }
 0x239   : > { %v782_v9 = vrot.slane %v661_v63, 1  ;;  %v783_v61 = vrot.slane %v662_v54, 1  ;;  %v1024_v29 = vrot.slane %v904_v53, 1  ;;  %v1147_v14 = vmul.f32 %v9081_v40, %v9483_v45 }
 0x23a   : > { %v2074_v55 = vadd.f32 %v2007_v36, %v1832_v5  ;;  %v615_v15 = vadd.f32 %v583_v30, %v549_v44  ;;  %v1025_v23 = vrot.slane %v905_v13, 1  ;;  %v1266_v27 = vrot.slane %v1146_v20, 1 }
 0x23b   : > { %v784_v25 = vsel %vm721_vm8, %v782_v9, %v783_v61  ;;  %v1267_v10 = vrot.slane %v1147_v14, 1  ;;  %v1388_v4 = vmul.f32 %v9001_v0, %v9245_v51  ;;  %v1389_v26 = vmul.f32 %v9001_v0, %v9255_v59  ;;  %v9633_v9 = vpop.permute.xlu0 %4317 }
 0x23c   : > { %v2108_v63 = vadd.f32 %v9149_v21, %v2074_v55  ;;  %v858_v54 = vadd.f32 %v784_v25, %v615_v15  ;;  %v1026_v53 = vsel %vm721_vm8, %v1024_v29, %v1025_v23  ;;  %v1631_v36 = vmul.f32 %v9094_v47, %v9586_v1 }
 0x23d   : > { %v1268_v20 = vsel %vm721_vm8, %v1266_v27, %v1267_v10  ;;  %v1509_v13 = vrot.slane %v1388_v4, 2  ;;  %v1510_v30 = vrot.slane %v1389_v26, 2  ;;  %v1632_v14 = vmul.f32 %v9094_v47, %v9599_v39 }
 0x23e   : > { %v9636_v5 = vsel %vm4574_vm12, %v2108_v63, %v4326_v7  ;;  %v1100_v44 = vadd.f32 %v1026_v53, %v858_v54  ;;  %v1751_v55 = vrot.slane %v1631_v36, 2  ;;  %v1873_v15 = vmul.f32 %v9108_v62, %v9591_v35 }
 0x23f   : > { %11841 = vst [vmem:[#allocation32_spill] sm:$0xff] %v9636_v5  ;;  %v1511_v29 = vsel %vm1448_vm9, %v1509_v13, %v1510_v30  ;;  %v1752_v25 = vrot.slane %v1632_v14, 2  ;;  %v1874_v4 = vmul.f32 %v9108_v62, %v9483_v45  ;;  %v9644_v27 = vsel %vm290_vm0, %v330_v3, 0.0  ;;  %v4475_v57 = vpop.permute.xlu2 %4474 }
 0x240   : > { %v1342_v26 = vadd.f32 %v1268_v20, %v1100_v44  ;;  %v1993_v51 = vrot.slane %v1873_v15, 2  ;;  %v452_v7 = vmul.f32 %v9057_v46, %v9255_v59  ;;  %v518_v63 = vmul.f32 %v8966_v18, %v9599_v39 }
 0x241   : > { %v1753_v54 = vsel %vm1448_vm9, %v1751_v55, %v1752_v25  ;;  %v1994_v53 = vrot.slane %v1874_v4, 2  ;;  %v584_v36 = vmul.f32 %v8973_v42, %v9483_v45  ;;  %v663_v13 = vmul.f32 %v8980_v32, %v9422_v34 }
 0x242   : > { %v1585_v14 = vadd.f32 %v1511_v29, %v1342_v26  ;;  %v550_v3 = vadd.f32 %v518_v63, %v452_v7  ;;  %v906_v20 = vmul.f32 %v8991_v19, %v9644_v27  ;;  %v1148_v44 = vmul.f32 %v9081_v40, %v9491_v50  ;;  %v9664_v26 = vpop.permute.xlu1 %4319 }
 0x243   : > { %v1995_v15 = vsel %vm1448_vm9, %v1993_v51, %v1994_v53  ;;  %v785_v5 = vrot.slane %v663_v13, 1  ;;  %v1390_v55 = vmul.f32 %v9001_v0, %v9422_v34  ;;  %v1633_v4 = vmul.f32 %v9094_v47, %v9644_v27 }
 0x244   : > { %v1827_v59 = vadd.f32 %v1753_v54, %v1585_v14  ;;  %v616_v2 = vadd.f32 %v584_v36, %v550_v3  ;;  %v1027_v48 = vrot.slane %v906_v20, 1  ;;  %v1269_v29 = vrot.slane %v1148_v44, 1 }
 0x245   : > { %v786_v7 = vsel %vm721_vm8, %v783_v61, %v785_v5  ;;  %v1512_v63 = vrot.slane %v1390_v55, 2  ;;  %v1754_v56 = vrot.slane %v1633_v4, 2  ;;  %v1875_v51 = vmul.f32 %v9108_v62, %v9491_v50  ;;  %v9678_v5 = vpop.permute.xlu0 %4323 }
 0x246   : > { %v2069_v13 = vadd.f32 %v1995_v15, %v1827_v59  ;;  %v859_v60 = vadd.f32 %v786_v7, %v616_v2  ;;  %v1028_v34 = vsel %vm721_vm8, %v1025_v23, %v1027_v48  ;;  %v1270_v37 = vsel %vm721_vm8, %v1267_v10, %v1269_v29 }
 0x247   : > { %v1513_v54 = vsel %vm1448_vm9, %v1510_v30, %v1512_v63  ;;  %v1755_v36 = vsel %vm1448_vm9, %v1752_v25, %v1754_v56  ;;  %v1996_v14 = vrot.slane %v1875_v51, 2  ;;  %v11842_v3 = vrot.slane %v11830_v22, 7 }
 0x248   : > { %v2103_v59 = vadd.f32 %v9149_v21, %v2069_v13  ;;  %v1101_v2 = vadd.f32 %v1028_v34, %v859_v60  ;;  %v453_v48 = vmul.f32 %v9057_v46, %v9586_v1  ;;  %v519_v23 = vmul.f32 %v8966_v18, %v9591_v35 }
 0x249   : > { %v9676_v61 = vsel %vm290_vm0, 0.0, %v11842_v3  ;;  %v1997_v10 = vsel %vm1448_vm9, %v1994_v53, %v1996_v14  ;;  %v664_v22 = vmul.f32 %v8980_v32, %v9586_v1  ;;  %v9692_v30 = vmul.f32 %v8980_v32, %v9599_v39 }
 0x24a   : > { %11843 = vst [vmem:[#allocation25_spill] sm:$0xff] %v9676_v61  ;;  %v585_v56 = vmul.f32 %v8973_v42, %v9676_v61  ;;  %v9696_v34 = vsel %vm4574_vm12, %v2103_v59, %v9578_v41  ;;  %v1343_v60 = vadd.f32 %v1270_v37, %v1101_v2  ;;  %v551_v25 = vadd.f32 %v519_v23, %v453_v48 }
 0x24b   : > { %11844 = vst [vmem:[#allocation55_spill] sm:$0xff] %v9696_v34  ;;  %v907_v18 = vmul.f32 %v8991_v19, %v9591_v35  ;;  %v787_v53 = vrot.slane %v664_v22, 1  ;;  %v11552_v20 = vrot.slane %v9692_v30, 1  ;;  %v9703_v42 = vmul.f32 %v8991_v19, %v9483_v45 }
 0x24c   : > { %v1149_v32 = vmul.f32 %v9081_v40, %v9676_v61  ;;  %v1586_v44 = vadd.f32 %v1513_v54, %v1343_v60  ;;  %v617_v15 = vadd.f32 %v585_v56, %v551_v25  ;;  %v9709_v37 = vmul.f32 %v9081_v40, %v9488_v43  ;;  %v9722_v54 = vpop.permute.xlu1 %4321  ;;  %v9737_v56 = vpop.permute.xlu2 %4484  ;;  %v4673_v60 = vld [vmem:[%s11361_s3] sm:$0xff] }
 0x24d   : > { %v1029_v55 = vrot.slane %v907_v18, 1  ;;  %v789_v41 = vsel %vm721_vm8, %v787_v53, %v11552_v20  ;;  %v11551_v4 = vrot.slane %v9703_v42, 1  ;;  %v1391_v19 = vmul.f32 %v9001_v0, %v9586_v1  ;;  %v9739_v22 = vpop.permute.xlu0 %4472  ;;  %4790 = vmatpush.msra.mxu0 %v4673_v60  ;;  %6124 = vmatpush.msra.mxu1 %v4673_v60 }
 0x24e   : > { %v1271_v29 = vrot.slane %v1149_v32, 1  ;;  %v1828_v7 = vadd.f32 %v1755_v36, %v1586_v44  ;;  %v860_v63 = vadd.f32 %v789_v41, %v617_v15  ;;  %v11550_v51 = vrot.slane %v9709_v37, 1  ;;  %6126 = vmatpush.msra.mxu3 %v4673_v60  ;;  %6125 = vmatpush.msra.mxu2 %v4673_v60  ;;  %v9801_v60 = vld [vmem:[%s11359_s1 + $0x4] ss:$0 sm:$0xff] }
 0x24f   : > { %v9720_v13 = vmul.f32 %v9001_v0, %v9599_v39  ;;  %v1031_v14 = vsel %vm721_vm8, %v1029_v55, %v11551_v4  ;;  %v1514_v3 = vrot.slane %v1391_v19, 2  ;;  %v1634_v59 = vmul.f32 %v9094_v47, %v9591_v35 }
 0x250   : > { %v9731_v36 = vmul.f32 %v9094_v47, %v9483_v45  ;;  %v2070_v2 = vadd.f32 %v1997_v10, %v1828_v7  ;;  %v1102_v48 = vadd.f32 %v1031_v14, %v860_v63  ;;  %v1273_v0 = vsel %vm721_vm8, %v1271_v29, %v11550_v51 }
 0x251   : > { %v11549_v23 = vrot.slane %v9720_v13, 2  ;;  %v1756_v25 = vrot.slane %v1634_v59, 2  ;;  %v1876_v10 = vmul.f32 %v9108_v62, %v9676_v61  ;;  %v9749_v53 = vmul.f32 %v9108_v62, %v9488_v43 }
 0x252   : > { %v11548_v18 = vrot.slane %v9731_v36, 2  ;;  %v2104_v32 = vadd.f32 %v9149_v21, %v2070_v2  ;;  %v1344_v44 = vadd.f32 %v1273_v0, %v1102_v48  ;;  %v9761_v19 = vsel %vm4607_vm13, %v9011_v6, %v4475_v57  ;;  %v9780_v6 = vld [vmem:[%s11359_s1 + $0x3] ss:$0 sm:$0xff] }
 0x253   : > { %v1516_v15 = vsel %vm1448_vm9, %v1514_v3, %v11549_v23  ;;  %v1998_v41 = vrot.slane %v1876_v10, 2  ;;  %v11547_v29 = vrot.slane %v9749_v53, 2  ;;  %v11846_v14 = vrot.slane %v9471_v28, 7  ;;  %v9787_v28 = vld [vmem:[%s11359_s1 + $0x6] ss:$0 sm:$0xff] }
 0x254   : > { %v1758_v55 = vsel %vm1448_vm9, %v1756_v25, %v11548_v18  ;;  %v9765_v7 = vsel %vm4574_vm12, %v2104_v32, %v9633_v9  ;;  %v1587_v63 = vadd.f32 %v1516_v15, %v1344_v44  ;;  %v455_v59 = vmul.f32 %v9057_v46, %v9591_v35  ;;  %v9794_v9 = vld [vmem:[%s11359_s1 + $0x1] ss:$0 sm:$0xff]  ;;  %v9810_v32 = vld [vmem:[%s11359_s1 + $0x2] ss:$0 sm:$0xff]  ;;  %v4469_v15 = vpop.permute.xlu1 %4468  ;;  %v4487_v4 = vpop.permute.xlu2 %4486 }
 0x255   : > { %11845 = vst [vmem:[#allocation65_spill] sm:$0xff] %v9765_v7  ;;  %v9770_v3 = vsel %vm290_vm0, 0.0, %v11846_v14  ;;  %v2000_v2 = vsel %vm1448_vm9, %v1998_v41, %v11547_v29  ;;  %v521_v57 = vmul.f32 %v9780_v6, %v9676_v61  ;;  %v667_v48 = vmul.f32 %v9794_v9, %v9591_v35  ;;  %v4467_v20 = vpop.permute.xlu0 %4466 }
 0x256   : > { %v587_v46 = vmul.f32 %v9787_v28, %v9770_v3  ;;  %v1829_v0 = vadd.f32 %v1758_v55, %v1587_v63  ;;  %v910_v25 = vmul.f32 %v9801_v60, %v9676_v61  ;;  %v1152_v10 = vmul.f32 %v9081_v40, %v9770_v3 }
 0x257   : > { %v1394_v44 = vmul.f32 %v9810_v32, %v9591_v35  ;;  %v553_v55 = vadd.f32 %v521_v57, %v455_v59  ;;  %v792_v41 = vrot.slane %v667_v48, 1  ;;  %v1637_v63 = vmul.f32 %v9094_v47, %v9676_v61 }
 0x258   : > { %v1879_v14 = vmul.f32 %v9108_v62, %v9770_v3  ;;  %v2071_v29 = vadd.f32 %v2000_v2, %v1829_v0  ;;  %v1034_v18 = vrot.slane %v910_v25, 1  ;;  %v1276_v23 = vrot.slane %v1152_v10, 1 }
 0x259   : > { %v1519_v51 = vrot.slane %v1394_v44, 2  ;;  %v619_v1 = vadd.f32 %v587_v46, %v553_v55  ;;  %v11847_v7 = vrot.slane %v9514_v52, 1  ;;  %v1761_v34 = vrot.slane %v1637_v63, 2 }
 0x25a   : > { %v2003_v59 = vrot.slane %v1879_v14, 2  ;;  %v2105_v57 = vadd.f32 %v9149_v21, %v2071_v29  ;;  %v11848_v48 = vrot.slane %v9523_v16, 1  ;;  %v11849_v2 = vrot.slane %v9530_v49, 1  ;;  %v9840_v16 = vld [vmem:[%s11359_s1] ss:$0 sm:$0xff] }
 0x25b   : > { %v794_v35 = vsel %vm721_vm8, %v792_v41, %v11847_v7  ;;  %v11850_v25 = vrot.slane %v9540_v58, 2  ;;  %v11851_v52 = vrot.slane %v9554_v38, 2  ;;  %v11852_v44 = vrot.slane %v9567_v17, 2 }
 0x25c   : > { %v1036_v61 = vsel %vm721_vm8, %v1034_v18, %v11848_v48  ;;  %v1278_v0 = vsel %vm721_vm8, %v1276_v23, %v11849_v2  ;;  %v862_v10 = vadd.f32 %v794_v35, %v619_v1  ;;  %v454_v49 = vmul.f32 %v9840_v16, %v9599_v39  ;;  %v4471_v41 = vpop.permute.xlu1 %4470 }
 0x25d   : > { %v1521_v46 = vsel %vm1448_vm9, %v1519_v51, %v11850_v25  ;;  %v1763_v7 = vsel %vm1448_vm9, %v1761_v34, %v11851_v52  ;;  %v2005_v21 = vsel %vm1448_vm9, %v2003_v59, %v11852_v44  ;;  %v9846_v58 = vsel %vm4574_vm12, %v2105_v57, %v9664_v26  ;;  %v4501_v25 = vpop.permute.xlu2 %4500 }
 0x25e   : > { %v520_v38 = vmul.f32 %v9780_v6, %v9483_v45  ;;  %v586_v17 = vmul.f32 %v9787_v28, %v9488_v43  ;;  %v666_v1 = vmul.f32 %v9794_v9, %v9644_v27  ;;  %v1104_v34 = vadd.f32 %v1036_v61, %v862_v10  ;;  %v4491_v10 = vpop.permute.xlu0 %4490 }
 0x25f   : > { %v909_v51 = vmul.f32 %v9801_v60, %v9491_v50  ;;  %v1151_v23 = vmul.f32 %v9081_v40, %v9494_v11  ;;  %v1393_v26 = vmul.f32 %v9810_v32, %v9644_v27  ;;  %v1636_v45 = vmul.f32 %v9094_v47, %v9491_v50 }
 0x260   : > { %v552_v18 = vadd.f32 %v520_v38, %v454_v49  ;;  %v790_v29 = vrot.slane %v666_v1, 1  ;;  %v1878_v55 = vmul.f32 %v9108_v62, %v9494_v11  ;;  %v1346_v63 = vadd.f32 %v1278_v0, %v1104_v34  ;;  %v11859_v34 = vld [vmem:[#allocation29_spill] sm:$0xff] }
 0x261   : > { %v1032_v61 = vrot.slane %v909_v51, 1  ;;  %v1274_v14 = vrot.slane %v1151_v23, 1  ;;  %v1517_v35 = vrot.slane %v1393_v26, 2  ;;  %v11853_v57 = vrot.slane %v9692_v30, 1 }
 0x262   : > { %v618_v59 = vadd.f32 %v586_v17, %v552_v18  ;;  %v1759_v48 = vrot.slane %v1636_v45, 2  ;;  %v2001_v2 = vrot.slane %v1878_v55, 2  ;;  %v1589_v52 = vadd.f32 %v1521_v46, %v1346_v63  ;;  %v11861_v18 = vld [vmem:[#allocation48_spill] sm:$0xff]  ;;  %v9914_v45 = vld [vmem:[%s11360_s2] ss:$0 sm:$0xff]  ;;  %v11864_v55 = vld [vmem:[#allocation15_spill] sm:$0xff] }
 0x263   : > { %v791_v40 = vsel %vm721_vm8, %v11853_v57, %v790_v29  ;;  %v11854_v47 = vrot.slane %v9703_v42, 1  ;;  %v11855_v62 = vrot.slane %v9709_v37, 1  ;;  %v11856_v44 = vrot.slane %v9720_v13, 2 }
 0x264   : > { %v861_v30 = vadd.f32 %v791_v40, %v618_v59  ;;  %v11857_v38 = vrot.slane %v9731_v36, 2  ;;  %v11858_v1 = vrot.slane %v9749_v53, 2  ;;  %v4617_v42 = vsel %vm4607_vm13, %v9089_v24, %v9737_v56  ;;  %v11860_v53 = vld [vmem:[#allocation51_spill] sm:$0xff]  ;;  %v11865_v59 = vld [vmem:[#allocation26_spill] sm:$0xff]  ;;  %v11866_v40 = vld [vmem:[#allocation8_spill] sm:$0xff] }
 0x265   : > { %v1033_v50 = vsel %vm721_vm8, %v11854_v47, %v1032_v61  ;;  %v1275_v0 = vsel %vm721_vm8, %v11855_v62, %v1274_v14  ;;  %v1518_v49 = vsel %vm1448_vm9, %v11856_v44, %v1517_v35  ;;  %v1831_v37 = vadd.f32 %v1763_v7, %v1589_v52  ;;  %v11863_v7 = vld [vmem:[#allocation47_spill] sm:$0xff]  ;;  %v4505_v35 = vpop.permute.xlu2 %4504  ;;  %v11870_v44 = vld [vmem:[#allocation6_spill] sm:$0xff] }
 0x266   : > { %v1760_v17 = vsel %vm1448_vm9, %v11857_v38, %v1759_v48  ;;  %v2002_v46 = vsel %vm1448_vm9, %v11858_v1, %v2001_v2  ;;  %v4611_v13 = vsel %vm4607_vm13, %v8957_v8, %v9739_v22  ;;  %v4609_v51 = vsel %vm4607_vm13, %v11859_v34, %v4469_v15  ;;  %v11867_v2 = vld [vmem:[#allocation9_spill] sm:$0xff]  ;;  %v11868_v47 = vld [vmem:[#allocation35_spill] sm:$0xff] }
 0x267   : > { %v9892_v36 = vsel %vm4607_vm13, %v9164_v33, %v4487_v4  ;;  %v1103_v23 = vadd.f32 %v1033_v50, %v861_v30  ;;  %v4608_v26 = vsel %vm4607_vm13, %v11860_v53, %v4467_v20  ;;  %v4610_v29 = vsel %vm4607_vm13, %v11861_v18, %v4471_v41  ;;  %v4489_v33 = vpop.permute.xlu1 %4488  ;;  %v11862_v4 = vld [vmem:[#allocation58_spill] sm:$0xff]  ;;  %v11869_v62 = vld [vmem:[#allocation43_spill] sm:$0xff]  ;;  %v9946_v1 = vld [vmem:[%s11359_s1 + $0x7] ss:$0 sm:$0xff] }
 0x268   : > { %v2073_v24 = vadd.f32 %v2005_v21, %v1831_v37  ;;  %v4641_v56 = vsel %vm4640_vm14, %v4608_v26, %v8877_v12  ;;  %v4625_v8 = vsel %vm4607_vm13, %v9233_v31, %v4501_v25  ;;  %v4642_v15 = vsel %vm4640_vm14, %v4609_v51, %v11862_v4  ;;  %v9955_v51 = vld [vmem:[%s11359_s1 + $0x5] ss:$0 sm:$0xff] }
 0x269   : > { %v1345_v22 = vadd.f32 %v1275_v0, %v1103_v23  ;;  %6088 = vmatmul.msk.f32.vlgmr.msra.gmra.mxu0 %vm4678_vm15, %v4641_v56  ;;  %v9907_v20 = vsel %vm4640_vm14, %v4610_v29, %v8877_v12  ;;  %v4620_v21 = vsel %vm4607_vm13, %v11863_v7, %v4491_v10  ;;  %v4619_v41 = vsel %vm4607_vm13, %v11864_v55, %v4489_v33  ;;  %v4503_v10 = vpop.permute.xlu0 %4502  ;;  %v9962_v23 = vld [vmem:[%s11359_s1 + $0x8] ss:$0 sm:$0xff] }
 0x26a   : > { %v2107_v31 = vadd.f32 %v9914_v45, %v2073_v24  ;;  %v9921_v63 = vsel %vm4640_vm14, %v4611_v13, %v11862_v4  ;;  %v9925_v61 = vsel %vm4640_vm14, %v4617_v42, %v11862_v4  ;;  %v432_v57 = vmul.f32 %v9840_v16, %v11865_v59  ;;  %v11871_v42 = vld [vmem:[#allocation22_spill] sm:$0xff] }
 0x26b   : > { %v1588_v14 = vadd.f32 %v1518_v49, %v1345_v22  ;;  %v498_v48 = vmul.f32 %v9780_v6, %v11866_v40  ;;  %v564_v25 = vmul.f32 %v9787_v28, %v11867_v2  ;;  %v4627_v50 = vsel %vm4607_vm13, %v11868_v47, %v4505_v35  ;;  %v11872_v56 = vld [vmem:[#allocation34_spill] sm:$0xff] }
 0x26c   : > { %v9935_v52 = vsel %vm4574_vm12, %v2107_v31, %v9678_v5  ;;  %v633_v0 = vmul.f32 %v9794_v9, %v11869_v62  ;;  %v876_v49 = vmul.f32 %v9801_v60, %v11870_v44  ;;  %v1118_v5 = vmul.f32 %v9946_v1, %v11871_v42  ;;  %v11874_v7 = vld [vmem:[#allocation46_spill] sm:$0xff] }
 0x26d   : > { %v1830_v30 = vadd.f32 %v1760_v17, %v1588_v14  ;;  %v530_v38 = vadd.f32 %v498_v48, %v432_v57  ;;  %v1360_v37 = vmul.f32 %v9810_v32, %v11869_v62  ;;  %v1603_v17 = vmul.f32 %v9955_v51, %v11870_v44  ;;  %v11878_v62 = vld [vmem:[#allocation7_spill] sm:$0xff] }
 0x26e   : > { %v735_v13 = vrot.slane %v633_v0, 1  ;;  %v977_v34 = vrot.slane %v876_v49, 1  ;;  %v1845_v53 = vmul.f32 %v9962_v23, %v11871_v42  ;;  %v1219_v29 = vrot.slane %v1118_v5, 1  ;;  %v11881_v5 = vld [vmem:[#allocation28_spill] sm:$0xff] }
 0x26f   : > { %v2072_v26 = vadd.f32 %v2002_v46, %v1830_v30  ;;  %v596_v18 = vadd.f32 %v564_v25, %v530_v38  ;;  %v1462_v24 = vrot.slane %v1360_v37, 2  ;;  %v11873_v22 = vrot.slane %v11872_v56, 1  ;;  %v4483_v57 = vpop.permute.xlu1 %4482  ;;  %v11876_v46 = vld [vmem:[#allocation27_spill] sm:$0xff]  ;;  %v11880_v30 = vld [vmem:[#allocation38_spill] sm:$0xff] }
 0x270   : > { %v11875_v31 = vrot.slane %v11874_v7, 1  ;;  %v1704_v14 = vrot.slane %v1603_v17, 2  ;;  %v1946_v35 = vrot.slane %v1845_v53, 2  ;;  %v11877_v25 = vrot.slane %v11876_v46, 1  ;;  %v11885_v53 = vld [vmem:[#allocation45_spill] sm:$0xff]  ;;  %v11886_v7 = vld [vmem:[#allocation55_spill] sm:$0xff] }
 0x271   : > { %v736_v33 = vsel %vm721_vm8, %v11873_v22, %v735_v13  ;;  %v2106_v59 = vadd.f32 %v9914_v45, %v2072_v26  ;;  %6089 = vmatmul.msk.f32.gmra.mxu0 %vm4678_vm15, %v4642_v15  ;;  %v11879_v0 = vrot.slane %v11878_v62, 2  ;;  %v4616_v38 = vsel %vm4607_vm13, %v11880_v30, %v4483_v57  ;;  %v11891_v62 = vld [vmem:[#allocation39_spill] sm:$0xff]  ;;  %v11892_v30 = vld [vmem:[#allocation36_spill] sm:$0xff] }
 0x272   : > { %v978_v55 = vsel %vm721_vm8, %v11875_v31, %v977_v34  ;;  %v839_v48 = vadd.f32 %v736_v33, %v596_v18  ;;  %v1220_v47 = vsel %vm721_vm8, %v11877_v25, %v1219_v29  ;;  %v11882_v37 = vrot.slane %v11881_v5, 2  ;;  %v11883_v34 = vld [vmem:[#allocation59_spill] sm:$0xff]  ;;  %v4509_v33 = vpop.permute.xlu0 %4508  ;;  %v11890_v25 = vld [vmem:[#allocation61_spill] sm:$0xff] }
 0x273   : > { %v1463_v49 = vsel %vm1448_vm9, %v11879_v0, %v1462_v24  ;;  %v11884_v17 = vrot.slane %v11883_v34, 2  ;;  %v4626_v26 = vsel %vm4607_vm13, %v11885_v53, %v4503_v10  ;;  %v9992_v18 = vsel %vm4574_vm12, %v2106_v59, %v9722_v54  ;;  %v4515_v24 = vpop.permute.xlu2 %4514  ;;  %v11887_v31 = vld [vmem:[#allocation19_spill] sm:$0xff] }
 0x274   : > { %v1705_v13 = vsel %vm1448_vm9, %v11882_v37, %v1704_v14  ;;  %v4649_v29 = vsel %vm4640_vm14, %v4616_v38, %v8877_v12  ;;  %v1081_v56 = vadd.f32 %v978_v55, %v839_v48  ;;  %v9999_v22 = vsel %vm4640_vm14, %v9761_v19, %v8877_v12  ;;  %v11888_v55 = vld [vmem:[#allocation54_spill] sm:$0xff]  ;;  %v11889_v19 = vld [vmem:[#allocation60_spill] sm:$0xff] }
 0x275   : > { %v1947_v15 = vsel %vm1448_vm9, %v11884_v17, %v1946_v35  ;;  %6096 = vmatmul.msk.f32.vlgmr.msra.gmra.mxu1 %vm4678_vm15, %v4649_v29  ;;  %v4632_v10 = vsel %vm4607_vm13, %v11886_v7, %v4515_v24  ;;  %v10007_v54 = vsel %vm4640_vm14, %v9892_v36, %v8877_v12  ;;  %v10011_v14 = vsel %vm4607_vm13, %v11887_v31, %v4509_v33  ;;  %v11893_v37 = vld [vmem:[#allocation50_spill] sm:$0xff]  ;;  %v11895_v17 = vld [vmem:[#allocation33_spill] sm:$0xff] }
 0x276   : > { %v10015_v35 = vsel %vm4640_vm14, %v4625_v8, %v11888_v55  ;;  %v4665_v59 = vsel %vm4640_vm14, %v4632_v10, %v11889_v19  ;;  %v1323_v57 = vadd.f32 %v1220_v47, %v1081_v56  ;;  %v10021_v48 = vsel %vm4640_vm14, %v4619_v41, %v11862_v4  ;;  %v11897_v33 = vld [vmem:[#allocation37_spill] sm:$0xff]  ;;  %v11899_v10 = vld [vmem:[#allocation56_spill] sm:$0xff] }
 0x277   : > { %v10025_v36 = vsel %vm4640_vm14, %v4626_v26, %v11889_v19  ;;  %6112 = vmatmul.msk.f32.vlgmr.msra.gmra.mxu3 %vm4678_vm15, %v4665_v59  ;;  %v10030_v46 = vsel %vm4640_vm14, %v4620_v21, %v8877_v12  ;;  %v10034_v8 = vsel %vm4640_vm14, %v4627_v50, %v11888_v55  ;;  %v441_v47 = vmul.f32 %v9840_v16, %v11890_v25  ;;  %v4499_v29 = vpop.permute.xlu1 %4498 }
 0x278   : > { %v507_v41 = vmul.f32 %v9780_v6, %v11891_v62  ;;  %v1566_v0 = vadd.f32 %v1463_v49, %v1323_v57  ;;  %v573_v38 = vmul.f32 %v9787_v28, %v11892_v30  ;;  %v646_v5 = vmul.f32 %v9794_v9, %v11890_v25 }
 0x279   : > { %v10046_v21 = vmul.f32 %v9794_v9, %v11893_v37  ;;  %v889_v50 = vmul.f32 %v9801_v60, %v11891_v62  ;;  %v10052_v53 = vmul.f32 %v9801_v60, %v11895_v17  ;;  %v1131_v49 = vmul.f32 %v9946_v1, %v11892_v30  ;;  %6090 = vmatmul.msk.f32.gmra.mxu0 %vm4678_vm15, %v9907_v20 }
 0x27a   : > { %v539_v34 = vadd.f32 %v507_v41, %v441_v47  ;;  %v1808_v26 = vadd.f32 %v1705_v13, %v1566_v0  ;;  %v757_v24 = vrot.slane %v646_v5, 1  ;;  %v10061_v7 = vmul.f32 %v9946_v1, %v11897_v33  ;;  %v4517_v13 = vpop.permute.xlu0 %4516 }
 0x27b   : > { %11894 = vst [vmem:[#allocation29_spill] sm:$0xff] %v10046_v21  ;;  %v11562_v56 = vrot.slane %v10046_v21, 1  ;;  %v4624_v31 = vsel %vm4607_vm13, %v11899_v10, %v4499_v29  ;;  %v999_v57 = vrot.slane %v889_v50, 1  ;;  %v11560_v47 = vrot.slane %v10052_v53, 1  ;;  %v4278_v42 = vpop.permute.xlu2 %4277 }
 0x27c   : > { %11896 = vst [vmem:[#allocation51_spill] sm:$0xff] %v10052_v53  ;;  %v605_v59 = vadd.f32 %v573_v38, %v539_v34  ;;  %v2050_v41 = vadd.f32 %v1947_v15, %v1808_v26  ;;  %v4657_v20 = vsel %vm4640_vm14, %v4624_v31, %v11889_v19  ;;  %v1241_v5 = vrot.slane %v1131_v49, 1  ;;  %v11900_v38 = vld [vmem:[#allocation65_spill] sm:$0xff] }
 0x27d   : > { %11898 = vst [vmem:[#allocation48_spill] sm:$0xff] %v10061_v7  ;;  %v759_v0 = vsel %vm721_vm8, %v757_v24, %v11562_v56  ;;  %6097 = vmatmul.msk.f32.gmra.mxu1 %vm4678_vm15, %v9925_v61  ;;  %6104 = vmatmul.msk.f32.vlgmr.msra.gmra.mxu2 %vm4678_vm15, %v4657_v20  ;;  %v4633_v34 = vsel %vm4607_vm13, %v11900_v38, %v4517_v13  ;;  %v11559_v26 = vrot.slane %v10061_v7, 1 }
 0x27e   : > { %v848_v50 = vadd.f32 %v759_v0, %v605_v59  ;;  %v1001_v15 = vsel %vm721_vm8, %v999_v57, %v11560_v47  ;;  %v2084_v29 = vadd.f32 %v9914_v45, %v2050_v41  ;;  %v4666_v49 = vsel %vm4640_vm14, %v4633_v34, %v11888_v55  ;;  %v11907_v47 = vld [vmem:[#allocation53_spill] sm:$0xff] }
 0x27f   : > { %v1373_v61 = vmul.f32 %v9810_v32, %v11890_v25  ;;  %v10087_v24 = vmul.f32 %v9810_v32, %v11893_v37  ;;  %6113 = vmatmul.msk.f32.gmra.mxu3 %vm4678_vm15, %v4666_v49  ;;  %v1243_v31 = vsel %vm721_vm8, %v1241_v5, %v11559_v26  ;;  %v1616_v59 = vmul.f32 %v9955_v51, %v11891_v62  ;;  %v4507_v62 = vpop.permute.xlu1 %4506  ;;  %v11905_v49 = vld [vmem:[#allocation21_spill] sm:$0xff] }
 0x280   : > { %v1090_v10 = vadd.f32 %v1001_v15, %v848_v50  ;;  %v10097_v57 = vmul.f32 %v9955_v51, %v11895_v17  ;;  %v4580_v25 = vsel %vm4574_vm12, %v2084_v29, %v4278_v42  ;;  %v1858_v13 = vmul.f32 %v9962_v23, %v11892_v30  ;;  %v11904_v15 = vld [vmem:[#allocation2_spill] sm:$0xff] }
 0x281   : > { %11901 = vst [vmem:[#allocation47_spill] sm:$0xff] %v10087_v24  ;;  %v1484_v41 = vrot.slane %v1373_v61, 2  ;;  %v11558_v20 = vrot.slane %v10087_v24, 2  ;;  %v1726_v38 = vrot.slane %v1616_v59, 2  ;;  %v10106_v5 = vmul.f32 %v9962_v23, %v11897_v33  ;;  %6091 = vmatmul.msk.f32.gmra.mxu0 %vm4678_vm15, %v9921_v63  ;;  %v11914_v24 = vld [vmem:[#allocation41_spill] sm:$0xff] }
 0x282   : > { %11902 = vst [vmem:[#allocation15_spill] sm:$0xff] %v10097_v57  ;;  %v1332_v0 = vadd.f32 %v1243_v31, %v1090_v10  ;;  %v11561_v34 = vrot.slane %v10097_v57, 2  ;;  %v1968_v50 = vrot.slane %v1858_v13, 2  ;;  %v440_v30 = vmul.f32 %v9840_v16, %v11904_v15 }
 0x283   : > { %11903 = vst [vmem:[#allocation26_spill] sm:$0xff] %v10106_v5  ;;  %v1486_v42 = vsel %vm1448_vm9, %v1484_v41, %v11558_v20  ;;  %v506_v29 = vmul.f32 %v9780_v6, %v11893_v37  ;;  %v10119_v61 = vsel %vm4607_vm13, %v11905_v49, %v4507_v62  ;;  %v11564_v31 = vrot.slane %v10106_v5, 2  ;;  %v10125_v59 = vpop.permute.xlu2 %4492  ;;  %v4521_v41 = vpop.permute.xlu0 %4520  ;;  %v11906_v20 = vld [vmem:[#allocation52_spill] sm:$0xff]  ;;  %v11932_v37 = vld [vmem:[#allocation5_spill] sm:$0xff] }
 0x284   : > { %v1575_v10 = vadd.f32 %v1486_v42, %v1332_v0  ;;  %v1728_v63 = vsel %vm1448_vm9, %v1726_v38, %v11561_v34  ;;  %v572_v15 = vmul.f32 %v9787_v28, %v11895_v17  ;;  %v645_v26 = vmul.f32 %v9794_v9, %v11906_v20  ;;  %v11908_v34 = vld [vmem:[#allocation42_spill] sm:$0xff] }
 0x285   : > { %v538_v13 = vadd.f32 %v506_v29, %v440_v30  ;;  %v888_v62 = vmul.f32 %v9801_v60, %v11907_v47  ;;  %6098 = vmatmul.msk.f32.gmra.mxu1 %vm4678_vm15, %v10007_v54  ;;  %6105 = vmatmul.msk.f32.gmra.mxu2 %vm4678_vm15, %v10015_v35  ;;  %v10139_v0 = vsel %vm4607_vm13, %v9992_v18, %v4521_v41  ;;  %v11911_v41 = vld [vmem:[#allocation40_spill] sm:$0xff] }
 0x286   : > { %v1817_v38 = vadd.f32 %v1728_v63, %v1575_v10  ;;  %v1970_v42 = vsel %vm1448_vm9, %v1968_v50, %v11564_v31  ;;  %v755_v29 = vrot.slane %v645_v26, 1  ;;  %v1130_v56 = vmul.f32 %v9946_v1, %v11908_v34  ;;  %v11909_v10 = vld [vmem:[#allocation16_spill] sm:$0xff] }
 0x287   : > { %v604_v30 = vadd.f32 %v572_v15, %v538_v13  ;;  %v997_v49 = vrot.slane %v888_v62, 1  ;;  %v1372_v54 = vmul.f32 %v9810_v32, %v11906_v20  ;;  %v1615_v35 = vmul.f32 %v9955_v51, %v11907_v47  ;;  %v11913_v62 = vld [vmem:[#allocation25_spill] sm:$0xff] }
 0x288   : > { %v2059_v57 = vadd.f32 %v1970_v42, %v1817_v38  ;;  %v1857_v18 = vmul.f32 %v9962_v23, %v11908_v34  ;;  %v11910_v63 = vrot.slane %v11909_v10, 1  ;;  %v11912_v26 = vrot.slane %v11911_v41, 1  ;;  %v4477_v10 = vpop.permute.xlu1 %4476 }
 0x289   : > { %v1239_v15 = vrot.slane %v1130_v56, 1  ;;  %v457_v38 = vmul.f32 %v9840_v16, %v11913_v62  ;;  %v1482_v31 = vrot.slane %v1372_v54, 2  ;;  %v1724_v5 = vrot.slane %v1615_v35, 2  ;;  %6092 = vmatmul.msk.f32.gmra.mxu0 %vm4678_vm15, %v9999_v22  ;;  %v11917_v54 = vld [vmem:[#allocation57_spill] sm:$0xff]  ;;  %v11919_v22 = vld [vmem:[#allocation62_spill] sm:$0xff] }
 0x28a   : > { %v756_v50 = vsel %vm721_vm8, %v11910_v63, %v755_v29  ;;  %v998_v13 = vsel %vm721_vm8, %v11912_v26, %v997_v49  ;;  %v10161_v20 = vadd.f32 %v9914_v45, %v2059_v57  ;;  %v11915_v29 = vrot.slane %v11914_v24, 1  ;;  %v11916_v49 = vld [vmem:[#allocation14_spill] sm:$0xff] }
 0x28b   : > { %v847_v42 = vadd.f32 %v756_v50, %v604_v30  ;;  %v1966_v41 = vrot.slane %v1857_v18, 2  ;;  %v523_v56 = vmul.f32 %v9780_v6, %v9770_v3  ;;  %v589_v26 = vmul.f32 %v9787_v28, %v11916_v49  ;;  %v10179_v53 = vpop.permute.xlu2 %4510 }
 0x28c   : > { %v1240_v63 = vsel %vm721_vm8, %v11915_v29, %v1239_v15  ;;  %v4613_v57 = vsel %vm4607_vm13, %v4580_v25, %v4477_v10  ;;  %v11918_v35 = vrot.slane %v11917_v54, 2  ;;  %v11920_v7 = vrot.slane %v11919_v22, 2  ;;  %v11921_v15 = vld [vmem:[#allocation63_spill] sm:$0xff] }
 0x28d   : > { %v1089_v30 = vadd.f32 %v998_v13, %v847_v42  ;;  %v4646_v18 = vsel %vm4640_vm14, %v4613_v57, %v11862_v4  ;;  %v11922_v29 = vrot.slane %v11921_v15, 2  ;;  %v555_v34 = vadd.f32 %v523_v56, %v457_v38  ;;  %6099 = vmatmul.msk.f32.gmra.mxu1 %vm4678_vm15, %v10021_v48  ;;  %6106 = vmatmul.msk.f32.gmra.mxu2 %vm4678_vm15, %v10025_v36  ;;  %v11923_v38 = vld [vmem:[#allocation31_spill] sm:$0xff]  ;;  %v11924_v56 = vld [vmem:[#allocation12_spill] sm:$0xff] }
 0x28e   : > { %v1483_v50 = vsel %vm1448_vm9, %v11918_v35, %v1482_v31  ;;  %v1725_v24 = vsel %vm1448_vm9, %v11920_v7, %v1724_v5  ;;  %v670_v25 = vmul.f32 %v9794_v9, %v11913_v62  ;;  %v10194_v5 = vmul.f32 %v9794_v9, %v9488_v43 }
 0x28f   : > { %v1967_v21 = vsel %vm1448_vm9, %v11922_v29, %v1966_v41  ;;  %v1331_v7 = vadd.f32 %v1240_v63, %v1089_v30  ;;  %v913_v31 = vmul.f32 %v9801_v60, %v9770_v3  ;;  %v621_v13 = vadd.f32 %v589_v26, %v555_v34 }
 0x290   : > { %v797_v42 = vrot.slane %v670_v25, 1  ;;  %v10200_v10 = vmul.f32 %v9801_v60, %v11923_v38  ;;  %v1155_v48 = vmul.f32 %v9946_v1, %v11916_v49  ;;  %v11576_v36 = vrot.slane %v10194_v5, 1  ;;  %v4519_v29 = vpop.permute.xlu1 %4518 }
 0x291   : > { %v1574_v41 = vadd.f32 %v1483_v50, %v1331_v7  ;;  %v1039_v63 = vrot.slane %v913_v31, 1  ;;  %v10207_v57 = vmul.f32 %v9946_v1, %v11924_v56  ;;  %v1397_v34 = vmul.f32 %v9810_v32, %v11913_v62  ;;  %6093 = vmatmul.msk.f32.gmra.mxu0 %vm4678_vm15, %v4646_v18 }
 0x292   : > { %v11574_v30 = vrot.slane %v10200_v10, 1  ;;  %v1281_v54 = vrot.slane %v1155_v48, 1  ;;  %v10214_v26 = vmul.f32 %v9810_v32, %v9488_v43  ;;  %v799_v50 = vsel %vm721_vm8, %v797_v42, %v11576_v36 }
 0x293   : > { %v1816_v35 = vadd.f32 %v1725_v24, %v1574_v41  ;;  %v11573_v22 = vrot.slane %v10207_v57, 1  ;;  %v1640_v15 = vmul.f32 %v9955_v51, %v9770_v3  ;;  %v864_v25 = vadd.f32 %v799_v50, %v621_v13  ;;  %v4523_v18 = vpop.permute.xlu2 %4522  ;;  %v4294_v41 = vpop.permute.xlu0 %4293 }
 0x294   : > { %v1041_v62 = vsel %vm721_vm8, %v1039_v63, %v11574_v30  ;;  %v1524_v7 = vrot.slane %v1397_v34, 2  ;;  %v11572_v24 = vrot.slane %v10214_v26, 2  ;;  %v4634_v31 = vsel %vm4607_vm13, %v9846_v58, %v4519_v29 }
 0x295   : > { %v2058_v42 = vadd.f32 %v1967_v21, %v1816_v35  ;;  %v1283_v48 = vsel %vm721_vm8, %v1281_v54, %v11573_v22  ;;  %v10234_v3 = vmul.f32 %v9955_v51, %v11923_v38  ;;  %v4667_v13 = vsel %vm4640_vm14, %v4634_v31, %v11889_v19  ;;  %6100 = vmatmul.msk.f32.gmra.mxu1 %vm4678_vm15, %v10030_v46 }
 0x296   : > { %v1106_v63 = vadd.f32 %v1041_v62, %v864_v25  ;;  %v1526_v34 = vsel %vm1448_vm9, %v1524_v7, %v11572_v24  ;;  %v1766_v58 = vrot.slane %v1640_v15, 2  ;;  %v10245_v21 = vsel %vm4607_vm13, %v9935_v52, %v4523_v18  ;;  %6107 = vmatmul.msk.f32.gmra.mxu2 %vm4678_vm15, %v10034_v8  ;;  %6114 = vmatmul.msk.f32.gmra.mxu3 %vm4678_vm15, %v4667_v13  ;;  %v11925_v62 = vld [vmem:[#allocation10_spill] sm:$0xff] }
 0x297   : > { %v2092_v54 = vadd.f32 %v9914_v45, %v2058_v42  ;;  %v11571_v35 = vrot.slane %v10234_v3, 2  ;;  %v1882_v50 = vmul.f32 %v9962_v23, %v11916_v49  ;;  %v10256_v46 = vmul.f32 %v9962_v23, %v11924_v56 }
 0x298   : > { %v1348_v15 = vadd.f32 %v1283_v48, %v1106_v63  ;;  %v4661_v52 = vsel %vm4640_vm14, %v10119_v61, %v11889_v19  ;;  %v4668_v8 = vsel %vm4640_vm14, %v10139_v0, %v11888_v55  ;;  %v450_v7 = vmul.f32 %v9840_v16, %v11925_v62  ;;  %v11926_v48 = vld [vmem:[#allocation64_spill] sm:$0xff] }
 0x299   : > { %v4588_v29 = vsel %vm4574_vm12, %v2092_v54, %v4294_v41  ;;  %v1768_v49 = vsel %vm1448_vm9, %v1766_v58, %v11571_v35  ;;  %v2008_v25 = vrot.slane %v1882_v50, 2  ;;  %v11575_v42 = vrot.slane %v10256_v46, 2  ;;  %v11927_v63 = vld [vmem:[#allocation24_spill] sm:$0xff]  ;;  %v4328_v54 = vpop.permute.xlu1 %4327 }
 0x29a   : > { %v1591_v31 = vadd.f32 %v1526_v34, %v1348_v15  ;;  %v4621_v61 = vsel %vm4607_vm13, %v4588_v29, %v10125_v59  ;;  %v516_v18 = vmul.f32 %v9780_v6, %v11926_v48  ;;  %v582_v13 = vmul.f32 %v9787_v28, %v9599_v39  ;;  %v11928_v35 = vld [vmem:[#allocation20_spill] sm:$0xff] }
 0x29b   : > { %v4654_v0 = vsel %vm4640_vm14, %v4621_v61, %v11862_v4  ;;  %v10281_v41 = vmul.f32 %v9794_v9, %v11925_v62  ;;  %v660_v34 = vmul.f32 %v9794_v9, %v11927_v63  ;;  %v2010_v59 = vsel %vm1448_vm9, %v2008_v25, %v11575_v42 }
 0x29c   : > { %v1833_v58 = vadd.f32 %v1768_v49, %v1591_v31  ;;  %v548_v50 = vadd.f32 %v516_v18, %v450_v7  ;;  %v10290_v15 = vmul.f32 %v9801_v60, %v11926_v48  ;;  %v903_v24 = vmul.f32 %v9801_v60, %v11928_v35  ;;  %v4296_v49 = vpop.permute.xlu2 %4295 }
 0x29d   : > { %v778_v29 = vrot.slane %v10281_v41, 1  ;;  %v780_v61 = vrot.slane %v660_v34, 1  ;;  %v10297_v22 = vmul.f32 %v9946_v1, %v9599_v39  ;;  %v1145_v7 = vmul.f32 %v9946_v1, %v9644_v27  ;;  %6101 = vmatmul.msk.f32.gmra.mxu1 %vm4678_vm15, %v4654_v0 }
 0x29e   : > { %v2075_v31 = vadd.f32 %v2010_v59, %v1833_v58  ;;  %v614_v30 = vadd.f32 %v582_v13, %v548_v50  ;;  %v1020_v25 = vrot.slane %v10290_v15, 1  ;;  %v10304_v18 = vsel %vm4574_vm12, %v10161_v20, %v4296_v49  ;;  %6108 = vmatmul.msk.f32.gmra.mxu2 %vm4678_vm15, %v4661_v52  ;;  %6115 = vmatmul.msk.f32.gmra.mxu3 %vm4678_vm15, %v4668_v8 }
 0x29f   : > { %v781_v41 = vsel %vm721_vm8, %v778_v29, %v780_v61  ;;  %v1022_v34 = vrot.slane %v903_v24, 1  ;;  %v1262_v42 = vrot.slane %v10297_v22, 1  ;;  %v1264_v59 = vrot.slane %v1145_v7, 1  ;;  %v10321_v24 = vpop.permute.xlu0 %4311 }
 0x2a0   : > { %v2109_v13 = vadd.f32 %v9914_v45, %v2075_v31  ;;  %v857_v58 = vadd.f32 %v781_v41, %v614_v30  ;;  %v1386_v50 = vmul.f32 %v9810_v32, %v11925_v62  ;;  %v1387_v52 = vmul.f32 %v9810_v32, %v11927_v63 }
 0x2a1   : > { %v1023_v20 = vsel %vm721_vm8, %v1020_v25, %v1022_v34  ;;  %v1629_v0 = vmul.f32 %v9955_v51, %v11926_v48  ;;  %v1630_v22 = vmul.f32 %v9955_v51, %v11928_v35  ;;  %v1265_v15 = vsel %vm721_vm8, %v1262_v42, %v1264_v59  ;;  %v11929_v35 = vld [vmem:[#allocation23_spill] sm:$0xff] }
 0x2a2   : > { %v10324_v8 = vsel %vm4574_vm12, %v2109_v13, %v4328_v54  ;;  %v1099_v30 = vadd.f32 %v1023_v20, %v857_v58  ;;  %v1505_v62 = vrot.slane %v1386_v50, 2  ;;  %v1507_v61 = vrot.slane %v1387_v52, 2  ;;  %v11930_v34 = vld [vmem:[#allocation11_spill] sm:$0xff]  ;;  %v10335_v13 = vpop.permute.xlu1 %4279  ;;  %v11931_v20 = vld [vmem:[#allocation18_spill] sm:$0xff] }
 0x2a3   : > { %v1747_v49 = vrot.slane %v1629_v0, 2  ;;  %v1749_v31 = vrot.slane %v1630_v22, 2  ;;  %v1871_v63 = vmul.f32 %v9962_v23, %v9599_v39  ;;  %v1872_v48 = vmul.f32 %v9962_v23, %v9644_v27 }
 0x2a4   : > { %v1341_v7 = vadd.f32 %v1265_v15, %v1099_v30  ;;  %v449_v41 = vmul.f32 %v9840_v16, %v11929_v35  ;;  %v515_v54 = vmul.f32 %v9780_v6, %v11930_v34  ;;  %v1508_v58 = vsel %vm1448_vm9, %v1505_v62, %v1507_v61  ;;  %v4314_v44 = vpop.permute.xlu2 %4313 }
 0x2a5   : > { %v1750_v59 = vsel %vm1448_vm9, %v1747_v49, %v1749_v31  ;;  %v1989_v50 = vrot.slane %v1871_v63, 2  ;;  %v581_v39 = vmul.f32 %v9787_v28, %v11931_v20  ;;  %v1991_v0 = vrot.slane %v1872_v48, 2 }
 0x2a6   : > { %v1584_v52 = vadd.f32 %v1508_v58, %v1341_v7  ;;  %v547_v22 = vadd.f32 %v515_v54, %v449_v41  ;;  %v658_v27 = vmul.f32 %v9794_v9, %v11929_v35  ;;  %v901_v30 = vmul.f32 %v9801_v60, %v11930_v34 }
 0x2a7   : > { %v1143_v15 = vmul.f32 %v9946_v1, %v11931_v20  ;;  %v1385_v61 = vmul.f32 %v9810_v32, %v11929_v35  ;;  %v1628_v31 = vmul.f32 %v9955_v51, %v11930_v34  ;;  %v1992_v7 = vsel %vm1448_vm9, %v1989_v50, %v1991_v0  ;;  %v10360_v0 = vpop.permute.xlu0 %4478 }
 0x2a8   : > { %v1826_v63 = vadd.f32 %v1750_v59, %v1584_v52  ;;  %v613_v48 = vadd.f32 %v581_v39, %v547_v22  ;;  %v777_v41 = vrot.slane %v658_v27, 1  ;;  %v1019_v54 = vrot.slane %v901_v30, 1  ;;  %v11933_v30 = vld [vmem:[#allocation17_spill] sm:$0xff] }
 0x2a9   : > { %v1261_v58 = vrot.slane %v1143_v15, 1  ;;  %v1504_v36 = vrot.slane %v1385_v61, 2  ;;  %v1746_v4 = vrot.slane %v1628_v31, 2  ;;  %v1870_v17 = vmul.f32 %v9962_v23, %v11931_v20  ;;  %v11934_v31 = vld [vmem:[#allocation30_spill] sm:$0xff] }
 0x2aa   : > { %v2068_v47 = vadd.f32 %v1992_v7, %v1826_v63  ;;  %v779_v33 = vsel %vm721_vm8, %v777_v41, %v778_v29  ;;  %v433_v35 = vmul.f32 %v9840_v16, %v11932_v37  ;;  %v1021_v59 = vsel %vm721_vm8, %v1019_v54, %v1020_v25  ;;  %v4525_v15 = vpop.permute.xlu1 %4524  ;;  %v11935_v54 = vld [vmem:[#allocation4_spill] sm:$0xff] }
 0x2ab   : > { %v856_v34 = vadd.f32 %v779_v33, %v613_v48  ;;  %v1263_v39 = vsel %vm721_vm8, %v1261_v58, %v1262_v42  ;;  %v1506_v52 = vsel %vm1448_vm9, %v1504_v36, %v1505_v62  ;;  %v1748_v29 = vsel %vm1448_vm9, %v1746_v4, %v1747_v49 }
 0x2ac   : > { %v2102_v22 = vadd.f32 %v9914_v45, %v2068_v47  ;;  %v1988_v27 = vrot.slane %v1870_v17, 2  ;;  %v499_v20 = vmul.f32 %v9780_v6, %v11933_v30  ;;  %v565_v33 = vmul.f32 %v9787_v28, %v11934_v31 }
 0x2ad   : > { %v1098_v61 = vadd.f32 %v1021_v59, %v856_v34  ;;  %v634_v42 = vmul.f32 %v9794_v9, %v11932_v37  ;;  %v10372_v36 = vmul.f32 %v9794_v9, %v11866_v40  ;;  %v877_v25 = vmul.f32 %v9801_v60, %v11933_v30 }
 0x2ae   : > { %v10375_v47 = vsel %vm4574_vm12, %v2102_v22, %v4314_v44  ;;  %v1990_v4 = vsel %vm1448_vm9, %v1988_v27, %v1989_v50  ;;  %v531_v17 = vadd.f32 %v499_v20, %v433_v35  ;;  %v10383_v7 = vmul.f32 %v9801_v60, %v11867_v2 }
 0x2af   : > { %v1340_v62 = vadd.f32 %v1263_v39, %v1098_v61  ;;  %v737_v49 = vrot.slane %v634_v42, 1  ;;  %v738_v63 = vrot.slane %v10372_v36, 1  ;;  %v979_v41 = vrot.slane %v877_v25, 1 }
 0x2b0   : > { %v597_v48 = vadd.f32 %v565_v33, %v531_v17  ;;  %v1119_v44 = vmul.f32 %v9946_v1, %v11934_v31  ;;  %v10389_v50 = vmul.f32 %v9946_v1, %v11935_v54  ;;  %v980_v34 = vrot.slane %v10383_v7, 1 }
 0x2b1   : > { %v1583_v58 = vadd.f32 %v1506_v52, %v1340_v62  ;;  %v739_v35 = vsel %vm721_vm8, %v737_v49, %v738_v63  ;;  %v1361_v59 = vmul.f32 %v9810_v32, %v11932_v37  ;;  %v10400_v20 = vmul.f32 %v9810_v32, %v11866_v40 }
 0x2b2   : > { %v840_v39 = vadd.f32 %v739_v35, %v597_v48  ;;  %v1221_v22 = vrot.slane %v1119_v44, 1  ;;  %v1222_v27 = vrot.slane %v10389_v50, 1  ;;  %v981_v52 = vsel %vm721_vm8, %v979_v41, %v980_v34  ;;  %v4495_v44 = vpop.permute.xlu1 %4494  ;;  %v11951_v50 = vld [vmem:[#allocation53_spill] sm:$0xff] }
 0x2b3   : > { %v1825_v61 = vadd.f32 %v1748_v29, %v1583_v58  ;;  %v1464_v33 = vrot.slane %v1361_v59, 2  ;;  %v1604_v42 = vmul.f32 %v9955_v51, %v11933_v30  ;;  %v1465_v25 = vrot.slane %v10400_v20, 2  ;;  %v10421_v30 = vpop.permute.xlu0 %4329 }
 0x2b4   : > { %v1082_v17 = vadd.f32 %v981_v52, %v840_v39  ;;  %v1223_v37 = vsel %vm721_vm8, %v1221_v22, %v1222_v27  ;;  %v10413_v62 = vmul.f32 %v9955_v51, %v11867_v2  ;;  %v1846_v48 = vmul.f32 %v9962_v23, %v11934_v31 }
 0x2b5   : > { %v2067_v29 = vadd.f32 %v1990_v4, %v1825_v61  ;;  %v1706_v49 = vrot.slane %v1604_v42, 2  ;;  %v10419_v41 = vmul.f32 %v9962_v23, %v11935_v54  ;;  %v1466_v35 = vsel %vm1448_vm9, %v1464_v33, %v1465_v25  ;;  %v11936_v42 = vld [vmem:[#allocation32_spill] sm:$0xff] }
 0x2b6   : > { %v1324_v58 = vadd.f32 %v1223_v37, %v1082_v17  ;;  %v1707_v59 = vrot.slane %v10413_v62, 2  ;;  %v4662_v4 = vsel %vm4640_vm14, %v10011_v14, %v11888_v55  ;;  %v1948_v39 = vrot.slane %v1846_v48, 2 }
 0x2b7   : > { %v2101_v31 = vadd.f32 %v9914_v45, %v2067_v29  ;;  %v1949_v22 = vrot.slane %v10419_v41, 2  ;;  %6109 = vmatmul.msk.f32.gmra.mxu2 %vm4678_vm15, %v4662_v4  ;;  %v4669_v61 = vsel %vm4640_vm14, %v10245_v21, %v11889_v19  ;;  %v4637_v14 = vsel %vm4607_vm13, %v11936_v42, %v4525_v15  ;;  %v11937_v4 = vld [vmem:[#allocation49_spill] sm:$0xff] }
 0x2b8   : > { %v1567_v52 = vadd.f32 %v1466_v35, %v1324_v58  ;;  %v1708_v33 = vsel %vm1448_vm9, %v1706_v49, %v1707_v59  ;;  %6116 = vmatmul.msk.f32.gmra.mxu3 %vm4678_vm15, %v4669_v61  ;;  %v458_v17 = vmul.f32 %v9840_v16, %v9488_v43  ;;  %v4670_v29 = vsel %vm4640_vm14, %v4637_v14, %v11888_v55 }
 0x2b9   : > { %v4597_v37 = vsel %vm4574_vm12, %v2101_v31, %v10321_v24  ;;  %v1950_v21 = vsel %vm1448_vm9, %v1948_v39, %v1949_v22  ;;  %v524_v49 = vmul.f32 %v9780_v6, %v11923_v38  ;;  %v590_v43 = vmul.f32 %v9787_v28, %v11924_v56  ;;  %v11938_v39 = vld [vmem:[#allocation13_spill] sm:$0xff] }
 0x2ba   : > { %v1809_v48 = vadd.f32 %v1708_v33, %v1567_v52  ;;  %v4630_v15 = vsel %vm4607_vm13, %v4597_v37, %v10179_v53  ;;  %v672_v24 = vmul.f32 %v9794_v9, %v9494_v11  ;;  %v915_v31 = vmul.f32 %v9801_v60, %v11937_v4 }
 0x2bb   : > { %v4663_v58 = vsel %vm4640_vm14, %v4630_v15, %v11889_v19  ;;  %v556_v35 = vadd.f32 %v524_v49, %v458_v17  ;;  %v1157_v38 = vmul.f32 %v9946_v1, %v11938_v39  ;;  %v1399_v53 = vmul.f32 %v9810_v32, %v9494_v11 }
 0x2bc   : > { %v2051_v61 = vadd.f32 %v1950_v21, %v1809_v48  ;;  %v800_v52 = vrot.slane %v672_v24, 1  ;;  %v1642_v56 = vmul.f32 %v9955_v51, %v11937_v4  ;;  %v1042_v42 = vrot.slane %v915_v31, 1 }
 0x2bd   : > { %v622_v33 = vadd.f32 %v590_v43, %v556_v35  ;;  %v1284_v14 = vrot.slane %v1157_v38, 1  ;;  %v1884_v17 = vmul.f32 %v9962_v23, %v11938_v39  ;;  %v11939_v49 = vrot.slane %v10194_v5, 1  ;;  %v4527_v39 = vpop.permute.xlu0 %4526  ;;  %v4513_v38 = vpop.permute.xlu1 %4512 }
 0x2be   : > { %v2085_v37 = vadd.f32 %v9914_v45, %v2051_v61  ;;  %v1527_v21 = vrot.slane %v1399_v53, 2  ;;  %v1769_v48 = vrot.slane %v1642_v56, 2  ;;  %v11940_v24 = vrot.slane %v10200_v10, 1 }
 0x2bf   : > { %v801_v15 = vsel %vm721_vm8, %v11939_v49, %v800_v52  ;;  %6110 = vmatmul.msk.f32.gmra.mxu2 %vm4678_vm15, %v4663_v58  ;;  %v11941_v35 = vrot.slane %v10207_v57, 1  ;;  %v2011_v31 = vrot.slane %v1884_v17, 2  ;;  %v11942_v61 = vrot.slane %v10214_v26, 2  ;;  %v11946_v17 = vld [vmem:[#allocation22_spill] sm:$0xff] }
 0x2c0   : > { %v865_v11 = vadd.f32 %v801_v15, %v622_v33  ;;  %v1043_v43 = vsel %vm721_vm8, %v11940_v24, %v1042_v42  ;;  %v4581_v5 = vsel %vm4574_vm12, %v2085_v37, %v10335_v13  ;;  %6117 = vmatmul.msk.f32.gmra.mxu3 %vm4678_vm15, %v4670_v29  ;;  %v11943_v10 = vrot.slane %v10234_v3, 2  ;;  %v11947_v37 = vld [vmem:[#allocation3_spill] sm:$0xff] }
 0x2c1   : > { %v1285_v4 = vsel %vm721_vm8, %v11941_v35, %v1284_v14  ;;  %v1528_v58 = vsel %vm1448_vm9, %v11942_v61, %v1527_v21  ;;  %v4622_v57 = vsel %vm4607_vm13, %v10304_v18, %v4495_v44  ;;  %v4614_v53 = vsel %vm4607_vm13, %v4581_v5, %v10360_v0  ;;  %v11945_v14 = vld [vmem:[#allocation6_spill] sm:$0xff] }
 0x2c2   : > { %v1770_v52 = vsel %vm1448_vm9, %v11943_v10, %v1769_v48  ;;  %v1107_v56 = vadd.f32 %v1043_v43, %v865_v11  ;;  %v11944_v33 = vrot.slane %v10256_v46, 2  ;;  %v4655_v26 = vsel %vm4640_vm14, %v4622_v57, %v8877_v12  ;;  %v11948_v57 = vld [vmem:[#allocation50_spill] sm:$0xff] }
 0x2c3   : > { %v4647_v29 = vsel %vm4640_vm14, %v4614_v53, %v8877_v12  ;;  %6102 = vmatmul.msk.f32.gmra.mxu1 %vm4678_vm15, %v4655_v26  ;;  %v4638_v3 = vsel %vm4607_vm13, %v10324_v8, %v4527_v39  ;;  %v4631_v18 = vsel %vm4607_vm13, %v10375_v47, %v4513_v38  ;;  %v434_v0 = vmul.f32 %v9840_v16, %v11866_v40  ;;  %v11950_v53 = vld [vmem:[#allocation37_spill] sm:$0xff]  ;;  %v11953_v26 = vld [vmem:[#allocation44_spill] sm:$0xff] }
 0x2c4   : > { %v2012_v13 = vsel %vm1448_vm9, %v11944_v33, %v2011_v31  ;;  %6094 = vmatmul.msk.f32.gmra.mxu0 %vm4678_vm15, %v4647_v29  ;;  %v1349_v46 = vadd.f32 %v1285_v4, %v1107_v56  ;;  %v4664_v44 = vsel %vm4640_vm14, %v4631_v18, %v11888_v55  ;;  %v4671_v12 = vsel %vm4640_vm14, %v4638_v3, %v11889_v19  ;;  %v4529_v29 = vpop.permute.xlu2 %4528 }
 0x2c5   : > { %v500_v42 = vmul.f32 %v9780_v6, %v11867_v2  ;;  %v566_v8 = vmul.f32 %v9787_v28, %v11935_v54  ;;  %v636_v47 = vmul.f32 %v9794_v9, %v11945_v14  ;;  %v879_v40 = vmul.f32 %v9801_v60, %v11946_v17 }
 0x2c6   : > { %v1121_v49 = vmul.f32 %v9946_v1, %v11947_v37  ;;  %v1592_v15 = vadd.f32 %v1528_v58, %v1349_v46  ;;  %v1363_v19 = vmul.f32 %v9810_v32, %v11945_v14  ;;  %v1606_v2 = vmul.f32 %v9955_v51, %v11946_v17 }
 0x2c7   : > { %v532_v21 = vadd.f32 %v500_v42, %v434_v0  ;;  %v740_v48 = vrot.slane %v636_v47, 1  ;;  %v982_v11 = vrot.slane %v879_v40, 1  ;;  %v1848_v24 = vmul.f32 %v9962_v23, %v11947_v37  ;;  %6111 = vmatmul.msk.f32.gmra.mxu2 %vm4678_vm15, %v4664_v44  ;;  %v11958_v40 = vld [vmem:[#allocation48_spill] sm:$0xff] }
 0x2c8   : > { %v1224_v54 = vrot.slane %v1121_v49, 1  ;;  %v1834_v43 = vadd.f32 %v1770_v52, %v1592_v15  ;;  %v1467_v4 = vrot.slane %v1363_v19, 2  ;;  %6118 = vmatmul.msk.f32.gmra.mxu3 %vm4678_vm15, %v4671_v12  ;;  %v1709_v38 = vrot.slane %v1606_v2, 2  ;;  %v11954_v12 = vld [vmem:[#allocation29_spill] sm:$0xff]  ;;  %v4282_v19 = vpop.permute.xlu0 %4281 }
 0x2c9   : > { %v598_v35 = vadd.f32 %v566_v8, %v532_v21  ;;  %v741_v31 = vsel %vm721_vm8, %v738_v63, %v740_v48  ;;  %v983_v39 = vsel %vm721_vm8, %v980_v34, %v982_v11  ;;  %v1951_v10 = vrot.slane %v1848_v24, 2  ;;  %v11949_v63 = vld [vmem:[#allocation33_spill] sm:$0xff]  ;;  %v11956_v8 = vld [vmem:[#allocation51_spill] sm:$0xff] }
 0x2ca   : > { %v2076_v5 = vadd.f32 %v2012_v13, %v1834_v43  ;;  %v1225_v58 = vsel %vm721_vm8, %v1222_v27, %v1224_v54  ;;  %v1468_v52 = vsel %vm1448_vm9, %v1465_v25, %v1467_v4  ;;  %v442_v36 = vmul.f32 %v9840_v16, %v11948_v57  ;;  %v11952_v13 = vld [vmem:[#allocation42_spill] sm:$0xff] }
 0x2cb   : > { %v841_v61 = vadd.f32 %v741_v31, %v598_v35  ;;  %v508_v7 = vmul.f32 %v9780_v6, %v11949_v63  ;;  %v574_v34 = vmul.f32 %v9787_v28, %v11950_v53  ;;  %v648_v27 = vmul.f32 %v9794_v9, %v11951_v50  ;;  %v11962_v35 = vld [vmem:[#allocation15_spill] sm:$0xff]  ;;  %v11966_v57 = vld [vmem:[#allocation58_spill] sm:$0xff] }
 0x2cc   : > { %v2110_v56 = vadd.f32 %v9914_v45, %v2076_v5  ;;  %v891_v20 = vmul.f32 %v9801_v60, %v11952_v13  ;;  %v1710_v25 = vsel %vm1448_vm9, %v1707_v59, %v1709_v38  ;;  %v1133_v6 = vmul.f32 %v9946_v1, %v11953_v26  ;;  %v4481_v38 = vpop.permute.xlu2 %4480 }
 0x2cd   : > { %v1083_v33 = vadd.f32 %v983_v39, %v841_v61  ;;  %v540_v16 = vadd.f32 %v508_v7, %v442_v36  ;;  %v1375_v28 = vmul.f32 %v9810_v32, %v11951_v50  ;;  %v760_v18 = vrot.slane %v648_v27, 1  ;;  %v4298_v7 = vpop.permute.xlu1 %4297  ;;  %v10608_v27 = vld [vmem:[%s11362_s4] ss:$0 sm:$0xff] }
 0x2ce   : > { %v1002_v0 = vrot.slane %v891_v20, 1  ;;  %v1618_v9 = vmul.f32 %v9955_v51, %v11952_v13  ;;  %v4606_v60 = vsel %vm4574_vm12, %v2110_v56, %v10421_v30  ;;  %v1244_v46 = vrot.slane %v1133_v6, 1 }
 0x2cf   : > { %v1325_v3 = vadd.f32 %v1225_v58, %v1083_v33  ;;  %v606_v62 = vadd.f32 %v574_v34, %v540_v16  ;;  %v1487_v59 = vrot.slane %v1375_v28, 2  ;;  %v11955_v42 = vrot.slane %v11954_v12, 1 }
 0x2d0   : > { %v11957_v32 = vrot.slane %v11956_v8, 1  ;;  %v1860_v47 = vmul.f32 %v9962_v23, %v11953_v26  ;;  %v1952_v51 = vsel %vm1448_vm9, %v1949_v22, %v1951_v10  ;;  %v11959_v37 = vrot.slane %v11958_v40, 1  ;;  %v11960_v23 = vld [vmem:[#allocation47_spill] sm:$0xff]  ;;  %v4497_v34 = vpop.permute.xlu0 %4496 }
 0x2d1   : > { %v1568_v44 = vadd.f32 %v1468_v52, %v1325_v3  ;;  %v761_v1 = vsel %vm721_vm8, %v11955_v42, %v760_v18  ;;  %v1729_v15 = vrot.slane %v1618_v9, 2  ;;  %v4639_v21 = vsel %vm4607_vm13, %v4606_v60, %v4529_v29 }
 0x2d2   : > { %v1003_v14 = vsel %vm721_vm8, %v11957_v32, %v1002_v0  ;;  %v849_v30 = vadd.f32 %v761_v1, %v606_v62  ;;  %v1245_v49 = vsel %vm721_vm8, %v11959_v37, %v1244_v46  ;;  %v4672_v48 = vsel %vm4640_vm14, %v4639_v21, %v11888_v55  ;;  %v11964_v55 = vld [vmem:[#allocation26_spill] sm:$0xff] }
 0x2d3   : > { %v1810_v17 = vadd.f32 %v1710_v25, %v1568_v44  ;;  %v11961_v54 = vrot.slane %v11960_v23, 2  ;;  %v1971_v22 = vrot.slane %v1860_v47, 2  ;;  %6119 = vmatmul.msk.f32.gmra.mxu3 %vm4678_vm15, %v4672_v48  ;;  %v11963_v4 = vrot.slane %v11962_v35, 2 }
 0x2d4   : > { %v1091_v2 = vadd.f32 %v1003_v14, %v849_v30  ;;  %v11965_v61 = vrot.slane %v11964_v55, 2 }
 0x2d5   : > { %v2052_v11 = vadd.f32 %v1952_v51, %v1810_v17  ;;  %v1488_v41 = vsel %vm1448_vm9, %v11961_v54, %v1487_v59  ;;  %v1730_v31 = vsel %vm1448_vm9, %v11963_v4, %v1729_v15 }
 0x2d6   : > { %v1333_v24 = vadd.f32 %v1245_v49, %v1091_v2  ;;  %v1972_v58 = vsel %vm1448_vm9, %v11965_v61, %v1971_v22 }
 0x2d7   : > { %v2086_v43 = vadd.f32 %v9914_v45, %v2052_v11 }
 0x2d8   : > { %v1576_v39 = vadd.f32 %v1488_v41, %v1333_v24 }
 0x2d9   : > { %v4582_v5 = vsel %vm4574_vm12, %v2086_v43, %v4282_v19 }
 0x2da   : > { %v1818_v10 = vadd.f32 %v1730_v31, %v1576_v39  ;;  %v4615_v52 = vsel %vm4607_vm13, %v4582_v5, %v4481_v38 }
 0x2db   : > { %v4648_v36 = vsel %vm4640_vm14, %v4615_v52, %v11966_v57 }
 0x2dc   : > { %v2060_v63 = vadd.f32 %v1972_v58, %v1818_v10  ;;  %6095 = vmatmul.msk.f32.gmra.mxu0 %vm4678_vm15, %v4648_v36 }
 0x2de   : > { %v2094_v53 = vadd.f32 %v9914_v45, %v2060_v63 }
 0x2e0   : > { %v4590_v56 = vsel %vm4574_vm12, %v2094_v53, %v4298_v7 }
 0x2e1   : > { %v4623_v33 = vsel %vm4607_vm13, %v4590_v56, %v4497_v34 }
 0x2e2   : > { %v4656_v50 = vsel %vm4640_vm14, %v4623_v33, %v11966_v57 }
 0x2e3   : > { %6103 = vmatmul.msk.f32.gmra.mxu1 %vm4678_vm15, %v4656_v50 }
 0x2e6   : > { %v4792_v13 = vpop.f32.mrf.mxu0 }
 0x2e7   : > { %v4793_v20 = vadd.f32 %v10608_v27, %v4792_v13 }
 0x2e9   : > { %v10611_v25 = vmul.f32 0.70710677, %v4793_v20  ;;  %v10639_v55 = vmul.f32 0.5, %v4793_v20 }
 0x2eb   : > { %v4952_v45 = vand.u32 2147483647, %v10611_v25  ;;  %vm5656_vm0 = vcmp.ge.f32.partialorder %v10611_v25, 0.0 }
 0x2ed   : > { %v4984_v16 = vmul.f32 0.3275911, %v4952_v45  ;;  %v5464_v1 = vmul.f32 %v4952_v45, %v4952_v45 }
 0x2ee   : > { %v4795_v6 = vpop.f32.mrf.mxu0 }
 0x2ef   : > { %v5016_v26 = vadd.f32 1.0, %v4984_v16  ;;  %v4796_v28 = vadd.f32 %v10608_v27, %v4795_v6  ;;  %v5496_v17 = vsub.f32 0.0, %v5464_v1 }
 0x2f1   : > { %6183 = vrcp.f32 %v5016_v26  ;;  %v10615_v29 = vmul.f32 0.70710677, %v4796_v28  ;;  %v5528_v24 = vmul.f32 1.442695, %v5496_v17  ;;  %v10649_v7 = vmul.f32 0.5, %v4796_v28 }
 0x2f2   : > { %v4816_v46 = vpop.f32.mrf.mxu1 }
 0x2f3   : > { %v4953_v18 = vand.u32 2147483647, %v10615_v29  ;;  %v10620_v12 = vadd.f32 %v10608_v27, %v4816_v46  ;;  %vm5657_vm1 = vcmp.ge.f32.partialorder %v10615_v29, 0.0 }
 0x2f5   : > { %v4985_v9 = vmul.f32 0.3275911, %v4953_v18  ;;  %v10625_v14 = vmul.f32 0.70710677, %v10620_v12  ;;  %v5465_v2 = vmul.f32 %v4953_v18, %v4953_v18 }
 0x2f6   : > { %v4798_v62 = vpop.f32.mrf.mxu0 }
 0x2f7   : > { %v6184_v3 = vpop.eup %6183  ;;  %v5017_v59 = vadd.f32 1.0, %v4985_v9  ;;  %v4799_v44 = vadd.f32 %v10608_v27, %v4798_v62  ;;  %v4960_v30 = vand.u32 2147483647, %v10625_v14  ;;  %v5497_v39 = vsub.f32 0.0, %v5465_v2 }
 0x2f8   : > { %v5080_v0 = vmul.f32 %v6184_v3, %v5016_v26  ;;  %vm5664_vm3 = vcmp.ge.f32.partialorder %v10625_v14, 0.0 }
 0x2f9   : > { %6185 = vrcp.f32 %v5017_v59  ;;  %v10622_v8 = vmul.f32 0.70710677, %v4799_v44  ;;  %v4992_v49 = vmul.f32 0.3275911, %v4960_v30  ;;  %v5530_v33 = vmul.f32 1.442695, %v5497_v39 }
 0x2fa   : > { %v5112_v60 = vsub.f32 2.0, %v5080_v0  ;;  %v4819_v21 = vpop.f32.mrf.mxu1  ;;  %v4864_v5 = vpop.f32.mrf.mxu3  ;;  %v10653_v50 = vmul.f32 0.5, %v4799_v44  ;;  %v5472_v0 = vmul.f32 %v4960_v30, %v4960_v30 }
 0x2fb   : > { %v4954_v47 = vand.u32 2147483647, %v10622_v8  ;;  %v5024_v41 = vadd.f32 1.0, %v4992_v49  ;;  %v10633_v22 = vadd.f32 %v10608_v27, %v4819_v21  ;;  %v10647_v36 = vadd.f32 %v10608_v27, %v4864_v5 }
 0x2fc   : > { %v5144_v42 = vmul.f32 %v6184_v3, %v5112_v60  ;;  %v5504_v30 = vsub.f32 0.0, %v5472_v0  ;;  %vm5658_vm2 = vcmp.ge.f32.partialorder %v10622_v8, 0.0 }
 0x2fd   : > { %v4986_v40 = vmul.f32 0.3275911, %v4954_v47  ;;  %v5466_v43 = vmul.f32 %v4954_v47, %v4954_v47  ;;  %v10644_v10 = vmul.f32 0.70710677, %v10633_v22  ;;  %v10656_v20 = vmul.f32 0.70710677, %v10647_v36 }
 0x2fe   : > { %v5176_v32 = vmul.f32 1.0614054, %v5144_v42  ;;  %v4801_v15 = vpop.f32.mrf.mxu0 }
 0x2ff   : > { %v6186_v19 = vpop.eup %6185  ;;  %v5018_v48 = vadd.f32 1.0, %v4986_v40  ;;  %v10630_v11 = vadd.f32 %v10608_v27, %v4801_v15  ;;  %v5498_v52 = vsub.f32 0.0, %v5466_v43  ;;  %v4961_v34 = vand.u32 2147483647, %v10644_v10 }
 0x300   : > { %v5208_v51 = vadd.f32 -1.4531521, %v5176_v32  ;;  %v5081_v54 = vmul.f32 %v6186_v19, %v5017_v59  ;;  %v4976_v47 = vand.u32 2147483647, %v10656_v20  ;;  %vm5665_vm5 = vcmp.ge.f32.partialorder %v10644_v10, 0.0 }
 0x301   : > { %6187 = vrcp.f32 %v5018_v48  ;;  %v10636_v35 = vmul.f32 0.70710677, %v10630_v11  ;;  %v4993_v3 = vmul.f32 0.3275911, %v4961_v34  ;;  %v5532_v28 = vmul.f32 1.442695, %v5498_v52 }
 0x302   : > { %v5240_v37 = vmul.f32 %v5208_v51, %v5144_v42  ;;  %v5113_v31 = vsub.f32 2.0, %v5081_v54  ;;  %6189 = vrcp.f32 %v5024_v41  ;;  %v5473_v32 = vmul.f32 %v4961_v34, %v4961_v34 }
 0x303   : > { %v4955_v38 = vand.u32 2147483647, %v10636_v35  ;;  %6191 = vpow2.f32 %v5528_v24  ;;  %v5025_v46 = vadd.f32 1.0, %v4993_v3  ;;  %vm5659_vm4 = vcmp.ge.f32.partialorder %v10636_v35, 0.0  ;;  %v5819_v35 = vld [vmem:[%s6420_s23 + $0x18] sm:$0xff] }
 0x304   : > { %v5272_v23 = vadd.f32 1.4214138, %v5240_v37  ;;  %v10641_v58 = vmul.f32 %v6186_v19, %v5113_v31  ;;  %v5505_v54 = vsub.f32 0.0, %v5473_v32  ;;  %vm5680_vm6 = vcmp.ge.f32.partialorder %v10656_v20, 0.0 }
 0x305   : > { %v4987_v57 = vmul.f32 0.3275911, %v4955_v38  ;;  %v5467_v1 = vmul.f32 %v4955_v38, %v4955_v38  ;;  %v5544_v38 = vmul.f32 1.442695, %v5504_v30 }
 0x306   : > { %v5304_v4 = vmul.f32 %v5272_v23, %v5144_v42  ;;  %v5177_v53 = vmul.f32 1.0614054, %v10641_v58  ;;  %v4804_v19 = vpop.f32.mrf.mxu0  ;;  %v10681_v25 = vmul.f32 1.442695, %v5505_v54  ;;  %v4822_v54 = vpop.f32.mrf.mxu1 }
 0x307   : > { %v6188_v56 = vpop.eup %6187  ;;  %v5019_v13 = vadd.f32 1.0, %v4987_v57  ;;  %v5499_v23 = vsub.f32 0.0, %v5467_v1  ;;  %v10669_v5 = vadd.f32 %v10608_v27, %v4804_v19 }
 0x308   : > { %v5336_v61 = vadd.f32 -0.28449672, %v5304_v4  ;;  %v6190_v45 = vpop.eup %6189  ;;  %v5209_v26 = vadd.f32 -1.4531521, %v5177_v53  ;;  %v5082_v6 = vmul.f32 %v6188_v56, %v5018_v48 }
 0x309   : > { %v5088_v18 = vmul.f32 %v6190_v45, %v5024_v41  ;;  %6193 = vrcp.f32 %v5019_v13  ;;  %v6192_v59 = vpop.eup %6191 }
 0x30a   : > { %v5368_v63 = vmul.f32 %v5336_v61, %v5144_v42  ;;  %v5241_v60 = vmul.f32 %v5209_v26, %v10641_v58  ;;  %v5114_v62 = vsub.f32 2.0, %v5082_v6  ;;  %6195 = vrcp.f32 %v5025_v46 }
 0x30b   : > { %v5120_v44 = vsub.f32 2.0, %v5088_v18  ;;  %6197 = vpow2.f32 %v5530_v33  ;;  %v5816_v33 = vld [vmem:[%s6420_s23] sm:$0xff] }
 0x30c   : > { %v5400_v16 = vadd.f32 0.2548296, %v5368_v63  ;;  %v5273_v17 = vadd.f32 1.4214138, %v5241_v60  ;;  %v10661_v40 = vmul.f32 %v6188_v56, %v5114_v62  ;;  %6199 = vpow2.f32 %v5532_v28 }
 0x30d   : > { %v10663_v37 = vmul.f32 %v6190_v45, %v5120_v44  ;;  %v10677_v45 = vmul.f32 1.442695, %v5499_v23  ;;  %v10686_v60 = vmul.f32 0.70710677, %v10669_v5 }
 0x30e   : > { %v5432_v9 = vmul.f32 %v5400_v16, %v5144_v42  ;;  %v5008_v42 = vmul.f32 0.3275911, %v4976_v47  ;;  %v5305_v15 = vmul.f32 %v5273_v17, %v10641_v58  ;;  %v5178_v21 = vmul.f32 1.0614054, %v10661_v40 }
 0x30f   : > { %v6194_v2 = vpop.eup %6193  ;;  %v5184_v48 = vmul.f32 1.0614054, %v10663_v37  ;;  %v10702_v17 = vand.u32 2147483647, %v10686_v60  ;;  %vm5660_vm7 = vcmp.ge.f32.partialorder %v10686_v60, 0.0 }
 0x310   : > { %v5592_v51 = vmul.f32 %v6192_v59, %v5432_v9  ;;  %v5040_v41 = vadd.f32 1.0, %v5008_v42  ;;  %v5337_v43 = vadd.f32 -0.28449672, %v5305_v15  ;;  %v5210_v4 = vadd.f32 -1.4531521, %v5178_v21  ;;  %v6196_v61 = vpop.eup %6195 }
 0x311   : > { %v5083_v31 = vmul.f32 %v6194_v2, %v5019_v13  ;;  %v5216_v39 = vadd.f32 -1.4531521, %v5184_v48  ;;  %v6198_v34 = vpop.eup %6197  ;;  %v5089_v16 = vmul.f32 %v6196_v61, %v5025_v46  ;;  %v5488_v59 = vmul.f32 %v4976_v47, %v4976_v47 }
 0x312   : > { %v5624_v49 = vsub.f32 1.0, %v5592_v51  ;;  %6201 = vrcp.f32 %v5040_v41  ;;  %v5369_v57 = vmul.f32 %v5337_v43, %v10641_v58  ;;  %v5242_v63 = vmul.f32 %v5210_v4, %v10661_v40  ;;  %v6200_v26 = vpop.eup %6199 }
 0x313   : > { %v5115_v53 = vsub.f32 2.0, %v5083_v31  ;;  %v5248_v13 = vmul.f32 %v5216_v39, %v10663_v37  ;;  %v5121_v9 = vsub.f32 2.0, %v5089_v16  ;;  %6203 = vpow2.f32 %v5544_v38 }
 0x314   : > { %v5688_v24 = vsub.f32 0.0, %v5624_v49  ;;  %v5401_v6 = vadd.f32 0.2548296, %v5369_v57  ;;  %v5274_v3 = vadd.f32 1.4214138, %v5242_v63  ;;  %v10719_v63 = vadd.f32 %v10608_v27, %v4822_v54  ;;  %v4840_v54 = vpop.f32.mrf.mxu2 }
 0x315   : > { %v10679_v28 = vmul.f32 %v6194_v2, %v5115_v53  ;;  %v5280_v0 = vadd.f32 1.4214138, %v5248_v13  ;;  %v10699_v51 = vmul.f32 %v6196_v61, %v5121_v9  ;;  %v4988_v4 = vmul.f32 0.3275911, %v10702_v17 }
 0x316   : > { %v5720_v52 = vsel %vm5656_vm0, %v5624_v49, %v5688_v24  ;;  %v5433_v62 = vmul.f32 %v5401_v6, %v10641_v58  ;;  %v5306_v46 = vmul.f32 %v5274_v3, %v10661_v40  ;;  %v10707_v58 = vmul.f32 0.5, %v10620_v12  ;;  %v5817_v6 = vld [vmem:[%s6420_s23 + $0x8] sm:$0xff] }
 0x317   : > { %v5752_v56 = vadd.f32 1.0, %v5720_v52  ;;  %v5312_v32 = vmul.f32 %v5280_v0, %v10663_v37  ;;  %v5185_v47 = vmul.f32 1.0614054, %v10699_v51  ;;  %v5020_v57 = vadd.f32 1.0, %v4988_v4 }
 0x318   : > { %v6202_v44 = vpop.eup %6201  ;;  %v5593_v30 = vmul.f32 %v6198_v34, %v5433_v62  ;;  %v5338_v42 = vadd.f32 -0.28449672, %v5306_v46 }
 0x319   : > { %v5784_v18 = vmul.f32 %v5752_v56, %v10639_v55  ;;  %v5179_v55 = vmul.f32 1.0614054, %v10679_v28  ;;  %v5104_v15 = vmul.f32 %v6202_v44, %v5040_v41  ;;  %v5344_v21 = vadd.f32 -0.28449672, %v5312_v32  ;;  %v6204_v13 = vpop.eup %6203 }
 0x31a   : > { %v5625_v19 = vsub.f32 1.0, %v5593_v30  ;;  %v5370_v2 = vmul.f32 %v5338_v42, %v10661_v40  ;;  %v5217_v43 = vadd.f32 -1.4531521, %v5185_v47  ;;  %v5520_v41 = vsub.f32 0.0, %v5488_v59 }
 0x31b   : > { %v5848_v1 = vmul.f32 %v5816_v33, %v5784_v18  ;;  %v5211_v49 = vadd.f32 -1.4531521, %v5179_v55  ;;  %v5136_v23 = vsub.f32 2.0, %v5104_v15  ;;  %v5376_v24 = vmul.f32 %v5344_v21, %v10663_v37 }
 0x31c   : > { %v5689_v31 = vsub.f32 0.0, %v5625_v19  ;;  %v5402_v12 = vadd.f32 0.2548296, %v5370_v2  ;;  %v5249_v52 = vmul.f32 %v5217_v43, %v10699_v51  ;;  %6205 = vrcp.f32 %v5020_v57 }
 0x31d   : > { %5880 = vst.msk [vmem:[%s10693_s14] sm:$0xff] %vm4678_vm15, %v5848_v1  ;;  %v5243_v48 = vmul.f32 %v5211_v49, %v10679_v28  ;;  %v10714_v38 = vmul.f32 %v6202_v44, %v5136_v23  ;;  %v5408_v61 = vadd.f32 0.2548296, %v5376_v24  ;;  %v5576_v29 = vmul.f32 1.442695, %v5520_v41 }
 0x31e   : > { %v5721_v53 = vsel %vm5657_vm1, %v5625_v19, %v5689_v31  ;;  %v5434_v34 = vmul.f32 %v5402_v12, %v10661_v40  ;;  %v5281_v18 = vadd.f32 1.4214138, %v5249_v52  ;;  %6207 = vpow2.f32 %v10677_v45  ;;  %v5818_v12 = vld [vmem:[%s6420_s23 + $0x10] sm:$0xff] }
 0x31f   : > { %v5275_v39 = vadd.f32 1.4214138, %v5243_v48  ;;  %v5200_v33 = vmul.f32 1.0614054, %v10714_v38  ;;  %v5753_v16 = vadd.f32 1.0, %v5721_v53  ;;  %v5440_v3 = vmul.f32 %v5408_v61, %v10663_v37  ;;  %v5824_v53 = vld [vmem:[%s6420_s23 + $0x40] sm:$0xff] }
 0x320   : > { %v5594_v0 = vmul.f32 %v6200_v26, %v5434_v34  ;;  %v5313_v55 = vmul.f32 %v5281_v18, %v10699_v51  ;;  %6209 = vpow2.f32 %v10681_v25  ;;  %v10736_v30 = vmul.f32 0.70710677, %v10719_v63 }
 0x321   : > { %v5307_v56 = vmul.f32 %v5275_v39, %v10679_v28  ;;  %v5232_v62 = vadd.f32 -1.4531521, %v5200_v33  ;;  %v5785_v46 = vmul.f32 %v5753_v16, %v10649_v7  ;;  %v5600_v40 = vmul.f32 %v6204_v13, %v5440_v3 }
 0x322   : > { %v5626_v59 = vsub.f32 1.0, %v5594_v0  ;;  %v5345_v32 = vadd.f32 -0.28449672, %v5313_v55  ;;  %6211 = vpow2.f32 %v5576_v29  ;;  %v6206_v45 = vpop.eup %6205  ;;  %v5468_v25 = vmul.f32 %v10702_v17, %v10702_v17 }
 0x323   : > { %v5339_v9 = vadd.f32 -0.28449672, %v5307_v56  ;;  %v5264_v37 = vmul.f32 %v5232_v62, %v10714_v38  ;;  %v5849_v1 = vmul.f32 %v5817_v6, %v5785_v46  ;;  %v5632_v26 = vsub.f32 1.0, %v5600_v40  ;;  %v4825_v62 = vpop.f32.mrf.mxu1 }
 0x324   : > { %v5690_v7 = vsub.f32 0.0, %v5626_v59  ;;  %v5377_v21 = vmul.f32 %v5345_v32, %v10699_v51  ;;  %v10744_v47 = vand.u32 2147483647, %v10736_v30  ;;  %v5084_v23 = vmul.f32 %v6206_v45, %v5020_v57  ;;  %v6208_v24 = vpop.eup %6207 }
 0x325   : > { %v5371_v44 = vmul.f32 %v5339_v9, %v10679_v28  ;;  %v5296_v49 = vadd.f32 1.4214138, %v5264_v37  ;;  %5881 = vst.msk [vmem:[%s10693_s14 + $0x8] sm:$0xff] %vm4678_vm15, %v5849_v1  ;;  %v5696_v15 = vsub.f32 0.0, %v5632_v26  ;;  %v10758_v56 = vadd.f32 %v10608_v27, %v4840_v54 }
 0x326   : > { %v5722_v19 = vsel %vm5658_vm2, %v5626_v59, %v5690_v7  ;;  %v5409_v4 = vadd.f32 0.2548296, %v5377_v21  ;;  %v4994_v17 = vmul.f32 0.3275911, %v10744_v47  ;;  %v6210_v31 = vpop.eup %6209  ;;  %v5116_v52 = vsub.f32 2.0, %v5084_v23 }
 0x327   : > { %v5403_v42 = vadd.f32 0.2548296, %v5371_v44  ;;  %v5328_v48 = vmul.f32 %v5296_v49, %v10714_v38  ;;  %v5754_v43 = vadd.f32 1.0, %v5722_v19  ;;  %v5728_v41 = vsel %vm5664_vm3, %v5632_v26, %v5696_v15  ;;  %v4843_v49 = vpop.f32.mrf.mxu2 }
 0x328   : > { %v5760_v39 = vadd.f32 1.0, %v5728_v41  ;;  %v5441_v57 = vmul.f32 %v5409_v4, %v10699_v51  ;;  %v5026_v34 = vadd.f32 1.0, %v4994_v17  ;;  %v6212_v14 = vpop.eup %6211  ;;  %v10762_v6 = vmul.f32 %v6206_v45, %v5116_v52 }
 0x329   : > { %v5435_v2 = vmul.f32 %v5403_v42, %v10679_v28  ;;  %v5360_v61 = vadd.f32 -0.28449672, %v5328_v48  ;;  %v5786_v28 = vmul.f32 %v5754_v43, %v10653_v50  ;;  %v5500_v29 = vsub.f32 0.0, %v5468_v25 }
 0x32a   : > { %v5792_v33 = vmul.f32 %v5760_v39, %v10707_v58  ;;  %v5601_v18 = vmul.f32 %v6210_v31, %v5441_v57  ;;  %6213 = vrcp.f32 %v5026_v34  ;;  %v5180_v9 = vmul.f32 1.0614054, %v10762_v6 }
 0x32b   : > { %v5595_v8 = vmul.f32 %v6208_v24, %v5435_v2  ;;  %v5392_v16 = vmul.f32 %v5360_v61, %v10714_v38  ;;  %v5850_v3 = vmul.f32 %v5818_v12, %v5786_v28  ;;  %v10769_v46 = vmul.f32 0.70710677, %v10758_v56  ;;  %v5825_v24 = vld [vmem:[%s6420_s23 + $0x48] sm:$0xff] }
 0x32c   : > { %v5856_v50 = vmul.f32 %v5824_v53, %v5792_v33  ;;  %v5633_v58 = vsub.f32 1.0, %v5601_v18  ;;  %v4891_v40 = vmul.f32 0.5, %v10630_v11  ;;  %v5212_v44 = vadd.f32 -1.4531521, %v5180_v9  ;;  %v4807_v53 = vpop.f32.mrf.mxu0 }
 0x32d   : > { %v5627_v13 = vsub.f32 1.0, %v5595_v8  ;;  %v5424_v51 = vadd.f32 0.2548296, %v5392_v16  ;;  %5882 = vst.msk [vmem:[%s10693_s14 + $0x10] sm:$0xff] %vm4678_vm15, %v5850_v3  ;;  %v4968_v26 = vand.u32 2147483647, %v10769_v46  ;;  %v10777_v32 = vadd.f32 %v10608_v27, %v4825_v62 }
 0x32e   : > { %5888 = vst.msk [vmem:[%s10693_s14 + $0x40] sm:$0xff] %vm4678_vm15, %v5856_v50  ;;  %v5697_v1 = vsub.f32 0.0, %v5633_v58  ;;  %v4897_v7 = vmul.f32 0.5, %v10633_v22  ;;  %v5244_v11 = vmul.f32 %v5212_v44, %v10762_v6  ;;  %v5536_v21 = vmul.f32 1.442695, %v5500_v29 }
 0x32f   : > { %v5691_v0 = vsub.f32 0.0, %v5627_v13  ;;  %v5456_v59 = vmul.f32 %v5424_v51, %v10714_v38  ;;  %v5000_v25 = vmul.f32 0.3275911, %v4968_v26  ;;  %v10785_v22 = vmul.f32 0.70710677, %v10777_v32  ;;  %v4828_v51 = vpop.f32.mrf.mxu1 }
 0x330   : > { %v6214_v45 = vpop.eup %6213  ;;  %v5729_v15 = vsel %vm5665_vm5, %v5633_v58, %v5697_v1  ;;  %v5276_v48 = vadd.f32 1.4214138, %v5244_v11  ;;  %v10788_v10 = vadd.f32 %v10608_v27, %v4843_v49  ;;  %v4912_v12 = vmul.f32 0.5, %v10647_v36  ;;  %v5840_v36 = vld [vmem:[%s6420_s23 + $0xc0] sm:$0xff] }
 0x331   : > { %v5723_v55 = vsel %vm5659_vm4, %v5627_v13, %v5691_v0  ;;  %v5616_v42 = vmul.f32 %v6212_v14, %v5456_v59  ;;  %v5761_v19 = vadd.f32 1.0, %v5729_v15  ;;  %v5090_v23 = vmul.f32 %v6214_v45, %v5026_v34 }
 0x332   : > { %v5755_v37 = vadd.f32 1.0, %v5723_v55  ;;  %v5032_v43 = vadd.f32 1.0, %v5000_v25  ;;  %v5308_v17 = vmul.f32 %v5276_v48, %v10762_v6  ;;  %v4963_v39 = vand.u32 2147483647, %v10785_v22 }
 0x333   : > { %v5648_v2 = vsub.f32 1.0, %v5616_v42  ;;  %v5793_v41 = vmul.f32 %v5761_v19, %v4897_v7  ;;  %v5122_v31 = vsub.f32 2.0, %v5090_v23  ;;  %v5474_v34 = vmul.f32 %v10744_v47, %v10744_v47 }
 0x334   : > { %v5787_v38 = vmul.f32 %v5755_v37, %v4891_v40  ;;  %6215 = vrcp.f32 %v5032_v43  ;;  %v5340_v52 = vadd.f32 -0.28449672, %v5308_v17  ;;  %v4995_v14 = vmul.f32 0.3275911, %v4963_v39 }
 0x335   : > { %v5712_v4 = vsub.f32 0.0, %v5648_v2  ;;  %v5857_v8 = vmul.f32 %v5825_v24, %v5793_v41  ;;  %v10796_v28 = vmul.f32 %v6214_v45, %v5122_v31  ;;  %6217 = vpow2.f32 %v5536_v21 }
 0x336   : > { %v5851_v54 = vmul.f32 %v5819_v35, %v5787_v38  ;;  %v5372_v20 = vmul.f32 %v5340_v52, %v10762_v6  ;;  %v10806_v13 = vmul.f32 0.70710677, %v10788_v10  ;;  %v5027_v3 = vadd.f32 1.0, %v4995_v14 }
 0x337   : > { %v5744_v61 = vsel %vm5680_vm6, %v5648_v2, %v5712_v4  ;;  %5889 = vst.msk [vmem:[%s10693_s14 + $0x48] sm:$0xff] %vm4678_vm15, %v5857_v8  ;;  %v5186_v33 = vmul.f32 1.0614054, %v10796_v28  ;;  %v10809_v18 = vadd.f32 %v10608_v27, %v4807_v53  ;;  %v5506_v58 = vsub.f32 0.0, %v5474_v34  ;;  %v5820_v34 = vld [vmem:[%s6420_s23 + $0x20] sm:$0xff] }
 0x338   : > { %5883 = vst.msk [vmem:[%s10693_s14 + $0x18] sm:$0xff] %vm4678_vm15, %v5851_v54  ;;  %v5776_v57 = vadd.f32 1.0, %v5744_v61  ;;  %v5404_v50 = vadd.f32 0.2548296, %v5372_v20  ;;  %v4969_v47 = vand.u32 2147483647, %v10806_v13  ;;  %v5480_v29 = vmul.f32 %v4968_v26, %v4968_v26 }
 0x339   : > { %v5218_v0 = vadd.f32 -1.4531521, %v5186_v33  ;;  %6219 = vrcp.f32 %v5027_v3  ;;  %v4892_v1 = vmul.f32 0.5, %v10669_v5  ;;  %v10819_v35 = vmul.f32 0.70710677, %v10809_v18 }
 0x33a   : > { %v5808_v16 = vmul.f32 %v5776_v57, %v4912_v12  ;;  %v6216_v9 = vpop.eup %6215  ;;  %v5436_v40 = vmul.f32 %v5404_v50, %v10762_v6  ;;  %v5001_v44 = vmul.f32 0.3275911, %v4969_v47  ;;  %v10822_v7 = vadd.f32 %v10608_v27, %v4828_v51 }
 0x33b   : > { %v5250_v55 = vmul.f32 %v5218_v0, %v10796_v28  ;;  %v5096_v59 = vmul.f32 %v6216_v9, %v5032_v43  ;;  %v6218_v37 = vpop.eup %6217  ;;  %v10825_v49 = vmul.f32 0.5, %v10719_v63  ;;  %v5548_v45 = vmul.f32 1.442695, %v5506_v58 }
 0x33c   : > { %v5872_v62 = vmul.f32 %v5840_v36, %v5808_v16  ;;  %v5596_v26 = vmul.f32 %v6218_v37, %v5436_v40  ;;  %v5033_v11 = vadd.f32 1.0, %v5001_v44  ;;  %v5512_v38 = vsub.f32 0.0, %v5480_v29 }
 0x33d   : > { %v5282_v42 = vadd.f32 1.4214138, %v5250_v55  ;;  %v5128_v6 = vsub.f32 2.0, %v5096_v59  ;;  %v4957_v15 = vand.u32 2147483647, %v10819_v35  ;;  %v10832_v2 = vmul.f32 0.5, %v10758_v56 }
 0x33e   : > { %5904 = vst.msk [vmem:[%s10693_s14 + $0xc0] sm:$0xff] %vm4678_vm15, %v5872_v62  ;;  %v5628_v5 = vsub.f32 1.0, %v5596_v26  ;;  %6221 = vrcp.f32 %v5033_v11  ;;  %v5475_v48 = vmul.f32 %v4963_v39, %v4963_v39  ;;  %v10835_v54 = vmul.f32 0.70710677, %v10822_v7 }
 0x33f   : > { %v5314_v21 = vmul.f32 %v5282_v42, %v10796_v28  ;;  %v10829_v25 = vmul.f32 %v6216_v9, %v5128_v6  ;;  %v6220_v19 = vpop.eup %6219  ;;  %v4989_v23 = vmul.f32 0.3275911, %v4957_v15  ;;  %6223 = vpow2.f32 %v5548_v45  ;;  %v4846_v9 = vpop.f32.mrf.mxu2 }
 0x340   : > { %v5692_v63 = vsub.f32 0.0, %v5628_v5  ;;  %v5091_v41 = vmul.f32 %v6220_v19, %v5027_v3  ;;  %v5560_v4 = vmul.f32 1.442695, %v5512_v38  ;;  %v4964_v31 = vand.u32 2147483647, %v10835_v54 }
 0x341   : > { %v5346_v24 = vadd.f32 -0.28449672, %v5314_v21  ;;  %v5192_v43 = vmul.f32 1.0614054, %v10829_v25  ;;  %v5021_v17 = vadd.f32 1.0, %v4989_v23  ;;  %v5481_v52 = vmul.f32 %v4969_v47, %v4969_v47 }
 0x342   : > { %v5724_v56 = vsel %vm5660_vm7, %v5628_v5, %v5692_v63  ;;  %v5123_v8 = vsub.f32 2.0, %v5091_v41  ;;  %v4996_v53 = vmul.f32 0.3275911, %v4964_v31  ;;  %v5507_v33 = vsub.f32 0.0, %v5475_v48 }
 0x343   : > { %v5378_v12 = vmul.f32 %v5346_v24, %v10796_v28  ;;  %v5224_v39 = vadd.f32 -1.4531521, %v5192_v43  ;;  %v5756_v61 = vadd.f32 1.0, %v5724_v56  ;;  %6225 = vrcp.f32 %v5021_v17 }
 0x344   : > { %v6222_v57 = vpop.eup %6221  ;;  %v10844_v20 = vmul.f32 %v6220_v19, %v5123_v8  ;;  %v5469_v60 = vmul.f32 %v4957_v15, %v4957_v15  ;;  %v5028_v50 = vadd.f32 1.0, %v4996_v53  ;;  %vm5666_vm8 = vcmp.ge.f32.partialorder %v10736_v30, 0.0 }
 0x345   : > { %v5410_v14 = vadd.f32 0.2548296, %v5378_v12  ;;  %v5256_v36 = vmul.f32 %v5224_v39, %v10829_v25  ;;  %v5788_v16 = vmul.f32 %v5756_v61, %v4892_v1  ;;  %v5097_v3 = vmul.f32 %v6222_v57, %v5033_v11  ;;  %v6224_v62 = vpop.eup %6223 }
 0x346   : > { %v5187_v51 = vmul.f32 1.0614054, %v10844_v20  ;;  %v5513_v40 = vsub.f32 0.0, %v5481_v52  ;;  %6227 = vrcp.f32 %v5028_v50  ;;  %v5501_v26 = vsub.f32 0.0, %v5469_v60 }
 0x347   : > { %v5442_v0 = vmul.f32 %v5410_v14, %v10796_v28  ;;  %v5288_v47 = vadd.f32 1.4214138, %v5256_v36  ;;  %v5852_v58 = vmul.f32 %v5820_v34, %v5788_v16  ;;  %v5129_v29 = vsub.f32 2.0, %v5097_v3  ;;  %v4867_v34 = vpop.f32.mrf.mxu3  ;;  %v5826_v14 = vld [vmem:[%s6420_s23 + $0x50] sm:$0xff] }
 0x348   : > { %6229 = vpow2.f32 %v5560_v4  ;;  %v5219_v44 = vadd.f32 -1.4531521, %v5187_v51  ;;  %v5550_v28 = vmul.f32 1.442695, %v5507_v33  ;;  %v10855_v42 = vadd.f32 %v10608_v27, %v4846_v9 }
 0x349   : > { %v5602_v55 = vmul.f32 %v6224_v62, %v5442_v0  ;;  %v5320_v59 = vmul.f32 %v5288_v47, %v10829_v25  ;;  %v6226_v37 = vpop.eup %6225  ;;  %5884 = vst.msk [vmem:[%s10693_s14 + $0x20] sm:$0xff] %vm4678_vm15, %v5852_v58  ;;  %v10852_v1 = vmul.f32 %v6222_v57, %v5129_v29  ;;  %v5562_v5 = vmul.f32 1.442695, %v5513_v40 }
 0x34a   : > { %v5251_v45 = vmul.f32 %v5219_v44, %v10844_v20  ;;  %v5085_v38 = vmul.f32 %v6226_v37, %v5021_v17  ;;  %v5476_v21 = vmul.f32 %v4964_v31, %v4964_v31  ;;  %v10860_v19 = vmul.f32 0.70710677, %v10855_v42 }
 0x34b   : > { %v5634_v6 = vsub.f32 1.0, %v5602_v55  ;;  %v5352_v11 = vadd.f32 -0.28449672, %v5320_v59  ;;  %v5193_v15 = vmul.f32 1.0614054, %v10852_v1  ;;  %6231 = vpow2.f32 %v5550_v28 }
 0x34c   : > { %v5283_v63 = vadd.f32 1.4214138, %v5251_v45  ;;  %v5117_v24 = vsub.f32 2.0, %v5085_v38  ;;  %v6228_v43 = vpop.eup %6227  ;;  %v5538_v4 = vmul.f32 1.442695, %v5501_v26  ;;  %vm5672_vm9 = vcmp.ge.f32.partialorder %v10769_v46, 0.0 }
 0x34d   : > { %v5698_v48 = vsub.f32 0.0, %v5634_v6  ;;  %v5384_v23 = vmul.f32 %v5352_v11, %v10829_v25  ;;  %v5225_v41 = vadd.f32 -1.4531521, %v5193_v15  ;;  %v4970_v56 = vand.u32 2147483647, %v10860_v19 }
 0x34e   : > { %v6230_v17 = vpop.eup %6229  ;;  %v5315_v39 = vmul.f32 %v5283_v63, %v10844_v20  ;;  %v10867_v8 = vmul.f32 %v6226_v37, %v5117_v24  ;;  %v5092_v53 = vmul.f32 %v6228_v43, %v5028_v50  ;;  %v5508_v16 = vsub.f32 0.0, %v5476_v21 }
 0x34f   : > { %v5730_v12 = vsel %vm5666_vm8, %v5634_v6, %v5698_v48  ;;  %v5416_v31 = vadd.f32 0.2548296, %v5384_v23  ;;  %v5257_v52 = vmul.f32 %v5225_v41, %v10852_v1  ;;  %v5002_v57 = vmul.f32 0.3275911, %v4970_v56  ;;  %v4849_v6 = vpop.f32.mrf.mxu2 }
 0x350   : > { %v5762_v61 = vadd.f32 1.0, %v5730_v12  ;;  %v5347_v33 = vadd.f32 -0.28449672, %v5315_v39  ;;  %v5181_v30 = vmul.f32 1.0614054, %v10867_v8  ;;  %v5124_v0 = vsub.f32 2.0, %v5092_v53 }
 0x351   : > { %v5448_v36 = vmul.f32 %v5416_v31, %v10829_v25  ;;  %v5289_v60 = vadd.f32 1.4214138, %v5257_v52  ;;  %v5034_v47 = vadd.f32 1.0, %v5002_v57  ;;  %v10877_v50 = vadd.f32 %v10608_v27, %v4867_v34  ;;  %v6232_v58 = vpop.eup %6231 }
 0x352   : > { %v5794_v3 = vmul.f32 %v5762_v61, %v10825_v49  ;;  %v5379_v9 = vmul.f32 %v5347_v33, %v10844_v20  ;;  %v5213_v62 = vadd.f32 -1.4531521, %v5181_v30  ;;  %v10880_v40 = vmul.f32 %v6228_v43, %v5124_v0 }
 0x353   : > { %v5608_v51 = vmul.f32 %v6230_v17, %v5448_v36  ;;  %v5321_v25 = vmul.f32 %v5289_v60, %v10852_v1  ;;  %6233 = vrcp.f32 %v5034_v47  ;;  %v4899_v49 = vmul.f32 0.5, %v10777_v32  ;;  %v5832_v17 = vld [vmem:[%s6420_s23 + $0x80] sm:$0xff] }
 0x354   : > { %v5858_v29 = vmul.f32 %v5826_v14, %v5794_v3  ;;  %v5411_v59 = vadd.f32 0.2548296, %v5379_v9  ;;  %v5245_v44 = vmul.f32 %v5213_v62, %v10867_v8  ;;  %vm5667_vm10 = vcmp.ge.f32.partialorder %v10785_v22, 0.0 }
 0x355   : > { %v5640_v55 = vsub.f32 1.0, %v5608_v51  ;;  %v10888_v37 = vmul.f32 0.5, %v10788_v10  ;;  %v5353_v28 = vadd.f32 -0.28449672, %v5321_v25  ;;  %6235 = vpow2.f32 %v5562_v5  ;;  %v4870_v51 = vpop.f32.mrf.mxu3 }
 0x356   : > { %5890 = vst.msk [vmem:[%s10693_s14 + $0x50] sm:$0xff] %vm4678_vm15, %v5858_v29  ;;  %v5188_v26 = vmul.f32 1.0614054, %v10880_v40  ;;  %v5443_v45 = vmul.f32 %v5411_v59, %v10844_v20  ;;  %v5277_v32 = vadd.f32 1.4214138, %v5245_v44  ;;  %6237 = vpow2.f32 %v5538_v4  ;;  %v5827_v29 = vld [vmem:[%s6420_s23 + $0x58] sm:$0xff] }
 0x357   : > { %v5704_v11 = vsub.f32 0.0, %v5640_v55  ;;  %v5385_v38 = vmul.f32 %v5353_v28, %v10852_v1  ;;  %v5552_v21 = vmul.f32 1.442695, %v5508_v16  ;;  %v10894_v48 = vmul.f32 0.70710677, %v10877_v50 }
 0x358   : > { %v5220_v15 = vadd.f32 -1.4531521, %v5188_v26  ;;  %v5603_v5 = vmul.f32 %v6232_v58, %v5443_v45  ;;  %v5309_v23 = vmul.f32 %v5277_v32, %v10867_v8  ;;  %v10900_v63 = vadd.f32 %v10608_v27, %v4849_v6 }
 0x359   : > { %v5736_v10 = vsel %vm5672_vm9, %v5640_v55, %v5704_v11  ;;  %v6234_v20 = vpop.eup %6233  ;;  %v5417_v43 = vadd.f32 0.2548296, %v5385_v38  ;;  %v10904_v4 = vand.u32 2147483647, %v10894_v48  ;;  %v5482_v46 = vmul.f32 %v4970_v56, %v4970_v56 }
 0x35a   : > { %v5768_v24 = vadd.f32 1.0, %v5736_v10  ;;  %v5252_v41 = vmul.f32 %v5220_v15, %v10880_v40  ;;  %v5635_v12 = vsub.f32 1.0, %v5603_v5  ;;  %v5341_v31 = vadd.f32 -0.28449672, %v5309_v23  ;;  %v4831_v23 = vpop.f32.mrf.mxu1 }
 0x35b   : > { %v5098_v39 = vmul.f32 %v6234_v20, %v5034_v47  ;;  %v6236_v61 = vpop.eup %6235  ;;  %v5449_v53 = vmul.f32 %v5417_v43, %v10852_v1  ;;  %v5009_v34 = vmul.f32 0.3275911, %v10904_v4  ;;  %v10912_v16 = vmul.f32 0.70710677, %v10900_v63 }
 0x35c   : > { %v5800_v52 = vmul.f32 %v5768_v24, %v10832_v2  ;;  %v5284_v57 = vadd.f32 1.4214138, %v5252_v41  ;;  %v6238_v14 = vpop.eup %6237  ;;  %v5699_v36 = vsub.f32 0.0, %v5635_v12  ;;  %v5373_v33 = vmul.f32 %v5341_v31, %v10867_v8 }
 0x35d   : > { %v5130_v30 = vsub.f32 2.0, %v5098_v39  ;;  %v5609_v56 = vmul.f32 %v6236_v61, %v5449_v53  ;;  %v5041_v2 = vadd.f32 1.0, %v5009_v34  ;;  %6239 = vpow2.f32 %v5552_v21 }
 0x35e   : > { %v5864_v3 = vmul.f32 %v5832_v17, %v5800_v52  ;;  %v5316_v60 = vmul.f32 %v5284_v57, %v10880_v40  ;;  %v5731_v1 = vsel %vm5667_vm10, %v5635_v12, %v5699_v36  ;;  %v5405_v0 = vadd.f32 0.2548296, %v5373_v33 }
 0x35f   : > { %v10917_v47 = vmul.f32 %v6234_v20, %v5130_v30  ;;  %v5763_v9 = vadd.f32 1.0, %v5731_v1  ;;  %v5641_v62 = vsub.f32 1.0, %v5609_v56  ;;  %6241 = vrcp.f32 %v5041_v2 }
 0x360   : > { %5896 = vst.msk [vmem:[%s10693_s14 + $0x80] sm:$0xff] %vm4678_vm15, %v5864_v3  ;;  %v5348_v58 = vadd.f32 -0.28449672, %v5316_v60  ;;  %v5437_v25 = vmul.f32 %v5405_v0, %v10867_v8  ;;  %v5514_v59 = vsub.f32 0.0, %v5482_v46  ;;  %v10925_v22 = vand.u32 2147483647, %v10912_v16 }
 0x361   : > { %v5194_v55 = vmul.f32 1.0614054, %v10917_v47  ;;  %v5795_v44 = vmul.f32 %v5763_v9, %v4899_v49  ;;  %v5705_v28 = vsub.f32 0.0, %v5641_v62  ;;  %v10929_v6 = vadd.f32 %v10608_v27, %v4870_v51  ;;  %v5821_v3 = vld [vmem:[%s6420_s23 + $0x28] sm:$0xff] }
 0x362   : > { %v5380_v26 = vmul.f32 %v5348_v58, %v10880_v40  ;;  %vm5673_vm11 = vcmp.ge.f32.partialorder %v10806_v13, 0.0  ;;  %v5597_v11 = vmul.f32 %v6238_v14, %v5437_v25  ;;  %v5003_v8 = vmul.f32 0.3275911, %v10925_v22  ;;  %v5833_v13 = vld [vmem:[%s6420_s23 + $0x88] sm:$0xff] }
 0x363   : > { %v5226_v45 = vadd.f32 -1.4531521, %v5194_v55  ;;  %v5859_v32 = vmul.f32 %v5827_v29, %v5795_v44  ;;  %v5737_v38 = vsel %vm5673_vm11, %v5641_v62, %v5705_v28  ;;  %vm5661_vm12 = vcmp.ge.f32.partialorder %v10819_v35, 0.0  ;;  %v6240_v49 = vpop.eup %6239  ;;  %v4852_v62 = vpop.f32.mrf.mxu2 }
 0x364   : > { %v5412_v15 = vadd.f32 0.2548296, %v5380_v26  ;;  %v5769_v21 = vadd.f32 1.0, %v5737_v38  ;;  %v5629_v10 = vsub.f32 1.0, %v5597_v11  ;;  %v5035_v27 = vadd.f32 1.0, %v5003_v8 }
 0x365   : > { %v5258_v5 = vmul.f32 %v5226_v45, %v10917_v47  ;;  %v6242_v20 = vpop.eup %6241  ;;  %5891 = vst.msk [vmem:[%s10693_s14 + $0x58] sm:$0xff] %vm4678_vm15, %v5859_v32  ;;  %v5564_v43 = vmul.f32 1.442695, %v5514_v59  ;;  %v10940_v41 = vmul.f32 0.70710677, %v10929_v6  ;;  %v4893_v14 = vmul.f32 0.5, %v10809_v18 }
 0x366   : > { %v5444_v24 = vmul.f32 %v5412_v15, %v10880_v40  ;;  %v5801_v17 = vmul.f32 %v5769_v21, %v10888_v37  ;;  %v5693_v12 = vsub.f32 0.0, %v5629_v10  ;;  %v5105_v39 = vmul.f32 %v6242_v20, %v5041_v2  ;;  %v10949_v40 = vld [vmem:[%s11362_s4] ss:$0 sm:$0xff] }
 0x367   : > { %v5290_v31 = vadd.f32 1.4214138, %v5258_v5  ;;  %6243 = vrcp.f32 %v5035_v27  ;;  %v10944_v61 = vand.u32 2147483647, %v10940_v41  ;;  %v10952_v52 = vadd.f32 %v10949_v40, %v4831_v23 }
 0x368   : > { %v5604_v46 = vmul.f32 %v6240_v49, %v5444_v24  ;;  %v5865_v53 = vmul.f32 %v5833_v13, %v5801_v17  ;;  %v5725_v37 = vsel %vm5661_vm12, %v5629_v10, %v5693_v12  ;;  %v5137_v34 = vsub.f32 2.0, %v5105_v39  ;;  %v4873_v13 = vpop.f32.mrf.mxu3 }
 0x369   : > { %v5322_v57 = vmul.f32 %v5290_v31, %v10917_v47  ;;  %v5757_v36 = vadd.f32 1.0, %v5725_v37  ;;  %v5010_v30 = vmul.f32 0.3275911, %v10944_v61  ;;  %6245 = vpow2.f32 %v5564_v43 }
 0x36a   : > { %v5636_v33 = vsub.f32 1.0, %v5604_v46  ;;  %5897 = vst.msk [vmem:[%s10693_s14 + $0x88] sm:$0xff] %vm4678_vm15, %v5865_v53  ;;  %v10962_v60 = vmul.f32 %v6242_v20, %v5137_v34  ;;  %v5489_v35 = vmul.f32 %v10904_v4, %v10904_v4  ;;  %vm5668_vm13 = vcmp.ge.f32.partialorder %v10835_v54, 0.0  ;;  %v5828_v54 = vld [vmem:[%s6420_s23 + $0x60] sm:$0xff] }
 0x36b   : > { %v5354_v56 = vadd.f32 -0.28449672, %v5322_v57  ;;  %v5789_v2 = vmul.f32 %v5757_v36, %v4893_v14  ;;  %v5042_v0 = vadd.f32 1.0, %v5010_v30  ;;  %v10970_v9 = vmul.f32 0.70710677, %v10952_v52 }
 0x36c   : > { %v5700_v1 = vsub.f32 0.0, %v5636_v33  ;;  %v5201_v51 = vmul.f32 1.0614054, %v10962_v60  ;;  %v4900_v25 = vmul.f32 0.5, %v10822_v7  ;;  %v4906_v26 = vmul.f32 0.5, %v10855_v42 }
 0x36d   : > { %v5386_v18 = vmul.f32 %v5354_v56, %v10917_v47  ;;  %v6244_v58 = vpop.eup %6243  ;;  %v5853_v29 = vmul.f32 %v5821_v3, %v5789_v2  ;;  %6247 = vrcp.f32 %v5042_v0  ;;  %v5521_v11 = vsub.f32 0.0, %v5489_v35  ;;  %v5834_v56 = vld [vmem:[%s6420_s23 + $0x90] sm:$0xff] }
 0x36e   : > { %v5732_v55 = vsel %vm5668_vm13, %v5636_v33, %v5700_v1  ;;  %v5233_v44 = vadd.f32 -1.4531521, %v5201_v51  ;;  %v5099_v28 = vmul.f32 %v6244_v58, %v5035_v27  ;;  %v4965_v45 = vand.u32 2147483647, %v10970_v9 }
 0x36f   : > { %v5764_v4 = vadd.f32 1.0, %v5732_v55  ;;  %v5418_v59 = vadd.f32 0.2548296, %v5386_v18  ;;  %5885 = vst.msk [vmem:[%s10693_s14 + $0x28] sm:$0xff] %vm4678_vm15, %v5853_v29  ;;  %v10979_v8 = vadd.f32 %v10949_v40, %v4852_v62  ;;  %v6246_v32 = vpop.eup %6245  ;;  %vm5674_vm14 = vcmp.ge.f32.partialorder %v10860_v19, 0.0  ;;  %v4855_v29 = vpop.f32.mrf.mxu2 }
 0x370   : > { %v5265_v15 = vmul.f32 %v5233_v44, %v10962_v60  ;;  %v5131_v49 = vsub.f32 2.0, %v5099_v28  ;;  %v10985_v21 = vmul.f32 0.5, %v10877_v50  ;;  %v5483_v42 = vmul.f32 %v10925_v22, %v10925_v22 }
 0x371   : > { %v5796_v38 = vmul.f32 %v5764_v4, %v4900_v25  ;;  %v5450_v7 = vmul.f32 %v5418_v59, %v10917_v47  ;;  %v4997_v10 = vmul.f32 0.3275911, %v4965_v45  ;;  %v5578_v24 = vmul.f32 1.442695, %v5521_v11 }
 0x372   : > { %v5297_v23 = vadd.f32 1.4214138, %v5265_v15  ;;  %v10989_v20 = vmul.f32 %v6244_v58, %v5131_v49  ;;  %v10992_v43 = vmul.f32 0.5, %v10900_v63  ;;  %v10995_v12 = vmul.f32 0.70710677, %v10979_v8 }
 0x373   : > { %v5860_v5 = vmul.f32 %v5828_v54, %v5796_v38  ;;  %v5610_v27 = vmul.f32 %v6246_v32, %v5450_v7  ;;  %v6248_v47 = vpop.eup %6247  ;;  %v5029_v17 = vadd.f32 1.0, %v4997_v10  ;;  %v5515_v46 = vsub.f32 0.0, %v5483_v42 }
 0x374   : > { %v5329_v22 = vmul.f32 %v5297_v23, %v10962_v60  ;;  %v5195_v31 = vmul.f32 1.0614054, %v10989_v20  ;;  %v5106_v39 = vmul.f32 %v6248_v47, %v5042_v0  ;;  %v4972_v53 = vand.u32 2147483647, %v10995_v12 }
 0x375   : > { %5892 = vst.msk [vmem:[%s10693_s14 + $0x60] sm:$0xff] %vm4678_vm15, %v5860_v5  ;;  %v5642_v50 = vsub.f32 1.0, %v5610_v27  ;;  %6249 = vrcp.f32 %v5029_v17  ;;  %v11003_v63 = vadd.f32 %v10949_v40, %v4873_v13  ;;  %v11006_v36 = vmul.f32 0.5, %v10929_v6 }
 0x376   : > { %v5361_v57 = vadd.f32 -0.28449672, %v5329_v22  ;;  %v5227_v34 = vadd.f32 -1.4531521, %v5195_v31  ;;  %v5138_v14 = vsub.f32 2.0, %v5106_v39  ;;  %6251 = vpow2.f32 %v5578_v24 }
 0x377   : > { %v5706_v37 = vsub.f32 0.0, %v5642_v50  ;;  %v5490_v33 = vmul.f32 %v10944_v61, %v10944_v61  ;;  %v5004_v30 = vmul.f32 0.3275911, %v4972_v53  ;;  %v5566_v18 = vmul.f32 1.442695, %v5515_v46 }
 0x378   : > { %v5393_v2 = vmul.f32 %v5361_v57, %v10962_v60  ;;  %v5259_v1 = vmul.f32 %v5227_v34, %v10989_v20  ;;  %v11015_v35 = vmul.f32 %v6248_v47, %v5138_v14  ;;  %v11018_v6 = vmul.f32 0.70710677, %v11003_v63  ;;  %v4876_v47 = vpop.f32.mrf.mxu3 }
 0x379   : > { %v5738_v3 = vsel %vm5674_vm14, %v5642_v50, %v5706_v37  ;;  %v5036_v51 = vadd.f32 1.0, %v5004_v30  ;;  %v5522_v55 = vsub.f32 0.0, %v5490_v33  ;;  %v5477_v38 = vmul.f32 %v4965_v45, %v4965_v45 }
 0x37a   : > { %v5770_v0 = vadd.f32 1.0, %v5738_v3  ;;  %v5425_v62 = vadd.f32 0.2548296, %v5393_v2  ;;  %v5291_v58 = vadd.f32 1.4214138, %v5259_v1  ;;  %v11028_v15 = vadd.f32 %v10949_v40, %v4855_v29 }
 0x37b   : > { %v5202_v61 = vmul.f32 1.0614054, %v11015_v35  ;;  %v6250_v19 = vpop.eup %6249  ;;  %6253 = vrcp.f32 %v5036_v51  ;;  %v11022_v4 = vand.u32 2147483647, %v11018_v6  ;;  %vm5681_vm0 = vcmp.ge.f32.partialorder %v10894_v48, 0.0 }
 0x37c   : > { %v5802_v25 = vmul.f32 %v5770_v0, %v4906_v26  ;;  %v5457_v59 = vmul.f32 %v5425_v62, %v10962_v60  ;;  %v5323_v44 = vmul.f32 %v5291_v58, %v10989_v20  ;;  %v5093_v54 = vmul.f32 %v6250_v19, %v5029_v17  ;;  %v6252_v11 = vpop.eup %6251 }
 0x37d   : > { %v5234_v28 = vadd.f32 -1.4531521, %v5202_v61  ;;  %v5011_v7 = vmul.f32 0.3275911, %v11022_v4  ;;  %6255 = vpow2.f32 %v5566_v18  ;;  %v5580_v60 = vmul.f32 1.442695, %v5522_v55 }
 0x37e   : > { %v5866_v32 = vmul.f32 %v5834_v56, %v5802_v25  ;;  %v5617_v26 = vmul.f32 %v6252_v11, %v5457_v59  ;;  %v5355_v49 = vadd.f32 -0.28449672, %v5323_v44  ;;  %v5125_v10 = vsub.f32 2.0, %v5093_v54 }
 0x37f   : > { %v5266_v42 = vmul.f32 %v5234_v28, %v11015_v35  ;;  %v5043_v5 = vadd.f32 1.0, %v5011_v7  ;;  %v5509_v17 = vsub.f32 0.0, %v5477_v38  ;;  %v5484_v50 = vmul.f32 %v4972_v53, %v4972_v53 }
 0x380   : > { %5898 = vst.msk [vmem:[%s10693_s14 + $0x90] sm:$0xff] %vm4678_vm15, %v5866_v32  ;;  %v5649_v27 = vsub.f32 1.0, %v5617_v26  ;;  %v5387_v45 = vmul.f32 %v5355_v49, %v10989_v20  ;;  %v11035_v13 = vmul.f32 %v6250_v19, %v5125_v10  ;;  %v11038_v22 = vmul.f32 0.70710677, %v11028_v15 }
 0x381   : > { %v5298_v23 = vadd.f32 1.4214138, %v5266_v42  ;;  %v6254_v24 = vpop.eup %6253  ;;  %6257 = vrcp.f32 %v5043_v5  ;;  %vm5675_vm1 = vcmp.ge.f32.partialorder %v10912_v16, 0.0  ;;  %v11047_v53 = vadd.f32 %v10949_v40, %v4876_v47 }
 0x382   : > { %v5713_v31 = vsub.f32 0.0, %v5649_v27  ;;  %v5419_v39 = vadd.f32 0.2548296, %v5387_v45  ;;  %v5189_v37 = vmul.f32 1.0614054, %v11035_v13  ;;  %6259 = vpow2.f32 %v5580_v60 }
 0x383   : > { %v5330_v46 = vmul.f32 %v5298_v23, %v11015_v35  ;;  %v5100_v57 = vmul.f32 %v6254_v24, %v5036_v51  ;;  %v11044_v34 = vand.u32 2147483647, %v11038_v22  ;;  %v6256_v56 = vpop.eup %6255  ;;  %v5554_v1 = vmul.f32 1.442695, %v5509_v17  ;;  %v5841_v51 = vld [vmem:[%s6420_s23 + $0xc8] sm:$0xff]  ;;  %v4810_v23 = vpop.f32.mrf.mxu0 }
 0x384   : > { %v5745_v14 = vsel %vm5681_vm0, %v5649_v27, %v5713_v31  ;;  %v5451_v33 = vmul.f32 %v5419_v39, %v10989_v20  ;;  %v5221_v3 = vadd.f32 -1.4531521, %v5189_v37  ;;  %v5516_v29 = vsub.f32 0.0, %v5484_v50  ;;  %v5835_v50 = vld [vmem:[%s6420_s23 + $0x98] sm:$0xff] }
 0x385   : > { %v5362_v30 = vadd.f32 -0.28449672, %v5330_v46  ;;  %v5777_v2 = vadd.f32 1.0, %v5745_v14  ;;  %v5132_v0 = vsub.f32 2.0, %v5100_v57  ;;  %v5005_v18 = vmul.f32 0.3275911, %v11044_v34 }
 0x386   : > { %v5611_v62 = vmul.f32 %v6256_v56, %v5451_v33  ;;  %v5253_v61 = vmul.f32 %v5221_v3, %v11035_v13  ;;  %v11060_v55 = vmul.f32 0.70710677, %v11047_v53  ;;  %vm5682_vm2 = vcmp.ge.f32.partialorder %v10940_v41, 0.0 }
 0x387   : > { %v5394_v58 = vmul.f32 %v5362_v30, %v11015_v35  ;;  %v6258_v19 = vpop.eup %6257  ;;  %v5809_v48 = vmul.f32 %v5777_v2, %v10985_v21  ;;  %v11057_v25 = vmul.f32 %v6254_v24, %v5132_v0  ;;  %v5037_v20 = vadd.f32 1.0, %v5005_v18 }
 0x388   : > { %v5643_v59 = vsub.f32 1.0, %v5611_v62  ;;  %v5285_v28 = vadd.f32 1.4214138, %v5253_v61  ;;  %v5107_v54 = vmul.f32 %v6258_v19, %v5043_v5  ;;  %v6260_v11 = vpop.eup %6259  ;;  %v5491_v21 = vmul.f32 %v11022_v4, %v11022_v4 }
 0x389   : > { %v5426_v44 = vadd.f32 0.2548296, %v5394_v58  ;;  %v5873_v32 = vmul.f32 %v5841_v51, %v5809_v48  ;;  %v5196_v38 = vmul.f32 1.0614054, %v11057_v25  ;;  %6261 = vrcp.f32 %v5037_v20 }
 0x38a   : > { %v5707_v7 = vsub.f32 0.0, %v5643_v59  ;;  %v5317_v49 = vmul.f32 %v5285_v28, %v11035_v13  ;;  %v5139_v42 = vsub.f32 2.0, %v5107_v54  ;;  %v11071_v10 = vmul.f32 0.5, %v10952_v52 }
 0x38b   : > { %v5458_v26 = vmul.f32 %v5426_v44, %v11015_v35  ;;  %5905 = vst.msk [vmem:[%s10693_s14 + $0xc8] sm:$0xff] %vm4678_vm15, %v5873_v32  ;;  %6263 = vpow2.f32 %v5554_v1  ;;  %v5228_v60 = vadd.f32 -1.4531521, %v5196_v38  ;;  %v11074_v5 = vand.u32 2147483647, %v11060_v55 }
 0x38c   : > { %v5739_v4 = vsel %vm5675_vm1, %v5643_v59, %v5707_v7  ;;  %v5349_v45 = vadd.f32 -0.28449672, %v5317_v49  ;;  %v11078_v35 = vmul.f32 %v6258_v19, %v5139_v42  ;;  %v5568_v17 = vmul.f32 1.442695, %v5516_v29  ;;  %v4858_v29 = vpop.f32.mrf.mxu2  ;;  %v5842_v59 = vld [vmem:[%s6420_s23 + $0xd0] sm:$0xff] }
 0x38d   : > { %v5618_v27 = vmul.f32 %v6260_v11, %v5458_v26  ;;  %v5771_v47 = vadd.f32 1.0, %v5739_v4  ;;  %v5260_v24 = vmul.f32 %v5228_v60, %v11057_v25  ;;  %v5012_v52 = vmul.f32 0.3275911, %v11074_v5 }
 0x38e   : > { %v5381_v39 = vmul.f32 %v5349_v45, %v11035_v13  ;;  %v5203_v46 = vmul.f32 1.0614054, %v11078_v35  ;;  %v5523_v37 = vsub.f32 0.0, %v5491_v21  ;;  %v11087_v30 = vadd.f32 %v10949_v40, %v4810_v23 }
 0x38f   : > { %v5650_v31 = vsub.f32 1.0, %v5618_v27  ;;  %v6262_v16 = vpop.eup %6261  ;;  %v5803_v57 = vmul.f32 %v5771_v47, %v10992_v43  ;;  %v5292_v14 = vadd.f32 1.4214138, %v5260_v24  ;;  %v5044_v33 = vadd.f32 1.0, %v5012_v52 }
 0x390   : > { %v5413_v56 = vadd.f32 0.2548296, %v5381_v39  ;;  %v5235_v2 = vadd.f32 -1.4531521, %v5203_v46  ;;  %v5101_v1 = vmul.f32 %v6262_v16, %v5037_v20  ;;  %vm5669_vm3 = vcmp.ge.f32.partialorder %v10970_v9, 0.0  ;;  %v4879_v9 = vpop.f32.mrf.mxu3 }
 0x391   : > { %v5714_v3 = vsub.f32 0.0, %v5650_v31  ;;  %v6264_v0 = vpop.eup %6263  ;;  %v5867_v18 = vmul.f32 %v5835_v50, %v5803_v57  ;;  %v5324_v51 = vmul.f32 %v5292_v14, %v11057_v25  ;;  %6265 = vrcp.f32 %v5044_v33 }
 0x392   : > { %v5445_v62 = vmul.f32 %v5413_v56, %v11035_v13  ;;  %v5267_v58 = vmul.f32 %v5235_v2, %v11078_v35  ;;  %v5133_v61 = vsub.f32 2.0, %v5101_v1  ;;  %6267 = vpow2.f32 %v5568_v17 }
 0x393   : > { %v5746_v43 = vsel %vm5682_vm2, %v5650_v31, %v5714_v3  ;;  %5899 = vst.msk [vmem:[%s10693_s14 + $0x98] sm:$0xff] %vm4678_vm15, %v5867_v18  ;;  %v5356_v48 = vadd.f32 -0.28449672, %v5324_v51  ;;  %v5582_v20 = vmul.f32 1.442695, %v5523_v37  ;;  %v5485_v32 = vmul.f32 %v11044_v34, %v11044_v34 }
 0x394   : > { %v5778_v19 = vadd.f32 1.0, %v5746_v43  ;;  %v5605_v44 = vmul.f32 %v6264_v0, %v5445_v62  ;;  %v5299_v28 = vadd.f32 1.4214138, %v5267_v58  ;;  %v11098_v54 = vmul.f32 %v6262_v16, %v5133_v61  ;;  %v5829_v16 = vld [vmem:[%s6420_s23 + $0x68] sm:$0xff] }
 0x395   : > { %v11101_v41 = vmul.f32 0.70710677, %v11087_v30  ;;  %v5388_v11 = vmul.f32 %v5356_v48, %v11057_v25  ;;  %v11108_v38 = vadd.f32 %v10949_v40, %v4858_v29  ;;  %6269 = vpow2.f32 %v5582_v20 }
 0x396   : > { %v5810_v13 = vmul.f32 %v5778_v19, %v11006_v36  ;;  %v5637_v21 = vsub.f32 1.0, %v5605_v44  ;;  %v5331_v7 = vmul.f32 %v5299_v28, %v11078_v35  ;;  %v5197_v26 = vmul.f32 1.0614054, %v11098_v54  ;;  %v4834_v28 = vpop.f32.mrf.mxu1 }
 0x397   : > { %v11113_v49 = vand.u32 2147483647, %v11101_v41  ;;  %v6266_v42 = vpop.eup %6265  ;;  %v4908_v36 = vmul.f32 0.5, %v10979_v8  ;;  %v5420_v4 = vadd.f32 0.2548296, %v5388_v11  ;;  %vm5676_vm4 = vcmp.ge.f32.partialorder %v10995_v12, 0.0 }
 0x398   : > { %v5874_v60 = vmul.f32 %v5842_v59, %v5810_v13  ;;  %v5701_v27 = vsub.f32 0.0, %v5637_v21  ;;  %v5363_v34 = vadd.f32 -0.28449672, %v5331_v7  ;;  %v5229_v45 = vadd.f32 -1.4531521, %v5197_v26  ;;  %v6268_v47 = vpop.eup %6267 }
 0x399   : > { %v5108_v23 = vmul.f32 %v6266_v42, %v5044_v33  ;;  %v5452_v24 = vmul.f32 %v5420_v4, %v11057_v25  ;;  %v5517_v17 = vsub.f32 0.0, %v5485_v32  ;;  %v4990_v52 = vmul.f32 0.3275911, %v11113_v49 }
 0x39a   : > { %5906 = vst.msk [vmem:[%s10693_s14 + $0xd0] sm:$0xff] %vm4678_vm15, %v5874_v60  ;;  %v11122_v50 = vmul.f32 0.70710677, %v11108_v38  ;;  %v5733_v8 = vsel %vm5669_vm3, %v5637_v21, %v5701_v27  ;;  %v5395_v31 = vmul.f32 %v5363_v34, %v11078_v35  ;;  %v5261_v39 = vmul.f32 %v5229_v45, %v11098_v54 }
 0x39b   : > { %v5140_v46 = vsub.f32 2.0, %v5108_v23  ;;  %v5765_v37 = vadd.f32 1.0, %v5733_v8  ;;  %v5612_v57 = vmul.f32 %v6268_v47, %v5452_v24  ;;  %v5492_v25 = vmul.f32 %v11074_v5, %v11074_v5  ;;  %v6270_v1 = vpop.eup %6269 }
 0x39c   : > { %v5022_v14 = vadd.f32 1.0, %v4990_v52  ;;  %v5427_v33 = vadd.f32 0.2548296, %v5395_v31  ;;  %v5293_v3 = vadd.f32 1.4214138, %v5261_v39  ;;  %v11139_v48 = vadd.f32 %v10949_v40, %v4879_v9 }
 0x39d   : > { %v11131_v56 = vmul.f32 %v6266_v42, %v5140_v46  ;;  %v4974_v2 = vand.u32 2147483647, %v11122_v50  ;;  %v5797_v0 = vmul.f32 %v5765_v37, %v11071_v10  ;;  %v5644_v18 = vsub.f32 1.0, %v5612_v57  ;;  %v5836_v42 = vld [vmem:[%s6420_s23 + $0xa0] sm:$0xff] }
 0x39e   : > { %v5570_v51 = vmul.f32 1.442695, %v5517_v17  ;;  %6271 = vrcp.f32 %v5022_v14  ;;  %v5459_v43 = vmul.f32 %v5427_v33, %v11078_v35  ;;  %v5325_v62 = vmul.f32 %v5293_v3, %v11098_v54 }
 0x39f   : > { %v5204_v5 = vmul.f32 1.0614054, %v11131_v56  ;;  %v5006_v58 = vmul.f32 0.3275911, %v4974_v2  ;;  %v5861_v61 = vmul.f32 %v5829_v16, %v5797_v0  ;;  %v5708_v29 = vsub.f32 0.0, %v5644_v18  ;;  %v5843_v16 = vld [vmem:[%s6420_s23 + $0xd8] sm:$0xff] }
 0x3a0   : > { %v5524_v19 = vsub.f32 0.0, %v5492_v25  ;;  %v5619_v20 = vmul.f32 %v6270_v1, %v5459_v43  ;;  %v5357_v10 = vadd.f32 -0.28449672, %v5325_v62  ;;  %v4915_v13 = vmul.f32 0.5, %v11003_v63 }
 0x3a1   : > { %v5236_v59 = vadd.f32 -1.4531521, %v5204_v5  ;;  %v5038_v44 = vadd.f32 1.0, %v5006_v58  ;;  %5893 = vst.msk [vmem:[%s10693_s14 + $0x68] sm:$0xff] %vm4678_vm15, %v5861_v61  ;;  %v5740_v35 = vsel %vm5676_vm4, %v5644_v18, %v5708_v29  ;;  %vm5683_vm5 = vcmp.ge.f32.partialorder %v11018_v6, 0.0 }
 0x3a2   : > { %6273 = vpow2.f32 %v5570_v51  ;;  %v5772_v11 = vadd.f32 1.0, %v5740_v35  ;;  %v5651_v32 = vsub.f32 1.0, %v5619_v20  ;;  %v5389_v21 = vmul.f32 %v5357_v10, %v11098_v54 }
 0x3a3   : > { %v5268_v7 = vmul.f32 %v5236_v59, %v11131_v56  ;;  %v5584_v60 = vmul.f32 1.442695, %v5524_v19  ;;  %6275 = vrcp.f32 %v5038_v44  ;;  %v11151_v4 = vmul.f32 0.70710677, %v11139_v48  ;;  %v4861_v19 = vpop.f32.mrf.mxu2 }
 0x3a4   : > { %v6272_v26 = vpop.eup %6271  ;;  %v11154_v12 = vadd.f32 %v10949_v40, %v4834_v28  ;;  %v5804_v63 = vmul.f32 %v5772_v11, %v4908_v36  ;;  %v5715_v27 = vsub.f32 0.0, %v5651_v32  ;;  %v5421_v34 = vadd.f32 0.2548296, %v5389_v21 }
 0x3a5   : > { %v5300_v45 = vadd.f32 1.4214138, %v5268_v7  ;;  %v4909_v23 = vmul.f32 0.5, %v11028_v15  ;;  %v11158_v47 = vmul.f32 0.5, %v11047_v53  ;;  %v5086_v24 = vmul.f32 %v6272_v26, %v5022_v14 }
 0x3a6   : > { %v11161_v17 = vand.u32 2147483647, %v11151_v4  ;;  %v5868_v52 = vmul.f32 %v5836_v42, %v5804_v63  ;;  %v5747_v8 = vsel %vm5683_vm5, %v5651_v32, %v5715_v27  ;;  %v5453_v36 = vmul.f32 %v5421_v34, %v11098_v54 }
 0x3a7   : > { %v5332_v31 = vmul.f32 %v5300_v45, %v11131_v56  ;;  %v5779_v46 = vadd.f32 1.0, %v5747_v8  ;;  %v5118_v37 = vsub.f32 2.0, %v5086_v24  ;;  %v5470_v15 = vmul.f32 %v11113_v49, %v11113_v49 }
 0x3a8   : > { %v6274_v39 = vpop.eup %6273  ;;  %v5013_v53 = vmul.f32 0.3275911, %v11161_v17  ;;  %5900 = vst.msk [vmem:[%s10693_s14 + $0xa0] sm:$0xff] %vm4678_vm15, %v5868_v52  ;;  %6277 = vpow2.f32 %v5584_v60  ;;  %v11174_v6 = vmul.f32 0.70710677, %v11154_v12  ;;  %v5486_v3 = vmul.f32 %v4974_v2, %v4974_v2 }
 0x3a9   : > { %v5613_v57 = vmul.f32 %v6274_v39, %v5453_v36  ;;  %v5364_v25 = vadd.f32 -0.28449672, %v5332_v31  ;;  %v6276_v54 = vpop.eup %6275  ;;  %v5811_v14 = vmul.f32 %v5779_v46, %v4915_v13  ;;  %v11176_v33 = vmul.f32 %v6272_v26, %v5118_v37  ;;  %v4882_v13 = vpop.f32.mrf.mxu3 }
 0x3aa   : > { %v5045_v9 = vadd.f32 1.0, %v5013_v53  ;;  %v5102_v0 = vmul.f32 %v6276_v54, %v5038_v44  ;;  %v4966_v18 = vand.u32 2147483647, %v11174_v6  ;;  %v5502_v62 = vsub.f32 0.0, %v5470_v15 }
 0x3ab   : > { %v5645_v1 = vsub.f32 1.0, %v5613_v57  ;;  %v5396_v49 = vmul.f32 %v5364_v25, %v11131_v56  ;;  %v5875_v51 = vmul.f32 %v5843_v16, %v5811_v14  ;;  %v5182_v43 = vmul.f32 1.0614054, %v11176_v33 }
 0x3ac   : > { %6279 = vrcp.f32 %v5045_v9  ;;  %v5134_v61 = vsub.f32 2.0, %v5102_v0  ;;  %v4998_v29 = vmul.f32 0.3275911, %v4966_v18  ;;  %vm5677_vm6 = vcmp.ge.f32.partialorder %v11038_v22, 0.0  ;;  %v5837_v22 = vld [vmem:[%s6420_s23 + $0xa8] sm:$0xff] }
 0x3ad   : > { %v5709_v5 = vsub.f32 0.0, %v5645_v1  ;;  %v5428_v58 = vadd.f32 0.2548296, %v5396_v49  ;;  %5907 = vst.msk [vmem:[%s10693_s14 + $0xd8] sm:$0xff] %vm4678_vm15, %v5875_v51  ;;  %vm5684_vm7 = vcmp.ge.f32.partialorder %v11060_v55, 0.0  ;;  %v5518_v20 = vsub.f32 0.0, %v5486_v3  ;;  %v4813_v55 = vpop.f32.mrf.mxu0 }
 0x3ae   : > { %v5214_v2 = vadd.f32 -1.4531521, %v5182_v43  ;;  %v6278_v10 = vpop.eup %6277  ;;  %v11186_v28 = vmul.f32 %v6276_v54, %v5134_v61  ;;  %v5030_v35 = vadd.f32 1.0, %v4998_v29  ;;  %v5540_v21 = vmul.f32 1.442695, %v5502_v62  ;;  %v5844_v51 = vld [vmem:[%s6420_s23 + $0xe0] sm:$0xff] }
 0x3af   : > { %v5741_v59 = vsel %vm5677_vm6, %v5645_v1, %v5709_v5  ;;  %v5460_v44 = vmul.f32 %v5428_v58, %v11131_v56  ;;  %v11190_v7 = vadd.f32 %v10949_v40, %v4861_v19  ;;  %v11194_v42 = vmul.f32 0.5, %v11087_v30 }
 0x3b0   : > { %v5773_v11 = vadd.f32 1.0, %v5741_v59  ;;  %v5246_v32 = vmul.f32 %v5214_v2, %v11176_v33  ;;  %v5198_v60 = vmul.f32 1.0614054, %v11186_v28  ;;  %6281 = vrcp.f32 %v5030_v35 }
 0x3b1   : > { %v5620_v26 = vmul.f32 %v6278_v10, %v5460_v44  ;;  %v5572_v34 = vmul.f32 1.442695, %v5518_v20  ;;  %v11198_v45 = vadd.f32 %v10949_v40, %v4882_v13  ;;  %v11201_v36 = vmul.f32 0.70710677, %v11190_v7 }
 0x3b2   : > { %v6280_v56 = vpop.eup %6279  ;;  %v5805_v63 = vmul.f32 %v5773_v11, %v4909_v23  ;;  %v5278_v27 = vadd.f32 1.4214138, %v5246_v32  ;;  %v5230_v52 = vadd.f32 -1.4531521, %v5198_v60  ;;  %6283 = vpow2.f32 %v5540_v21 }
 0x3b3   : > { %v5652_v24 = vsub.f32 1.0, %v5620_v26  ;;  %v5109_v8 = vmul.f32 %v6280_v56, %v5045_v9  ;;  %v5493_v39 = vmul.f32 %v11161_v17, %v11161_v17  ;;  %v4975_v15 = vand.u32 2147483647, %v11201_v36 }
 0x3b4   : > { %v5869_v31 = vmul.f32 %v5837_v22, %v5805_v63  ;;  %v5310_v30 = vmul.f32 %v5278_v27, %v11176_v33  ;;  %v5262_v46 = vmul.f32 %v5230_v52, %v11186_v28  ;;  %6285 = vpow2.f32 %v5572_v34 }
 0x3b5   : > { %v5716_v23 = vsub.f32 0.0, %v5652_v24  ;;  %v5141_v37 = vsub.f32 2.0, %v5109_v8  ;;  %v5478_v16 = vmul.f32 %v4966_v18, %v4966_v18  ;;  %v11211_v57 = vmul.f32 0.70710677, %v11198_v45 }
 0x3b6   : > { %5901 = vst.msk [vmem:[%s10693_s14 + $0xa8] sm:$0xff] %vm4678_vm15, %v5869_v31  ;;  %v5342_v53 = vadd.f32 -0.28449672, %v5310_v30  ;;  %v6282_v25 = vpop.eup %6281  ;;  %v5294_v17 = vadd.f32 1.4214138, %v5262_v46  ;;  %v5525_v49 = vsub.f32 0.0, %v5493_v39  ;;  %v11230_v32 = vadd.f32 %v10949_v40, %v4813_v55 }
 0x3b7   : > { %v5748_v54 = vsel %vm5684_vm7, %v5652_v24, %v5716_v23  ;;  %v11215_v14 = vmul.f32 %v6280_v56, %v5141_v37  ;;  %v5007_v3 = vmul.f32 0.3275911, %v4975_v15  ;;  %v5094_v0 = vmul.f32 %v6282_v25, %v5030_v35 }
 0x3b8   : > { %v5780_v9 = vadd.f32 1.0, %v5748_v54  ;;  %v5374_v1 = vmul.f32 %v5342_v53, %v11176_v33  ;;  %v5326_v43 = vmul.f32 %v5294_v17, %v11186_v28  ;;  %v11222_v5 = vand.u32 2147483647, %v11211_v57  ;;  %v6284_v58 = vpop.eup %6283 }
 0x3b9   : > { %v5205_v18 = vmul.f32 1.0614054, %v11215_v14  ;;  %v5039_v62 = vadd.f32 1.0, %v5007_v3  ;;  %v5126_v19 = vsub.f32 2.0, %v5094_v0  ;;  %v5510_v2 = vsub.f32 0.0, %v5478_v16 }
 0x3ba   : > { %v5812_v61 = vmul.f32 %v5780_v9, %v11158_v47  ;;  %v5406_v29 = vadd.f32 0.2548296, %v5374_v1  ;;  %v5358_v20 = vadd.f32 -0.28449672, %v5326_v43  ;;  %v5014_v59 = vmul.f32 0.3275911, %v11222_v5  ;;  %v6286_v44 = vpop.eup %6285  ;;  %v4885_v9 = vpop.f32.mrf.mxu3 }
 0x3bb   : > { %v5237_v10 = vadd.f32 -1.4531521, %v5205_v18  ;;  %6287 = vrcp.f32 %v5039_v62  ;;  %v11227_v11 = vmul.f32 %v6282_v25, %v5126_v19  ;;  %v5586_v22 = vmul.f32 1.442695, %v5525_v49  ;;  %v5822_v18 = vld [vmem:[%s6420_s23 + $0x30] sm:$0xff] }
 0x3bc   : > { %v5876_v35 = vmul.f32 %v5844_v51, %v5812_v61  ;;  %v5438_v13 = vmul.f32 %v5406_v29, %v11176_v33  ;;  %v5390_v47 = vmul.f32 %v5358_v20, %v11186_v28  ;;  %v5046_v26 = vadd.f32 1.0, %v5014_v59 }
 0x3bd   : > { %v5269_v21 = vmul.f32 %v5237_v10, %v11215_v14  ;;  %vm5662_vm8 = vcmp.ge.f32.partialorder %v11101_v41, 0.0  ;;  %v4910_v56 = vmul.f32 0.5, %v11108_v38  ;;  %v5190_v33 = vmul.f32 1.0614054, %v11227_v11 }
 0x3be   : > { %5908 = vst.msk [vmem:[%s10693_s14 + $0xe0] sm:$0xff] %vm4678_vm15, %v5876_v35  ;;  %v5598_v60 = vmul.f32 %v6284_v58, %v5438_v13  ;;  %v5422_v63 = vadd.f32 0.2548296, %v5390_v47  ;;  %v5556_v34 = vmul.f32 1.442695, %v5510_v2  ;;  %6289 = vrcp.f32 %v5046_v26 }
 0x3bf   : > { %v5301_v27 = vadd.f32 1.4214138, %v5269_v21  ;;  %vm5678_vm9 = vcmp.ge.f32.partialorder %v11122_v50, 0.0  ;;  %v5222_v52 = vadd.f32 -1.4531521, %v5190_v33  ;;  %6291 = vpow2.f32 %v5586_v22  ;;  %v5838_v33 = vld [vmem:[%s6420_s23 + $0xb0] sm:$0xff] }
 0x3c0   : > { %v5630_v24 = vsub.f32 1.0, %v5598_v60  ;;  %v11241_v8 = vmul.f32 0.70710677, %v11230_v32  ;;  %v5454_v30 = vmul.f32 %v5422_v63, %v11186_v28  ;;  %v5487_v38 = vmul.f32 %v4975_v15, %v4975_v15 }
 0x3c1   : > { %v6288_v31 = vpop.eup %6287  ;;  %v5333_v39 = vmul.f32 %v5301_v27, %v11215_v14  ;;  %v5254_v46 = vmul.f32 %v5222_v52, %v11227_v11  ;;  %v11250_v25 = vmul.f32 0.5, %v11139_v48  ;;  %6293 = vpow2.f32 %v5556_v34  ;;  %v4837_v52 = vpop.f32.mrf.mxu1 }
 0x3c2   : > { %v5694_v23 = vsub.f32 0.0, %v5630_v24  ;;  %v5103_v37 = vmul.f32 %v6288_v31, %v5039_v62  ;;  %v11247_v53 = vand.u32 2147483647, %v11241_v8  ;;  %v5614_v16 = vmul.f32 %v6286_v44, %v5454_v30 }
 0x3c3   : > { %v5365_v54 = vadd.f32 -0.28449672, %v5333_v39  ;;  %v5286_v17 = vadd.f32 1.4214138, %v5254_v46  ;;  %v5519_v43 = vsub.f32 0.0, %v5487_v38  ;;  %v11262_v2 = vadd.f32 %v10949_v40, %v4885_v9 }
 0x3c4   : > { %v5726_v28 = vsel %vm5662_vm8, %v5630_v24, %v5694_v23  ;;  %v5135_v3 = vsub.f32 2.0, %v5103_v37  ;;  %v4991_v15 = vmul.f32 0.3275911, %v11247_v53  ;;  %v6290_v1 = vpop.eup %6289  ;;  %v5646_v0 = vsub.f32 1.0, %v5614_v16 }
 0x3c5   : > { %v5758_v49 = vadd.f32 1.0, %v5726_v28  ;;  %v5397_v51 = vmul.f32 %v5365_v54, %v11215_v14  ;;  %v5318_v48 = vmul.f32 %v5286_v17, %v11227_v11  ;;  %v5110_v55 = vmul.f32 %v6290_v1, %v5046_v26  ;;  %v6292_v41 = vpop.eup %6291 }
 0x3c6   : > { %v11258_v62 = vmul.f32 %v6288_v31, %v5135_v3  ;;  %v5023_v58 = vadd.f32 1.0, %v4991_v15  ;;  %v5710_v29 = vsub.f32 0.0, %v5646_v0  ;;  %v5574_v27 = vmul.f32 1.442695, %v5519_v43 }
 0x3c7   : > { %v5790_v61 = vmul.f32 %v5758_v49, %v11194_v42  ;;  %v5429_v19 = vadd.f32 0.2548296, %v5397_v51  ;;  %v5350_v20 = vadd.f32 -0.28449672, %v5318_v48  ;;  %v5142_v59 = vsub.f32 2.0, %v5110_v55  ;;  %v6294_v44 = vpop.eup %6293 }
 0x3c8   : > { %v5199_v10 = vmul.f32 1.0614054, %v11258_v62  ;;  %6295 = vrcp.f32 %v5023_v58  ;;  %v5742_v13 = vsel %vm5678_vm9, %v5646_v0, %v5710_v29  ;;  %v5494_v42 = vmul.f32 %v11222_v5, %v11222_v5 }
 0x3c9   : > { %v5854_v35 = vmul.f32 %v5822_v18, %v5790_v61  ;;  %v5461_v47 = vmul.f32 %v5429_v19, %v11215_v14  ;;  %v5774_v21 = vadd.f32 1.0, %v5742_v13  ;;  %v5382_v22 = vmul.f32 %v5350_v20, %v11227_v11 }
 0x3ca   : > { %v5231_v26 = vadd.f32 -1.4531521, %v5199_v10  ;;  %v11271_v60 = vmul.f32 %v6290_v1, %v5142_v59  ;;  %v11277_v34 = vmul.f32 0.70710677, %v11262_v2  ;;  %vm5685_vm10 = vcmp.ge.f32.partialorder %v11151_v4, 0.0 }
 0x3cb   : > { %5886 = vst.msk [vmem:[%s10693_s14 + $0x30] sm:$0xff] %vm4678_vm15, %v5854_v35  ;;  %v5621_v63 = vmul.f32 %v6292_v41, %v5461_v47  ;;  %v5806_v50 = vmul.f32 %v5774_v21, %v4910_v56  ;;  %v5414_v24 = vadd.f32 0.2548296, %v5382_v22  ;;  %v5526_v30 = vsub.f32 0.0, %v5494_v42 }
 0x3cc   : > { %v5263_v14 = vmul.f32 %v5231_v26, %v11258_v62  ;;  %v5206_v5 = vmul.f32 1.0614054, %v11271_v60  ;;  %v11283_v39 = vand.u32 2147483647, %v11277_v34  ;;  %v11288_v17 = vadd.f32 %v10949_v40, %v4837_v52  ;;  %v5845_v40 = vld [vmem:[%s6420_s23 + $0xe8] sm:$0xff] }
 0x3cd   : > { %v5653_v31 = vsub.f32 1.0, %v5621_v63  ;;  %v5870_v23 = vmul.f32 %v5838_v33, %v5806_v50  ;;  %v5446_v46 = vmul.f32 %v5414_v24, %v11227_v11  ;;  %6297 = vpow2.f32 %v5574_v27 }
 0x3ce   : > { %v6296_v38 = vpop.eup %6295  ;;  %v5295_v37 = vadd.f32 1.4214138, %v5263_v14  ;;  %v5238_v56 = vadd.f32 -1.4531521, %v5206_v5  ;;  %v5015_v28 = vmul.f32 0.3275911, %v11283_v39 }
 0x3cf   : > { %v5717_v16 = vsub.f32 0.0, %v5653_v31  ;;  %v5087_v54 = vmul.f32 %v6296_v38, %v5023_v58  ;;  %5902 = vst.msk [vmem:[%s10693_s14 + $0xb0] sm:$0xff] %vm4678_vm15, %v5870_v23  ;;  %v5606_v3 = vmul.f32 %v6294_v44, %v5446_v46  ;;  %v5588_v1 = vmul.f32 1.442695, %v5526_v30 }
 0x3d0   : > { %v5327_v15 = vmul.f32 %v5295_v37, %v11258_v62  ;;  %v5270_v9 = vmul.f32 %v5238_v56, %v11271_v60  ;;  %v5047_v0 = vadd.f32 1.0, %v5015_v28  ;;  %v5471_v58 = vmul.f32 %v11247_v53, %v11247_v53 }
 0x3d1   : > { %v5749_v11 = vsel %vm5685_vm10, %v5653_v31, %v5717_v16  ;;  %v5119_v49 = vsub.f32 2.0, %v5087_v54  ;;  %v5638_v43 = vsub.f32 1.0, %v5606_v3  ;;  %v11302_v41 = vmul.f32 0.70710677, %v11288_v17 }
 0x3d2   : > { %v5781_v51 = vadd.f32 1.0, %v5749_v11  ;;  %v5359_v18 = vadd.f32 -0.28449672, %v5327_v15  ;;  %v5302_v48 = vadd.f32 1.4214138, %v5270_v9  ;;  %6299 = vrcp.f32 %v5047_v0 }
 0x3d3   : > { %v11297_v55 = vmul.f32 %v6296_v38, %v5119_v49  ;;  %v5702_v61 = vsub.f32 0.0, %v5638_v43  ;;  %v4902_v20 = vmul.f32 0.5, %v11154_v12  ;;  %vm5670_vm11 = vcmp.ge.f32.partialorder %v11174_v6, 0.0  ;;  %v6298_v59 = vpop.eup %6297  ;;  %v5830_v12 = vld [vmem:[%s6420_s23 + $0x70] sm:$0xff] }
 0x3d4   : > { %v5813_v4 = vmul.f32 %v5781_v51, %v11250_v25  ;;  %v5391_v29 = vmul.f32 %v5359_v18, %v11258_v62  ;;  %v5334_v19 = vmul.f32 %v5302_v48, %v11271_v60  ;;  %v11311_v53 = vand.u32 2147483647, %v11302_v41  ;;  %v5839_v51 = vld [vmem:[%s6420_s23 + $0xb8] sm:$0xff] }
 0x3d5   : > { %v5183_v10 = vmul.f32 1.0614054, %v11297_v55  ;;  %v5734_v35 = vsel %vm5670_vm11, %v5638_v43, %v5702_v61  ;;  %6301 = vpow2.f32 %v5588_v1  ;;  %v5503_v26 = vsub.f32 0.0, %v5471_v58 }
 0x3d6   : > { %v5877_v44 = vmul.f32 %v5845_v40, %v5813_v4  ;;  %v5423_v25 = vadd.f32 0.2548296, %v5391_v29  ;;  %v5366_v13 = vadd.f32 -0.28449672, %v5334_v19  ;;  %v5766_v47 = vadd.f32 1.0, %v5734_v35 }
 0x3d7   : > { %v5215_v42 = vadd.f32 -1.4531521, %v5183_v10  ;;  %v4999_v21 = vmul.f32 0.3275911, %v11311_v53  ;;  %v5542_v23 = vmul.f32 1.442695, %v5503_v26  ;;  %v5495_v3 = vmul.f32 %v11283_v39, %v11283_v39 }
 0x3d8   : > { %5909 = vst.msk [vmem:[%s10693_s14 + $0xe8] sm:$0xff] %vm4678_vm15, %v5877_v44  ;;  %v5455_v6 = vmul.f32 %v5423_v25, %v11258_v62  ;;  %v5398_v22 = vmul.f32 %v5366_v13, %v11271_v60  ;;  %v6300_v33 = vpop.eup %6299  ;;  %v5798_v63 = vmul.f32 %v5766_v47, %v4902_v20  ;;  %vm5679_vm12 = vcmp.ge.f32.partialorder %v11201_v36, 0.0 }
 0x3d9   : > { %v5247_v27 = vmul.f32 %v5215_v42, %v11297_v55  ;;  %v5031_v50 = vadd.f32 1.0, %v4999_v21  ;;  %v5111_v5 = vmul.f32 %v6300_v33, %v5047_v0  ;;  %v4911_v1 = vmul.f32 0.5, %v11190_v7 }
 0x3da   : > { %v5615_v24 = vmul.f32 %v6298_v59, %v5455_v6  ;;  %v5430_v14 = vadd.f32 0.2548296, %v5398_v22  ;;  %v5862_v52 = vmul.f32 %v5830_v12, %v5798_v63  ;;  %vm5686_vm13 = vcmp.ge.f32.partialorder %v11211_v57, 0.0  ;;  %v5846_v59 = vld [vmem:[%s6420_s23 + $0xf0] sm:$0xff] }
 0x3db   : > { %v5279_v31 = vadd.f32 1.4214138, %v5247_v27  ;;  %6303 = vrcp.f32 %v5031_v50  ;;  %v5143_v62 = vsub.f32 2.0, %v5111_v5  ;;  %v6302_v46 = vpop.eup %6301  ;;  %v5527_v40 = vsub.f32 0.0, %v5495_v3  ;;  %v5823_v5 = vld [vmem:[%s6420_s23 + $0x38] sm:$0xff] }
 0x3dc   : > { %v5647_v30 = vsub.f32 1.0, %v5615_v24  ;;  %v5462_v38 = vmul.f32 %v5430_v14, %v11271_v60  ;;  %5894 = vst.msk [vmem:[%s10693_s14 + $0x70] sm:$0xff] %vm4678_vm15, %v5862_v52  ;;  %6305 = vpow2.f32 %v5542_v23  ;;  %v4918_v7 = vmul.f32 0.5, %v11198_v45 }
 0x3dd   : > { %v5311_v37 = vmul.f32 %v5279_v31, %v11297_v55  ;;  %v5175_v54 = vmul.f32 %v6300_v33, %v5143_v62  ;;  %v5590_v13 = vmul.f32 1.442695, %v5527_v40  ;;  %v5479_v47 = vmul.f32 %v11311_v53, %v11311_v53 }
 0x3de   : > { %v5711_v56 = vsub.f32 0.0, %v5647_v30  ;;  %v5622_v16 = vmul.f32 %v6302_v46, %v5462_v38  ;;  %vm5663_vm14 = vcmp.ge.f32.partialorder %v11241_v8, 0.0  ;;  %v4895_v53 = vmul.f32 0.5, %v11230_v32 }
 0x3df   : > { %v5343_v28 = vadd.f32 -0.28449672, %v5311_v37  ;;  %v5207_v60 = vmul.f32 1.0614054, %v5175_v54  ;;  %6307 = vpow2.f32 %v5590_v13  ;;  %v5511_v26 = vsub.f32 0.0, %v5479_v47 }
 0x3e0   : > { %v5743_v15 = vsel %vm5679_vm12, %v5647_v30, %v5711_v56  ;;  %v5654_v9 = vsub.f32 1.0, %v5622_v16  ;;  %vm5687_vm0 = vcmp.ge.f32.partialorder %v11277_v34, 0.0  ;;  %vm5671_vm1 = vcmp.ge.f32.partialorder %v11302_v41, 0.0 }
 0x3e1   : > { %v6304_v11 = vpop.eup %6303  ;;  %v5775_v49 = vadd.f32 1.0, %v5743_v15  ;;  %v5375_v0 = vmul.f32 %v5343_v28, %v11297_v55  ;;  %v5239_v18 = vadd.f32 -1.4531521, %v5207_v60  ;;  %v5558_v52 = vmul.f32 1.442695, %v5511_v26  ;;  %v5847_v60 = vld [vmem:[%s6420_s23 + $0xf8] sm:$0xff] }
 0x3e2   : > { %v5718_v43 = vsub.f32 0.0, %v5654_v9  ;;  %v5095_v48 = vmul.f32 %v6304_v11, %v5031_v50  ;;  %v6306_v10 = vpop.eup %6305  ;;  %v4919_v15 = vmul.f32 0.5, %v11262_v2  ;;  %v4903_v34 = vmul.f32 0.5, %v11288_v17 }
 0x3e3   : > { %v5807_v36 = vmul.f32 %v5775_v49, %v4911_v1  ;;  %v5407_v39 = vadd.f32 0.2548296, %v5375_v0  ;;  %v5271_v4 = vmul.f32 %v5239_v18, %v5175_v54  ;;  %6309 = vpow2.f32 %v5558_v52 }
 0x3e4   : > { %v5750_v58 = vsel %vm5686_vm13, %v5654_v9, %v5718_v43  ;;  %v5127_v61 = vsub.f32 2.0, %v5095_v48  ;;  %v5831_v48 = vld [vmem:[%s6420_s23 + $0x78] sm:$0xff] }
 0x3e5   : > { %v5871_v29 = vmul.f32 %v5839_v51, %v5807_v36  ;;  %v5782_v19 = vadd.f32 1.0, %v5750_v58  ;;  %v5439_v20 = vmul.f32 %v5407_v39, %v11297_v55  ;;  %v5303_v44 = vadd.f32 1.4214138, %v5271_v4  ;;  %v6308_v23 = vpop.eup %6307 }
 0x3e6   : > { %v5159_v35 = vmul.f32 %v6304_v11, %v5127_v61 }
 0x3e7   : > { %5903 = vst.msk [vmem:[%s10693_s14 + $0xb8] sm:$0xff] %vm4678_vm15, %v5871_v29  ;;  %v5814_v25 = vmul.f32 %v5782_v19, %v4918_v7  ;;  %v5599_v57 = vmul.f32 %v6306_v10, %v5439_v20  ;;  %v5335_v42 = vmul.f32 %v5303_v44, %v5175_v54 }
 0x3e8   : > { %v5191_v21 = vmul.f32 1.0614054, %v5159_v35 }
 0x3e9   : > { %v5878_v12 = vmul.f32 %v5846_v59, %v5814_v25  ;;  %v5631_v45 = vsub.f32 1.0, %v5599_v57  ;;  %v5367_v6 = vadd.f32 -0.28449672, %v5335_v42 }
 0x3ea   : > { %v5223_v55 = vadd.f32 -1.4531521, %v5191_v21 }
 0x3eb   : > { %5910 = vst.msk [vmem:[%s10693_s14 + $0xf0] sm:$0xff] %vm4678_vm15, %v5878_v12  ;;  %v5695_v22 = vsub.f32 0.0, %v5631_v45  ;;  %v5399_v33 = vmul.f32 %v5367_v6, %v5175_v54 }
 0x3ec   : > { %v5255_v63 = vmul.f32 %v5223_v55, %v5159_v35 }
 0x3ed   : > { %v5727_v27 = vsel %vm5663_vm14, %v5631_v45, %v5695_v22  ;;  %v5431_v24 = vadd.f32 0.2548296, %v5399_v33 }
 0x3ee   : > { %v5759_v50 = vadd.f32 1.0, %v5727_v27  ;;  %v5287_v14 = vadd.f32 1.4214138, %v5255_v63 }
 0x3ef   : > { %v5463_v30 = vmul.f32 %v5431_v24, %v5175_v54  ;;  %v6310_v54 = vpop.eup %6309 }
 0x3f0   : > { %v5791_v31 = vmul.f32 %v5759_v50, %v4895_v53  ;;  %v5319_v38 = vmul.f32 %v5287_v14, %v5159_v35 }
 0x3f1   : > { %v5623_v46 = vmul.f32 %v6308_v23, %v5463_v30 }
 0x3f2   : > { %v5855_v62 = vmul.f32 %v5823_v5, %v5791_v31  ;;  %v5351_v37 = vadd.f32 -0.28449672, %v5319_v38 }
 0x3f3   : > { %v5655_v8 = vsub.f32 1.0, %v5623_v46 }
 0x3f4   : > { %5887 = vst.msk [vmem:[%s10693_s14 + $0x38] sm:$0xff] %vm4678_vm15, %v5855_v62  ;;  %v5383_v56 = vmul.f32 %v5351_v37, %v5159_v35 }
 0x3f5   : > { %v5719_v32 = vsub.f32 0.0, %v5655_v8 }
 0x3f6   : > { %v5415_v16 = vadd.f32 0.2548296, %v5383_v56 }
 0x3f7   : > { %v5751_v28 = vsel %vm5687_vm0, %v5655_v8, %v5719_v32 }
 0x3f8   : > { %v5447_v3 = vmul.f32 %v5415_v16, %v5159_v35  ;;  %v5783_v9 = vadd.f32 1.0, %v5751_v28 }
 0x3fa   : > { %v5607_v11 = vmul.f32 %v6310_v54, %v5447_v3  ;;  %v5815_v1 = vmul.f32 %v5783_v9, %v4919_v15 }
 0x3fc   : > { %v5639_v49 = vsub.f32 1.0, %v5607_v11  ;;  %v5879_v0 = vmul.f32 %v5847_v60, %v5815_v1 }
 0x3fe   : > { %v5703_v51 = vsub.f32 0.0, %v5639_v49  ;;  %5911 = vst.msk [vmem:[%s10693_s14 + $0xf8] sm:$0xff] %vm4678_vm15, %v5879_v0 }
 0x400   : > { %v5735_v43 = vsel %vm5671_vm1, %v5639_v49, %v5703_v51 }
 0x401   : > { %v5767_v18 = vadd.f32 1.0, %v5735_v43 }
 0x403   : > { %v5799_v36 = vmul.f32 %v5767_v18, %v4903_v34 }
 0x405   : > { %v5863_v39 = vmul.f32 %v5831_v48, %v5799_v36 }
 0x407   : > { %5895 = vst.msk [vmem:[%s10693_s14 + $0x78] sm:$0xff] %vm4678_vm15, %v5863_v39 }
 0x408 PF: > { %s15_s18 = sadd.s32 1, %s6365_s18  }
 0x409   : > { %p12_p4 = scmp.ge.s32.totalorder %s15_s18, 4  }
 0x40b   :  { %14 = sbr.rel (!%p12_p4) target bundleno = 1 (0x1), region = 84 }

</bundles_post_ra>
